<compile_context>
chip_gen: v7x
topology: tpu7x:2x2x1
jax: 0.10.0
libtpu: 0.0.40
codegen_flags: <defaults>
</compile_context>

<pallas_src>
import numpy as np
import jax
import jax.numpy as jnp
from jax.experimental import pallas as pl
from jax.experimental.pallas import tpu as pltpu


# ----------------------------- fused Pallas kernel --------------------------

def _testnet4_kernel(x_ref, w1_ref, ph1_ref, w2_ref, ph2_ref, w3_ref, fc_ref, o_ref):
    f32, bf16 = jnp.float32, jnp.bfloat16
    x = x_ref[...]                                   # (B, 32, 128) bf16
    bsz = x.shape[0]

    def conv(act, w_ref):
        # act: (B, Hin, WCin) bf16; w_ref: (k*WCin, WCout) bf16 (K-fused banded weight,
        # pool-W already folded in for conv1/conv2).  ONE MXU matmul per conv.
        _, hin, wcin = act.shape
        k = w_ref.shape[0] // wcin
        hout = hin - k + 1
        lhs = jnp.concatenate([act[:, di:di + hout, :] for di in range(k)], axis=-1)
        lhs = lhs.reshape(bsz * hout, k * wcin)          # stack batch along M
        return jnp.dot(lhs, w_ref[...], preferred_element_type=f32)   # (B*Hout, WCout)

    def pool_h(y, ph_ref, wc):
        # y: (B*Hin, WC) f32 -> (B, Hout, WC) bf16 via block-diag kron(I_B, pool) matmul.
        p = jnp.dot(ph_ref[...], y.astype(bf16), preferred_element_type=f32)
        return p.astype(bf16).reshape(bsz, ph_ref.shape[0] // bsz, wc)

    a = pool_h(conv(x, w1_ref), ph1_ref, w1_ref.shape[1])      # (B, 14, 224)
    b = pool_h(conv(a, w2_ref), ph2_ref, w2_ref.shape[1])      # (B, 6, 192)
    c = conv(b, w3_ref).astype(bf16)                           # (B*4, 128)
    c = c.reshape(bsz, fc_ref.shape[0])                        # (B, 512)  NCHW-flatten order baked into fc pack
    o_ref[...] = jnp.dot(c, fc_ref[...], preferred_element_type=f32)   # (B, 128) lane-dense


# ----------------------------- weight packing (one-time, numpy) -------------

def _conv_band_np(w_oikk, w_in):
    """(Cout,Cin,k,k) conv weight -> (k, Win*Cin, Wout*Cout) banded matrices."""
    cout, cin, k, _ = w_oikk.shape
    w_out = w_in - k + 1
    w_np = np.asarray(w_oikk, np.float32)
    band = np.zeros((k, w_in * cin, w_out * cout), np.float32)
    for di in range(k):
        for wo in range(w_out):
            for dj in range(k):
                wc = wo + dj
                band[di, wc * cin:(wc + 1) * cin,
                     wo * cout:(wo + 1) * cout] = w_np[:, :, di, dj].T
    return band


def _pool_h_np(h_in):
    h_out = h_in // 2
    m = np.zeros((h_out, h_in), np.float32)
    for i in range(h_out):
        m[i, 2 * i] = 0.5
        m[i, 2 * i + 1] = 0.5
    return m


def _pool_w_np(w_in, c):
    w_out = w_in // 2
    m = np.zeros((w_in * c, w_out * c), np.float32)
    for wo in range(w_out):
        for cc in range(c):
            m[(2 * wo) * c + cc, wo * c + cc] = 0.5
            m[(2 * wo + 1) * c + cc, wo * c + cc] = 0.5
    return m


def _pack_fc_np(fc_of, c, h, w, out_pad):
    """(outputs, C*H*W) PyTorch fc weight -> (H*W*C, out_pad) matching our layout."""
    o = fc_of.shape[0]
    f = np.asarray(fc_of, np.float32).reshape(o, c, h, w)
    f = np.transpose(f, (2, 3, 1, 0)).reshape(h * w * c, o)
    if out_pad > o:
        f = np.concatenate([f, np.zeros((h * w * c, out_pad - o), np.float32)], axis=1)
    return f


def pack_params(raw, in_hw=(32, 32), batch_block=16, cin_pad=4, out_pad=128):
    h0, w0 = in_hw
    w1 = np.asarray(raw["conv1"], np.float32)
    w2 = np.asarray(raw["conv2"], np.float32)
    w3 = np.asarray(raw["conv3"], np.float32)
    fc = np.asarray(raw["fc1"], np.float32)

    c1, cin, k1, _ = w1.shape
    if cin_pad > cin:                       # pad conv1 Cin 3->4: input rows become 128 lanes
        w1 = np.concatenate(
            [w1, np.zeros((c1, cin_pad - cin, k1, k1), np.float32)], axis=1)
    h1o, w1o = h0 - k1 + 1, w0 - k1 + 1
    hp1, wp1 = h1o // 2, w1o // 2
    c2, _, k2, _ = w2.shape
    h2o, w2o = hp1 - k2 + 1, wp1 - k2 + 1
    hp2, wp2 = h2o // 2, w2o // 2
    c3, _, k3, _ = w3.shape
    h3o, w3o = hp2 - k3 + 1, wp2 - k3 + 1

    # K-fused banded conv weights; pool-W folded into conv1/conv2 (shrinks matmul N).
    w1f = _conv_band_np(w1, w0).reshape(k1 * w0 * cin_pad, w1o * c1) @ _pool_w_np(w1o, c1)
    w2f = _conv_band_np(w2, wp1).reshape(k2 * wp1 * c1, w2o * c2) @ _pool_w_np(w2o, c2)
    w3f = _conv_band_np(w3, wp2).reshape(k3 * wp2 * c2, w3o * c3)
    # Row-pool as block-diagonal matrices over the (batch, row) stacked M dimension.
    ph1 = np.kron(np.eye(batch_block, dtype=np.float32), _pool_h_np(h1o))
    ph2 = np.kron(np.eye(batch_block, dtype=np.float32), _pool_h_np(h2o))
    fcp = _pack_fc_np(fc, c3, h3o, w3o, out_pad)

    bf = lambda a: jnp.asarray(a).astype(jnp.bfloat16)
    return {"w1": bf(w1f), "ph1": bf(ph1), "w2": bf(w2f), "ph2": bf(ph2),
            "w3": bf(w3f), "fc": bf(fcp)}


# --------------------------------- model ------------------------------------

def init_params(scale=1, outputs=10, seed=0):
    key = jax.random.PRNGKey(seed)
    k1, k2, k3, k4 = jax.random.split(key, 4)
    c1, c2, c3 = int(16 * scale), int(32 * scale), int(32 * scale)
    fc_in = int(32 * scale) * 4 * 4
    return {
        "conv1": 0.05 * jax.random.normal(k1, (c1, 3, 5, 5), jnp.float32),
        "conv2": 0.05 * jax.random.normal(k2, (c2, c1, 3, 3), jnp.float32),
        "conv3": 0.05 * jax.random.normal(k3, (c3, c2, 3, 3), jnp.float32),
        "fc1":   0.05 * jax.random.normal(k4, (outputs, fc_in), jnp.float32),
    }


def testnet4_forward(packed, x, *, batch_block=16, cin_pad=4, num_outputs=10):
    n, cin, h0, w0 = x.shape
    bsz = batch_block
    # One-time boundary relayout: NCHW -> (N, H, W*Cpad), zero-padded channels, bf16.
    xt = jnp.transpose(x, (0, 2, 3, 1))
    if cin_pad > cin:
        xt = jnp.pad(xt, ((0, 0), (0, 0), (0, 0), (0, cin_pad - cin)))
    xp = xt.reshape(n, h0, w0 * cin_pad).astype(jnp.bfloat16)
    npad = -(-n // bsz) * bsz
    if npad != n:
        xp = jnp.pad(xp, ((0, npad - n), (0, 0), (0, 0)))
    out_pad = packed["fc"].shape[-1]

    weights = (packed["w1"], packed["ph1"], packed["w2"], packed["ph2"],
               packed["w3"], packed["fc"])
    weight_specs = [pl.BlockSpec(a.shape, lambda i: (0, 0)) for a in weights]

    out = pl.pallas_call(
        _testnet4_kernel,
        out_shape=jax.ShapeDtypeStruct((npad, out_pad), jnp.float32),
        grid=(npad // bsz,),
        in_specs=[pl.BlockSpec((bsz, h0, w0 * cin_pad), lambda i: (i, 0, 0))]
                 + weight_specs,
        out_specs=pl.BlockSpec((bsz, out_pad), lambda i: (i, 0)),
        compiler_params=pltpu.CompilerParams(
            dimension_semantics=("parallel",)),
    )(xp, *weights)
    return out[:n, :num_outputs]


# ------------------------------ pure-JAX reference ---------------------------

def _avgpool2_ref(x):  # NCHW, exact 2x2 mean
    return 0.25 * (x[:, :, 0::2, 0::2] + x[:, :, 0::2, 1::2] +
                   x[:, :, 1::2, 0::2] + x[:, :, 1::2, 1::2])


def _reference_forward(raw, x):
    hp = jax.lax.Precision.HIGHEST
    dn = ('NCHW', 'OIHW', 'NCHW')
    out = jax.lax.conv_general_dilated(x, raw["conv1"], (1, 1), 'VALID',
                                       dimension_numbers=dn, precision=hp)
    out = _avgpool2_ref(out)
    out = jax.lax.conv_general_dilated(out, raw["conv2"], (1, 1), 'VALID',
                                       dimension_numbers=dn, precision=hp)
    out = _avgpool2_ref(out)
    out = jax.lax.conv_general_dilated(out, raw["conv3"], (1, 1), 'VALID',
                                       dimension_numbers=dn, precision=hp)
    out = out.reshape(out.shape[0], -1)
    return jnp.dot(out, raw["fc1"].T, precision=hp)


if __name__ == "__main__":
    N = 32   # two grid steps of B=16 (keeps both v7x TensorCores busy)
    x = jax.random.normal(jax.random.PRNGKey(0), (N, 3, 32, 32), jnp.float32)
    raw = init_params(scale=1, outputs=10, seed=0)
    packed = pack_params(raw, in_hw=(32, 32), batch_block=16)

    fwd = jax.jit(testnet4_forward)
    y = fwd(packed, x)
    jax.block_until_ready(y)
    assert y.shape == (N, 10), y.shape

    y_ref = _reference_forward(raw, x)
    # bf16 MXU operands (f32 accumulation) vs HIGHEST-precision f32 reference.
    np.testing.assert_allclose(np.asarray(y), np.asarray(y_ref),
                               rtol=5e-2, atol=1e-2)
    print("KERNEL_OK")
</pallas_src>

<mosaic_0001>
module attributes {stable_mosaic.version = 11 : i64} {
  func.func @_testnet4_kernel(%arg0: i32, %arg1: memref<16x32x128xbf16, #tpu.memory_space<vmem>>, %arg2: memref<640x224xbf16, #tpu.memory_space<vmem>>, %arg3: memref<224x448xbf16, #tpu.memory_space<vmem>>, %arg4: memref<672x192xbf16, #tpu.memory_space<vmem>>, %arg5: memref<96x192xbf16, #tpu.memory_space<vmem>>, %arg6: memref<576x128xbf16, #tpu.memory_space<vmem>>, %arg7: memref<512x128xbf16, #tpu.memory_space<vmem>>, %arg8: memref<16x128xf32, #tpu.memory_space<vmem>>) attributes {dimension_semantics = [#tpu.dimension_semantics<parallel>], iteration_bounds = array<i64: 2>, scalar_prefetch = 0 : i64, scratch_operands = 0 : i64, tpu.core_type = #tpu.core_type<tc>, window_params = [{transform_indices = @transform_0, window_bounds = array<i64: 16, 32, 128>}, {pipeline_mode = #tpu.pipeline_mode<synchronous>, transform_indices = @transform_1, window_bounds = array<i64: 640, 224>}, {pipeline_mode = #tpu.pipeline_mode<synchronous>, transform_indices = @transform_2, window_bounds = array<i64: 224, 448>}, {pipeline_mode = #tpu.pipeline_mode<synchronous>, transform_indices = @transform_3, window_bounds = array<i64: 672, 192>}, {pipeline_mode = #tpu.pipeline_mode<synchronous>, transform_indices = @transform_4, window_bounds = array<i64: 96, 192>}, {pipeline_mode = #tpu.pipeline_mode<synchronous>, transform_indices = @transform_5, window_bounds = array<i64: 576, 128>}, {pipeline_mode = #tpu.pipeline_mode<synchronous>, transform_indices = @transform_6, window_bounds = array<i64: 512, 128>}, {transform_indices = @transform_7, window_bounds = array<i64: 16, 128>}]} {
    %c0 = arith.constant 0 : index
    %c0_0 = arith.constant 0 : index
    %c0_1 = arith.constant 0 : index
    %0 = vector.load %arg1[%c0, %c0_0, %c0_1] : memref<16x32x128xbf16, #tpu.memory_space<vmem>>, vector<16x32x128xbf16>
    %1 = vector.extract_strided_slice %0 {offsets = [0, 0, 0], sizes = [16, 28, 128], strides = [1, 1, 1]} : vector<16x32x128xbf16> to vector<16x28x128xbf16>
    %2 = vector.extract_strided_slice %0 {offsets = [0, 1, 0], sizes = [16, 28, 128], strides = [1, 1, 1]} : vector<16x32x128xbf16> to vector<16x28x128xbf16>
    %3 = vector.extract_strided_slice %0 {offsets = [0, 2, 0], sizes = [16, 28, 128], strides = [1, 1, 1]} : vector<16x32x128xbf16> to vector<16x28x128xbf16>
    %4 = vector.extract_strided_slice %0 {offsets = [0, 3, 0], sizes = [16, 28, 128], strides = [1, 1, 1]} : vector<16x32x128xbf16> to vector<16x28x128xbf16>
    %5 = vector.extract_strided_slice %0 {offsets = [0, 4, 0], sizes = [16, 28, 128], strides = [1, 1, 1]} : vector<16x32x128xbf16> to vector<16x28x128xbf16>
    %6 = tpu.concatenate %1, %2, %3, %4, %5 in 2 : vector<16x28x128xbf16>, vector<16x28x128xbf16>, vector<16x28x128xbf16>, vector<16x28x128xbf16>, vector<16x28x128xbf16> -> vector<16x28x640xbf16>
    %7 = vector.shape_cast %6 : vector<16x28x640xbf16> to vector<448x640xbf16>
    %c0_2 = arith.constant 0 : index
    %c0_3 = arith.constant 0 : index
    %8 = vector.load %arg2[%c0_2, %c0_3] : memref<640x224xbf16, #tpu.memory_space<vmem>>, vector<640x224xbf16>
    %cst = arith.constant dense<0.000000e+00> : vector<448x224xf32>
    %9 = tpu.matmul %7, %8, %cst {dimension_numbers = #tpu.dot_dimension_numbers<[1], [0], [0], [1], [0, 0, 1, 1], [], []>} : vector<448x640xbf16>, vector<640x224xbf16>, vector<448x224xf32> -> vector<448x224xf32>
    %c0_4 = arith.constant 0 : index
    %c0_5 = arith.constant 0 : index
    %10 = vector.load %arg3[%c0_4, %c0_5] : memref<224x448xbf16, #tpu.memory_space<vmem>>, vector<224x448xbf16>
    %11 = arith.truncf %9 : vector<448x224xf32> to vector<448x224xbf16>
    %cst_6 = arith.constant dense<0.000000e+00> : vector<224x224xf32>
    %12 = tpu.matmul %10, %11, %cst_6 {dimension_numbers = #tpu.dot_dimension_numbers<[1], [0], [0], [1], [0, 0, 1, 1], [], []>} : vector<224x448xbf16>, vector<448x224xbf16>, vector<224x224xf32> -> vector<224x224xf32>
    %13 = arith.truncf %12 : vector<224x224xf32> to vector<224x224xbf16>
    %14 = vector.shape_cast %13 : vector<224x224xbf16> to vector<16x14x224xbf16>
    %15 = vector.extract_strided_slice %14 {offsets = [0, 0, 0], sizes = [16, 12, 224], strides = [1, 1, 1]} : vector<16x14x224xbf16> to vector<16x12x224xbf16>
    %16 = vector.extract_strided_slice %14 {offsets = [0, 1, 0], sizes = [16, 12, 224], strides = [1, 1, 1]} : vector<16x14x224xbf16> to vector<16x12x224xbf16>
    %17 = vector.extract_strided_slice %14 {offsets = [0, 2, 0], sizes = [16, 12, 224], strides = [1, 1, 1]} : vector<16x14x224xbf16> to vector<16x12x224xbf16>
    %18 = tpu.concatenate %15, %16, %17 in 2 : vector<16x12x224xbf16>, vector<16x12x224xbf16>, vector<16x12x224xbf16> -> vector<16x12x672xbf16>
    %19 = vector.shape_cast %18 : vector<16x12x672xbf16> to vector<192x672xbf16>
    %c0_7 = arith.constant 0 : index
    %c0_8 = arith.constant 0 : index
    %20 = vector.load %arg4[%c0_7, %c0_8] : memref<672x192xbf16, #tpu.memory_space<vmem>>, vector<672x192xbf16>
    %cst_9 = arith.constant dense<0.000000e+00> : vector<192x192xf32>
    %21 = tpu.matmul %19, %20, %cst_9 {dimension_numbers = #tpu.dot_dimension_numbers<[1], [0], [0], [1], [0, 0, 1, 1], [], []>} : vector<192x672xbf16>, vector<672x192xbf16>, vector<192x192xf32> -> vector<192x192xf32>
    %c0_10 = arith.constant 0 : index
    %c0_11 = arith.constant 0 : index
    %22 = vector.load %arg5[%c0_10, %c0_11] : memref<96x192xbf16, #tpu.memory_space<vmem>>, vector<96x192xbf16>
    %23 = arith.truncf %21 : vector<192x192xf32> to vector<192x192xbf16>
    %cst_12 = arith.constant dense<0.000000e+00> : vector<96x192xf32>
    %24 = tpu.matmul %22, %23, %cst_12 {dimension_numbers = #tpu.dot_dimension_numbers<[1], [0], [0], [1], [0, 0, 1, 1], [], []>} : vector<96x192xbf16>, vector<192x192xbf16>, vector<96x192xf32> -> vector<96x192xf32>
    %25 = arith.truncf %24 : vector<96x192xf32> to vector<96x192xbf16>
    %26 = vector.shape_cast %25 : vector<96x192xbf16> to vector<16x6x192xbf16>
    %27 = vector.extract_strided_slice %26 {offsets = [0, 0, 0], sizes = [16, 4, 192], strides = [1, 1, 1]} : vector<16x6x192xbf16> to vector<16x4x192xbf16>
    %28 = vector.extract_strided_slice %26 {offsets = [0, 1, 0], sizes = [16, 4, 192], strides = [1, 1, 1]} : vector<16x6x192xbf16> to vector<16x4x192xbf16>
    %29 = vector.extract_strided_slice %26 {offsets = [0, 2, 0], sizes = [16, 4, 192], strides = [1, 1, 1]} : vector<16x6x192xbf16> to vector<16x4x192xbf16>
    %30 = tpu.concatenate %27, %28, %29 in 2 : vector<16x4x192xbf16>, vector<16x4x192xbf16>, vector<16x4x192xbf16> -> vector<16x4x576xbf16>
    %31 = vector.shape_cast %30 : vector<16x4x576xbf16> to vector<64x576xbf16>
    %c0_13 = arith.constant 0 : index
    %c0_14 = arith.constant 0 : index
    %32 = vector.load %arg6[%c0_13, %c0_14] : memref<576x128xbf16, #tpu.memory_space<vmem>>, vector<576x128xbf16>
    %cst_15 = arith.constant dense<0.000000e+00> : vector<64x128xf32>
    %33 = tpu.matmul %31, %32, %cst_15 {dimension_numbers = #tpu.dot_dimension_numbers<[1], [0], [0], [1], [0, 0, 1, 1], [], []>} : vector<64x576xbf16>, vector<576x128xbf16>, vector<64x128xf32> -> vector<64x128xf32>
    %34 = arith.truncf %33 : vector<64x128xf32> to vector<64x128xbf16>
    %35 = vector.shape_cast %34 : vector<64x128xbf16> to vector<16x512xbf16>
    %c0_16 = arith.constant 0 : index
    %c0_17 = arith.constant 0 : index
    %36 = vector.load %arg7[%c0_16, %c0_17] : memref<512x128xbf16, #tpu.memory_space<vmem>>, vector<512x128xbf16>
    %cst_18 = arith.constant dense<0.000000e+00> : vector<16x128xf32>
    %37 = tpu.matmul %35, %36, %cst_18 {dimension_numbers = #tpu.dot_dimension_numbers<[1], [0], [0], [1], [0, 0, 1, 1], [], []>} : vector<16x512xbf16>, vector<512x128xbf16>, vector<16x128xf32> -> vector<16x128xf32>
    %c0_19 = arith.constant 0 : index
    %c0_20 = arith.constant 0 : index
    %38 = vector.load %arg8[%c0_19, %c0_20] : memref<16x128xf32, #tpu.memory_space<vmem>>, vector<16x128xf32>
    tpu.vector_store %arg8[%c0_19, %c0_20], %37 {strides = array<i32>} : memref<16x128xf32, #tpu.memory_space<vmem>>, vector<16x128xf32>,
    return
  }
  func.func @transform_0(%arg0: i32) -> (i32, i32, i32) {
    %c0_i32 = arith.constant 0 : i32
    %c0_i32_0 = arith.constant 0 : i32
    %c0_i32_1 = arith.constant 0 : i32
    return %arg0, %c0_i32, %c0_i32_0 : i32, i32, i32
  }
  func.func @transform_1(%arg0: i32) -> (i32, i32) {
    %c0_i32 = arith.constant 0 : i32
    %c0_i32_0 = arith.constant 0 : i32
    %c0_i32_1 = arith.constant 0 : i32
    return %c0_i32, %c0_i32_0 : i32, i32
  }
  func.func @transform_2(%arg0: i32) -> (i32, i32) {
    %c0_i32 = arith.constant 0 : i32
    %c0_i32_0 = arith.constant 0 : i32
    %c0_i32_1 = arith.constant 0 : i32
    return %c0_i32, %c0_i32_0 : i32, i32
  }
  func.func @transform_3(%arg0: i32) -> (i32, i32) {
    %c0_i32 = arith.constant 0 : i32
    %c0_i32_0 = arith.constant 0 : i32
    %c0_i32_1 = arith.constant 0 : i32
    return %c0_i32, %c0_i32_0 : i32, i32
  }
  func.func @transform_4(%arg0: i32) -> (i32, i32) {
    %c0_i32 = arith.constant 0 : i32
    %c0_i32_0 = arith.constant 0 : i32
    %c0_i32_1 = arith.constant 0 : i32
    return %c0_i32, %c0_i32_0 : i32, i32
  }
  func.func @transform_5(%arg0: i32) -> (i32, i32) {
    %c0_i32 = arith.constant 0 : i32
    %c0_i32_0 = arith.constant 0 : i32
    %c0_i32_1 = arith.constant 0 : i32
    return %c0_i32, %c0_i32_0 : i32, i32
  }
  func.func @transform_6(%arg0: i32) -> (i32, i32) {
    %c0_i32 = arith.constant 0 : i32
    %c0_i32_0 = arith.constant 0 : i32
    %c0_i32_1 = arith.constant 0 : i32
    return %c0_i32, %c0_i32_0 : i32, i32
  }
  func.func @transform_7(%arg0: i32) -> (i32, i32) {
    %c0_i32 = arith.constant 0 : i32
    %c0_i32_0 = arith.constant 0 : i32
    return %arg0, %c0_i32 : i32, i32
  }
}

</mosaic_0001>

<bundles_post_ra>
// kernel: testnet4_forward.1
= control target key start
LH: loop header
LB: loop body
LE: loop exit
PB: predicated region body
PF: predicated region fallthrough
CT: control target
= control target key end

     0   :  { %s17706_s24 = smov 0   ;;  %s22878_s0 = inlined_call_operand.vmem [shape: bf16[32,32,128], index: 0, kind: input, shape index: {}]   ;;  %s22879_s1 = inlined_call_operand.vmem [shape: bf16[640,224], index: 1, kind: input, shape index: {}]   ;;  %s22880_s2 = inlined_call_operand.vmem [shape: bf16[224,448], index: 2, kind: input, shape index: {}]   ;;  %s22881_s3 = inlined_call_operand.vmem [shape: bf16[672,192], index: 3, kind: input, shape index: {}]   ;;  %s22882_s4 = inlined_call_operand.vmem [shape: bf16[96,192], index: 4, kind: input, shape index: {}]   ;;  %s22883_s5 = inlined_call_operand.vmem [shape: bf16[576,128], index: 5, kind: input, shape index: {}]   ;;  %s22884_s6 = inlined_call_operand.vmem [shape: bf16[512,128], index: 6, kind: input, shape index: {}]   ;;  %s22885_s7 = inlined_call_operand.vmem [shape: f32[32,128], index: 7, kind: output, shape index: {}]  }
   0x1 LB: > { %s16043_s25 = sadd.s32 4294967295, %s17659_s24   ;;  %p16047_p0 = scmp.ge.s32.totalorder %s17659_s24, 1  ;;  %s17659_s24 = sphi %s17706_s24, %s17_s24  }
   0x2   : > { %p239_p1 = scmp.lt.s32.totalorder %s17659_s24, 3 }
   0x4   : > { %p240_p2 = pnand %p16047_p0, %p239_p1 }
   0x6   : > { %243 = sbr.rel (%p240_p2) target bundleno = 2829 (0xb0d), region = 48 }
   0xd   : > { %v17205_v0 = vld [vmem:[%s22879_s1 + $0x4] ss:$8 sps:$4 sm:$0xff]   ;;  %v17207_v1 = vld [vmem:[%s22879_s1] ss:$8 sps:$4 sm:$0xff]   ;;  %v17208_v2 = vld [vmem:[%s22879_s1 + $0x14] ss:$8 sps:$4 sm:$0xff]   ;;  %v969_v17 = vlaneseq }
   0xe   : > { %4730 = vmatprep.subr.bf16.mxu0 %v17205_v0  ;;  %v17210_v3 = vld [vmem:[%s22879_s1 + $0x10] ss:$8 sps:$4 sm:$0xff]   ;;  %v17211_v4 = vld [vmem:[%s22879_s1 + $0x24] ss:$8 sps:$4 sm:$0xff]   ;;  %s16048_s13 = sshll.u32 %s16043_s25, 4  ;;  %vm751_vm1 = vcmask 1046528  }
   0xf   : > { %4731 = vmatpush1.bf16.msra.mxu0 %v17207_v1  ;;  %v17213_v5 = vld [vmem:[%s22879_s1 + $0x20] ss:$8 sps:$4 sm:$0xff]   ;;  %p273_p3 = scmp.lt.s32.totalorder %s16048_s13, 31  ;;  %v17214_v6 = vld [vmem:[%s22879_s1 + $0x34] ss:$8 sps:$4 sm:$0xff]   ;;  %v17780_v28 = vshrl.u32 %v969_v17, 7 }
  0x10   : > { %4732 = vmatprep.subr.bf16.mxu0 %v17208_v2  ;;  %v17216_v7 = vld [vmem:[%s22879_s1 + $0x30] ss:$8 sps:$4 sm:$0xff]   ;;  %v17217_v8 = vld [vmem:[%s22879_s1 + $0x44] ss:$8 sps:$4 sm:$0xff]   ;;  %v17219_v9 = vld [vmem:[%s22879_s1 + $0x40] ss:$8 sps:$4 sm:$0xff]  }
  0x11   : > { %s23538_s13 = smov (!%p273_p3, %s16048_s13), 31  ;;  %v17220_v10 = vld [vmem:[%s22879_s1 + $0x54] ss:$8 sps:$4 sm:$0xff]   ;;  %v17222_v11 = vld [vmem:[%s22879_s1 + $0x50] ss:$8 sps:$4 sm:$0xff]   ;;  %23137 = vst [vmem:[#allocation2_spill] sm:$0xff] %v17780_v28 }
  0x12   : > { %s16667_s26 = sshll.u32 %s23538_s13, 4  ;;  %v17223_v12 = vld [vmem:[%s22879_s1 + $0x64] ss:$8 sps:$4 sm:$0xff]   ;;  %v17661_v15 = vmov 1983009808   ;;  %vm913_vm3 = vcmask 1045504  }
  0x13   : > { %4733 = vmatpush1.bf16.msra.mxu0 %v17210_v3  ;;  %s17752_s8 = scalar_lea.vmem %s22878_s0, %s16667_s26  ;;  %v967_v16 = vunpack.c.l.s4 %v17661_v15  ;;  %v17225_v21 = vld [vmem:[%s22879_s1 + $0x60] ss:$8 sps:$4 sm:$0xff]   ;;  %v17226_v23 = vld [vmem:[%s22879_s1 + $0x74] ss:$8 sps:$4 sm:$0xff]   ;;  %v17228_v32 = vld [vmem:[%s22879_s1 + $0x70] ss:$8 sps:$4 sm:$0xff]  }
  0x14   : > { %4734 = vmatprep.subr.bf16.mxu0 %v17211_v4  ;;  %v286_v13 = vld [vmem:[%s17752_s8] sm:$0xf]  ;;  %v287_v14 = vld [vmem:[%s17752_s8 + $0x4] sm:$0xf]  ;;  %v17763_v18 = vld [vmem:[%s17752_s8 + $0x8] sm:$0xf] }
  0x15   : > { %v289_v19 = vld [vmem:[%s17752_s8 + $0xc] sm:$0xf]  ;;  %v17766_v20 = vcombine.low %v286_v13, %v287_v14  ;;  %v968_v27 = vunpack.c.0.s8 %v967_v16  ;;  %v17783_v29 = vld [vmem:[%s17752_s8 + $0x10] sm:$0xf]  ;;  %v291_v30 = vld [vmem:[%s17752_s8 + $0x14] sm:$0xf] }
  0x16   : > { %v17772_v22 = vcombine.low %v17763_v18, %v289_v19  ;;  %vm510_vm0 = vsmask.f32 7424  ;;  %v17229_v34 = vld [vmem:[%s22879_s1 + $0x84] ss:$8 sps:$4 sm:$0xff]   ;;  %v17799_v36 = vcombine.low %v17783_v29, %v291_v30  ;;  %v17805_v38 = vld [vmem:[%s17752_s8 + $0x18] sm:$0xf] }
  0x17   : > { %4735 = vmatpush1.bf16.msra.mxu0 %v17213_v5  ;;  %v22897_v24 = vshrl.u32 %v17766_v20, 16  ;;  %v22894_v25 = vshll.u32 %v17766_v20, 16  ;;  %v17802_v37 = vsub.s32 %v968_v27, %v17780_v28  ;;  %v293_v39 = vld [vmem:[%s17752_s8 + $0x1c] sm:$0xf]  ;;  %v17231_v41 = vld [vmem:[%s22879_s1 + $0x80] ss:$8 sps:$4 sm:$0xff]  }
  0x18   : > { %4736 = vmatprep.subr.bf16.mxu0 %v17214_v6  ;;  %v22896_v26 = vshll.u32 %v17772_v22, 16  ;;  %23138 = vst [vmem:[#allocation3_spill] sm:$0xff] %v17799_v36  ;;  %v17232_v44 = vld [vmem:[%s22879_s1 + $0x94] ss:$8 sps:$4 sm:$0xff]   ;;  %v17817_v45 = vcombine.low %v17805_v38, %v293_v39  ;;  %v529_v46 = vshll.u32 %v17799_v36, 16  ;;  %v527_v54 = vshrl.u32 %v17799_v36, 16 }
  0x19   : > { %v516_v31 = vrot.slane %v22894_v25, 1  ;;  %23139 = vst [vmem:[#allocation4_spill] sm:$0xff] %v17802_v37  ;;  %v17234_v49 = vld [vmem:[%s22879_s1 + $0x90] ss:$8 sps:$4 sm:$0xff]   ;;  %v17235_v53 = vld [vmem:[%s22879_s1 + $0xa4] ss:$8 sps:$4 sm:$0xff]  }
  0x1a   : > { %v521_v33 = vrot.slane %v22896_v26, 1  ;;  %23140 = vst [vmem:[#allocation5_spill] sm:$0xff] %v17817_v45  ;;  %v538_v52 = vshrl.u32 %v17817_v45, 16  ;;  %v531_v55 = vrot.slane %v529_v46, 1  ;;  %v534_v56 = vshll.u32 %v17817_v45, 16  ;;  %s17664_s22 = smov 96  }
  0x1b   : > { %4737 = vmatpush1.bf16.msra.mxu0 %v17216_v7  ;;  %v517_v35 = vor.u32 %v516_v31, %v22897_v24  ;;  %v17237_v58 = vld [vmem:[%s22879_s1 + $0xa0] ss:$8 sps:$4 sm:$0xff]   ;;  %v22895_v59 = vshrl.u32 %v17772_v22, 16  ;;  %v808_v60 = vrot.slane %v527_v54, 1  ;;  %v809_v61 = vrot.slane %v529_v46, 2  ;;  %s17665_s9 = smov 64  }
  0x1c   : > { %4738 = vmatprep.subr.bf16.mxu0 %v17217_v8  ;;  %v812_v62 = vrot.slane %v534_v56, 2  ;;  %v811_v63 = vrot.slane %v538_v52, 1  ;;  %v17238_v0 = vld [vmem:[%s22879_s1 + $0xb4] ss:$8 sps:$4 sm:$0xff]   ;;  %v532_v1 = vor.u32 %v531_v55, %v527_v54  ;;  %v536_v2 = vrot.slane %v534_v56, 1  ;;  %s16051_s16 = sshll.u32 %s16043_s25, 1 }
  0x1d   : > { %v522_v40 = vsel %vm510_vm0, %v517_v35, %v521_v33  ;;  %v755_v3 = vrot.slane %v17799_v36, 1  ;;  %v17240_v4 = vld [vmem:[%s22879_s1 + $0xb0] ss:$8 sps:$4 sm:$0xff]   ;;  %v525_v5 = vor.u32 %v22895_v59, %v521_v33  ;;  %v17853_v6 = vrot.slane %v17817_v45, 1  ;;  %v17244_v19 = vld [vmem:[%s22879_s1 + $0xd4] ss:$8 sps:$4 sm:$0xff]  }
  0x1e   : > { %v16085_v42 = vcombine.low %v286_v13, %v522_v40  ;;  %v963_v43 = vcombine.high %v17766_v20, %v522_v40  ;;  %v810_v7 = vor.u32 %v809_v61, %v808_v60  ;;  %v17855_v8 = vor.u32 %v812_v62, %v811_v63  ;;  %v17243_v13 = vld [vmem:[%s22879_s1 + $0xc0] ss:$8 sps:$4 sm:$0xff]   ;;  %v17246_v27 = vld [vmem:[%s22879_s1 + $0xd0] ss:$8 sps:$4 sm:$0xff]   ;;  %v17247_v30 = vld [vmem:[%s22879_s1 + $0xe4] ss:$8 sps:$4 sm:$0xff]  }
  0x1f   : > { %4739 = vmatpush1.bf16.msra.mxu0 %v17219_v9  ;;  %v17241_v9 = vld [vmem:[%s22879_s1 + $0xc4] ss:$8 sps:$4 sm:$0xff]   ;;  %vm800_vm2 = vsmask.f32 6400  ;;  %v1016_v14 = vcombine.high %v17772_v22, %v525_v5  ;;  %v757_v16 = vsel %vm751_vm1, %v755_v3, %v17853_v6  ;;  %v16086_v31 = vcombine.low %v17763_v18, %v525_v5  ;;  %v299_v35 = vld [vmem:[%s17752_s8 + $0x34] sm:$0xf] }
  0x20   : > { %4740 = vmatprep.subr.bf16.mxu0 %v17220_v10  ;;  %v972_v47 = vrot.slane %v16085_v42, %v17802_v37  ;;  %v979_v48 = vrot.slane %v963_v43, %v17802_v37  ;;  %v537_v10 = vsel %vm510_vm0, %v532_v1, %v536_v2  ;;  %v814_v17 = vsel %vm800_vm2, %v810_v7, %v17855_v8  ;;  %v17901_v43 = vld [vmem:[%s17752_s8 + $0x38] sm:$0xf]  ;;  %v17257_v63 = vld [vmem:[%s22879_s1 + $0x104] ss:$8 sps:$4 sm:$0xff]   ;;  %v18221_v26 = vld [vmem:[%s17752_s8 + $0x70] sm:$0xf] }
  0x21   : > { %v16087_v15 = vcombine.low %v17783_v29, %v537_v10  ;;  %v297_v29 = vld [vmem:[%s17752_s8 + $0x2c] sm:$0xf]  ;;  %v1068_v33 = vcombine.low %v757_v16, %v814_v17  ;;  %v1032_v39 = vrot.slane %v1016_v14, %v17802_v37  ;;  %v1067_v40 = vcombine.high %v17799_v36, %v537_v10  ;;  %v17252_v62 = vld [vmem:[%s22879_s1 + $0xf0] ss:$8 sps:$4 sm:$0xff]   ;;  %p280_p4 = scmp.lt.s32.totalorder %s16051_s16, 3 }
  0x22   : > { %v17826_v50 = vrot.slane %v972_v47, %v17802_v37  ;;  %v17829_v51 = vrot.slane %v979_v48, %v17802_v37  ;;  %v1069_v42 = vcombine.high %v757_v16, %v814_v17  ;;  %v1025_v47 = vrot.slane %v16086_v31, %v17802_v37 }
  0x23   : > { %4741 = vmatpush1.bf16.msra.mxu0 %v17222_v11  ;;  %v17862_v11 = vld [vmem:[%s17752_s8 + $0x20] sm:$0xf]  ;;  %v17910_v48 = vrot.slane %v1068_v33, %v17802_v37  ;;  %v17921_v55 = vrot.slane %v1067_v40, %v17802_v37  ;;  %v1121_v3 = vcombine.low %v17853_v6, %v17855_v8  ;;  %vm6047_vm4 = vcmask 523264   ;;  %s23540_s16 = smov (!%p280_p4, %s16051_s16), 3 }
  0x24   : > { %4742 = vmatprep.subr.bf16.mxu0 %v17223_v12  ;;  %v2739_v57 = vcombine.high %v17826_v50, %v17829_v51  ;;  %v295_v12 = vld [vmem:[%s17752_s8 + $0x24] sm:$0xf]  ;;  %v17924_v56 = vrot.slane %v1069_v42, %v17802_v37  ;;  %v2738_v16 = vcombine.low %v17826_v50, %v17829_v51  ;;  %vm8792_vm5 = vcmask 785408  }
  0x25   : > { %vm11975_vm6 = vcmask 261120  }
  0x26   : > { %4762 = vmatprep.mubr.bf16.mxu0 %v2739_v57  ;;  %v1101_v5 = vcombine.high %v17921_v55, %v17924_v56 }
  0x27   : > { %4743 = vmatpush1.bf16.msra.mxu0 %v17225_v21  ;;  %v17878_v21 = vld [vmem:[%s17752_s8 + $0x28] sm:$0xf] }
  0x28   : > { %4744 = vmatprep.subr.bf16.mxu0 %v17226_v23  ;;  %v17881_v23 = vcombine.low %v17862_v11, %v295_v12  ;;  %v17905_v18 = vcombine.low %v17878_v21, %v297_v29  ;;  %v17974_v29 = vrot.slane %v1121_v3, %v17802_v37 }
  0x2a   : > { %v22890_v46 = vshll.u32 %v17881_v23, 16  ;;  %v22889_v60 = vshll.u32 %v17905_v18, 16 }
  0x2b   : > { %4745 = vmatpush1.bf16.msra.mxu0 %v17228_v32  ;;  %v17891_v32 = vor.u32 %v538_v52, %v536_v2  ;;  %v17249_v52 = vld [vmem:[%s22879_s1 + $0xe0] ss:$8 sps:$4 sm:$0xff]  }
  0x2c   : > { %4746 = vmatprep.subr.bf16.mxu0 %v17229_v34  ;;  %v17894_v34 = vld [vmem:[%s17752_s8 + $0x30] sm:$0xf]  ;;  %v551_v12 = vrot.slane %v22889_v60, 1 }
  0x2d   : > { %v17927_v57 = vcombine.low %v17894_v34, %v299_v35 }
  0x2f   : > { %4747 = vmatpush1.bf16.msra.mxu0 %v17231_v41  ;;  %v1076_v41 = vrot.slane %v16087_v15, %v17802_v37  ;;  %23141 = vst [vmem:[#allocation6_spill] sm:$0xff] %v17927_v57  ;;  %v557_v7 = vshrl.u32 %v17927_v57, 16  ;;  %v17255_v15 = vld [vmem:[%s22879_s1 + $0x100] ss:$8 sps:$4 sm:$0xff]  }
  0x30   : > { %4748 = vmatprep.subr.bf16.mxu0 %v17232_v44  ;;  %v301_v44 = vld [vmem:[%s17752_s8 + $0x3c] sm:$0xf] }
  0x31   : > { %v16117_v54 = vcombine.low %v1032_v39, %v1076_v41  ;;  %v17934_v61 = vcombine.low %v17901_v43, %v301_v44  ;;  %v1099_v1 = vcombine.high %v1076_v41, %v17910_v48  ;;  %v822_v35 = vrot.slane %v557_v7, 1 }
  0x33   : > { %4749 = vmatpush1.bf16.msra.mxu0 %v17234_v49  ;;  %v16088_v49 = vcombine.low %v17805_v38, %v17891_v32  ;;  %v22891_v38 = vshrl.u32 %v17881_v23, 16  ;;  %23142 = vst [vmem:[#allocation7_spill] sm:$0xff] %v17934_v61  ;;  %v568_v14 = vshrl.u32 %v17934_v61, 16  ;;  %v16119_v17 = vcombine.low %v1099_v1, %v17921_v55 }
  0x34   : > { %4750 = vmatprep.subr.bf16.mxu0 %v17235_v53  ;;  %v17250_v53 = vld [vmem:[%s22879_s1 + $0xf4] ss:$8 sps:$4 sm:$0xff]  }
  0x35   : > { %v17947_v2 = vrot.slane %v16088_v49, %v17802_v37  ;;  %v825_v39 = vrot.slane %v568_v14, 1  ;;  %v17983_v41 = vrot.slane %v16119_v17, %v17802_v37  ;;  %v17260_v49 = vld [vmem:[%s22879_s1 + $0x110] ss:$8 sps:$4 sm:$0xff]   ;;  %v303_v17 = vld [vmem:[%s17752_s8 + $0x44] sm:$0xf] }
  0x37   : > { %4751 = vmatpush1.bf16.msra.mxu0 %v17237_v58  ;;  %v546_v58 = vrot.slane %v22890_v46, 1  ;;  %v16121_v31 = vcombine.low %v1101_v5, %v17947_v2  ;;  %v1152_v44 = vcombine.high %v17947_v2, %v17974_v29  ;;  %v17265_v5 = vld [vmem:[%s22879_s1 + $0x120] ss:$8 sps:$4 sm:$0xff]  }
  0x38   : > { %4752 = vmatprep.subr.bf16.mxu0 %v17238_v0  ;;  %v17943_v0 = vrot.slane %v1025_v47, %v17802_v37 }
  0x39   : > { %v547_v10 = vor.u32 %v546_v58, %v22891_v38  ;;  %v2836_v47 = vrot.slane %v16121_v31, %v17802_v37  ;;  %v17267_v58 = vld [vmem:[%s22879_s1 + $0x124] ss:$8 sps:$4 sm:$0xff]  }
  0x3b   : > { %4753 = vmatpush1.bf16.msra.mxu0 %v17240_v4  ;;  %v2783_v4 = vrot.slane %v16117_v54, %v17802_v37  ;;  %v552_v50 = vsel %vm510_vm0, %v547_v10, %v551_v12  ;;  %v761_v54 = vrot.slane %v17927_v57, 1 }
  0x3c   : > { %4754 = vmatprep.subr.bf16.mxu0 %v17241_v9  ;;  %v559_v9 = vshll.u32 %v17927_v57, 16 }
  0x3e   : > { %v561_v33 = vrot.slane %v559_v9, 1  ;;  %v823_v51 = vrot.slane %v559_v9, 2  ;;  %v2791_v9 = vcombine.low %v17943_v0, %v2783_v4 }
  0x3f   : > { %4755 = vmatpush1.bf16.msra.mxu0 %v17243_v13  ;;  %v564_v13 = vshll.u32 %v17934_v61, 16 }
  0x40   : > { %4756 = vmatprep.subr.bf16.mxu0 %v17244_v19  ;;  %v17262_v19 = vld [vmem:[%s22879_s1 + $0x114] ss:$8 sps:$4 sm:$0xff]   ;;  %v824_v1 = vor.u32 %v823_v51, %v822_v35 }
  0x41   : > { %v826_v40 = vrot.slane %v564_v13, 2 }
  0x43   : > { %4757 = vmatpush1.bf16.msra.mxu0 %v17246_v27  ;;  %v1120_v27 = vcombine.high %v17817_v45, %v17891_v32  ;;  %v22892_v32 = vshrl.u32 %v17905_v18, 16  ;;  %v18002_v3 = vor.u32 %v826_v40, %v825_v39 }
  0x44   : > { %4758 = vmatprep.subr.bf16.mxu0 %v17247_v30  ;;  %v2792_v30 = vcombine.high %v17943_v0, %v2783_v4  ;;  %v18022_v4 = vld [vmem:[%s17752_s8 + $0x40] sm:$0xf] }
  0x45   : > { %v17986_v42 = vrot.slane %v1120_v27, %v17802_v37  ;;  %v828_v0 = vsel %vm800_vm2, %v824_v1, %v18002_v3  ;;  %v307_v1 = vld [vmem:[%s17752_s8 + $0x54] sm:$0xf] }
  0x47   : > { %4759 = vmatpush1.bf16.msra.mxu0 %v17249_v52  ;;  %v16089_v52 = vcombine.low %v17862_v11, %v552_v50  ;;  %v555_v11 = vor.u32 %v22892_v32, %v551_v12  ;;  %v16123_v10 = vcombine.low %v1152_v44, %v17986_v42  ;;  %v18042_v44 = vld [vmem:[%s17752_s8 + $0x48] sm:$0xf] }
  0x48   : > { %4760 = vmatprep.subr.bf16.mxu0 %v17250_v53  ;;  %v566_v53 = vrot.slane %v564_v13, 1  ;;  %v2845_v13 = vcombine.high %v17983_v41, %v2836_v47 }
  0x49   : > { %v16090_v27 = vcombine.low %v17878_v21, %v555_v11  ;;  %v18031_v31 = vrot.slane %v16123_v10, %v17802_v37  ;;  %v1224_v40 = vcombine.high %v17905_v18, %v555_v11  ;;  %v17282_v11 = vld [vmem:[%s22879_s1 + $0x154] ss:$8 sps:$4 sm:$0xff]  }
  0x4b   : > { %4761 = vmatpush1.bf16.msra.mxu0 %v17252_v62  ;;  %v562_v62 = vor.u32 %v561_v33, %v557_v7  ;;  %v17272_v7 = vld [vmem:[%s22879_s1 + $0x134] ss:$8 sps:$4 sm:$0xff]   ;;  %v17277_v33 = vld [vmem:[%s22879_s1 + $0x144] ss:$8 sps:$4 sm:$0xff]   ;;  %v1233_v39 = vrot.slane %v16090_v27, %v17802_v37 }
  0x4c   : > { %5043 = vmatprep.subr.bf16.mxu0 %v17257_v63  ;;  %v18000_v63 = vrot.slane %v17934_v61, 1  ;;  %v309_v27 = vld [vmem:[%s17752_s8 + $0x5c] sm:$0xf] }
  0x4d   : > { %v567_v12 = vsel %vm510_vm0, %v562_v62, %v566_v53  ;;  %v18055_v62 = vld [vmem:[%s17752_s8 + $0x50] sm:$0xf] }
  0x4e   : > { %4763 = vmatmul.mubr.bf16.vlgmr.msra.gmra.mrb[0].mxu0 %v2738_v16  ;;  %v763_v16 = vsel %vm751_vm1, %v761_v54, %v18000_v63  ;;  %v16091_v21 = vcombine.low %v17894_v34, %v567_v12  ;;  %v17275_v54 = vld [vmem:[%s22879_s1 + $0x140] ss:$8 sps:$4 sm:$0xff]   ;;  %v2844_v34 = vcombine.low %v17983_v41, %v2836_v47  ;;  %v18071_v47 = vrot.slane %v1233_v39, %v17802_v37 }
  0x4f   : > { %5044 = vmatpush1.bf16.msra.mxu0 %v17255_v15  ;;  %4772 = vmatprep.mubr.bf16.mxu0 %v2792_v30  ;;  %v1180_v15 = vrot.slane %v16089_v52, %v17802_v37  ;;  %v17270_v30 = vld [vmem:[%s22879_s1 + $0x130] ss:$8 sps:$4 sm:$0xff]   ;;  %v18046_v52 = vcombine.low %v18022_v4, %v303_v17 }
  0x50   : > { %5045 = vmatprep.subr.bf16.mxu0 %v17262_v19  ;;  %v1171_v19 = vcombine.high %v17881_v23, %v552_v50  ;;  %v1276_v50 = vcombine.low %v763_v16, %v828_v0  ;;  %v1284_v10 = vrot.slane %v16091_v21, %v17802_v37 }
  0x51   : > { %v2889_v35 = vrot.slane %v1180_v15, %v17802_v37  ;;  %23143 = vst [vmem:[#allocation8_spill] sm:$0xff] %v18046_v52  ;;  %v22888_v39 = vshrl.u32 %v18046_v52, 16 }
  0x52   : > { %v1187_v51 = vrot.slane %v1171_v19, %v17802_v37  ;;  %v18065_v41 = vrot.slane %v1276_v50, %v17802_v37  ;;  %v18082_v19 = vld [vmem:[%s17752_s8 + $0x58] sm:$0xf] }
  0x53   : > { %5046 = vmatpush1.bf16.msra.mxu0 %v17260_v49  ;;  %v305_v49 = vld [vmem:[%s17752_s8 + $0x4c] sm:$0xf]  ;;  %v2897_v21 = vcombine.low %v18031_v31, %v2889_v35 }
  0x54   : > { %5047 = vmatprep.subr.bf16.mxu0 %v17267_v58  ;;  %v570_v58 = vor.u32 %v568_v14, %v566_v53  ;;  %v18068_v14 = vrot.slane %v1187_v51, %v17802_v37  ;;  %v1240_v53 = vrot.slane %v1224_v40, %v17802_v37  ;;  %v18079_v17 = vcombine.low %v18042_v44, %v305_v49 }
  0x56   : > { %4773 = vmatmul.mubr.bf16.gmra.mrb[4].mxu0 %v2791_v9  ;;  %v1275_v9 = vcombine.high %v17927_v57, %v567_v12  ;;  %v16092_v15 = vcombine.low %v17901_v43, %v570_v58  ;;  %v1329_v12 = vcombine.low %v18000_v63, %v18002_v3  ;;  %23144 = vst [vmem:[#allocation9_spill] sm:$0xff] %v18079_v17  ;;  %v22893_v60 = vshrl.u32 %v18079_v17, 16 }
  0x57   : > { %4782 = vmatprep.mubr.bf16.mxu0 %v2845_v13  ;;  %5048 = vmatpush1.bf16.msra.mxu0 %v17265_v5  ;;  %v2898_v5 = vcombine.high %v18031_v31, %v2889_v35  ;;  %v1277_v13 = vcombine.high %v763_v16, %v828_v0  ;;  %v1307_v16 = vcombine.high %v1284_v10, %v18065_v41  ;;  %v22886_v31 = vshll.u32 %v18079_v17, 16 }
  0x58   : > { %5049 = vmatprep.subr.bf16.mxu0 %v17272_v7  ;;  %v22887_v7 = vshll.u32 %v18046_v52, 16  ;;  %v18092_v43 = vrot.slane %v1275_v9, %v17802_v37  ;;  %v18096_v0 = vcombine.low %v18055_v62, %v307_v1  ;;  %v16125_v50 = vcombine.low %v1240_v53, %v1284_v10  ;;  %v17292_v9 = vld [vmem:[%s22879_s1 + $0x174] ss:$8 sps:$4 sm:$0xff]  }
  0x59   : > { %v1328_v51 = vcombine.high %v17934_v61, %v570_v58  ;;  %v18104_v49 = vrot.slane %v1277_v13, %v17802_v37  ;;  %v2951_v35 = vcombine.high %v18068_v14, %v18071_v47  ;;  %v18117_v1 = vcombine.low %v18082_v19, %v309_v27 }
  0x5a   : > { %23145 = vst [vmem:[#allocation10_spill] sm:$0xff] %v18096_v0  ;;  %v576_v40 = vrot.slane %v22887_v7, 1  ;;  %v16127_v58 = vcombine.low %v1307_v16, %v18092_v43  ;;  %v18132_v13 = vrot.slane %v16125_v50, %v17802_v37  ;;  %v581_v27 = vrot.slane %v22886_v31, 1  ;;  %v17295_v7 = vld [vmem:[%s22879_s1 + $0x180] ss:$8 sps:$4 sm:$0xff]  }
  0x5b   : > { %5050 = vmatpush1.bf16.msra.mxu0 %v17270_v30  ;;  %v17280_v30 = vld [vmem:[%s22879_s1 + $0x150] ss:$8 sps:$4 sm:$0xff]   ;;  %23148 = vst [vmem:[#allocation13_spill] sm:$0xff] %v18117_v1  ;;  %v18127_v10 = vrot.slane %v1328_v51, %v17802_v37  ;;  %v594_v51 = vshll.u32 %v18117_v1, 16  ;;  %v2950_v31 = vcombine.low %v18068_v14, %v18071_v47  ;;  %v17302_v14 = vld [vmem:[%s22879_s1 + $0x194] ss:$8 sps:$4 sm:$0xff]  }
  0x5c   : > { %5051 = vmatprep.subr.bf16.mxu0 %v17277_v33  ;;  %v17287_v33 = vld [vmem:[%s22879_s1 + $0x164] ss:$8 sps:$4 sm:$0xff]   ;;  %v577_v53 = vor.u32 %v576_v40, %v22888_v39  ;;  %v2995_v16 = vrot.slane %v16127_v58, %v17802_v37  ;;  %v598_v40 = vshrl.u32 %v18117_v1, 16 }
  0x5d   : > { %23149 = vst [vmem:[#allocation14_spill] sm:$0xff] %v18127_v10  ;;  %v596_v38 = vrot.slane %v594_v51, 1 }
  0x5e   : > { %4783 = vmatmul.mubr.bf16.gmra.mrb[8].mxu0 %v2844_v34  ;;  %v18107_v34 = vrot.slane %v16092_v15, %v17802_v37  ;;  %v1309_v15 = vcombine.high %v18092_v43, %v18104_v49  ;;  %v582_v39 = vsel %vm510_vm0, %v577_v53, %v581_v27  ;;  %v839_v32 = vrot.slane %v598_v40, 1 }
  0x5f   : > { %4792 = vmatprep.mubr.bf16.mxu0 %v2898_v5  ;;  %5052 = vmatpush1.bf16.msra.mxu0 %v17275_v54  ;;  %v18110_v54 = vrot.slane %v1329_v12, %v17802_v37  ;;  %v17285_v5 = vld [vmem:[%s22879_s1 + $0x160] ss:$8 sps:$4 sm:$0xff]   ;;  %v16093_v53 = vcombine.low %v18022_v4, %v582_v39  ;;  %v3003_v25 = vcombine.low %v18132_v13, %v2995_v16 }
  0x60   : > { %5053 = vmatprep.subr.bf16.mxu0 %v17282_v11  ;;  %23146 = vst [vmem:[#allocation11_spill] sm:$0xff] %v18107_v34  ;;  %v589_v11 = vshll.u32 %v18096_v0, 16 }
  0x61   : > { %23147 = vst [vmem:[#allocation12_spill] sm:$0xff] %v18110_v54  ;;  %v1360_v12 = vcombine.high %v18107_v34, %v18110_v54 }
  0x62   : > { %v591_v50 = vrot.slane %v589_v11, 1  ;;  %v837_v47 = vrot.slane %v589_v11, 2 }
  0x63   : > { %5054 = vmatpush1.bf16.msra.mxu0 %v17280_v30  ;;  %v17290_v30 = vld [vmem:[%s22879_s1 + $0x170] ss:$8 sps:$4 sm:$0xff]   ;;  %v16131_v58 = vcombine.low %v1360_v12, %v18127_v10  ;;  %v1379_v12 = vcombine.high %v18046_v52, %v582_v39 }
  0x64   : > { %5055 = vmatprep.subr.bf16.mxu0 %v17287_v33  ;;  %v17297_v33 = vld [vmem:[%s22879_s1 + $0x184] ss:$8 sps:$4 sm:$0xff]  }
  0x65   : > { %v3048_v4 = vrot.slane %v16131_v58, %v17802_v37  ;;  %v1395_v58 = vrot.slane %v1379_v12, %v17802_v37 }
  0x66   : > { %4793 = vmatmul.mubr.bf16.gmra.mrb[12].mxu0 %v2897_v21  ;;  %v587_v21 = vshrl.u32 %v18096_v0, 16 }
  0x67   : > { %4802 = vmatprep.mubr.bf16.mxu0 %v2951_v35  ;;  %5056 = vmatpush1.bf16.msra.mxu0 %v17285_v5  ;;  %v16129_v35 = vcombine.low %v1309_v15, %v18107_v34  ;;  %v3004_v5 = vcombine.high %v18132_v13, %v2995_v16  ;;  %v840_v15 = vrot.slane %v594_v51, 2  ;;  %v311_v51 = vld [vmem:[%s17752_s8 + $0x64] sm:$0xf] }
  0x68   : > { %5057 = vmatprep.subr.bf16.mxu0 %v17292_v9  ;;  %v592_v46 = vor.u32 %v591_v50, %v587_v21  ;;  %v836_v9 = vrot.slane %v587_v21, 1  ;;  %v17300_v50 = vld [vmem:[%s22879_s1 + $0x190] ss:$8 sps:$4 sm:$0xff]   ;;  %v17307_v21 = vld [vmem:[%s22879_s1 + $0x1a4] ss:$8 sps:$4 sm:$0xff]  }
  0x69   : > { %v18174_v11 = vrot.slane %v16129_v35, %v17802_v37  ;;  %v1388_v35 = vrot.slane %v16093_v53, %v17802_v37  ;;  %v18215_v53 = vrot.slane %v1395_v58, %v17802_v37  ;;  %v18232_v58 = vld [vmem:[%s17752_s8 + $0x78] sm:$0xf] }
  0x6a   : > { %v597_v39 = vsel %vm510_vm0, %v592_v46, %v596_v38  ;;  %v17305_v46 = vld [vmem:[%s22879_s1 + $0x1a0] ss:$8 sps:$4 sm:$0xff]  }
  0x6b   : > { %5058 = vmatpush1.bf16.msra.mxu0 %v17290_v30  ;;  %v585_v30 = vor.u32 %v22893_v60, %v581_v27  ;;  %v18184_v27 = vrot.slane %v18117_v1, 1  ;;  %v838_v60 = vor.u32 %v837_v47, %v836_v9  ;;  %v16095_v59 = vcombine.low %v18055_v62, %v597_v39  ;;  %v313_v47 = vld [vmem:[%s17752_s8 + $0x6c] sm:$0xf] }
  0x6c   : > { %5059 = vmatprep.subr.bf16.mxu0 %v17297_v33  ;;  %v18179_v33 = vld [vmem:[%s17752_s8 + $0x60] sm:$0xf]  ;;  %v3057_v9 = vcombine.high %v18174_v11, %v3048_v4  ;;  %v18212_v16 = vrot.slane %v1388_v35, %v17802_v37  ;;  %v17317_v35 = vld [vmem:[%s22879_s1 + $0x1c4] ss:$8 sps:$4 sm:$0xff]  }
  0x6d   : > { %23150 = vst [vmem:[#allocation15_spill] sm:$0xff] %v18184_v27  ;;  %v18209_v62 = vcombine.low %v18179_v33, %v311_v51  ;;  %v16094_v12 = vcombine.low %v18042_v44, %v585_v30  ;;  %v315_v51 = vld [vmem:[%s17752_s8 + $0x74] sm:$0xf] }
  0x6e   : > { %4803 = vmatmul.mubr.bf16.gmra.mrb[16].mxu0 %v2950_v31  ;;  %v767_v31 = vrot.slane %v18096_v0, 1  ;;  %v3110_v24 = vcombine.high %v18212_v16, %v18215_v53 }
  0x6f   : > { %4812 = vmatprep.mubr.bf16.mxu0 %v3004_v5  ;;  %5060 = vmatpush1.bf16.msra.mxu0 %v17295_v7  ;;  %v18186_v5 = vor.u32 %v840_v15, %v839_v32  ;;  %v1432_v7 = vcombine.high %v18079_v17, %v585_v30  ;;  %v17312_v32 = vld [vmem:[%s22879_s1 + $0x1b4] ss:$8 sps:$4 sm:$0xff]   ;;  %23152 = vst [vmem:[#allocation17_spill] sm:$0xff] %v18209_v62 }
  0x70   : > { %5061 = vmatprep.subr.bf16.mxu0 %v17302_v14  ;;  %v18201_v14 = vld [vmem:[%s17752_s8 + $0x68] sm:$0xf]  ;;  %v769_v15 = vsel %vm751_vm1, %v767_v31, %v18184_v27  ;;  %v1492_v31 = vrot.slane %v16095_v59, %v17802_v37  ;;  %v317_v59 = vld [vmem:[%s17752_s8 + $0x7c] sm:$0xf] }
  0x71   : > { %23151 = vst [vmem:[#allocation16_spill] sm:$0xff] %v18186_v5  ;;  %v842_v13 = vsel %vm800_vm2, %v838_v60, %v18186_v5  ;;  %v600_v60 = vor.u32 %v598_v40, %v596_v38  ;;  %v18236_v38 = vcombine.low %v18201_v14, %v313_v47  ;;  %v22898_v40 = vshll.u32 %v18209_v62, 16 }
  0x72   : > { %v1484_v44 = vcombine.low %v769_v15, %v842_v13  ;;  %v1485_v30 = vcombine.high %v769_v15, %v842_v13 }
  0x73   : > { %5062 = vmatpush1.bf16.msra.mxu0 %v17300_v50  ;;  %v1448_v50 = vrot.slane %v1432_v7, %v17802_v37  ;;  %23153 = vst [vmem:[#allocation18_spill] sm:$0xff] %v18236_v38  ;;  %v3056_v7 = vcombine.low %v18174_v11, %v3048_v4  ;;  %v16096_v15 = vcombine.low %v18082_v19, %v600_v60  ;;  %v17315_v11 = vld [vmem:[%s22879_s1 + $0x1c0] ss:$8 sps:$4 sm:$0xff]   ;;  %v22901_v4 = vshrl.u32 %v18209_v62, 16 }
  0x74   : > { %5063 = vmatprep.subr.bf16.mxu0 %v17307_v21  ;;  %v17310_v21 = vld [vmem:[%s22879_s1 + $0x1b0] ss:$8 sps:$4 sm:$0xff]   ;;  %v18251_v47 = vrot.slane %v1485_v30, %v17802_v37  ;;  %v606_v19 = vrot.slane %v22898_v40, 1  ;;  %v1536_v28 = vcombine.high %v18117_v1, %v600_v60 }
  0x76   : > { %4813 = vmatmul.mubr.bf16.gmra.mrb[20].mxu0 %v3003_v25  ;;  %v1483_v25 = vcombine.high %v18096_v0, %v597_v39  ;;  %v16133_v39 = vcombine.low %v1448_v50, %v1492_v31  ;;  %23156 = vst [vmem:[#allocation21_spill] sm:$0xff] %v18251_v47  ;;  %v18264_v50 = vcombine.low %v18232_v58, %v317_v59 }
  0x77   : > { %4822 = vmatprep.mubr.bf16.mxu0 %v3057_v9  ;;  %5064 = vmatpush1.bf16.msra.mxu0 %v17305_v46  ;;  %v1441_v9 = vrot.slane %v16094_v12, %v17802_v37  ;;  %v18248_v46 = vrot.slane %v1484_v44, %v17802_v37  ;;  %v22903_v12 = vshll.u32 %v18236_v38, 16  ;;  %v1537_v44 = vcombine.low %v18184_v27, %v18186_v5 }
  0x78   : > { %5065 = vmatprep.subr.bf16.mxu0 %v17312_v32  ;;  %v18245_v13 = vrot.slane %v1483_v25, %v17802_v37  ;;  %v18254_v32 = vcombine.low %v18221_v26, %v315_v51  ;;  %23158 = vst [vmem:[#allocation23_spill] sm:$0xff] %v18264_v50  ;;  %v18269_v25 = vrot.slane %v16096_v15, %v17802_v37 }
  0x79   : > { %23155 = vst [vmem:[#allocation20_spill] sm:$0xff] %v18248_v46  ;;  %v3140_v51 = vrot.slane %v1441_v9, %v17802_v37  ;;  %v1515_v30 = vcombine.high %v1492_v31, %v18248_v46  ;;  %v611_v9 = vrot.slane %v22903_v12, 1  ;;  %v3109_v31 = vcombine.low %v18212_v16, %v18215_v53 }
  0x7a   : > { %23154 = vst [vmem:[#allocation19_spill] sm:$0xff] %v18245_v13  ;;  %23157 = vst [vmem:[#allocation22_spill] sm:$0xff] %v18254_v32  ;;  %v1517_v40 = vcombine.high %v18245_v13, %v18251_v47  ;;  %v617_v59 = vshrl.u32 %v18254_v32, 16  ;;  %v18288_v0 = vrot.slane %v1537_v44, %v17802_v37  ;;  %v18295_v16 = vrot.slane %v1536_v28, %v17802_v37  ;;  %v17322_v44 = vld [vmem:[%s22879_s1 + $0x1d4] ss:$8 sps:$4 sm:$0xff]  }
  0x7b   : > { %5066 = vmatpush1.bf16.msra.mxu0 %v17310_v21  ;;  %v3154_v21 = vrot.slane %v16133_v39, %v17802_v37  ;;  %23159 = vst [vmem:[#allocation24_spill] sm:$0xff] %v18269_v25  ;;  %v624_v39 = vshll.u32 %v18264_v50, 16 }
  0x7c   : > { %5067 = vmatprep.subr.bf16.mxu0 %v17317_v35  ;;  %v619_v35 = vshll.u32 %v18254_v32, 16  ;;  %23160 = vst [vmem:[#allocation25_spill] sm:$0xff] %v18288_v0  ;;  %v850_v61 = vrot.slane %v617_v59, 1  ;;  %23161 = vst [vmem:[#allocation26_spill] sm:$0xff] %v18295_v16  ;;  %v1568_v53 = vcombine.high %v18269_v25, %v18288_v0 }
  0x7d   : > { %v3163_v15 = vcombine.high %v3140_v51, %v3154_v21  ;;  %v854_v36 = vrot.slane %v624_v39, 2  ;;  %v626_v60 = vrot.slane %v624_v39, 1  ;;  %v18310_v39 = vrot.slane %v18264_v50, 1 }
  0x7e   : > { %4823 = vmatmul.mubr.bf16.gmra.mrb[24].mxu0 %v3056_v7  ;;  %v607_v7 = vor.u32 %v606_v19, %v22901_v4  ;;  %v16137_v19 = vcombine.low %v1517_v40, %v18269_v25  ;;  %v621_v4 = vrot.slane %v619_v35, 1  ;;  %v851_v57 = vrot.slane %v619_v35, 2  ;;  %v17320_v40 = vld [vmem:[%s22879_s1 + $0x1d0] ss:$8 sps:$4 sm:$0xff]  }
  0x7f   : > { %4832 = vmatprep.mubr.bf16.mxu0 %v3110_v24  ;;  %5068 = vmatpush1.bf16.msra.mxu0 %v17315_v11  ;;  %v628_v24 = vshrl.u32 %v18264_v50, 16  ;;  %v16135_v11 = vcombine.low %v1515_v30, %v18245_v13  ;;  %23162 = vst [vmem:[#allocation27_spill] sm:$0xff] %v18310_v39  ;;  %v18352_v25 = vld [vmem:[%s17752_s8 + $0x98] sm:$0xf]  ;;  %v329_v13 = vld [vmem:[%s17752_s8 + $0xac] sm:$0xf] }
  0x80   : > { %v612_v12 = vsel %vm510_vm0, %v607_v7, %v611_v9  ;;  %v3207_v35 = vrot.slane %v16137_v19, %v17802_v37  ;;  %v622_v7 = vor.u32 %v621_v4, %v617_v59  ;;  %v852_v27 = vor.u32 %v851_v57, %v850_v61  ;;  %5069 = vmatprep.subr.bf16.mxu0 %v17322_v44 }
  0x81   : > { %v853_v45 = vrot.slane %v628_v24, 1  ;;  %v3193_v30 = vrot.slane %v16135_v11, %v17802_v37  ;;  %v16097_v28 = vcombine.low %v18179_v33, %v612_v12  ;;  %v3162_v11 = vcombine.low %v3140_v51, %v3154_v21  ;;  %v319_v21 = vld [vmem:[%s17752_s8 + $0x84] sm:$0xf] }
  0x82   : > { %v16139_v4 = vcombine.low %v1568_v53, %v18295_v16  ;;  %v627_v59 = vsel %vm510_vm0, %v622_v7, %v626_v60  ;;  %v1587_v61 = vcombine.high %v18209_v62, %v612_v12 }
  0x83   : > { %v18312_v1 = vor.u32 %v854_v36, %v853_v45  ;;  %5070 = vmatpush1.bf16.msra.mxu0 %v17320_v40  ;;  %v3216_v19 = vcombine.high %v3193_v30, %v3207_v35  ;;  %v1596_v33 = vrot.slane %v16097_v28, %v17802_v37  ;;  %v18324_v45 = vld [vmem:[%s17752_s8 + $0x80] sm:$0xf]  ;;  %v16099_v40 = vcombine.low %v18221_v26, %v627_v59  ;;  %v321_v28 = vld [vmem:[%s17752_s8 + $0x8c] sm:$0xf] }
  0x84   : > { %v18337_v12 = vcombine.low %v18324_v45, %v319_v21  ;;  %v1691_v26 = vcombine.high %v18254_v32, %v627_v59  ;;  %v630_v21 = vor.u32 %v628_v24, %v626_v60 }
  0x85   : > { %23163 = vst [vmem:[#allocation28_spill] sm:$0xff] %v18312_v1  ;;  %v856_v36 = vsel %vm800_vm2, %v852_v27, %v18312_v1  ;;  %v3260_v53 = vrot.slane %v1596_v33, %v17802_v37  ;;  %v18333_v27 = vld [vmem:[%s17752_s8 + $0x88] sm:$0xf] }
  0x86   : > { %4833 = vmatmul.mubr.bf16.gmra.mrb[28].mxu0 %v3109_v31  ;;  %v773_v31 = vrot.slane %v18254_v32, 1  ;;  %23165 = vst [vmem:[#allocation29_spill] sm:$0xff] %v18337_v12  ;;  %v1744_v32 = vcombine.high %v18264_v50, %v630_v21 }
  0x87   : > { %4842 = vmatprep.mubr.bf16.mxu0 %v3163_v15  ;;  %v23164_v15 = vshrl.u32 %v18236_v38, 16 }
  0x88   : > { %v775_v57 = vsel %vm751_vm1, %v773_v31, %v18310_v39  ;;  %v18342_v31 = vld [vmem:[%s17752_s8 + $0x90] sm:$0xf] }
  0x89   : > { %v615_v5 = vor.u32 %v23164_v15, %v611_v9  ;;  %v3246_v9 = vrot.slane %v16139_v4, %v17802_v37  ;;  %v1692_v44 = vcombine.low %v775_v57, %v856_v36  ;;  %v3215_v15 = vcombine.low %v3193_v30, %v3207_v35 }
  0x8a   : > { %v1700_v4 = vrot.slane %v16099_v40, %v17802_v37  ;;  %v22915_v30 = vshll.u32 %v18337_v12, 16  ;;  %v18367_v40 = vrot.slane %v1691_v26, %v17802_v37  ;;  %v1693_v24 = vcombine.high %v775_v57, %v856_v36 }
  0x8b   : > { %v16098_v51 = vcombine.low %v18201_v14, %v615_v5  ;;  %v1603_v14 = vrot.slane %v1587_v61, %v17802_v37  ;;  %v3269_v33 = vcombine.high %v3246_v9, %v3260_v53  ;;  %v18349_v16 = vrot.slane %v1692_v44, %v17802_v37  ;;  %v325_v61 = vld [vmem:[%s17752_s8 + $0x9c] sm:$0xf]  ;;  %v17325_v44 = vld [vmem:[%s22879_s1 + $0x1e0] ss:$8 sps:$4 sm:$0xff]  }
  0x8c   : > { %23168 = vst [vmem:[#allocation32_spill] sm:$0xff] %v18367_v40  ;;  %v636_v36 = vrot.slane %v22915_v30, 1  ;;  %v18387_v26 = vcombine.low %v18352_v25, %v325_v61 }
  0x8d   : > { %v1649_v7 = vrot.slane %v16098_v51, %v17802_v37  ;;  %23166 = vst [vmem:[#allocation30_spill] sm:$0xff] %v18349_v16  ;;  %v18356_v51 = vcombine.low %v18333_v27, %v321_v28  ;;  %v17327_v28 = vld [vmem:[%s22879_s1 + $0x1e4] ss:$8 sps:$4 sm:$0xff]  }
  0x8e   : > { %4843 = vmatmul.mubr.bf16.gmra.mrb[32].mxu0 %v3162_v11  ;;  %v1640_v11 = vcombine.high %v18236_v38, %v615_v5  ;;  %v18360_v5 = vrot.slane %v1603_v14, %v17802_v37  ;;  %v1723_v14 = vcombine.high %v1700_v4, %v18349_v16  ;;  %23170 = vst [vmem:[#allocation34_spill] sm:$0xff] %v18387_v26  ;;  %v23177_v50 = vshrl.u32 %v18387_v26, 16 }
  0x8f   : > { %4852 = vmatprep.mubr.bf16.mxu0 %v3216_v19  ;;  %v323_v19 = vld [vmem:[%s17752_s8 + $0x94] sm:$0xf]  ;;  %23167 = vst [vmem:[#allocation31_spill] sm:$0xff] %v18356_v51  ;;  %v18363_v35 = vrot.slane %v1649_v7, %v17802_v37  ;;  %v16100_v7 = vcombine.low %v18232_v58, %v630_v21  ;;  %5071 = vmatprep.subr.bf16.mxu0 %v17327_v28  ;;  %v654_v21 = vshll.u32 %v18387_v26, 16 }
  0x90   : > { %v1656_v59 = vrot.slane %v1640_v11, %v17802_v37  ;;  %v18370_v60 = vcombine.low %v18342_v31, %v323_v19  ;;  %v3268_v19 = vcombine.low %v3246_v9, %v3260_v53  ;;  %5072 = vmatpush1.bf16.msra.mxu0 %v17325_v44  ;;  %v18392_v58 = vrot.slane %v1693_v24, %v17802_v37 }
  0x91   : > { %v16143_v30 = vcombine.low %v1723_v14, %v18367_v40  ;;  %v18398_v11 = vrot.slane %v16100_v7, %v17802_v37  ;;  %v23174_v9 = vshrl.u32 %v18337_v12, 16  ;;  %v23175_v44 = vshll.u32 %v18356_v51, 16  ;;  %v17330_v7 = vld [vmem:[%s22879_s1 + $0x1f0] ss:$8 sps:$4 sm:$0xff]  }
  0x92   : > { %23169 = vst [vmem:[#allocation33_spill] sm:$0xff] %v18370_v60  ;;  %23171 = vst [vmem:[#allocation35_spill] sm:$0xff] %v18392_v58  ;;  %v649_v57 = vshll.u32 %v18370_v60, 16  ;;  %v16141_v16 = vcombine.low %v1656_v59, %v1700_v4  ;;  %v647_v28 = vshrl.u32 %v18370_v60, 16  ;;  %v1725_v4 = vcombine.high %v18367_v40, %v18392_v58 }
  0x93   : > { %23172 = vst [vmem:[#allocation36_spill] sm:$0xff] %v18398_v11  ;;  %v637_v53 = vor.u32 %v636_v36, %v23174_v9  ;;  %v641_v24 = vrot.slane %v23175_v44, 1  ;;  %v18421_v9 = vrot.slane %v1744_v32, %v17802_v37  ;;  %v18430_v32 = vld [vmem:[%s17752_s8 + $0xa0] sm:$0xf]  ;;  %v868_v40 = vrot.slane %v654_v21, 2 }
  0x94   : > { %v651_v59 = vrot.slane %v649_v57, 1  ;;  %v3352_v36 = vrot.slane %v16141_v16, %v17802_v37  ;;  %v864_v16 = vrot.slane %v647_v28, 1  ;;  %v867_v58 = vrot.slane %v23177_v50, 1 }
  0x95   : > { %23176 = vst [vmem:[#allocation38_spill] sm:$0xff] %v18421_v9  ;;  %v642_v14 = vsel %vm510_vm0, %v637_v53, %v641_v24 }
  0x96   : > { %4853 = vmatmul.mubr.bf16.gmra.mrb[36].mxu0 %v3215_v15  ;;  %v1745_v15 = vcombine.low %v18310_v39, %v18312_v1  ;;  %v656_v39 = vrot.slane %v654_v21, 1  ;;  %v327_v1 = vld [vmem:[%s17752_s8 + $0xa4] sm:$0xf]  ;;  %v652_v53 = vor.u32 %v651_v59, %v647_v28  ;;  %v331_v28 = vld [vmem:[%s17752_s8 + $0xb4] sm:$0xf]  ;;  %v23179_v21 = vshrl.u32 %v17766_v20, 16 }
  0x97   : > { %4862 = vmatprep.mubr.bf16.mxu0 %v3269_v33  ;;  %v3322_v33 = vcombine.high %v18360_v5, %v18363_v35  ;;  %v779_v59 = vrot.slane %v18370_v60, 1 }
  0x98   : > { %v18401_v61 = vrot.slane %v1745_v15, %v17802_v37  ;;  %v17332_v15 = vld [vmem:[%s22879_s1 + $0x1f4] ss:$8 sps:$4 sm:$0xff]   ;;  %v18451_v50 = vrot.slane %v23179_v21, 1  ;;  %v18463_v21 = vld [vmem:[%s17752_s8 + $0xb8] sm:$0xf] }
  0x99   : > { %5073 = vmatprep.subr.bf16.mxu0 %v17332_v15 }
  0x9a   : > { %23173 = vst [vmem:[#allocation37_spill] sm:$0xff] %v18401_v61  ;;  %v1776_v44 = vcombine.high %v18398_v11, %v18401_v61  ;;  %5074 = vmatpush1.bf16.msra.mxu0 %v17330_v7  ;;  %v16145_v61 = vcombine.low %v1725_v4, %v18398_v11  ;;  %v23178_v7 = vshrl.u32 %v18356_v51, 16  ;;  %v18446_v4 = vld [vmem:[%s17752_s8 + $0xb0] sm:$0xf]  ;;  %v18468_v11 = vor.u32 %v868_v40, %v867_v58 }
  0x9b   : > { %v18480_v38 = vcombine.low %v18446_v4, %v331_v28 }
  0x9c   : > { %v16147_v0 = vcombine.low %v1776_v44, %v18421_v9  ;;  %v645_v47 = vor.u32 %v23178_v7, %v641_v24  ;;  %v3405_v44 = vrot.slane %v16145_v61, %v17802_v37  ;;  %23181 = vst [vmem:[#allocation40_spill] sm:$0xff] %v18468_v11 }
  0x9d   : > { %23183 = vst [vmem:[#allocation41_spill] sm:$0xff] %v18480_v38 }
  0x9e   : > { %4863 = vmatmul.mubr.bf16.gmra.mrb[40].mxu0 %v3268_v19  ;;  %v3366_v19 = vrot.slane %v16143_v30, %v17802_v37  ;;  %v865_v30 = vrot.slane %v649_v57, 2  ;;  %v18440_v57 = vld [vmem:[%s17752_s8 + $0xa8] sm:$0xf]  ;;  %v3419_v24 = vrot.slane %v16147_v0, %v17802_v37  ;;  %v333_v0 = vld [vmem:[%s17752_s8 + $0xbc] sm:$0xf]  ;;  %v16102_v58 = vcombine.low %v18333_v27, %v645_v47 }
  0x9f   : > { %4872 = vmatprep.mubr.bf16.mxu0 %v3322_v33  ;;  %v3321_v33 = vcombine.low %v18360_v5, %v18363_v35  ;;  %v16101_v5 = vcombine.low %v18324_v45, %v642_v14  ;;  %v1795_v35 = vcombine.high %v18337_v12, %v642_v14  ;;  %v657_v45 = vsel %vm510_vm0, %v652_v53, %v656_v39 }
  0xa0   : > { %v3375_v15 = vcombine.high %v3352_v36, %v3366_v19  ;;  %v18456_v14 = vcombine.low %v18430_v32, %v327_v1  ;;  %v866_v53 = vor.u32 %v865_v30, %v864_v16  ;;  %v18471_v1 = vcombine.low %v18440_v57, %v329_v13 }
  0xa1   : > { %v1804_v7 = vrot.slane %v16101_v5, %v17802_v37  ;;  %v1811_v9 = vrot.slane %v1795_v35, %v17802_v37  ;;  %v16103_v61 = vcombine.low %v18342_v31, %v657_v45  ;;  %v23182_v5 = vshll.u32 %v17772_v22, 16 }
  0xa2   : > { %v3374_v35 = vcombine.low %v3352_v36, %v3366_v19  ;;  %v22938_v62 = vshll.u32 %v18456_v14, 16  ;;  %v3428_v16 = vcombine.high %v3405_v44, %v3419_v24  ;;  %v870_v30 = vsel %vm800_vm2, %v866_v53, %v18468_v11 }
  0xa3   : > { %v805_v12 = vrot.slane %v23182_v5, 2  ;;  %v18483_v40 = vrot.slane %v1804_v7, %v17802_v37  ;;  %v3472_v13 = vrot.slane %v1811_v9, %v17802_v37  ;;  %v18493_v19 = vcombine.low %v18463_v21, %v333_v0 }
  0xa4   : > { %v1899_v7 = vcombine.high %v18370_v60, %v657_v45  ;;  %v1908_v5 = vrot.slane %v16103_v61, %v17802_v37  ;;  %v23185_v9 = vshrl.u32 %v18387_v26, 16  ;;  %v23186_v27 = vshrl.u32 %v17772_v22, 16  ;;  %v17335_v45 = vld [vmem:[%s22879_s1 + $0x204] ss:$8 sps:$4 sm:$0xff]  }
  0xa5   : > { %23184 = vst [vmem:[#allocation42_spill] sm:$0xff] %v18493_v19  ;;  %v666_v36 = vrot.slane %v22938_v62, 1  ;;  %v679_v0 = vshll.u32 %v18480_v38, 16  ;;  %v3427_v60 = vcombine.low %v3405_v44, %v3419_v24  ;;  %5356 = vmatprep.subr.bf16.mxu0 %v17335_v45  ;;  %v1857_v62 = vrot.slane %v16102_v58, %v17802_v37 }
  0xa6   : > { %4873 = vmatmul.mubr.bf16.gmra.mrb[44].mxu0 %v3321_v33  ;;  %v18466_v33 = vrot.slane %v18387_v26, 1  ;;  %v677_v44 = vshrl.u32 %v18480_v38, 16  ;;  %v688_v58 = vshrl.u32 %v18493_v19, 16  ;;  %v18531_v45 = vrot.slane %v18493_v19, 1 }
  0xa7   : > { %4882 = vmatprep.mubr.bf16.mxu0 %v3375_v15  ;;  %v1848_v15 = vcombine.high %v18356_v51, %v645_v47  ;;  %v660_v47 = vor.u32 %v23185_v9, %v656_v39  ;;  %v3481_v39 = vcombine.high %v18483_v40, %v3472_v13  ;;  %v23187_v9 = vshll.u32 %v18471_v1, 16 }
  0xa8   : > { %23180 = vst [vmem:[#allocation39_spill] sm:$0xff] %v18466_v33  ;;  %v781_v31 = vsel %vm751_vm1, %v779_v59, %v18466_v33  ;;  %v804_v59 = vrot.slane %v23186_v27, 1  ;;  %v684_v27 = vshll.u32 %v18493_v19, 16  ;;  %v18515_v51 = vrot.slane %v1899_v7, %v17802_v37  ;;  %23190 = vst [vmem:[#allocation45_spill] sm:$0xff] %v18531_v45 }
  0xa9   : > { %v1864_v28 = vrot.slane %v1848_v15, %v17802_v37  ;;  %v1900_v15 = vcombine.low %v781_v31, %v870_v30  ;;  %v1901_v61 = vcombine.high %v781_v31, %v870_v30  ;;  %v16104_v46 = vcombine.low %v18352_v25, %v660_v47 }
  0xaa   : > { %v681_v24 = vrot.slane %v679_v0, 1  ;;  %v686_v31 = vrot.slane %v684_v27, 1  ;;  %v3511_v7 = vrot.slane %v1857_v62, %v17802_v37  ;;  %v879_v10 = vrot.slane %v679_v0, 2 }
  0xab   : > { %v16149_v53 = vcombine.low %v1864_v28, %v1908_v5  ;;  %v18521_v30 = vrot.slane %v1900_v15, %v17802_v37  ;;  %v785_v28 = vrot.slane %v18480_v38, 1  ;;  %v23191_v15 = vshll.u32 %v17766_v20, 16 }
  0xac   : > { %v18539_v52 = vrot.slane %v16104_v46, %v17802_v37  ;;  %v1953_v62 = vcombine.low %v18466_v33, %v18468_v11  ;;  %v3480_v17 = vcombine.low %v18483_v40, %v3472_v13  ;;  %v881_v11 = vrot.slane %v688_v58, 1 }
  0xad   : > { %23188 = vst [vmem:[#allocation43_spill] sm:$0xff] %v18521_v30  ;;  %v3525_v25 = vrot.slane %v16149_v53, %v17802_v37  ;;  %v802_v34 = vrot.slane %v23191_v15, 2 }
  0xae   : > { %4883 = vmatmul.mubr.bf16.gmra.mrb[48].mxu0 %v3374_v35  ;;  %v671_v35 = vrot.slane %v23187_v9, 1  ;;  %v18524_v9 = vrot.slane %v1901_v61, %v17802_v37  ;;  %v1931_v61 = vcombine.high %v1908_v5, %v18521_v30  ;;  %v18551_v46 = vrot.slane %v1953_v62, %v17802_v37 }
  0xaf   : > { %4892 = vmatprep.mubr.bf16.mxu0 %v3428_v16  ;;  %v878_v16 = vrot.slane %v677_v44, 1  ;;  %v803_v0 = vor.u32 %v802_v34, %v18451_v50  ;;  %v3534_v15 = vcombine.high %v3511_v7, %v3525_v25  ;;  %v18553_v30 = vor.u32 %v805_v12, %v804_v59 }
  0xb0   : > { %23189 = vst [vmem:[#allocation44_spill] sm:$0xff] %v18524_v9  ;;  %v1933_v54 = vcombine.high %v18515_v51, %v18524_v9  ;;  %v16151_v5 = vcombine.low %v1931_v61, %v18515_v51  ;;  %v1984_v12 = vcombine.high %v18539_v52, %v18551_v46  ;;  %v3533_v61 = vcombine.low %v3511_v7, %v3525_v25  ;;  %v335_v25 = vld [vmem:[%s17752_s8 + $0xc4] sm:$0xf] }
  0xb1   : > { %v18558_v34 = vsel %vm800_vm2, %v803_v0, %v18553_v30  ;;  %v880_v59 = vor.u32 %v879_v10, %v878_v16 }
  0xb2   : > { %v16153_v9 = vcombine.low %v1933_v54, %v18539_v52  ;;  %v3564_v54 = vrot.slane %v16151_v5, %v17802_v37 }
  0xb4   : > { %v3578_v40 = vrot.slane %v16153_v9, %v17802_v37 }
  0xb6   : > { %4893 = vmatmul.mubr.bf16.gmra.mrb[52].mxu0 %v3427_v60  ;;  %v23192_v60 = vshrl.u32 %v18456_v14, 16 }
  0xb7   : > { %4902 = vmatprep.mubr.bf16.mxu0 %v3481_v39  ;;  %v1952_v39 = vcombine.high %v18387_v26, %v660_v47  ;;  %v682_v47 = vor.u32 %v681_v24, %v677_v44 }
  0xb8   : > { %v667_v53 = vor.u32 %v666_v36, %v23192_v60  ;;  %v882_v36 = vrot.slane %v684_v27, 2  ;;  %v3587_v60 = vcombine.high %v3564_v54, %v3578_v40 }
  0xb9   : > { %v18561_v50 = vrot.slane %v1952_v39, %v17802_v37  ;;  %v687_v0 = vsel %vm510_vm0, %v682_v47, %v686_v31  ;;  %v3586_v39 = vcombine.low %v3564_v54, %v3578_v40 }
  0xba   : > { %v672_v33 = vsel %vm510_vm0, %v667_v53, %v671_v35  ;;  %v18568_v27 = vor.u32 %v882_v36, %v881_v11  ;;  %v16107_v24 = vcombine.low %v18446_v4, %v687_v0  ;;  %v2107_v4 = vcombine.high %v18480_v38, %v687_v0 }
  0xbb   : > { %v16105_v13 = vcombine.low %v18430_v32, %v672_v33  ;;  %v16155_v9 = vcombine.low %v1984_v12, %v18561_v50  ;;  %v787_v32 = vsel %vm751_vm1, %v785_v28, %v18531_v45  ;;  %v2003_v11 = vcombine.high %v18456_v14, %v672_v33  ;;  %v18585_v28 = vld [vmem:[%s17752_s8 + $0xc0] sm:$0xf] }
  0xbc   : > { %23193 = vst [vmem:[#allocation46_spill] sm:$0xff] %v18568_v27  ;;  %v884_v10 = vsel %vm800_vm2, %v880_v59, %v18568_v27  ;;  %v18592_v36 = vcombine.low %v18585_v28, %v335_v25  ;;  %v18600_v59 = vld [vmem:[%s17752_s8 + $0xc8] sm:$0xf] }
  0xbd   : > { %v2012_v53 = vrot.slane %v16105_v13, %v17802_v37  ;;  %v2108_v7 = vcombine.low %v787_v32, %v884_v10  ;;  %v2019_v33 = vrot.slane %v2003_v11, %v17802_v37  ;;  %v2116_v13 = vrot.slane %v16107_v24, %v17802_v37  ;;  %v341_v24 = vld [vmem:[%s17752_s8 + $0xdc] sm:$0xf] }
  0xbe   : > { %4903 = vmatmul.mubr.bf16.gmra.mrb[56].mxu0 %v3480_v17  ;;  %v23194_v17 = vshrl.u32 %v18471_v1, 16  ;;  %23195 = vst [vmem:[#allocation47_spill] sm:$0xff] %v18592_v36  ;;  %v18618_v11 = vrot.slane %v2107_v4, %v17802_v37 }
  0xbf   : > { %4912 = vmatprep.mubr.bf16.mxu0 %v3534_v15  ;;  %v3631_v44 = vrot.slane %v2012_v53, %v17802_v37  ;;  %v18597_v47 = vrot.slane %v2108_v7, %v17802_v37 }
  0xc0   : > { %v675_v62 = vor.u32 %v23194_v17, %v671_v35  ;;  %v3617_v35 = vrot.slane %v16155_v9, %v17802_v37  ;;  %v18604_v17 = vld [vmem:[%s17752_s8 + $0xd0] sm:$0xf]  ;;  %v22957_v9 = vshll.u32 %v18592_v36, 16  ;;  %23198 = vst [vmem:[#allocation50_spill] sm:$0xff] %v18618_v11 }
  0xc1   : > { %23196 = vst [vmem:[#allocation48_spill] sm:$0xff] %v18597_v47 }
  0xc2   : > { %v16106_v16 = vcombine.low %v18440_v57, %v675_v62  ;;  %v2056_v15 = vcombine.high %v18471_v1, %v675_v62  ;;  %v690_v57 = vor.u32 %v688_v58, %v686_v31  ;;  %v3640_v12 = vcombine.high %v3617_v35, %v3631_v44  ;;  %v339_v31 = vld [vmem:[%s17752_s8 + $0xd4] sm:$0xf] }
  0xc3   : > { %v3670_v58 = vrot.slane %v2019_v33, %v17802_v37  ;;  %v2109_v62 = vcombine.high %v787_v32, %v884_v10  ;;  %v3639_v32 = vcombine.low %v3617_v35, %v3631_v44  ;;  %v18625_v10 = vld [vmem:[%s17752_s8 + $0xd8] sm:$0xf]  ;;  %v696_v35 = vrot.slane %v22957_v9, 1 }
  0xc4   : > { %v2065_v5 = vrot.slane %v16106_v16, %v17802_v37  ;;  %v2072_v54 = vrot.slane %v2056_v15, %v17802_v37  ;;  %v16108_v40 = vcombine.low %v18463_v21, %v690_v57  ;;  %v2139_v16 = vcombine.high %v2116_v13, %v18597_v47 }
  0xc5   : > { %v18622_v21 = vcombine.low %v18604_v17, %v339_v31  ;;  %v2160_v25 = vcombine.high %v18493_v19, %v690_v57  ;;  %v22960_v15 = vshrl.u32 %v18592_v36, 16  ;;  %v18644_v57 = vcombine.low %v18625_v10, %v341_v24 }
  0xc6   : > { %4913 = vmatmul.mubr.bf16.gmra.mrb[60].mxu0 %v3533_v61  ;;  %v337_v61 = vld [vmem:[%s17752_s8 + $0xcc] sm:$0xf]  ;;  %v3684_v0 = vrot.slane %v2065_v5, %v17802_v37  ;;  %v16157_v7 = vcombine.low %v2072_v54, %v2116_v13  ;;  %v18630_v33 = vrot.slane %v16108_v40, %v17802_v37  ;;  %v16159_v4 = vcombine.low %v2139_v16, %v18618_v11 }
  0xc7   : > { %4922 = vmatprep.mubr.bf16.mxu0 %v3587_v60  ;;  %v2161_v60 = vcombine.low %v18531_v45, %v18568_v27  ;;  %v18613_v53 = vcombine.low %v18600_v59, %v337_v61  ;;  %23199 = vst [vmem:[#allocation51_spill] sm:$0xff] %v18622_v21  ;;  %23202 = vst [vmem:[#allocation54_spill] sm:$0xff] %v18644_v57  ;;  %v709_v13 = vshll.u32 %v18622_v21, 16  ;;  %v707_v24 = vshrl.u32 %v18622_v21, 16 }
  0xc8   : > { %23200 = vst [vmem:[#allocation52_spill] sm:$0xff] %v18630_v33  ;;  %v3723_v61 = vrot.slane %v16157_v7, %v17802_v37  ;;  %v18649_v31 = vrot.slane %v2160_v25, %v17802_v37  ;;  %v3737_v16 = vrot.slane %v16159_v4, %v17802_v37  ;;  %v718_v25 = vshrl.u32 %v18644_v57, 16 }
  0xc9   : > { %23197 = vst [vmem:[#allocation49_spill] sm:$0xff] %v18613_v53  ;;  %v18637_v5 = vrot.slane %v2161_v60, %v17802_v37  ;;  %v22961_v44 = vshll.u32 %v18613_v53, 16  ;;  %v711_v7 = vrot.slane %v709_v13, 1  ;;  %v3692_v9 = vcombine.low %v3670_v58, %v3684_v0 }
  0xca   : > { %23203 = vst [vmem:[#allocation55_spill] sm:$0xff] %v18649_v31  ;;  %v892_v4 = vrot.slane %v707_v24, 1  ;;  %v895_v45 = vrot.slane %v718_v25, 1 }
  0xcb   : > { %23201 = vst [vmem:[#allocation53_spill] sm:$0xff] %v18637_v5  ;;  %v2192_v40 = vcombine.high %v18630_v33, %v18637_v5  ;;  %v701_v60 = vrot.slane %v22961_v44, 1  ;;  %v893_v5 = vrot.slane %v709_v13, 2 }
  0xcd   : > { %v16163_v19 = vcombine.low %v2192_v40, %v18649_v31  ;;  %v345_v31 = vld [vmem:[%s17752_s8 + $0xec] sm:$0xf] }
  0xce   : > { %4923 = vmatmul.mubr.bf16.gmra.mrb[64].mxu0 %v3586_v39  ;;  %v18634_v39 = vrot.slane %v2109_v62, %v17802_v37  ;;  %v697_v62 = vor.u32 %v696_v35, %v22960_v15  ;;  %v22969_v35 = vshrl.u32 %v18613_v53, 16  ;;  %v3746_v15 = vcombine.high %v3723_v61, %v3737_v16 }
  0xcf   : > { %4932 = vmatprep.mubr.bf16.mxu0 %v3640_v12  ;;  %v3693_v12 = vcombine.high %v3670_v58, %v3684_v0  ;;  %v3790_v40 = vrot.slane %v16163_v19, %v17802_v37 }
  0xd0   : > { %v2141_v54 = vcombine.high %v18618_v11, %v18634_v39  ;;  %v702_v38 = vsel %vm510_vm0, %v697_v62, %v701_v60  ;;  %v705_v0 = vor.u32 %v22969_v35, %v701_v60  ;;  %v791_v62 = vrot.slane %v18622_v21, 1  ;;  %v343_v60 = vld [vmem:[%s17752_s8 + $0xe4] sm:$0xf]  ;;  %v18689_v35 = vld [vmem:[%s17752_s8 + $0xe8] sm:$0xf] }
  0xd1   : > { %v16109_v27 = vcombine.low %v18585_v28, %v702_v38  ;;  %v2211_v58 = vcombine.high %v18592_v36, %v702_v38  ;;  %v894_v28 = vor.u32 %v893_v5, %v892_v4 }
  0xd2   : > { %v16161_v44 = vcombine.low %v2141_v54, %v18630_v33  ;;  %v2264_v19 = vcombine.high %v18613_v53, %v705_v0  ;;  %v18710_v33 = vld [vmem:[%s17752_s8 + $0xf0] sm:$0xf] }
  0xd4   : > { %v3776_v54 = vrot.slane %v16161_v44, %v17802_v37  ;;  %v2227_v44 = vrot.slane %v2211_v58, %v17802_v37  ;;  %v2280_v4 = vrot.slane %v2264_v19, %v17802_v37 }
  0xd6   : > { %4933 = vmatmul.mubr.bf16.gmra.mrb[68].mxu0 %v3639_v32  ;;  %v714_v32 = vshll.u32 %v18644_v57, 16 }
  0xd7   : > { %4942 = vmatprep.mubr.bf16.mxu0 %v3693_v12  ;;  %v712_v12 = vor.u32 %v711_v7, %v707_v24  ;;  %v18676_v24 = vrot.slane %v18644_v57, 1  ;;  %v3745_v7 = vcombine.low %v3723_v61, %v3737_v16  ;;  %v3843_v61 = vrot.slane %v2227_v44, %v17802_v37 }
  0xd8   : > { %v716_v26 = vrot.slane %v714_v32, 1  ;;  %v896_v47 = vrot.slane %v714_v32, 2 }
  0xd9   : > { %23204 = vst [vmem:[#allocation56_spill] sm:$0xff] %v18676_v24 }
  0xda   : > { %v717_v13 = vsel %vm510_vm0, %v712_v12, %v716_v26  ;;  %v18678_v38 = vor.u32 %v896_v47, %v895_v45  ;;  %v3799_v12 = vcombine.high %v3776_v54, %v3790_v40  ;;  %v793_v45 = vsel %vm751_vm1, %v791_v62, %v18676_v24 }
  0xdb   : > { %v16111_v32 = vcombine.low %v18604_v17, %v717_v13  ;;  %v16110_v17 = vcombine.low %v18600_v59, %v705_v0  ;;  %v2315_v16 = vcombine.high %v18622_v21, %v717_v13  ;;  %v720_v62 = vor.u32 %v718_v25, %v716_v26  ;;  %v347_v59 = vld [vmem:[%s17752_s8 + $0xf4] sm:$0xf]  ;;  %v349_v26 = vld [vmem:[%s17752_s8 + $0xfc] sm:$0xf] }
  0xdc   : > { %23205 = vst [vmem:[#allocation57_spill] sm:$0xff] %v18678_v38  ;;  %v3798_v0 = vcombine.low %v3776_v54, %v3790_v40 }
  0xdd   : > { %v2324_v58 = vrot.slane %v16111_v32, %v17802_v37  ;;  %v18715_v19 = vrot.slane %v2315_v16, %v17802_v37  ;;  %v18718_v32 = vld [vmem:[%s17752_s8 + $0xf8] sm:$0xf]  ;;  %v16112_v25 = vcombine.low %v18625_v10, %v720_v62 }
  0xde   : > { %4943 = vmatmul.mubr.bf16.gmra.mrb[72].mxu0 %v3692_v9  ;;  %v18681_v9 = vld [vmem:[%s17752_s8 + $0xe0] sm:$0xf]  ;;  %v18736_v16 = vcombine.low %v18718_v32, %v349_v26  ;;  %s16052_s8 = sshll.u32 %s23540_s16, 3 }
  0xdf   : > { %4952 = vmatprep.mubr.bf16.mxu0 %v3746_v15  ;;  %v2220_v15 = vrot.slane %v16109_v27, %v17802_v37  ;;  %v18693_v5 = vcombine.low %v18681_v9, %v343_v60  ;;  %v898_v27 = vsel %vm800_vm2, %v894_v28, %v18678_v38  ;;  %v18706_v60 = vcombine.low %v18689_v35, %v345_v31  ;;  %s283_s19 = scalar_lea.vmem %s22885_s7, %s16052_s8 }
  0xe0   : > { %v2316_v28 = vcombine.low %v793_v45, %v898_v27  ;;  %23206 = vst [vmem:[#allocation58_spill] sm:$0xff] %v18715_v19  ;;  %v16165_v31 = vcombine.low %v2280_v4, %v2324_v58 }
  0xe1   : > { %v3829_v47 = vrot.slane %v2220_v15, %v17802_v37  ;;  %v2317_v15 = vcombine.high %v793_v45, %v898_v27  ;;  %v22972_v44 = vshll.u32 %v18693_v5, 16  ;;  %v22973_v45 = vshll.u32 %v18706_v60, 16 }
  0xe2   : > { %v18725_v27 = vrot.slane %v2316_v28, %v17802_v37  ;;  %v3896_v4 = vrot.slane %v16165_v31, %v17802_v37  ;;  %v18741_v28 = vrot.slane %v16112_v25, %v17802_v37  ;;  %v744_v25 = vshll.u32 %v18736_v16, 16 }
  0xe3   : > { %v3852_v13 = vcombine.high %v3829_v47, %v3843_v61  ;;  %v18728_v54 = vrot.slane %v2317_v15, %v17802_v37  ;;  %v726_v40 = vrot.slane %v22972_v44, 1  ;;  %v731_v15 = vrot.slane %v22973_v45, 1 }
  0xe4   : > { %23207 = vst [vmem:[#allocation59_spill] sm:$0xff] %v18725_v27  ;;  %23209 = vst [vmem:[#allocation61_spill] sm:$0xff] %v18741_v28  ;;  %v2369_v44 = vcombine.low %v18676_v24, %v18678_v38  ;;  %v748_v45 = vshrl.u32 %v18736_v16, 16  ;;  %v3851_v21 = vcombine.low %v3829_v47, %v3843_v61  ;;  %v910_v11 = vrot.slane %v744_v25, 2 }
  0xe5   : > { %23208 = vst [vmem:[#allocation60_spill] sm:$0xff] %v18728_v54  ;;  %v2349_v26 = vcombine.high %v18715_v19, %v18728_v54 }
  0xe6   : > { %4953 = vmatmul.mubr.bf16.gmra.mrb[76].mxu0 %v3745_v7  ;;  %v2273_v7 = vrot.slane %v16110_v17, %v17802_v37  ;;  %v18733_v17 = vcombine.low %v18710_v33, %v347_v59  ;;  %v2347_v59 = vcombine.high %v2324_v58, %v18725_v27  ;;  %v18758_v58 = vrot.slane %v2369_v44, %v17802_v37 }
  0xe7   : > { %4962 = vmatprep.mubr.bf16.mxu0 %v3799_v12  ;;  %v22979_v12 = vshrl.u32 %v18693_v5, 16  ;;  %v16169_v38 = vcombine.low %v2349_v26, %v18741_v28  ;;  %v909_v53 = vrot.slane %v748_v45, 1  ;;  %v733_v44 = vshrl.u32 %v18706_v60, 16 }
  0xe8   : > { %v3882_v10 = vrot.slane %v2273_v7, %v17802_v37  ;;  %v739_v7 = vshll.u32 %v18733_v17, 16  ;;  %v737_v31 = vshrl.u32 %v18733_v17, 16  ;;  %23210 = vst [vmem:[#allocation62_spill] sm:$0xff] %v18758_v58  ;;  %v16167_v24 = vcombine.low %v2347_v59, %v18715_v19 }
  0xe9   : > { %v2400_v61 = vcombine.high %v18741_v28, %v18758_v58  ;;  %v3949_v26 = vrot.slane %v16169_v38, %v17802_v37  ;;  %v18776_v19 = vor.u32 %v910_v11, %v909_v53 }
  0xea   : > { %v3905_v36 = vcombine.high %v3882_v10, %v3896_v4  ;;  %v906_v54 = vrot.slane %v737_v31, 1  ;;  %v907_v27 = vrot.slane %v739_v7, 2  ;;  %v3935_v59 = vrot.slane %v16167_v24, %v17802_v37 }
  0xeb   : > { %v3904_v28 = vcombine.low %v3882_v10, %v3896_v4 }
  0xec   : > { %v3958_v58 = vcombine.high %v3935_v59, %v3949_v26 }
  0xee   : > { %4963 = vmatmul.mubr.bf16.gmra.mrb[80].mxu0 %v3798_v0  ;;  %v727_v0 = vor.u32 %v726_v40, %v22979_v12  ;;  %v741_v12 = vrot.slane %v739_v7, 1  ;;  %v746_v7 = vrot.slane %v744_v25, 1  ;;  %v3957_v25 = vcombine.low %v3935_v59, %v3949_v26 }
  0xef   : > { %4972 = vmatprep.mubr.bf16.mxu0 %v3852_v13  ;;  %v2368_v13 = vcombine.high %v18644_v57, %v720_v62  ;;  %v797_v57 = vrot.slane %v18733_v17, 1 }
  0xf0   : > { %v732_v40 = vsel %vm510_vm0, %v727_v0, %v731_v15  ;;  %v742_v0 = vor.u32 %v741_v12, %v737_v31 }
  0xf1   : > { %v18764_v47 = vrot.slane %v2368_v13, %v17802_v37  ;;  %v16113_v62 = vcombine.low %v18681_v9, %v732_v40  ;;  %v908_v13 = vor.u32 %v907_v27, %v906_v54  ;;  %v735_v9 = vor.u32 %v733_v44, %v731_v15 }
  0xf2   : > { %v747_v38 = vsel %vm510_vm0, %v742_v0, %v746_v7  ;;  %v2419_v53 = vcombine.high %v18693_v5, %v732_v40 }
  0xf3   : > { %v16171_v24 = vcombine.low %v2400_v61, %v18764_v47  ;;  %v912_v31 = vsel %vm800_vm2, %v908_v13, %v18776_v19  ;;  %v16114_v11 = vcombine.low %v18689_v35, %v735_v9  ;;  %v16115_v10 = vcombine.low %v18710_v33, %v747_v38 }
  0xf4   : > { %v2435_v15 = vrot.slane %v2419_v53, %v17802_v37  ;;  %v2472_v61 = vcombine.high %v18706_v60, %v735_v9  ;;  %v2523_v40 = vcombine.high %v18733_v17, %v747_v38 }
  0xf5   : > { %v3988_v27 = vrot.slane %v16171_v24, %v17802_v37  ;;  %v2532_v35 = vrot.slane %v16115_v10, %v17802_v37 }
  0xf6   : > { %4973 = vmatmul.mubr.bf16.gmra.mrb[84].mxu0 %v3851_v21  ;;  %v18774_v21 = vrot.slane %v18736_v16, 1  ;;  %v4041_v33 = vrot.slane %v2435_v15, %v17802_v37  ;;  %v2488_v59 = vrot.slane %v2472_v61, %v17802_v37  ;;  %v18804_v26 = vrot.slane %v2523_v40, %v17802_v37 }
  0xf7   : > { %4982 = vmatprep.mubr.bf16.mxu0 %v3905_v36  ;;  %v2428_v36 = vrot.slane %v16113_v62, %v17802_v37  ;;  %v750_v62 = vor.u32 %v748_v45, %v746_v7 }
  0xf8   : > { %v799_v12 = vsel %vm751_vm1, %v797_v57, %v18774_v21  ;;  %v2481_v57 = vrot.slane %v16114_v11, %v17802_v37  ;;  %v2577_v24 = vcombine.low %v18774_v21, %v18776_v19  ;;  %v16173_v38 = vcombine.low %v2488_v59, %v2532_v35 }
  0xf9   : > { %v4002_v54 = vrot.slane %v2428_v36, %v17802_v37  ;;  %v2524_v4 = vcombine.low %v799_v12, %v912_v31  ;;  %v2525_v9 = vcombine.high %v799_v12, %v912_v31  ;;  %v16116_v36 = vcombine.low %v18718_v32, %v750_v62 }
  0xfa   : > { %v4055_v0 = vrot.slane %v2481_v57, %v17802_v37  ;;  %v2576_v53 = vcombine.high %v18736_v16, %v750_v62  ;;  %v18819_v12 = vrot.slane %v2577_v24, %v17802_v37  ;;  %v4094_v31 = vrot.slane %v16173_v38, %v17802_v37 }
  0xfb   : > { %v4010_v45 = vcombine.low %v3988_v27, %v4002_v54  ;;  %v18813_v10 = vrot.slane %v2525_v9, %v17802_v37  ;;  %v753_v57 = vrot.slane %v17772_v22, 1 }
  0xfc   : > { %v4064_v7 = vcombine.high %v4041_v33, %v4055_v0  ;;  %v18822_v32 = vrot.slane %v2576_v53, %v17802_v37  ;;  %v4063_v61 = vcombine.low %v4041_v33, %v4055_v0 }
  0xfe   : > { %4983 = vmatmul.mubr.bf16.gmra.mrb[88].mxu0 %v3904_v28  ;;  %v4011_v28 = vcombine.high %v3988_v27, %v4002_v54  ;;  %v2557_v54 = vcombine.high %v18804_v26, %v18813_v10 }
  0xff   : > { %4992 = vmatprep.mubr.bf16.mxu0 %v3958_v58  ;;  %v18798_v58 = vrot.slane %v2524_v4, %v17802_v37  ;;  %v18816_v4 = vrot.slane %v16116_v36, %v17802_v37 }
 0x101   : > { %v2555_v13 = vcombine.high %v2532_v35, %v18798_v58  ;;  %v2608_v15 = vcombine.high %v18816_v4, %v18819_v12 }
 0x103   : > { %v16175_v11 = vcombine.low %v2555_v13, %v18804_v26  ;;  %v16179_v35 = vcombine.low %v2608_v15, %v18822_v32 }
 0x105   : > { %v4108_v27 = vrot.slane %v16175_v11, %v17802_v37  ;;  %v4161_v13 = vrot.slane %v16179_v35, %v17802_v37  ;;  %v1017_v11 = vcombine.low %v753_v57, %v18553_v30  ;;  %v23213_v35 = vshll.u32 %v17881_v23, 16 }
 0x106   : > { %4993 = vmatmul.mubr.bf16.gmra.mrb[92].mxu0 %v3957_v25  ;;  %v752_v25 = vrot.slane %v17766_v20, 1 }
 0x107   : > { %5002 = vmatprep.mubr.bf16.mxu0 %v4011_v28  ;;  %v4117_v40 = vcombine.high %v4094_v31, %v4108_v27  ;;  %v16177_v28 = vcombine.low %v2557_v54, %v18816_v4  ;;  %v4116_v24 = vcombine.low %v4094_v31, %v4108_v27  ;;  %v1039_v31 = vrot.slane %v1017_v11, %v17802_v37 }
 0x108   : > { %v754_v62 = vsel %vm751_vm1, %v752_v25, %v753_v57  ;;  %v23211_v25 = vshrl.u32 %v17905_v18, 16 }
 0x109   : > { %v4147_v59 = vrot.slane %v16177_v28, %v17802_v37  ;;  %v964_v9 = vcombine.low %v754_v62, %v18558_v34  ;;  %v965_v36 = vcombine.high %v754_v62, %v18558_v34  ;;  %v816_v62 = vrot.slane %v23213_v35, 2 }
 0x10b   : > { %v986_v33 = vrot.slane %v964_v9, %v17802_v37  ;;  %v993_v0 = vrot.slane %v965_v36, %v17802_v37  ;;  %v4169_v15 = vcombine.low %v4147_v59, %v4161_v13  ;;  %v23214_v9 = vshll.u32 %v17905_v18, 16 }
 0x10c   : > { %v1151_v36 = vcombine.low %v17947_v2, %v17974_v29 }
 0x10d   : > { %v2723_v38 = vrot.slane %v986_v33, %v17802_v37  ;;  %v2737_v53 = vrot.slane %v993_v0, %v17802_v37  ;;  %v759_v33 = vrot.slane %v17905_v18, 1 }
 0x10e   : > { %5003 = vmatmul.mubr.bf16.gmra.mrb[96].mxu0 %v4010_v45  ;;  %v4170_v45 = vcombine.high %v4147_v59, %v4161_v13  ;;  %v2776_v59 = vrot.slane %v1039_v31, %v17802_v37  ;;  %v17338_v31 = vld [vmem:[%s22879_s1 + $0x214] ss:$8 sps:$4 sm:$0xff]  }
 0x10f   : > { %5012 = vmatprep.mubr.bf16.mxu0 %v4064_v7  ;;  %v1018_v7 = vcombine.high %v753_v57, %v18553_v30  ;;  %v2741_v34 = vcombine.high %v2723_v38, %v2737_v53  ;;  %v819_v30 = vrot.slane %v23214_v9, 2  ;;  %v1100_v57 = vcombine.low %v17921_v55, %v17924_v56 }
 0x110   : > { %v2740_v11 = vcombine.low %v2723_v38, %v2737_v53 }
 0x111   : > { %v1046_v54 = vrot.slane %v1018_v7, %v17802_v37  ;;  %v16120_v55 = vcombine.high %v17910_v48, %v1100_v57 }
 0x113   : > { %v16118_v27 = vcombine.low %v1046_v54, %v17910_v48  ;;  %v17333_v54 = vld [vmem:[%s22879_s1 + $0x200] ss:$8 sps:$4 sm:$0xff]   ;;  %v2829_v48 = vrot.slane %v16120_v55, %v17802_v37 }
 0x114   : > { %v17345_v55 = vld [vmem:[%s22879_s1 + $0x240] ss:$8 sps:$4 sm:$0xff]  }
 0x115   : > { %v2790_v13 = vrot.slane %v16118_v27, %v17802_v37  ;;  %v17336_v27 = vld [vmem:[%s22879_s1 + $0x210] ss:$8 sps:$4 sm:$0xff]  }
 0x116   : > { %5013 = vmatmul.mubr.bf16.gmra.mrb[100].mxu0 %v4063_v61  ;;  %v818_v61 = vrot.slane %v23211_v25, 1  ;;  %v17341_v25 = vld [vmem:[%s22879_s1 + $0x224] ss:$8 sps:$4 sm:$0xff]  }
 0x117   : > { %5022 = vmatprep.mubr.bf16.mxu0 %v4117_v40  ;;  %v23212_v40 = vshrl.u32 %v17881_v23, 16 }
 0x118   : > { %v820_v7 = vor.u32 %v819_v30, %v818_v61  ;;  %v2793_v61 = vcombine.low %v2776_v59, %v2790_v13 }
 0x119   : > { %v815_v28 = vrot.slane %v23212_v40, 1 }
 0x11a   : > { %v1225_v9 = vcombine.low %v759_v33, %v820_v7 }
 0x11b   : > { %v817_v0 = vor.u32 %v816_v62, %v815_v28  ;;  %v17344_v62 = vld [vmem:[%s22879_s1 + $0x234] ss:$8 sps:$4 sm:$0xff]  }
 0x11e   : > { %5023 = vmatmul.mubr.bf16.gmra.mrb[104].mxu0 %v4116_v24  ;;  %v1122_v24 = vcombine.high %v17853_v6, %v17855_v8  ;;  %v821_v8 = vsel %vm800_vm2, %v817_v0, %v820_v7 }
 0x11f   : > { %5032 = vmatprep.mubr.bf16.mxu0 %v4170_v45  ;;  %v758_v45 = vrot.slane %v17881_v23, 1 }
 0x120   : > { %v1150_v2 = vrot.slane %v1122_v24, %v17802_v37  ;;  %v1247_v24 = vrot.slane %v1225_v9, %v17802_v37  ;;  %v23222_v9 = vld [vmem:[#allocation11_spill] sm:$0xff] }
 0x121   : > { %v760_v6 = vsel %vm751_vm1, %v758_v45, %v759_v33  ;;  %v1226_v45 = vcombine.high %v759_v33, %v820_v7  ;;  %v1308_v7 = vcombine.low %v18092_v43, %v18104_v49 }
 0x122   : > { %v1153_v53 = vcombine.low %v17986_v42, %v1150_v2  ;;  %v17339_v42 = vld [vmem:[%s22879_s1 + $0x220] ss:$8 sps:$4 sm:$0xff]   ;;  %v1330_v2 = vcombine.high %v18000_v63, %v18002_v3 }
 0x124   : > { %v16124_v35 = vcombine.high %v17974_v29, %v1153_v53  ;;  %v17342_v29 = vld [vmem:[%s22879_s1 + $0x230] ss:$8 sps:$4 sm:$0xff]   ;;  %v1358_v53 = vrot.slane %v1330_v2, %v17802_v37 }
 0x126   : > { %5033 = vmatmul.mubr.bf16.gmra.mrb[108].mxu0 %v4169_v15  ;;  %v2794_v15 = vcombine.high %v2776_v59, %v2790_v13  ;;  %v2882_v30 = vrot.slane %v16124_v35, %v17802_v37  ;;  %v1173_v59 = vcombine.high %v760_v6, %v821_v8  ;;  %v17347_v13 = vld [vmem:[%s22879_s1 + $0x244] ss:$8 sps:$4 sm:$0xff]  }
 0x127   : > { %5075 = vmatprep.mubr.bf16.mxu0 %v2741_v34  ;;  %v16122_v34 = vcombine.high %v17924_v56, %v1151_v36  ;;  %v1172_v56 = vcombine.low %v760_v6, %v821_v8  ;;  %v17348_v6 = vld [vmem:[%s22879_s1 + $0x250] ss:$8 sps:$4 sm:$0xff]  }
 0x129   : > { %v2843_v38 = vrot.slane %v16122_v34, %v17802_v37  ;;  %v1194_v28 = vrot.slane %v1172_v56, %v17802_v37  ;;  %v17350_v34 = vld [vmem:[%s22879_s1 + $0x254] ss:$8 sps:$4 sm:$0xff]  }
 0x12a   : > { %v23215_v56 = vld [vmem:[#allocation9_spill] sm:$0xff] }
 0x12b   : > { %v2847_v40 = vcombine.high %v2829_v48, %v2843_v38  ;;  %v2896_v57 = vrot.slane %v1194_v28, %v17802_v37  ;;  %v2846_v36 = vcombine.low %v2829_v48, %v2843_v38  ;;  %v16128_v38 = vcombine.high %v18065_v41, %v1308_v7 }
 0x12c   : > { %v23216_v43 = vshrl.u32 %v23215_v56, 16  ;;  %v23220_v28 = vshll.u32 %v23215_v56, 16 }
 0x12d   : > { %v2900_v0 = vcombine.high %v2882_v30, %v2896_v57  ;;  %v2899_v8 = vcombine.low %v2882_v30, %v2896_v57  ;;  %v23223_v57 = vld [vmem:[#allocation14_spill] sm:$0xff] }
 0x12e   : > { %5076 = vmatmul.mubr.bf16.vlgmr.msra.gmra.mrb[0].mxu0 %v2740_v11  ;;  %v1201_v11 = vrot.slane %v1173_v59, %v17802_v37  ;;  %v833_v35 = vrot.slane %v23220_v28, 2  ;;  %v1361_v59 = vcombine.low %v23223_v57, %v1358_v53  ;;  %v17351_v53 = vld [vmem:[%s22879_s1 + $0x260] ss:$8 sps:$4 sm:$0xff]  }
 0x12f   : > { %5357 = vmatpush1.bf16.msra.mxu0 %v17333_v54  ;;  %5085 = vmatprep.mubr.bf16.mxu0 %v2794_v15  ;;  %v2949_v54 = vrot.slane %v1247_v24, %v17802_v37  ;;  %v1254_v15 = vrot.slane %v1226_v45, %v17802_v37 }
 0x130   : > { %5358 = vmatprep.subr.bf16.mxu0 %v17338_v31  ;;  %v2935_v33 = vrot.slane %v1201_v11, %v17802_v37 }
 0x131   : > { %v16126_v48 = vcombine.low %v1254_v15, %v18065_v41  ;;  %v3002_v41 = vrot.slane %v16128_v38, %v17802_v37 }
 0x132   : > { %v2953_v31 = vcombine.high %v2935_v33, %v2949_v54  ;;  %v2952_v45 = vcombine.low %v2935_v33, %v2949_v54 }
 0x133   : > { %5359 = vmatpush1.bf16.msra.mxu0 %v17336_v27  ;;  %v832_v27 = vrot.slane %v23216_v43, 1  ;;  %v17353_v43 = vld [vmem:[%s22879_s1 + $0x264] ss:$8 sps:$4 sm:$0xff]  }
 0x134   : > { %5360 = vmatprep.subr.bf16.mxu0 %v17341_v25  ;;  %v23217_v25 = vld [vmem:[#allocation8_spill] sm:$0xff] }
 0x135   : > { %v23218_v63 = vshrl.u32 %v23217_v25, 16  ;;  %v834_v24 = vor.u32 %v833_v35, %v832_v27  ;;  %v23224_v35 = vld [vmem:[#allocation20_spill] sm:$0xff] }
 0x136   : > { %5086 = vmatmul.mubr.bf16.gmra.mrb[4].mxu0 %v2793_v61  ;;  %v23219_v61 = vshll.u32 %v23217_v25, 16 }
 0x137   : > { %5095 = vmatprep.mubr.bf16.mxu0 %v2847_v40  ;;  %5361 = vmatpush1.bf16.msra.mxu0 %v17339_v42  ;;  %v829_v3 = vrot.slane %v23218_v63, 1  ;;  %v2988_v42 = vrot.slane %v16126_v48, %v17802_v37 }
 0x138   : > { %5362 = vmatprep.subr.bf16.mxu0 %v17344_v62  ;;  %v830_v40 = vrot.slane %v23219_v61, 2  ;;  %v23221_v62 = vld [vmem:[#allocation12_spill] sm:$0xff] }
 0x139   : > { %v1359_v30 = vcombine.low %v23222_v9, %v23221_v62 }
 0x13b   : > { %5363 = vmatpush1.bf16.msra.mxu0 %v17342_v29  ;;  %v764_v29 = vrot.slane %v23217_v25, 1  ;;  %v16130_v11 = vcombine.high %v18104_v49, %v1359_v30  ;;  %v23227_v30 = vld [vmem:[#allocation17_spill] sm:$0xff] }
 0x13c   : > { %5364 = vmatprep.subr.bf16.mxu0 %v17347_v13  ;;  %v765_v13 = vrot.slane %v23215_v56, 1  ;;  %v23228_v57 = vshrl.u32 %v23227_v30, 16 }
 0x13d   : > { %v3041_v7 = vrot.slane %v16130_v11, %v17802_v37  ;;  %v23231_v11 = vld [vmem:[#allocation21_spill] sm:$0xff] }
 0x13e   : > { %5096 = vmatmul.mubr.bf16.gmra.mrb[8].mxu0 %v2846_v36  ;;  %v831_v36 = vor.u32 %v830_v40, %v829_v3  ;;  %v766_v15 = vsel %vm751_vm1, %v764_v29, %v765_v13  ;;  %v1434_v33 = vcombine.high %v765_v13, %v834_v24  ;;  %v1433_v38 = vcombine.low %v765_v13, %v834_v24 }
 0x13f   : > { %5105 = vmatprep.mubr.bf16.mxu0 %v2900_v0  ;;  %5365 = vmatpush1.bf16.msra.mxu0 %v17345_v55  ;;  %v3006_v0 = vcombine.high %v2988_v42, %v3002_v41  ;;  %v16132_v55 = vcombine.high %v23221_v62, %v1361_v59  ;;  %v843_v59 = vrot.slane %v23228_v57, 1  ;;  %v23229_v29 = vshll.u32 %v23227_v30, 16  ;;  %v23237_v57 = vld [vmem:[#allocation26_spill] sm:$0xff] }
 0x140   : > { %5366 = vmatprep.subr.bf16.mxu0 %v17350_v34  ;;  %v835_v34 = vsel %vm800_vm2, %v831_v36, %v834_v24  ;;  %v1462_v3 = vrot.slane %v1434_v33, %v17802_v37  ;;  %v1455_v40 = vrot.slane %v1433_v38, %v17802_v37 }
 0x141   : > { %v3055_v2 = vrot.slane %v16132_v55, %v17802_v37  ;;  %v844_v13 = vrot.slane %v23229_v29, 2  ;;  %v23232_v55 = vld [vmem:[#allocation19_spill] sm:$0xff] }
 0x143   : > { %5367 = vmatpush1.bf16.msra.mxu0 %v17348_v6  ;;  %v1380_v6 = vcombine.low %v766_v15, %v835_v34  ;;  %v3059_v48 = vcombine.high %v3041_v7, %v3055_v2  ;;  %v3058_v61 = vcombine.low %v3041_v7, %v3055_v2  ;;  %v23234_v7 = vld [vmem:[#allocation24_spill] sm:$0xff] }
 0x144   : > { %5368 = vmatprep.subr.bf16.mxu0 %v17353_v43 }
 0x145   : > { %v1402_v54 = vrot.slane %v1380_v6, %v17802_v37  ;;  %v23235_v6 = vld [vmem:[#allocation16_spill] sm:$0xff] }
 0x146   : > { %5106 = vmatmul.mubr.bf16.gmra.mrb[12].mxu0 %v2899_v8  ;;  %v1381_v8 = vcombine.high %v766_v15, %v835_v34  ;;  %v1516_v15 = vcombine.low %v23232_v55, %v23231_v11  ;;  %v23233_v34 = vld [vmem:[#allocation25_spill] sm:$0xff] }
 0x147   : > { %5115 = vmatprep.mubr.bf16.mxu0 %v2953_v31  ;;  %v3005_v31 = vcombine.low %v2988_v42, %v3002_v41  ;;  %v3094_v27 = vrot.slane %v1402_v54, %v17802_v37  ;;  %5369 = vmatpush1.bf16.msra.mxu0 %v17351_v53  ;;  %v16134_v42 = vcombine.low %v1462_v3, %v23224_v35  ;;  %v23225_v41 = vld [vmem:[#allocation18_spill] sm:$0xff] }
 0x148   : > { %v1409_v49 = vrot.slane %v1381_v8, %v17802_v37  ;;  %v23226_v62 = vshrl.u32 %v23225_v41, 16  ;;  %v23230_v36 = vshll.u32 %v23225_v41, 16  ;;  %v1567_v2 = vcombine.low %v23234_v7, %v23233_v34  ;;  %v23236_v8 = vld [vmem:[#allocation15_spill] sm:$0xff] }
 0x149   : > { %v771_v54 = vrot.slane %v23225_v41, 1  ;;  %v16136_v43 = vcombine.high %v23224_v35, %v1516_v15 }
 0x14a   : > { %v3108_v63 = vrot.slane %v1409_v49, %v17802_v37  ;;  %v846_v9 = vrot.slane %v23226_v62, 1  ;;  %v847_v24 = vrot.slane %v23230_v36, 2  ;;  %v845_v49 = vor.u32 %v844_v13, %v843_v59 }
 0x14b   : > { %v16138_v3 = vcombine.high %v23231_v11, %v1567_v2 }
 0x14c   : > { %v3112_v28 = vcombine.high %v3094_v27, %v3108_v63  ;;  %v848_v33 = vor.u32 %v847_v24, %v846_v9  ;;  %v3111_v38 = vcombine.low %v3094_v27, %v3108_v63 }
 0x14d   : > { %v3214_v62 = vrot.slane %v16138_v3, %v17802_v37 }
 0x14e   : > { %5116 = vmatmul.mubr.bf16.gmra.mrb[16].mxu0 %v2952_v45  ;;  %v3147_v45 = vrot.slane %v1455_v40, %v17802_v37  ;;  %v1641_v11 = vcombine.low %v771_v54, %v848_v33 }
 0x14f   : > { %5125 = vmatprep.mubr.bf16.mxu0 %v3006_v0  ;;  %v3161_v0 = vrot.slane %v16134_v42, %v17802_v37  ;;  %v3200_v42 = vrot.slane %v16136_v43, %v17802_v37 }
 0x150   : > { %v1663_v2 = vrot.slane %v1641_v11, %v17802_v37 }
 0x151   : > { %v3165_v53 = vcombine.high %v3147_v45, %v3161_v0  ;;  %v3164_v63 = vcombine.low %v3147_v45, %v3161_v0  ;;  %v3218_v59 = vcombine.high %v3200_v42, %v3214_v62  ;;  %v3217_v55 = vcombine.low %v3200_v42, %v3214_v62  ;;  %v23243_v62 = vld [vmem:[#allocation31_spill] sm:$0xff] }
 0x152   : > { %v1642_v45 = vcombine.high %v771_v54, %v848_v33 }
 0x156   : > { %5126 = vmatmul.mubr.bf16.gmra.mrb[20].mxu0 %v3005_v31  ;;  %v1538_v31 = vcombine.high %v23236_v8, %v23235_v6  ;;  %v17356_v6 = vld [vmem:[%s22879_s1 + $0x274] ss:$8 sps:$4 sm:$0xff]   ;;  %v3320_v8 = vrot.slane %v1663_v2, %v17802_v37  ;;  %v23251_v2 = vld [vmem:[#allocation38_spill] sm:$0xff] }
 0x157   : > { %5135 = vmatprep.mubr.bf16.mxu0 %v3059_v48  ;;  %v770_v48 = vrot.slane %v23227_v30, 1  ;;  %5370 = vmatprep.subr.bf16.mxu0 %v17356_v6  ;;  %v777_v6 = vrot.slane %v23243_v62, 1 }
 0x159   : > { %v772_v40 = vsel %vm751_vm1, %v770_v48, %v771_v54  ;;  %v23238_v48 = vld [vmem:[#allocation35_spill] sm:$0xff]  ;;  %v23240_v54 = vld [vmem:[#allocation28_spill] sm:$0xff] }
 0x15e   : > { %5136 = vmatmul.mubr.bf16.gmra.mrb[24].mxu0 %v3058_v61  ;;  %v1566_v61 = vrot.slane %v1538_v31, %v17802_v37  ;;  %v1670_v31 = vrot.slane %v1642_v45, %v17802_v37 }
 0x15f   : > { %5145 = vmatprep.mubr.bf16.mxu0 %v3112_v28  ;;  %v849_v28 = vsel %vm800_vm2, %v845_v49, %v848_v33  ;;  %v23239_v49 = vld [vmem:[#allocation32_spill] sm:$0xff]  ;;  %v23241_v33 = vld [vmem:[#allocation27_spill] sm:$0xff] }
 0x160   : > { %v1569_v9 = vcombine.low %v23237_v57, %v1566_v61  ;;  %v1588_v27 = vcombine.low %v772_v40, %v849_v28  ;;  %v1589_v13 = vcombine.high %v772_v40, %v849_v28  ;;  %v23242_v61 = vld [vmem:[#allocation30_spill] sm:$0xff]  ;;  %v23244_v57 = vshrl.u32 %v23243_v62, 16 }
 0x161   : > { %v16142_v40 = vcombine.low %v1670_v31, %v23242_v61 }
 0x162   : > { %v1610_v35 = vrot.slane %v1588_v27, %v17802_v37  ;;  %v16140_v29 = vcombine.high %v23233_v34, %v1569_v9  ;;  %v1617_v15 = vrot.slane %v1589_v13, %v17802_v37  ;;  %v17354_v34 = vld [vmem:[%s22879_s1 + $0x270] ss:$8 sps:$4 sm:$0xff]   ;;  %v860_v9 = vrot.slane %v23244_v57, 1 }
 0x163   : > { %5371 = vmatpush1.bf16.msra.mxu0 %v17354_v34  ;;  %v23245_v27 = vld [vmem:[#allocation29_spill] sm:$0xff]  ;;  %v23248_v13 = vshll.u32 %v23243_v62, 16 }
 0x164   : > { %v3253_v36 = vrot.slane %v16140_v29, %v17802_v37  ;;  %v3267_v24 = vrot.slane %v1610_v35, %v17802_v37  ;;  %v3306_v0 = vrot.slane %v1617_v15, %v17802_v37  ;;  %v23247_v35 = vshll.u32 %v23245_v27, 16  ;;  %v23250_v15 = vld [vmem:[#allocation36_spill] sm:$0xff] }
 0x165   : > { %v861_v11 = vrot.slane %v23248_v13, 2  ;;  %v776_v34 = vrot.slane %v23245_v27, 1 }
 0x166   : > { %5146 = vmatmul.mubr.bf16.gmra.mrb[28].mxu0 %v3111_v38  ;;  %v3271_v7 = vcombine.high %v3253_v36, %v3267_v24  ;;  %v1724_v38 = vcombine.low %v23239_v49, %v23238_v48  ;;  %v3270_v43 = vcombine.low %v3253_v36, %v3267_v24  ;;  %v3324_v3 = vcombine.high %v3306_v0, %v3320_v8 }
 0x167   : > { %5155 = vmatprep.mubr.bf16.mxu0 %v3165_v53  ;;  %v1746_v53 = vcombine.high %v23241_v33, %v23240_v54  ;;  %v858_v29 = vrot.slane %v23247_v35, 2  ;;  %v3359_v36 = vrot.slane %v16142_v40, %v17802_v37  ;;  %v862_v49 = vor.u32 %v861_v11, %v860_v9 }
 0x168   : > { %v16144_v28 = vcombine.high %v23242_v61, %v1724_v38  ;;  %v3323_v38 = vcombine.low %v3306_v0, %v3320_v8 }
 0x169   : > { %v1774_v42 = vrot.slane %v1746_v53, %v17802_v37 }
 0x16a   : > { %v3373_v24 = vrot.slane %v16144_v28, %v17802_v37 }
 0x16b   : > { %v1777_v45 = vcombine.low %v23251_v2, %v1774_v42  ;;  %v23254_v2 = vshrl.u32 %v18456_v14, 16 }
 0x16c   : > { %v3377_v54 = vcombine.high %v3359_v36, %v3373_v24  ;;  %v3376_v57 = vcombine.low %v3359_v36, %v3373_v24  ;;  %v23252_v36 = vld [vmem:[#allocation43_spill] sm:$0xff] }
 0x16e   : > { %5156 = vmatmul.mubr.bf16.gmra.mrb[32].mxu0 %v3164_v63  ;;  %v23246_v63 = vshrl.u32 %v23245_v27, 16 }
 0x16f   : > { %5165 = vmatprep.mubr.bf16.mxu0 %v3218_v59 }
 0x170   : > { %v857_v59 = vrot.slane %v23246_v63, 1  ;;  %v1849_v63 = vcombine.low %v777_v6, %v862_v49 }
 0x172   : > { %v859_v31 = vor.u32 %v858_v29, %v857_v59  ;;  %v1871_v11 = vrot.slane %v1849_v63, %v17802_v37 }
 0x176   : > { %5166 = vmatmul.mubr.bf16.gmra.mrb[36].mxu0 %v3217_v55  ;;  %v23249_v55 = vld [vmem:[#allocation37_spill] sm:$0xff] }
 0x177   : > { %5175 = vmatprep.mubr.bf16.mxu0 %v3271_v7  ;;  %v1775_v7 = vcombine.low %v23250_v15, %v23249_v55  ;;  %v16148_v53 = vcombine.high %v23249_v55, %v1777_v45  ;;  %v23253_v15 = vshrl.u32 %v18471_v1, 16  ;;  %v871_v45 = vrot.slane %v23254_v2, 1 }
 0x179   : > { %v16146_v33 = vcombine.high %v23238_v48, %v1775_v7  ;;  %v3426_v40 = vrot.slane %v16148_v53, %v17802_v37  ;;  %v1850_v48 = vcombine.high %v777_v6, %v862_v49  ;;  %v874_v7 = vrot.slane %v23253_v15, 1 }
 0x17b   : > { %v3412_v61 = vrot.slane %v16146_v33, %v17802_v37  ;;  %v1878_v29 = vrot.slane %v1850_v48, %v17802_v37  ;;  %v23257_v33 = vld [vmem:[#allocation44_spill] sm:$0xff] }
 0x17c   : > { %v1932_v53 = vcombine.low %v18515_v51, %v23257_v33 }
 0x17d   : > { %v3430_v9 = vcombine.high %v3412_v61, %v3426_v40  ;;  %v3429_v13 = vcombine.low %v3412_v61, %v3426_v40  ;;  %v16150_v24 = vcombine.low %v1878_v29, %v23252_v36  ;;  %v23259_v61 = vld [vmem:[#allocation39_spill] sm:$0xff] }
 0x17e   : > { %5176 = vmatmul.mubr.bf16.gmra.mrb[40].mxu0 %v3270_v43  ;;  %v778_v43 = vsel %vm751_vm1, %v776_v34, %v777_v6  ;;  %v23255_v34 = vshll.u32 %v18456_v14, 16  ;;  %v16152_v48 = vcombine.high %v23252_v36, %v1932_v53  ;;  %v23260_v53 = vld [vmem:[#allocation50_spill] sm:$0xff] }
 0x17f   : > { %5185 = vmatprep.mubr.bf16.mxu0 %v3324_v3  ;;  %v863_v3 = vsel %vm800_vm2, %v859_v31, %v862_v49  ;;  %v23256_v31 = vshll.u32 %v18471_v1, 16 }
 0x180   : > { %v1796_v28 = vcombine.low %v778_v43, %v863_v3  ;;  %v1797_v42 = vcombine.high %v778_v43, %v863_v3  ;;  %v872_v6 = vrot.slane %v23255_v34, 2  ;;  %v1983_v43 = vcombine.low %v18539_v52, %v18551_v46  ;;  %v23258_v3 = vld [vmem:[#allocation40_spill] sm:$0xff] }
 0x181   : > { %v875_v49 = vrot.slane %v23256_v31, 2  ;;  %v1954_v40 = vcombine.high %v23259_v61, %v23258_v3  ;;  %v23261_v3 = vld [vmem:[#allocation46_spill] sm:$0xff]  ;;  %v23262_v61 = vld [vmem:[#allocation45_spill] sm:$0xff] }
 0x182   : > { %v1818_v0 = vrot.slane %v1796_v28, %v17802_v37  ;;  %v1825_v8 = vrot.slane %v1797_v42, %v17802_v37  ;;  %v782_v28 = vrot.slane %v18456_v14, 1  ;;  %v783_v42 = vrot.slane %v18471_v1, 1 }
 0x183   : > { %v16154_v63 = vcombine.high %v23257_v33, %v1983_v43  ;;  %v1982_v51 = vrot.slane %v1954_v40, %v17802_v37  ;;  %v2140_v43 = vcombine.low %v23260_v53, %v18634_v39  ;;  %v2162_v40 = vcombine.high %v23262_v61, %v23261_v3 }
 0x184   : > { %v3465_v59 = vrot.slane %v1818_v0, %v17802_v37  ;;  %v3479_v35 = vrot.slane %v1825_v8, %v17802_v37  ;;  %v784_v29 = vsel %vm751_vm1, %v782_v28, %v783_v42 }
 0x186   : > { %5186 = vmatmul.mubr.bf16.gmra.mrb[44].mxu0 %v3323_v38  ;;  %v3483_v55 = vcombine.high %v3465_v59, %v3479_v35  ;;  %v3518_v38 = vrot.slane %v1871_v11, %v17802_v37  ;;  %v3482_v0 = vcombine.low %v3465_v59, %v3479_v35  ;;  %v3585_v11 = vrot.slane %v16154_v63, %v17802_v37 }
 0x187   : > { %5195 = vmatprep.mubr.bf16.mxu0 %v3377_v54  ;;  %v3532_v54 = vrot.slane %v16150_v24, %v17802_v37 }
 0x189   : > { %v3536_v8 = vcombine.high %v3518_v38, %v3532_v54  ;;  %v3535_v35 = vcombine.low %v3518_v38, %v3532_v54 }
 0x18e   : > { %5196 = vmatmul.mubr.bf16.gmra.mrb[48].mxu0 %v3376_v57  ;;  %v873_v57 = vor.u32 %v872_v6, %v871_v45 }
 0x18f   : > { %5205 = vmatprep.mubr.bf16.mxu0 %v3430_v9  ;;  %v876_v9 = vor.u32 %v875_v49, %v874_v7 }
 0x191   : > { %v877_v52 = vsel %vm800_vm2, %v873_v57, %v876_v9  ;;  %v2057_v34 = vcombine.low %v783_v42, %v876_v9  ;;  %v2058_v38 = vcombine.high %v783_v42, %v876_v9  ;;  %v2190_v9 = vrot.slane %v2162_v40, %v17802_v37 }
 0x192   : > { %v2004_v59 = vcombine.low %v784_v29, %v877_v52  ;;  %v2005_v7 = vcombine.high %v784_v29, %v877_v52  ;;  %v23266_v29 = vld [vmem:[#allocation47_spill] sm:$0xff] }
 0x193   : > { %v2086_v33 = vrot.slane %v2058_v38, %v17802_v37  ;;  %v23267_v52 = vshrl.u32 %v23266_v29, 16 }
 0x194   : > { %v2026_v36 = vrot.slane %v2004_v59, %v17802_v37  ;;  %v2033_v31 = vrot.slane %v2005_v7, %v17802_v37  ;;  %v23271_v7 = vld [vmem:[#allocation52_spill] sm:$0xff] }
 0x196   : > { %5206 = vmatmul.mubr.bf16.gmra.mrb[52].mxu0 %v3429_v13  ;;  %v3571_v13 = vrot.slane %v16152_v48, %v17802_v37  ;;  %v3638_v45 = vrot.slane %v2026_v36, %v17802_v37  ;;  %v3677_v54 = vrot.slane %v2033_v31, %v17802_v37  ;;  %v23264_v48 = vld [vmem:[#allocation49_spill] sm:$0xff] }
 0x197   : > { %5215 = vmatprep.mubr.bf16.mxu0 %v3483_v55  ;;  %v1985_v55 = vcombine.low %v18561_v50, %v1982_v51  ;;  %v2079_v50 = vrot.slane %v2057_v34, %v17802_v37  ;;  %v23265_v63 = vshrl.u32 %v23264_v48, 16  ;;  %v23269_v59 = vshll.u32 %v23264_v48, 16 }
 0x198   : > { %v3589_v24 = vcombine.high %v3571_v13, %v3585_v11  ;;  %v3588_v6 = vcombine.low %v3571_v13, %v3585_v11  ;;  %v885_v13 = vrot.slane %v23267_v52, 1  ;;  %v23268_v11 = vshll.u32 %v23266_v29, 16 }
 0x199   : > { %v16156_v15 = vcombine.high %v18551_v46, %v1985_v55  ;;  %v3691_v46 = vrot.slane %v2079_v50, %v17802_v37  ;;  %v888_v51 = vrot.slane %v23265_v63, 1  ;;  %v789_v31 = vrot.slane %v23264_v48, 1 }
 0x19a   : > { %v886_v55 = vrot.slane %v23268_v11, 2 }
 0x19b   : > { %v3624_v2 = vrot.slane %v16156_v15, %v17802_v37  ;;  %v3695_v57 = vcombine.high %v3677_v54, %v3691_v46  ;;  %v23270_v15 = vld [vmem:[#allocation53_spill] sm:$0xff]  ;;  %v3694_v38 = vcombine.low %v3677_v54, %v3691_v46 }
 0x19d   : > { %v3642_v49 = vcombine.high %v3624_v2, %v3638_v45  ;;  %v3641_v28 = vcombine.low %v3624_v2, %v3638_v45  ;;  %v2191_v2 = vcombine.low %v23271_v7, %v23270_v15  ;;  %v23272_v45 = vld [vmem:[#allocation55_spill] sm:$0xff]  ;;  %v23275_v7 = vshll.u32 %v18693_v5, 16 }
 0x19e   : > { %5216 = vmatmul.mubr.bf16.gmra.mrb[56].mxu0 %v3482_v0  ;;  %v23263_v0 = vld [vmem:[#allocation48_spill] sm:$0xff]  ;;  %v2193_v34 = vcombine.low %v23272_v45, %v2190_v9  ;;  %v23276_v45 = vshll.u32 %v18706_v60, 16 }
 0x19f   : > { %5225 = vmatprep.mubr.bf16.mxu0 %v3536_v8  ;;  %v16158_v8 = vcombine.low %v2086_v33, %v23263_v0  ;;  %v16160_v42 = vcombine.high %v23263_v0, %v2140_v43  ;;  %v16162_v53 = vcombine.high %v18634_v39, %v2191_v2  ;;  %v900_v2 = vrot.slane %v23275_v7, 2 }
 0x1a0   : > { %v16164_v43 = vcombine.high %v23270_v15, %v2193_v34  ;;  %v903_v34 = vrot.slane %v23276_v45, 2 }
 0x1a1   : > { %v3744_v36 = vrot.slane %v16160_v42, %v17802_v37  ;;  %v3783_v40 = vrot.slane %v16162_v53, %v17802_v37 }
 0x1a6   : > { %5226 = vmatmul.mubr.bf16.gmra.mrb[60].mxu0 %v3535_v35  ;;  %v889_v35 = vrot.slane %v23269_v59, 2  ;;  %v23273_v59 = vld [vmem:[#allocation59_spill] sm:$0xff] }
 0x1a7   : > { %5235 = vmatprep.mubr.bf16.mxu0 %v3589_v24  ;;  %v3730_v24 = vrot.slane %v16158_v8, %v17802_v37 }
 0x1a8   : > { %v890_v50 = vor.u32 %v889_v35, %v888_v51 }
 0x1a9   : > { %v3748_v33 = vcombine.high %v3730_v24, %v3744_v36  ;;  %v3747_v8 = vcombine.low %v3730_v24, %v3744_v36  ;;  %v902_v24 = vrot.slane %v733_v44, 1  ;;  %v23274_v36 = vshrl.u32 %v18693_v5, 16  ;;  %v23280_v44 = vld [vmem:[#allocation61_spill] sm:$0xff] }
 0x1aa   : > { %v2266_v46 = vcombine.high %v789_v31, %v890_v50  ;;  %v2265_v9 = vcombine.low %v789_v31, %v890_v50 }
 0x1ab   : > { %v899_v15 = vrot.slane %v23274_v36, 1 }
 0x1ac   : > { %v2294_v52 = vrot.slane %v2266_v46, %v17802_v37  ;;  %v2287_v11 = vrot.slane %v2265_v9, %v17802_v37 }
 0x1ae   : > { %5236 = vmatmul.mubr.bf16.gmra.mrb[64].mxu0 %v3588_v6  ;;  %v788_v6 = vrot.slane %v23266_v29, 1  ;;  %v16166_v35 = vcombine.low %v2294_v52, %v23273_v59 }
 0x1af   : > { %5245 = vmatprep.mubr.bf16.mxu0 %v3642_v49  ;;  %v887_v49 = vor.u32 %v886_v55, %v885_v13 }
 0x1b0   : > { %v790_v3 = vsel %vm751_vm1, %v788_v6, %v789_v31  ;;  %v3889_v6 = vrot.slane %v2287_v11, %v17802_v37  ;;  %v3903_v31 = vrot.slane %v16166_v35, %v17802_v37 }
 0x1b1   : > { %v891_v61 = vsel %vm800_vm2, %v887_v49, %v890_v50  ;;  %v23277_v49 = vld [vmem:[#allocation60_spill] sm:$0xff]  ;;  %v23278_v50 = vld [vmem:[#allocation58_spill] sm:$0xff] }
 0x1b2   : > { %v2213_v0 = vcombine.high %v790_v3, %v891_v61 }
 0x1b4   : > { %v2241_v39 = vrot.slane %v2213_v0, %v17802_v37  ;;  %v904_v0 = vor.u32 %v903_v34, %v902_v24 }
 0x1b6   : > { %5246 = vmatmul.mubr.bf16.gmra.mrb[68].mxu0 %v3641_v28  ;;  %v3797_v28 = vrot.slane %v16164_v43, %v17802_v37  ;;  %v3850_v51 = vrot.slane %v2241_v39, %v17802_v37  ;;  %v23281_v43 = vld [vmem:[#allocation57_spill] sm:$0xff] }
 0x1b7   : > { %5255 = vmatprep.mubr.bf16.mxu0 %v3695_v57  ;;  %v2212_v57 = vcombine.low %v790_v3, %v891_v61  ;;  %v23282_v3 = vld [vmem:[#allocation56_spill] sm:$0xff] }
 0x1b8   : > { %v3801_v42 = vcombine.high %v3783_v40, %v3797_v28  ;;  %v3800_v13 = vcombine.low %v3783_v40, %v3797_v28  ;;  %v2370_v61 = vcombine.high %v23282_v3, %v23281_v43  ;;  %v794_v40 = vrot.slane %v18693_v5, 1 }
 0x1b9   : > { %v2234_v54 = vrot.slane %v2212_v57, %v17802_v37  ;;  %v795_v28 = vrot.slane %v18706_v60, 1  ;;  %v901_v57 = vor.u32 %v900_v2, %v899_v15 }
 0x1ba   : > { %v2398_v46 = vrot.slane %v2370_v61, %v17802_v37 }
 0x1bb   : > { %v3836_v63 = vrot.slane %v2234_v54, %v17802_v37  ;;  %v796_v9 = vsel %vm751_vm1, %v794_v40, %v795_v28  ;;  %v905_v52 = vsel %vm800_vm2, %v901_v57, %v904_v0  ;;  %v2473_v2 = vcombine.low %v795_v28, %v904_v0 }
 0x1bc   : > { %v2421_v7 = vcombine.high %v796_v9, %v905_v52  ;;  %v2474_v34 = vcombine.high %v795_v28, %v904_v0  ;;  %v914_v28 = vrot.slane %v17766_v20, 2 }
 0x1bd   : > { %v3854_v55 = vcombine.high %v3836_v63, %v3850_v51 }
 0x1be   : > { %5256 = vmatmul.mubr.bf16.gmra.mrb[72].mxu0 %v3694_v38  ;;  %v2348_v38 = vcombine.low %v23278_v50, %v23277_v49 }
 0x1bf   : > { %5265 = vmatprep.mubr.bf16.mxu0 %v3748_v33  ;;  %v23279_v33 = vld [vmem:[#allocation62_spill] sm:$0xff] }
 0x1c0   : > { %v2399_v53 = vcombine.low %v23280_v44, %v23279_v33  ;;  %v16168_v54 = vcombine.high %v23273_v59, %v2348_v38  ;;  %v2578_v44 = vcombine.high %v18774_v21, %v18776_v19  ;;  %v915_v21 = vrot.slane %v17772_v22, 2 }
 0x1c2   : > { %v16170_v39 = vcombine.high %v23277_v49, %v2399_v53  ;;  %v2606_v40 = vrot.slane %v2578_v44, %v17802_v37  ;;  %v920_v44 = vrot.slane %v17881_v23, 2 }
 0x1c4   : > { %v3956_v11 = vrot.slane %v16170_v39, %v17802_v37  ;;  %v2609_v19 = vcombine.low %v18822_v32, %v2606_v40 }
 0x1c6   : > { %5266 = vmatmul.mubr.bf16.gmra.mrb[76].mxu0 %v3747_v8  ;;  %v3853_v8 = vcombine.low %v3836_v63, %v3850_v51  ;;  %v2420_v63 = vcombine.low %v796_v9, %v905_v52  ;;  %v3906_v51 = vcombine.low %v3889_v6, %v3903_v31  ;;  %v16180_v20 = vcombine.high %v18819_v12, %v2609_v19 }
 0x1c7   : > { %5275 = vmatprep.mubr.bf16.mxu0 %v3801_v42  ;;  %v3907_v42 = vcombine.high %v3889_v6, %v3903_v31  ;;  %v2495_v6 = vrot.slane %v2473_v2, %v17802_v37  ;;  %v2502_v31 = vrot.slane %v2474_v34, %v17802_v37 }
 0x1c8   : > { %v2442_v59 = vrot.slane %v2420_v63, %v17802_v37 }
 0x1c9   : > { %v4062_v38 = vrot.slane %v2495_v6, %v17802_v37  ;;  %v16174_v43 = vcombine.low %v2502_v31, %v18798_v58  ;;  %v17662_v6 = vmov 0  }
 0x1ca   : > { %v4009_v15 = vrot.slane %v2442_v59, %v17802_v37 }
 0x1cb   : > { %v4101_v57 = vrot.slane %v16174_v43, %v17802_v37 }
 0x1ce   : > { %5276 = vmatmul.mubr.bf16.gmra.mrb[80].mxu0 %v3800_v13  ;;  %v3942_v13 = vrot.slane %v16168_v54, %v17802_v37  ;;  %v916_v54 = vsel %vm913_vm3, %v914_v28, %v915_v21 }
 0x1cf   : > { %5285 = vmatprep.mubr.bf16.mxu0 %v3854_v55  ;;  %v2401_v55 = vcombine.low %v18764_v47, %v2398_v46  ;;  %v2449_v47 = vrot.slane %v2421_v7, %v17802_v37  ;;  %v998_v39 = vcombine.high %v916_v54, %v916_v54  ;;  %v1005_v32 = vrot.slane %v916_v54, %v17802_v37 }
 0x1d0   : > { %v3960_v35 = vcombine.high %v3942_v13, %v3956_v11  ;;  %v3959_v45 = vcombine.low %v3942_v13, %v3956_v11  ;;  %v23283_v11 = vld [vmem:[#allocation3_spill] sm:$0xff] }
 0x1d1   : > { %v16172_v24 = vcombine.high %v23279_v33, %v2401_v55  ;;  %v4048_v50 = vrot.slane %v2449_v47, %v17802_v37  ;;  %v2556_v33 = vcombine.low %v18804_v26, %v18813_v10  ;;  %v2607_v26 = vcombine.low %v18816_v4, %v18819_v12  ;;  %v23284_v55 = vld [vmem:[#allocation5_spill] sm:$0xff] }
 0x1d2   : > { %v4168_v4 = vrot.slane %v16180_v20, %v17802_v37  ;;  %v1012_v22 = vrot.slane %v998_v39, %v17802_v37  ;;  %v1013_v13 = vcombine.high %v1005_v32, %v1005_v32  ;;  %v917_v12 = vrot.slane %v23283_v11, 2 }
 0x1d3   : > { %v3995_v36 = vrot.slane %v16172_v24, %v17802_v37  ;;  %v4066_v3 = vcombine.high %v4048_v50, %v4062_v38  ;;  %v16176_v61 = vcombine.high %v18798_v58, %v2556_v33  ;;  %v918_v63 = vrot.slane %v23284_v55, 2 }
 0x1d4   : > { %v2742_v24 = vcombine.low %v1005_v32, %v1013_v13  ;;  %v23286_v13 = vld [vmem:[#allocation7_spill] sm:$0xff] }
 0x1d5   : > { %v4013_v49 = vcombine.high %v3995_v36, %v4009_v15  ;;  %v4012_v53 = vcombine.low %v3995_v36, %v4009_v15  ;;  %v4115_v0 = vrot.slane %v16176_v61, %v17802_v37  ;;  %v919_v15 = vsel %vm913_vm3, %v917_v12, %v918_v63 }
 0x1d6   : > { %5286 = vmatmul.mubr.bf16.gmra.mrb[84].mxu0 %v3853_v8  ;;  %v4065_v8 = vcombine.low %v4048_v50, %v4062_v38  ;;  %v2750_v34 = vrot.slane %v2742_v24, %v17802_v37  ;;  %v1102_v47 = vcombine.high %v919_v15, %v919_v15  ;;  %v1161_v28 = vrot.slane %v918_v63, %v17802_v37 }
 0x1d7   : > { %5295 = vmatprep.mubr.bf16.mxu0 %v3907_v42  ;;  %v4119_v58 = vcombine.high %v4101_v57, %v4115_v0  ;;  %v16178_v42 = vcombine.high %v18813_v10, %v2607_v26  ;;  %v4118_v9 = vcombine.low %v4101_v57, %v4115_v0  ;;  %v1014_v10 = vcombine.high %v1012_v22, %v1012_v22 }
 0x1d8   : > { %v1116_v33 = vrot.slane %v1102_v47, %v17802_v37  ;;  %v1154_v0 = vcombine.high %v918_v63, %v918_v63 }
 0x1d9   : > { %v4154_v46 = vrot.slane %v16178_v42, %v17802_v37  ;;  %v2743_v36 = vcombine.low %v1012_v22, %v1014_v10  ;;  %v23285_v22 = vld [vmem:[#allocation6_spill] sm:$0xff]  ;;  %v924_v10 = vrot.slane %v23286_v13, 2 }
 0x1da   : > { %v1118_v40 = vcombine.high %v1116_v33, %v1116_v33 }
 0x1db   : > { %v4172_v52 = vcombine.high %v4154_v46, %v4168_v4  ;;  %v4171_v59 = vcombine.low %v4154_v46, %v4168_v4 }
 0x1de   : > { %5296 = vmatmul.mubr.bf16.gmra.mrb[88].mxu0 %v3906_v51  ;;  %v1050_v51 = vcombine.high %v915_v21, %v915_v21 }
 0x1df   : > { %5305 = vmatprep.mubr.bf16.mxu0 %v3960_v35  ;;  %v1057_v35 = vrot.slane %v915_v21, %v17802_v37  ;;  %v2849_v21 = vcombine.low %v1118_v40, %v1161_v28 }
 0x1e0   : > { %v1064_v7 = vrot.slane %v1050_v51, %v17802_v37 }
 0x1e1   : > { %v1065_v2 = vcombine.high %v1057_v35, %v1057_v35  ;;  %v2863_v54 = vrot.slane %v2849_v21, %v17802_v37 }
 0x1e3   : > { %v2795_v31 = vcombine.low %v1057_v35, %v1065_v2 }
 0x1e5   : > { %v2803_v43 = vrot.slane %v2795_v31, %v17802_v37  ;;  %v926_v31 = vrot.slane %v23217_v25, 2 }
 0x1e6   : > { %5306 = vmatmul.mubr.bf16.gmra.mrb[92].mxu0 %v3959_v45  ;;  %v1109_v45 = vrot.slane %v919_v15, %v17802_v37 }
 0x1e7   : > { %5315 = vmatprep.mubr.bf16.mxu0 %v4013_v49  ;;  %v2757_v49 = vrot.slane %v2743_v36, %v17802_v37 }
 0x1e8   : > { %v2796_v50 = vcombine.low %v1064_v7, %v1109_v45  ;;  %v1117_v61 = vcombine.high %v1109_v45, %v1109_v45 }
 0x1e9   : > { %v2758_v38 = vcombine.low %v2750_v34, %v2757_v49 }
 0x1ea   : > { %v2848_v23 = vcombine.low %v1117_v61, %v1116_v33  ;;  %v1369_v33 = vrot.slane %v924_v10, %v17802_v37 }
 0x1ec   : > { %v2856_v20 = vrot.slane %v2848_v23, %v17802_v37 }
 0x1ee   : > { %5316 = vmatmul.mubr.bf16.gmra.mrb[96].mxu0 %v4012_v53  ;;  %v921_v53 = vrot.slane %v17905_v18, 2  ;;  %v1168_v18 = vrot.slane %v1154_v0, %v17802_v37 }
 0x1ef   : > { %5325 = vmatprep.mubr.bf16.mxu0 %v4066_v3  ;;  %v2810_v3 = vrot.slane %v2796_v50, %v17802_v37  ;;  %v927_v50 = vrot.slane %v23215_v56, 2 }
 0x1f0   : > { %v922_v57 = vsel %vm913_vm3, %v920_v44, %v921_v53  ;;  %v1265_v32 = vrot.slane %v921_v53, %v17802_v37  ;;  %v1258_v36 = vcombine.high %v921_v53, %v921_v53 }
 0x1f1   : > { %v1213_v26 = vrot.slane %v922_v57, %v17802_v37  ;;  %v2811_v19 = vcombine.low %v2803_v43, %v2810_v3  ;;  %v1206_v42 = vcombine.high %v922_v57, %v922_v57  ;;  %v928_v3 = vsel %vm913_vm3, %v926_v31, %v927_v50 }
 0x1f2   : > { %v1273_v63 = vcombine.high %v1265_v32, %v1265_v32  ;;  %v1272_v34 = vrot.slane %v1258_v36, %v17802_v37  ;;  %v1414_v25 = vcombine.high %v928_v3, %v928_v3  ;;  %v1421_v23 = vrot.slane %v928_v3, %v17802_v37 }
 0x1f3   : > { %v1220_v4 = vrot.slane %v1206_v42, %v17802_v37 }
 0x1f4   : > { %v2955_v24 = vcombine.low %v1265_v32, %v1273_v63  ;;  %v1428_v21 = vrot.slane %v1414_v25, %v17802_v37 }
 0x1f5   : > { %v1222_v55 = vcombine.high %v1220_v4, %v1220_v4 }
 0x1f6   : > { %5326 = vmatmul.mubr.bf16.gmra.mrb[100].mxu0 %v4065_v8  ;;  %v1169_v8 = vcombine.high %v1161_v28, %v1161_v28  ;;  %v2969_v45 = vrot.slane %v2955_v24, %v17802_v37  ;;  %v1377_v28 = vcombine.high %v1369_v33, %v1369_v33  ;;  %v1430_v42 = vcombine.high %v1428_v21, %v1428_v21 }
 0x1f7   : > { %5335 = vmatprep.mubr.bf16.mxu0 %v4119_v58  ;;  %v1221_v58 = vcombine.high %v1213_v26, %v1213_v26 }
 0x1f8   : > { %v2901_v39 = vcombine.low %v1169_v8, %v1168_v18 }
 0x1f9   : > { %v2902_v46 = vcombine.low %v1213_v26, %v1221_v58  ;;  %v1429_v58 = vcombine.high %v1421_v23, %v1421_v23 }
 0x1fa   : > { %v2909_v11 = vrot.slane %v2901_v39, %v17802_v37  ;;  %v23288_v39 = vld [vmem:[#allocation13_spill] sm:$0xff] }
 0x1fb   : > { %v2916_v12 = vrot.slane %v2902_v46, %v17802_v37  ;;  %v930_v46 = vrot.slane %v23288_v39, 2 }
 0x1fd   : > { %v2917_v35 = vcombine.low %v2909_v11, %v2916_v12 }
 0x1fe   : > { %5336 = vmatmul.mubr.bf16.gmra.mrb[104].mxu0 %v4118_v9  ;;  %v2864_v9 = vcombine.low %v2856_v20, %v2863_v54  ;;  %v23287_v20 = vld [vmem:[#allocation10_spill] sm:$0xff] }
 0x1ff   : > { %5345 = vmatprep.mubr.bf16.mxu0 %v4172_v52  ;;  %v923_v52 = vrot.slane %v23285_v22, 2  ;;  %v929_v54 = vrot.slane %v23287_v20, 2  ;;  %v3113_v22 = vcombine.low %v1421_v23, %v1429_v58  ;;  %v23290_v23 = vld [vmem:[#allocation23_spill] sm:$0xff] }
 0x201   : > { %v925_v51 = vsel %vm913_vm3, %v923_v52, %v924_v10  ;;  %v3114_v52 = vcombine.low %v1428_v21, %v1430_v42  ;;  %v931_v13 = vsel %vm913_vm3, %v929_v54, %v930_v46  ;;  %v936_v21 = vrot.slane %v23290_v23, 2 }
 0x202   : > { %v1310_v15 = vcombine.high %v925_v51, %v925_v51  ;;  %v1317_v7 = vrot.slane %v925_v51, %v17802_v37  ;;  %v1525_v12 = vrot.slane %v931_v13, %v17802_v37  ;;  %v1518_v51 = vcombine.high %v931_v13, %v931_v13 }
 0x203   : > { %v3128_v63 = vrot.slane %v3114_v52, %v17802_v37 }
 0x204   : > { %v1324_v49 = vrot.slane %v1310_v15, %v17802_v37  ;;  %v1325_v47 = vcombine.high %v1317_v7, %v1317_v7  ;;  %v3007_v53 = vcombine.low %v1272_v34, %v1317_v7  ;;  %v1532_v36 = vrot.slane %v1518_v51, %v17802_v37 }
 0x205   : > { %v932_v15 = vrot.slane %v23227_v30, 2  ;;  %v933_v7 = vrot.slane %v23225_v41, 2  ;;  %v1533_v34 = vcombine.high %v1525_v12, %v1525_v12  ;;  %v1785_v51 = vrot.slane %v936_v21, %v17802_v37 }
 0x206   : > { %5346 = vmatmul.mubr.bf16.gmra.mrb[108].mxu0 %v4171_v59  ;;  %v2954_v59 = vcombine.low %v1220_v4, %v1222_v55  ;;  %v3008_v43 = vcombine.low %v1325_v47, %v1324_v49  ;;  %v1326_v61 = vcombine.high %v1324_v49, %v1324_v49  ;;  %v3015_v57 = vrot.slane %v3007_v53, %v17802_v37 }
 0x207   : > { %5388 = vmatprep.mubr.bf16.mxu0 %v17662_v6  ;;  %v1466_v4 = vcombine.high %v927_v50, %v927_v50  ;;  %v3121_v55 = vrot.slane %v3113_v22, %v17802_v37  ;;  %v1534_v49 = vcombine.high %v1532_v36, %v1532_v36  ;;  %v1577_v47 = vrot.slane %v930_v46, %v17802_v37 }
 0x208   : > { %v2962_v2 = vrot.slane %v2954_v59, %v17802_v37  ;;  %v3022_v0 = vrot.slane %v3008_v43, %v17802_v37  ;;  %v3060_v56 = vcombine.low %v1326_v61, %v1369_v33  ;;  %v934_v31 = vsel %vm913_vm3, %v932_v15, %v933_v7 }
 0x209   : > { %v3129_v24 = vcombine.low %v3121_v55, %v3128_v63  ;;  %v3219_v30 = vcombine.low %v1533_v34, %v1532_v36  ;;  %v1585_v53 = vcombine.high %v1577_v47, %v1577_v47  ;;  %v1622_v3 = vcombine.high %v934_v31, %v934_v31 }
 0x20a   : > { %v2970_v44 = vcombine.low %v2962_v2, %v2969_v45  ;;  %v3068_v18 = vrot.slane %v3060_v56, %v17802_v37  ;;  %v1681_v56 = vrot.slane %v933_v7, %v17802_v37  ;;  %v939_v55 = vrot.slane %v23243_v62, 2 }
 0x20b   : > { %v3227_v61 = vrot.slane %v3219_v30, %v17802_v37  ;;  %v1778_v63 = vcombine.high %v936_v21, %v936_v21 }
 0x20c   : > { %v1689_v42 = vcombine.high %v1681_v56, %v1681_v56 }
 0x20e   : > { %5389 = vmatmul.mubr.bf16.vlgmr.msra.gmra.mrb[0].mxu0 %v2758_v38  ;;  %v1362_v38 = vcombine.high %v924_v10, %v924_v10  ;;  %v1480_v10 = vrot.slane %v1466_v4, %v17802_v37  ;;  %v1674_v4 = vcombine.high %v933_v7, %v933_v7  ;;  %v1792_v7 = vrot.slane %v1778_v63, %v17802_v37 }
 0x20f   : > { %5398 = vmatprep.mubr.bf16.mxu0 %v17662_v6 }
 0x210   : > { %v1376_v40 = vrot.slane %v1362_v38, %v17802_v37  ;;  %v3167_v59 = vcombine.low %v1480_v10, %v1525_v12  ;;  %v1629_v38 = vrot.slane %v934_v31, %v17802_v37  ;;  %v1688_v13 = vrot.slane %v1674_v4, %v17802_v37 }
 0x211   : > { %v938_v12 = vrot.slane %v23245_v27, 2 }
 0x212   : > { %v3061_v26 = vcombine.low %v1377_v28, %v1376_v40  ;;  %v3181_v45 = vrot.slane %v3167_v59, %v17802_v37  ;;  %v1637_v43 = vcombine.high %v1629_v38, %v1629_v38 }
 0x213   : > { %v940_v36 = vsel %vm913_vm3, %v938_v12, %v939_v55 }
 0x214   : > { %v3075_v8 = vrot.slane %v3061_v26, %v17802_v37  ;;  %v23289_v26 = vld [vmem:[#allocation22_spill] sm:$0xff]  ;;  %v1830_v27 = vcombine.high %v940_v36, %v940_v36  ;;  %v1837_v31 = vrot.slane %v940_v36, %v17802_v37 }
 0x216   : > { %5399 = vmatmul.mubr.bf16.gmra.mrb[4].mxu0 %v2811_v19  ;;  %v3023_v19 = vcombine.low %v3015_v57, %v3022_v0  ;;  %v3076_v32 = vcombine.low %v3068_v18, %v3075_v8  ;;  %v3273_v57 = vcombine.low %v1629_v38, %v1637_v43  ;;  %v1636_v0 = vrot.slane %v1622_v3, %v17802_v37  ;;  %v23292_v43 = vld [vmem:[#allocation34_spill] sm:$0xff] }
 0x217   : > { %5408 = vmatprep.mubr.bf16.mxu0 %v17662_v6  ;;  %v1845_v30 = vcombine.high %v1837_v31, %v1837_v31  ;;  %v942_v3 = vrot.slane %v23292_v43, 2 }
 0x218   : > { %v3287_v8 = vrot.slane %v3273_v57, %v17802_v37  ;;  %v1638_v58 = vcombine.high %v1636_v0, %v1636_v0 }
 0x219   : > { %v3484_v57 = vcombine.low %v1837_v31, %v1845_v30 }
 0x21a   : > { %v3325_v39 = vcombine.low %v1636_v0, %v1638_v58 }
 0x21b   : > { %v3492_v23 = vrot.slane %v3484_v57, %v17802_v37 }
 0x21c   : > { %v3333_v22 = vrot.slane %v3325_v39, %v17802_v37  ;;  %v945_v39 = vrot.slane %v18471_v1, 2 }
 0x21e   : > { %5409 = vmatmul.mubr.bf16.gmra.mrb[8].mxu0 %v2864_v9  ;;  %v1473_v9 = vrot.slane %v927_v50, %v17802_v37  ;;  %v1570_v50 = vcombine.high %v930_v46, %v930_v46  ;;  %v3326_v46 = vcombine.low %v1681_v56, %v1689_v42 }
 0x21f   : > { %5418 = vmatprep.mubr.bf16.mxu0 %v17662_v6 }
 0x220   : > { %v1481_v11 = vcombine.high %v1473_v9, %v1473_v9  ;;  %v1584_v41 = vrot.slane %v1570_v50, %v17802_v37  ;;  %v3340_v52 = vrot.slane %v3326_v46, %v17802_v37  ;;  %v1844_v50 = vrot.slane %v1830_v27, %v17802_v37  ;;  %v23294_v27 = vld [vmem:[#allocation42_spill] sm:$0xff] }
 0x222   : > { %v3272_v28 = vcombine.low %v1585_v53, %v1584_v41  ;;  %v23291_v41 = vld [vmem:[#allocation33_spill] sm:$0xff] }
 0x223   : > { %v941_v53 = vrot.slane %v23291_v41, 2  ;;  %v2090_v41 = vcombine.high %v945_v39, %v945_v39 }
 0x224   : > { %v3280_v18 = vrot.slane %v3272_v28, %v17802_v37 }
 0x226   : > { %5419 = vmatmul.mubr.bf16.gmra.mrb[12].mxu0 %v2917_v35  ;;  %v3166_v35 = vcombine.low %v1473_v9, %v1481_v11  ;;  %v3288_v54 = vcombine.low %v3280_v18, %v3287_v8 }
 0x227   : > { %5428 = vmatprep.mubr.bf16.mxu0 %v17662_v6 }
 0x228   : > { %v3174_v2 = vrot.slane %v3166_v35, %v17802_v37  ;;  %v3341_v35 = vcombine.low %v3333_v22, %v3340_v52  ;;  %v1993_v22 = vrot.slane %v942_v3, %v17802_v37 }
 0x22a   : > { %v3182_v33 = vcombine.low %v3174_v2, %v3181_v45  ;;  %v1793_v2 = vcombine.high %v1785_v51, %v1785_v51 }
 0x22e   : > { %5429 = vmatmul.mubr.bf16.gmra.mrb[16].mxu0 %v2970_v44  ;;  %v3220_v44 = vcombine.low %v1534_v49, %v1577_v47  ;;  %v3432_v49 = vcombine.low %v1793_v2, %v1792_v7  ;;  %v2097_v2 = vrot.slane %v945_v39, %v17802_v37 }
 0x22f   : > { %5438 = vmatprep.mubr.bf16.mxu0 %v17662_v6 }
 0x230   : > { %v3234_v40 = vrot.slane %v3220_v44, %v17802_v37  ;;  %v1846_v44 = vcombine.high %v1844_v50, %v1844_v50 }
 0x232   : > { %v3235_v25 = vcombine.low %v3227_v61, %v3234_v40  ;;  %v1882_v61 = vcombine.high %v939_v55, %v939_v55  ;;  %v1889_v40 = vrot.slane %v939_v55, %v17802_v37  ;;  %v3485_v0 = vcombine.low %v1844_v50, %v1846_v44 }
 0x233   : > { %v2001_v55 = vcombine.high %v1993_v22, %v1993_v22  ;;  %v2105_v50 = vcombine.high %v2097_v2, %v2097_v2 }
 0x234   : > { %v1896_v56 = vrot.slane %v1882_v61, %v17802_v37 }
 0x235   : > { %v3697_v44 = vcombine.low %v2097_v2, %v2105_v50 }
 0x236   : > { %5439 = vmatmul.mubr.bf16.gmra.mrb[20].mxu0 %v3023_v19  ;;  %v935_v19 = vrot.slane %v23289_v26, 2  ;;  %v1897_v26 = vcombine.high %v1889_v40, %v1889_v40 }
 0x237   : > { %5448 = vmatprep.mubr.bf16.mxu0 %v17662_v6  ;;  %v3711_v61 = vrot.slane %v3697_v44, %v17802_v37 }
 0x238   : > { %v937_v20 = vsel %vm913_vm3, %v935_v19, %v936_v21  ;;  %v3499_v21 = vrot.slane %v3485_v0, %v17802_v37  ;;  %v3537_v8 = vcombine.low %v1889_v40, %v1897_v26  ;;  %v2104_v40 = vrot.slane %v2090_v41, %v17802_v37 }
 0x239   : > { %v1726_v9 = vcombine.high %v937_v20, %v937_v20  ;;  %v950_v0 = vrot.slane %v23266_v29, 2 }
 0x23a   : > { %v3500_v42 = vcombine.low %v3492_v23, %v3499_v21  ;;  %v3545_v46 = vrot.slane %v3537_v8, %v17802_v37 }
 0x23b   : > { %v1740_v10 = vrot.slane %v1726_v9, %v17802_v37 }
 0x23d   : > { %v1742_v15 = vcombine.high %v1740_v10, %v1740_v10 }
 0x23e   : > { %5449 = vmatmul.mubr.bf16.gmra.mrb[24].mxu0 %v3076_v32  ;;  %v1733_v32 = vrot.slane %v937_v20, %v17802_v37 }
 0x23f   : > { %5458 = vmatprep.mubr.bf16.mxu0 %v17662_v6  ;;  %v3431_v62 = vcombine.low %v1742_v15, %v1785_v51 }
 0x240   : > { %v1741_v11 = vcombine.high %v1733_v32, %v1733_v32  ;;  %v3378_v59 = vcombine.low %v1688_v13, %v1733_v32  ;;  %v1986_v13 = vcombine.high %v942_v3, %v942_v3 }
 0x241   : > { %v3439_v38 = vrot.slane %v3431_v62, %v17802_v37  ;;  %v948_v62 = vrot.slane %v23294_v27, 2 }
 0x242   : > { %v3386_v45 = vrot.slane %v3378_v59, %v17802_v37  ;;  %v2000_v1 = vrot.slane %v1986_v13, %v17802_v37 }
 0x243   : > { %v2201_v26 = vrot.slane %v948_v62, %v17802_v37 }
 0x246   : > { %5459 = vmatmul.mubr.bf16.gmra.mrb[28].mxu0 %v3129_v24  ;;  %v3379_v24 = vcombine.low %v1741_v11, %v1740_v10 }
 0x247   : > { %5468 = vmatprep.mubr.bf16.mxu0 %v17662_v6 }
 0x248   : > { %v3393_v34 = vrot.slane %v3379_v24, %v17802_v37  ;;  %v3643_v24 = vcombine.low %v2001_v55, %v2000_v1 }
 0x24a   : > { %v3394_v47 = vcombine.low %v3386_v45, %v3393_v34  ;;  %v23293_v45 = vld [vmem:[#allocation41_spill] sm:$0xff] }
 0x24b   : > { %v947_v34 = vrot.slane %v23293_v45, 2 }
 0x24e   : > { %5469 = vmatmul.mubr.bf16.gmra.mrb[32].mxu0 %v3182_v33  ;;  %v3446_v33 = vrot.slane %v3432_v49, %v17802_v37  ;;  %v3651_v49 = vrot.slane %v3643_v24, %v17802_v37 }
 0x24f   : > { %5478 = vmatprep.mubr.bf16.mxu0 %v17662_v6 }
 0x250   : > { %v3447_v28 = vcombine.low %v3439_v38, %v3446_v33  ;;  %v949_v38 = vsel %vm913_vm3, %v947_v34, %v948_v62 }
 0x251   : > { %v2149_v43 = vrot.slane %v949_v38, %v17802_v37 }
 0x253   : > { %v2157_v57 = vcombine.high %v2149_v43, %v2149_v43  ;;  %v3749_v23 = vcombine.low %v2104_v40, %v2149_v43 }
 0x256   : > { %5479 = vmatmul.mubr.bf16.gmra.mrb[36].mxu0 %v3235_v25  ;;  %v943_v25 = vsel %vm913_vm3, %v941_v53, %v942_v3  ;;  %v2142_v53 = vcombine.high %v949_v38, %v949_v38 }
 0x257   : > { %5488 = vmatprep.mubr.bf16.mxu0 %v17662_v6  ;;  %v1941_v19 = vrot.slane %v943_v25, %v17802_v37  ;;  %v1934_v18 = vcombine.high %v943_v25, %v943_v25  ;;  %v951_v25 = vrot.slane %v23264_v48, 2 }
 0x259   : > { %v3538_v58 = vcombine.low %v1896_v56, %v1941_v19  ;;  %v1948_v20 = vrot.slane %v1934_v18, %v17802_v37  ;;  %v1949_v9 = vcombine.high %v1941_v19, %v1941_v19  ;;  %v2194_v56 = vcombine.high %v948_v62, %v948_v62 }
 0x25a   : > { %v952_v18 = vsel %vm913_vm3, %v950_v0, %v951_v25  ;;  %v2298_v1 = vcombine.high %v951_v25, %v951_v25  ;;  %v2305_v55 = vrot.slane %v951_v25, %v17802_v37 }
 0x25b   : > { %v3552_v4 = vrot.slane %v3538_v58, %v17802_v37  ;;  %v1950_v32 = vcombine.high %v1948_v20, %v1948_v20  ;;  %v2208_v58 = vrot.slane %v2194_v56, %v17802_v37  ;;  %v2246_v29 = vcombine.high %v952_v18, %v952_v18 }
 0x25c   : > { %v2312_v24 = vrot.slane %v2298_v1, %v17802_v37 }
 0x25d   : > { %v3553_v11 = vcombine.low %v3545_v46, %v3552_v4  ;;  %v3591_v12 = vcombine.low %v1950_v32, %v1993_v22  ;;  %v2253_v4 = vrot.slane %v952_v18, %v17802_v37  ;;  %v959_v18 = vrot.slane %v18733_v17, 2 }
 0x25e   : > { %5489 = vmatmul.mubr.bf16.gmra.mrb[40].mxu0 %v3288_v54  ;;  %v944_v54 = vrot.slane %v18456_v14, 2  ;;  %v3590_v14 = vcombine.low %v1949_v9, %v1948_v20  ;;  %v3757_v20 = vrot.slane %v3749_v23, %v17802_v37  ;;  %v2260_v9 = vrot.slane %v2246_v29, %v17802_v37 }
 0x25f   : > { %5498 = vmatprep.mubr.bf16.mxu0 %v17662_v6  ;;  %v3605_v59 = vrot.slane %v3591_v12, %v17802_v37 }
 0x260   : > { %v946_v52 = vsel %vm913_vm3, %v944_v54, %v945_v39  ;;  %v2262_v13 = vcombine.high %v2260_v9, %v2260_v9 }
 0x261   : > { %v2045_v10 = vrot.slane %v946_v52, %v17802_v37  ;;  %v2038_v51 = vcombine.high %v946_v52, %v946_v52  ;;  %v2261_v52 = vcombine.high %v2253_v4, %v2253_v4 }
 0x263   : > { %v2053_v63 = vcombine.high %v2045_v10, %v2045_v10  ;;  %v2052_v15 = vrot.slane %v2038_v51, %v17802_v37  ;;  %v3855_v51 = vcombine.low %v2253_v4, %v2261_v52 }
 0x265   : > { %v3644_v36 = vcombine.low %v2045_v10, %v2053_v63  ;;  %v2054_v31 = vcombine.high %v2052_v15, %v2052_v15  ;;  %v23295_v10 = vld [vmem:[#allocation51_spill] sm:$0xff] }
 0x266   : > { %5499 = vmatmul.mubr.bf16.gmra.mrb[44].mxu0 %v3341_v35  ;;  %v3598_v35 = vrot.slane %v3590_v14, %v17802_v37  ;;  %v23296_v14 = vld [vmem:[#allocation54_spill] sm:$0xff] }
 0x267   : > { %5508 = vmatprep.mubr.bf16.mxu0 %v17662_v6  ;;  %v3696_v30 = vcombine.low %v2052_v15, %v2054_v31  ;;  %v954_v12 = vrot.slane %v23296_v14, 2  ;;  %v957_v31 = vrot.slane %v18706_v60, 2 }
 0x268   : > { %v3606_v7 = vcombine.low %v3598_v35, %v3605_v59  ;;  %v3856_v35 = vcombine.low %v2260_v9, %v2262_v13 }
 0x269   : > { %v3704_v3 = vrot.slane %v3696_v30, %v17802_v37  ;;  %v2409_v44 = vrot.slane %v954_v12, %v17802_v37 }
 0x26a   : > { %v3870_v2 = vrot.slane %v3856_v35, %v17802_v37 }
 0x26b   : > { %v3712_v19 = vcombine.low %v3704_v3, %v3711_v61  ;;  %v2417_v40 = vcombine.high %v2409_v44, %v2409_v44 }
 0x26e   : > { %5509 = vmatmul.mubr.bf16.gmra.mrb[48].mxu0 %v3394_v47  ;;  %v3658_v47 = vrot.slane %v3644_v36, %v17802_v37  ;;  %v2313_v36 = vcombine.high %v2305_v55, %v2305_v55 }
 0x26f   : > { %5518 = vmatprep.mubr.bf16.mxu0 %v17662_v6 }
 0x270   : > { %v3659_v33 = vcombine.low %v3651_v49, %v3658_v47  ;;  %v3908_v34 = vcombine.low %v2305_v55, %v2313_v36  ;;  %v956_v47 = vrot.slane %v18693_v5, 2 }
 0x272   : > { %v3916_v50 = vrot.slane %v3908_v34, %v17802_v37  ;;  %v958_v41 = vsel %vm913_vm3, %v956_v47, %v957_v31 }
 0x273   : > { %v2461_v43 = vrot.slane %v958_v41, %v17802_v37  ;;  %v2454_v25 = vcombine.high %v958_v41, %v958_v41 }
 0x275   : > { %v2468_v23 = vrot.slane %v2454_v25, %v17802_v37 }
 0x276   : > { %5519 = vmatmul.mubr.bf16.gmra.mrb[52].mxu0 %v3447_v28  ;;  %v2156_v28 = vrot.slane %v2142_v53, %v17802_v37  ;;  %v2402_v53 = vcombine.high %v954_v12, %v954_v12 }
 0x277   : > { %5528 = vmatprep.mubr.bf16.mxu0 %v17662_v6 }
 0x278   : > { %v3750_v21 = vcombine.low %v2157_v57, %v2156_v28  ;;  %v2158_v8 = vcombine.high %v2156_v28, %v2156_v28  ;;  %v2416_v60 = vrot.slane %v2402_v53, %v17802_v37  ;;  %v2469_v28 = vcombine.high %v2461_v43, %v2461_v43 }
 0x27a   : > { %v3764_v54 = vrot.slane %v3750_v21, %v17802_v37  ;;  %v3802_v48 = vcombine.low %v2158_v8, %v2201_v26  ;;  %v4014_v56 = vcombine.low %v2417_v40, %v2416_v60  ;;  %v2513_v21 = vrot.slane %v957_v31, %v17802_v37 }
 0x27b   : > { %v960_v8 = vrot.slane %v18736_v16, 2 }
 0x27c   : > { %v3765_v46 = vcombine.low %v3757_v20, %v3764_v54  ;;  %v3810_v32 = vrot.slane %v3802_v48, %v17802_v37  ;;  %v2470_v20 = vcombine.high %v2468_v23, %v2468_v23  ;;  %v2521_v54 = vcombine.high %v2513_v21, %v2513_v21 }
 0x27d   : > { %v961_v29 = vsel %vm913_vm3, %v959_v18, %v960_v8  ;;  %v2617_v1 = vrot.slane %v960_v8, %v17802_v37 }
 0x27e   : > { %5529 = vmatmul.mubr.bf16.gmra.mrb[56].mxu0 %v3500_v42  ;;  %v2209_v42 = vcombine.high %v2201_v26, %v2201_v26  ;;  %v4015_v26 = vcombine.low %v2461_v43, %v2469_v28  ;;  %v4068_v4 = vcombine.low %v2513_v21, %v2521_v54  ;;  %v2558_v9 = vcombine.high %v961_v29, %v961_v29 }
 0x27f   : > { %5538 = vmatprep.mubr.bf16.mxu0 %v17662_v6  ;;  %v2565_v17 = vrot.slane %v961_v29, %v17802_v37 }
 0x280   : > { %v3803_v39 = vcombine.low %v2209_v42, %v2208_v58  ;;  %v4022_v58 = vrot.slane %v4014_v56, %v17802_v37  ;;  %v4029_v42 = vrot.slane %v4015_v26, %v17802_v37  ;;  %v2572_v52 = vrot.slane %v2558_v9, %v17802_v37 }
 0x281   : > { %v2573_v13 = vcombine.high %v2565_v17, %v2565_v17 }
 0x282   : > { %v3817_v22 = vrot.slane %v3803_v39, %v17802_v37  ;;  %v4030_v48 = vcombine.low %v4022_v58, %v4029_v42  ;;  %v2506_v39 = vcombine.high %v957_v31, %v957_v31 }
 0x283   : > { %v4121_v14 = vcombine.low %v2573_v13, %v2572_v52 }
 0x284   : > { %v3818_v63 = vcombine.low %v3810_v32, %v3817_v22  ;;  %v2520_v16 = vrot.slane %v2506_v39, %v17802_v37  ;;  %v4082_v22 = vrot.slane %v4068_v4, %v17802_v37 }
 0x286   : > { %5539 = vmatmul.mubr.bf16.gmra.mrb[60].mxu0 %v3553_v11  ;;  %v953_v11 = vrot.slane %v23295_v10, 2  ;;  %v4120_v10 = vcombine.low %v2520_v16, %v2565_v17 }
 0x287   : > { %5548 = vmatprep.mubr.bf16.mxu0 %v17662_v6 }
 0x288   : > { %v955_v59 = vsel %vm913_vm3, %v953_v11, %v954_v12  ;;  %v2610_v12 = vcombine.high %v960_v8, %v960_v8  ;;  %v4128_v55 = vrot.slane %v4120_v10, %v17802_v37 }
 0x289   : > { %v2357_v15 = vrot.slane %v955_v59, %v17802_v37  ;;  %v2350_v45 = vcombine.high %v955_v59, %v955_v59  ;;  %v2625_v59 = vcombine.high %v2617_v1, %v2617_v1 }
 0x28a   : > { %v2624_v35 = vrot.slane %v2610_v12, %v17802_v37 }
 0x28b   : > { %v3909_v27 = vcombine.low %v2312_v24, %v2357_v15  ;;  %v2364_v49 = vrot.slane %v2350_v45, %v17802_v37  ;;  %v17359_v45 = vld [vmem:[%s22880_s2 + $0x4] ss:$16 sps:$4 sm:$0xff]  }
 0x28c   : > { %6122 = vmatprep.mubr.bf16.mxu1 %v17359_v45 }
 0x28d   : > { %v3923_v38 = vrot.slane %v3909_v27, %v17802_v37  ;;  %v2366_v30 = vcombine.high %v2364_v49, %v2364_v49 }
 0x28e   : > { %5549 = vmatmul.mubr.bf16.gmra.mrb[64].mxu0 %v3606_v7  ;;  %v3863_v7 = vrot.slane %v3855_v51, %v17802_v37  ;;  %v2574_v51 = vcombine.high %v2572_v52, %v2572_v52 }
 0x28f   : > { %5558 = vmatprep.mubr.bf16.mxu0 %v17662_v6  ;;  %v3924_v3 = vcombine.low %v3916_v50, %v3923_v38  ;;  %v3962_v61 = vcombine.low %v2366_v30, %v2409_v44 }
 0x290   : > { %v3871_v62 = vcombine.low %v3863_v7, %v3870_v2  ;;  %v4173_v36 = vcombine.low %v2574_v51, %v2617_v1 }
 0x291   : > { %v3976_v0 = vrot.slane %v3962_v61, %v17802_v37 }
 0x292   : > { %v4181_v7 = vrot.slane %v4173_v36, %v17802_v37 }
 0x296   : > { %5559 = vmatmul.mubr.bf16.gmra.mrb[68].mxu0 %v3659_v33  ;;  %v2365_v33 = vcombine.high %v2357_v15, %v2357_v15  ;;  %v4174_v15 = vcombine.low %v2625_v59, %v2624_v35 }
 0x297   : > { %5568 = vmatprep.mubr.bf16.mxu0 %v17662_v6 }
 0x298   : > { %v3961_v5 = vcombine.low %v2365_v33, %v2364_v49  ;;  %v4188_v2 = vrot.slane %v4174_v15, %v17802_v37 }
 0x29a   : > { %v3969_v57 = vrot.slane %v3961_v5, %v17802_v37 }
 0x29e   : > { %5569 = vmatmul.mubr.bf16.gmra.mrb[72].mxu0 %v3712_v19  ;;  %v3977_v19 = vcombine.low %v3969_v57, %v3976_v0 }
 0x29f   : > { %5578 = vmatprep.mubr.bf16.mxu0 %v17662_v6 }
 0x2a6   : > { %5579 = vmatmul.mubr.bf16.gmra.mrb[76].mxu0 %v3765_v46  ;;  %v4067_v46 = vcombine.low %v2468_v23, %v2470_v20 }
 0x2a7   : > { %5588 = vmatprep.mubr.bf16.mxu0 %v17662_v6 }
 0x2a8   : > { %v4075_v32 = vrot.slane %v4067_v46, %v17802_v37 }
 0x2aa   : > { %v4083_v11 = vcombine.low %v4075_v32, %v4082_v22 }
 0x2ae   : > { %5589 = vmatmul.mubr.bf16.gmra.mrb[80].mxu0 %v3818_v63  ;;  %v4135_v63 = vrot.slane %v4121_v14, %v17802_v37 }
 0x2af   : > { %5598 = vmatprep.mubr.bf16.mxu0 %v17662_v6 }
 0x2b0   : > { %v4136_v24 = vcombine.low %v4128_v55, %v4135_v63 }
 0x2b6   : > { %5599 = vmatmul.mubr.bf16.gmra.mrb[84].mxu0 %v3871_v62  ;;  %v4189_v62 = vcombine.low %v4181_v7, %v4188_v2 }
 0x2b7   : > { %5608 = vmatprep.mubr.bf16.mxu0 %v17662_v6 }
 0x2be   : > { %5609 = vmatmul.mubr.bf16.gmra.mrb[88].mxu0 %v3924_v3 }
 0x2bf   : > { %5618 = vmatprep.mubr.bf16.mxu0 %v17662_v6 }
 0x2c6   : > { %5619 = vmatmul.mubr.bf16.gmra.mrb[92].mxu0 %v3977_v19 }
 0x2c7   : > { %5628 = vmatprep.mubr.bf16.mxu0 %v17662_v6 }
 0x2ce   : > { %5629 = vmatmul.mubr.bf16.gmra.mrb[96].mxu0 %v4030_v48 }
 0x2cf   : > { %5638 = vmatprep.mubr.bf16.mxu0 %v17662_v6 }
 0x2d6   : > { %5639 = vmatmul.mubr.bf16.gmra.mrb[100].mxu0 %v4083_v11 }
 0x2d7   : > { %5648 = vmatprep.mubr.bf16.mxu0 %v17662_v6 }
 0x2de   : > { %5649 = vmatmul.mubr.bf16.gmra.mrb[104].mxu0 %v4136_v24 }
 0x2df   : > { %5658 = vmatprep.mubr.bf16.mxu0 %v17662_v6 }
 0x2e1   : > { %v5390_v34 = vpop.f32.mrb[0].mxu0 }
 0x2e2   : > { %v5392_v27 = vpop.f32.mrb[1].mxu0 }
 0x2e3   : > { %v5394_v49 = vpop.f32.mrb[2].mxu0 }
 0x2e4   : > { %v5725_v47 = vpack.c.bf16 %v5394_v49, %v5390_v34  ;;  %v5396_v31 = vpop.f32.mrb[3].mxu0 }
 0x2e5   : > { %v5726_v50 = vpack.c.bf16 %v5396_v31, %v5392_v27 }
 0x2e6   : > { %5659 = vmatmul.mubr.bf16.gmra.mrb[108].mxu0 %v4189_v62 }
 0x2e7   : > { %6090 = vmatprep.subr.bf16.mxu1 %v5726_v50 }
 0x2e8   : > { %6091 = vmatpush1.bf16.msra.mxu1 %v5725_v47 }
 0x2e9   : > { %v5400_v38 = vpop.f32.mrb[4].mxu0 }
 0x2ea   : > { %v5402_v33 = vpop.f32.mrb[5].mxu0 }
 0x2eb   : > { %v5404_v30 = vpop.f32.mrb[6].mxu0 }
 0x2ec   : > { %v5727_v44 = vpack.c.bf16 %v5404_v30, %v5400_v38  ;;  %v5406_v6 = vpop.f32.mrb[7].mxu0 }
 0x2ed   : > { %v5728_v41 = vpack.c.bf16 %v5406_v6, %v5402_v33 }
 0x2ef   : > { %6092 = vmatprep.subr.bf16.mxu1 %v5728_v41 }
 0x2f0   : > { %6093 = vmatpush1.bf16.msra.mxu1 %v5727_v44 }
 0x2f1   : > { %v5410_v53 = vpop.f32.mrb[8].mxu0 }
 0x2f2   : > { %v5412_v43 = vpop.f32.mrb[9].mxu0 }
 0x2f3   : > { %v5414_v3 = vpop.f32.mrb[10].mxu0 }
 0x2f4   : > { %v5729_v5 = vpack.c.bf16 %v5414_v3, %v5410_v53  ;;  %v5416_v61 = vpop.f32.mrb[11].mxu0 }
 0x2f5   : > { %v5730_v60 = vpack.c.bf16 %v5416_v61, %v5412_v43 }
 0x2f7   : > { %6094 = vmatprep.subr.bf16.mxu1 %v5730_v60 }
 0x2f8   : > { %6095 = vmatpush1.bf16.msra.mxu1 %v5729_v5 }
 0x2f9   : > { %v5420_v40 = vpop.f32.mrb[12].mxu0 }
 0x2fa   : > { %v5422_v28 = vpop.f32.mrb[13].mxu0 }
 0x2fb   : > { %v5424_v57 = vpop.f32.mrb[14].mxu0 }
 0x2fc   : > { %v5731_v0 = vpack.c.bf16 %v5424_v57, %v5420_v40  ;;  %v5426_v25 = vpop.f32.mrb[15].mxu0 }
 0x2fd   : > { %v5732_v56 = vpack.c.bf16 %v5426_v25, %v5422_v28 }
 0x2ff   : > { %6096 = vmatprep.subr.bf16.mxu1 %v5732_v56 }
 0x300   : > { %6097 = vmatpush1.bf16.msra.mxu1 %v5731_v0 }
 0x301   : > { %v5430_v26 = vpop.f32.mrb[16].mxu0 }
 0x302   : > { %v5432_v19 = vpop.f32.mrb[17].mxu0 }
 0x303   : > { %v5434_v23 = vpop.f32.mrb[18].mxu0 }
 0x304   : > { %v5733_v21 = vpack.c.bf16 %v5434_v23, %v5430_v26  ;;  %v5436_v18 = vpop.f32.mrb[19].mxu0 }
 0x305   : > { %v5734_v8 = vpack.c.bf16 %v5436_v18, %v5432_v19 }
 0x307   : > { %6098 = vmatprep.subr.bf16.mxu1 %v5734_v8 }
 0x308   : > { %6099 = vmatpush1.bf16.msra.mxu1 %v5733_v21 }
 0x309   : > { %v5440_v58 = vpop.f32.mrb[20].mxu0 }
 0x30a   : > { %v5442_v42 = vpop.f32.mrb[21].mxu0 }
 0x30b   : > { %v5444_v20 = vpop.f32.mrb[22].mxu0 }
 0x30c   : > { %v5735_v54 = vpack.c.bf16 %v5444_v20, %v5440_v58  ;;  %v5446_v29 = vpop.f32.mrb[23].mxu0 }
 0x30d   : > { %v5736_v48 = vpack.c.bf16 %v5446_v29, %v5442_v42  ;;  %v17360_v29 = vld [vmem:[%s22880_s2 + $0x24] ss:$16 sps:$4 sm:$0xff]  }
 0x30f   : > { %6100 = vmatprep.subr.bf16.mxu1 %v5736_v48 }
 0x310   : > { %6101 = vmatpush1.bf16.msra.mxu1 %v5735_v54  ;;  %v17357_v54 = vld [vmem:[%s22880_s2] ss:$16 sps:$4 sm:$0xff]  }
 0x311   : > { %v5450_v39 = vpop.f32.mrb[24].mxu0 }
 0x312   : > { %v5452_v46 = vpop.f32.mrb[25].mxu0 }
 0x313   : > { %v5454_v4 = vpop.f32.mrb[26].mxu0 }
 0x314   : > { %v5737_v9 = vpack.c.bf16 %v5454_v4, %v5450_v39  ;;  %v5456_v17 = vpop.f32.mrb[27].mxu0 }
 0x315   : > { %v5738_v16 = vpack.c.bf16 %v5456_v17, %v5452_v46 }
 0x317   : > { %6102 = vmatprep.subr.bf16.mxu1 %v5738_v16  ;;  %v17362_v16 = vld [vmem:[%s22880_s2 + $0x20] ss:$16 sps:$4 sm:$0xff]  }
 0x318   : > { %6103 = vmatpush1.bf16.msra.mxu1 %v5737_v9 }
 0x319   : > { %v5460_v32 = vpop.f32.mrb[28].mxu0 }
 0x31a   : > { %v5462_v22 = vpop.f32.mrb[29].mxu0 }
 0x31b   : > { %v5464_v52 = vpop.f32.mrb[30].mxu0 }
 0x31c   : > { %v5739_v13 = vpack.c.bf16 %v5464_v52, %v5460_v32  ;;  %v5466_v10 = vpop.f32.mrb[31].mxu0  ;;  %v17363_v32 = vld [vmem:[%s22880_s2 + $0x44] ss:$16 sps:$4 sm:$0xff]  }
 0x31d   : > { %v5740_v11 = vpack.c.bf16 %v5466_v10, %v5462_v22 }
 0x31f   : > { %6104 = vmatprep.subr.bf16.mxu1 %v5740_v11 }
 0x320   : > { %6105 = vmatpush1.bf16.msra.mxu1 %v5739_v13 }
 0x321   : > { %v5470_v14 = vpop.f32.mrb[32].mxu0 }
 0x322   : > { %v5472_v12 = vpop.f32.mrb[33].mxu0 }
 0x323   : > { %v5474_v1 = vpop.f32.mrb[34].mxu0 }
 0x324   : > { %v5741_v55 = vpack.c.bf16 %v5474_v1, %v5470_v14  ;;  %v5476_v63 = vpop.f32.mrb[35].mxu0  ;;  %v17366_v1 = vld [vmem:[%s22880_s2 + $0x64] ss:$16 sps:$4 sm:$0xff]  }
 0x325   : > { %v5742_v51 = vpack.c.bf16 %v5476_v63, %v5472_v12  ;;  %v17365_v12 = vld [vmem:[%s22880_s2 + $0x40] ss:$16 sps:$4 sm:$0xff]  }
 0x327   : > { %6106 = vmatprep.subr.bf16.mxu1 %v5742_v51 }
 0x328   : > { %6107 = vmatpush1.bf16.msra.mxu1 %v5741_v55 }
 0x329   : > { %v5480_v35 = vpop.f32.mrb[36].mxu0 }
 0x32a   : > { %v5482_v59 = vpop.f32.mrb[37].mxu0 }
 0x32b   : > { %v5484_v24 = vpop.f32.mrb[38].mxu0 }
 0x32c   : > { %v5743_v36 = vpack.c.bf16 %v5484_v24, %v5480_v35  ;;  %v5486_v15 = vpop.f32.mrb[39].mxu0 }
 0x32d   : > { %v5744_v7 = vpack.c.bf16 %v5486_v15, %v5482_v59  ;;  %v17369_v15 = vld [vmem:[%s22880_s2 + $0x84] ss:$16 sps:$4 sm:$0xff]  }
 0x32f   : > { %6108 = vmatprep.subr.bf16.mxu1 %v5744_v7 }
 0x330   : > { %6109 = vmatpush1.bf16.msra.mxu1 %v5743_v36  ;;  %v17368_v36 = vld [vmem:[%s22880_s2 + $0x60] ss:$16 sps:$4 sm:$0xff]  }
 0x331   : > { %v5490_v2 = vpop.f32.mrb[40].mxu0 }
 0x332   : > { %v5492_v45 = vpop.f32.mrb[41].mxu0 }
 0x333   : > { %v5494_v34 = vpop.f32.mrb[42].mxu0 }
 0x334   : > { %v5745_v27 = vpack.c.bf16 %v5494_v34, %v5490_v2  ;;  %v5496_v62 = vpop.f32.mrb[43].mxu0 }
 0x335   : > { %v5746_v49 = vpack.c.bf16 %v5496_v62, %v5492_v45 }
 0x337   : > { %6110 = vmatprep.subr.bf16.mxu1 %v5746_v49  ;;  %v17371_v49 = vld [vmem:[%s22880_s2 + $0x80] ss:$16 sps:$4 sm:$0xff]  }
 0x338   : > { %6111 = vmatpush1.bf16.msra.mxu1 %v5745_v27 }
 0x339   : > { %v5500_v47 = vpop.f32.mrb[44].mxu0 }
 0x33a   : > { %v5502_v31 = vpop.f32.mrb[45].mxu0 }
 0x33b   : > { %v5504_v50 = vpop.f32.mrb[46].mxu0 }
 0x33c   : > { %v5747_v38 = vpack.c.bf16 %v5504_v50, %v5500_v47  ;;  %v5506_v33 = vpop.f32.mrb[47].mxu0  ;;  %v17372_v47 = vld [vmem:[%s22880_s2 + $0xa4] ss:$16 sps:$4 sm:$0xff]  }
 0x33d   : > { %v5748_v30 = vpack.c.bf16 %v5506_v33, %v5502_v31 }
 0x33f   : > { %6112 = vmatprep.subr.bf16.mxu1 %v5748_v30 }
 0x340   : > { %6113 = vmatpush1.bf16.msra.mxu1 %v5747_v38 }
 0x341   : > { %v5510_v44 = vpop.f32.mrb[48].mxu0 }
 0x342   : > { %v5512_v6 = vpop.f32.mrb[49].mxu0 }
 0x343   : > { %v5514_v41 = vpop.f32.mrb[50].mxu0 }
 0x344   : > { %v5749_v53 = vpack.c.bf16 %v5514_v41, %v5510_v44  ;;  %v5516_v43 = vpop.f32.mrb[51].mxu0  ;;  %v17375_v41 = vld [vmem:[%s22880_s2 + $0xc4] ss:$16 sps:$4 sm:$0xff]  }
 0x345   : > { %v5750_v3 = vpack.c.bf16 %v5516_v43, %v5512_v6  ;;  %v17374_v6 = vld [vmem:[%s22880_s2 + $0xa0] ss:$16 sps:$4 sm:$0xff]  }
 0x347   : > { %6114 = vmatprep.subr.bf16.mxu1 %v5750_v3 }
 0x348   : > { %6115 = vmatpush1.bf16.msra.mxu1 %v5749_v53 }
 0x349   : > { %v5520_v5 = vpop.f32.mrb[52].mxu0 }
 0x34a   : > { %v5522_v61 = vpop.f32.mrb[53].mxu0 }
 0x34b   : > { %v5524_v60 = vpop.f32.mrb[54].mxu0 }
 0x34c   : > { %v5751_v40 = vpack.c.bf16 %v5524_v60, %v5520_v5  ;;  %v5526_v28 = vpop.f32.mrb[55].mxu0 }
 0x34d   : > { %v5752_v57 = vpack.c.bf16 %v5526_v28, %v5522_v61  ;;  %v17378_v28 = vld [vmem:[%s22880_s2 + $0xe4] ss:$16 sps:$4 sm:$0xff]  }
 0x34f   : > { %6116 = vmatprep.subr.bf16.mxu1 %v5752_v57 }
 0x350   : > { %6117 = vmatpush1.bf16.msra.mxu1 %v5751_v40  ;;  %v17377_v40 = vld [vmem:[%s22880_s2 + $0xc0] ss:$16 sps:$4 sm:$0xff]  }
 0x351   : > { %v5530_v0 = vpop.f32.mrb[56].mxu0 }
 0x352   : > { %v5532_v25 = vpop.f32.mrb[57].mxu0 }
 0x353   : > { %v5534_v56 = vpop.f32.mrb[58].mxu0 }
 0x354   : > { %v5753_v26 = vpack.c.bf16 %v5534_v56, %v5530_v0  ;;  %v5536_v19 = vpop.f32.mrb[59].mxu0 }
 0x355   : > { %v5754_v23 = vpack.c.bf16 %v5536_v19, %v5532_v25 }
 0x357   : > { %6118 = vmatprep.subr.bf16.mxu1 %v5754_v23  ;;  %v17380_v23 = vld [vmem:[%s22880_s2 + $0xe0] ss:$16 sps:$4 sm:$0xff]  }
 0x358   : > { %6119 = vmatpush1.bf16.msra.mxu1 %v5753_v26 }
 0x359   : > { %v5540_v21 = vpop.f32.mrb[60].mxu0 }
 0x35a   : > { %v5542_v18 = vpop.f32.mrb[61].mxu0 }
 0x35b   : > { %v5544_v8 = vpop.f32.mrb[62].mxu0 }
 0x35c   : > { %v5755_v58 = vpack.c.bf16 %v5544_v8, %v5540_v21  ;;  %v5546_v42 = vpop.f32.mrb[63].mxu0  ;;  %v17381_v21 = vld [vmem:[%s22880_s2 + $0x104] ss:$16 sps:$4 sm:$0xff]  }
 0x35d   : > { %v5756_v20 = vpack.c.bf16 %v5546_v42, %v5542_v18 }
 0x35f   : > { %6120 = vmatprep.subr.bf16.mxu1 %v5756_v20 }
 0x360   : > { %6121 = vmatpush1.bf16.msra.mxu1 %v5755_v58 }
 0x361   : > { %v5550_v48 = vpop.f32.mrb[64].mxu0 }
 0x362   : > { %v5552_v39 = vpop.f32.mrb[65].mxu0 }
 0x363   : > { %v5554_v46 = vpop.f32.mrb[66].mxu0  ;;  %6123 = vmatmul.mubr.bf16.vlgmr.msra.gmra.mrb[0].mxu1 %v17357_v54 }
 0x364   : > { %v5757_v4 = vpack.c.bf16 %v5554_v46, %v5550_v48  ;;  %v5556_v9 = vpop.f32.mrb[67].mxu0  ;;  %6132 = vmatprep.mubr.bf16.mxu1 %v17360_v29  ;;  %v17383_v29 = vld [vmem:[%s22880_s2 + $0x100] ss:$16 sps:$4 sm:$0xff]   ;;  %v17384_v48 = vld [vmem:[%s22880_s2 + $0x124] ss:$16 sps:$4 sm:$0xff]  }
 0x365   : > { %v5758_v17 = vpack.c.bf16 %v5556_v9, %v5552_v39 }
 0x367   : > { %6263 = vmatprep.subr.bf16.mxu1 %v5758_v17 }
 0x368   : > { %6264 = vmatpush1.bf16.msra.mxu1 %v5757_v4 }
 0x369   : > { %v5560_v22 = vpop.f32.mrb[68].mxu0 }
 0x36a   : > { %v5562_v52 = vpop.f32.mrb[69].mxu0 }
 0x36b   : > { %v5564_v13 = vpop.f32.mrb[70].mxu0  ;;  %6133 = vmatmul.mubr.bf16.gmra.mrb[4].mxu1 %v17362_v16 }
 0x36c   : > { %v5759_v10 = vpack.c.bf16 %v5564_v13, %v5560_v22  ;;  %v5566_v11 = vpop.f32.mrb[71].mxu0  ;;  %6142 = vmatprep.mubr.bf16.mxu1 %v17363_v32  ;;  %v17386_v32 = vld [vmem:[%s22880_s2 + $0x120] ss:$16 sps:$4 sm:$0xff]   ;;  %v17387_v22 = vld [vmem:[%s22880_s2 + $0x144] ss:$16 sps:$4 sm:$0xff]  }
 0x36d   : > { %v5760_v14 = vpack.c.bf16 %v5566_v11, %v5562_v52 }
 0x36f   : > { %6265 = vmatprep.subr.bf16.mxu1 %v5760_v14 }
 0x370   : > { %6266 = vmatpush1.bf16.msra.mxu1 %v5759_v10 }
 0x371   : > { %v5570_v55 = vpop.f32.mrb[72].mxu0 }
 0x372   : > { %v5572_v63 = vpop.f32.mrb[73].mxu0 }
 0x373   : > { %v5574_v51 = vpop.f32.mrb[74].mxu0  ;;  %6143 = vmatmul.mubr.bf16.gmra.mrb[8].mxu1 %v17365_v12 }
 0x374   : > { %v5761_v35 = vpack.c.bf16 %v5574_v51, %v5570_v55  ;;  %v5576_v59 = vpop.f32.mrb[75].mxu0  ;;  %6152 = vmatprep.mubr.bf16.mxu1 %v17366_v1  ;;  %v17389_v1 = vld [vmem:[%s22880_s2 + $0x140] ss:$16 sps:$4 sm:$0xff]   ;;  %v17390_v55 = vld [vmem:[%s22880_s2 + $0x164] ss:$16 sps:$4 sm:$0xff]  }
 0x375   : > { %v5762_v24 = vpack.c.bf16 %v5576_v59, %v5572_v63 }
 0x377   : > { %6267 = vmatprep.subr.bf16.mxu1 %v5762_v24 }
 0x378   : > { %6268 = vmatpush1.bf16.msra.mxu1 %v5761_v35 }
 0x379   : > { %v5580_v7 = vpop.f32.mrb[76].mxu0 }
 0x37a   : > { %v5582_v2 = vpop.f32.mrb[77].mxu0 }
 0x37b   : > { %v5584_v45 = vpop.f32.mrb[78].mxu0  ;;  %6153 = vmatmul.mubr.bf16.gmra.mrb[12].mxu1 %v17368_v36 }
 0x37c   : > { %v5763_v34 = vpack.c.bf16 %v5584_v45, %v5580_v7  ;;  %v5586_v27 = vpop.f32.mrb[79].mxu0  ;;  %6162 = vmatprep.mubr.bf16.mxu1 %v17369_v15  ;;  %v17392_v15 = vld [vmem:[%s22880_s2 + $0x160] ss:$16 sps:$4 sm:$0xff]   ;;  %v17393_v7 = vld [vmem:[%s22880_s2 + $0x184] ss:$16 sps:$4 sm:$0xff]  }
 0x37d   : > { %v5764_v62 = vpack.c.bf16 %v5586_v27, %v5582_v2 }
 0x37f   : > { %6269 = vmatprep.subr.bf16.mxu1 %v5764_v62 }
 0x380   : > { %6270 = vmatpush1.bf16.msra.mxu1 %v5763_v34 }
 0x381   : > { %v5590_v31 = vpop.f32.mrb[80].mxu0 }
 0x382   : > { %v5592_v50 = vpop.f32.mrb[81].mxu0 }
 0x383   : > { %v5594_v38 = vpop.f32.mrb[82].mxu0  ;;  %6163 = vmatmul.mubr.bf16.gmra.mrb[16].mxu1 %v17371_v49 }
 0x384   : > { %v5765_v33 = vpack.c.bf16 %v5594_v38, %v5590_v31  ;;  %v5596_v30 = vpop.f32.mrb[83].mxu0  ;;  %6172 = vmatprep.mubr.bf16.mxu1 %v17372_v47  ;;  %v17395_v47 = vld [vmem:[%s22880_s2 + $0x180] ss:$16 sps:$4 sm:$0xff]   ;;  %v17396_v31 = vld [vmem:[%s22880_s2 + $0x1a4] ss:$16 sps:$4 sm:$0xff]  }
 0x385   : > { %v5766_v44 = vpack.c.bf16 %v5596_v30, %v5592_v50  ;;  %v17398_v50 = vld [vmem:[%s22880_s2 + $0x1a0] ss:$16 sps:$4 sm:$0xff]   ;;  %v17401_v38 = vld [vmem:[%s22880_s2 + $0xc] ss:$16 sps:$4 sm:$0xff]  }
 0x386   : > { %v17402_v30 = vld [vmem:[%s22880_s2 + $0x2c] ss:$16 sps:$4 sm:$0xff]  }
 0x387   : > { %6271 = vmatprep.subr.bf16.mxu1 %v5766_v44  ;;  %v17404_v44 = vld [vmem:[%s22880_s2 + $0x28] ss:$16 sps:$4 sm:$0xff]  }
 0x388   : > { %6272 = vmatpush1.bf16.msra.mxu1 %v5765_v33  ;;  %v17399_v33 = vld [vmem:[%s22880_s2 + $0x8] ss:$16 sps:$4 sm:$0xff]  }
 0x389   : > { %v5600_v53 = vpop.f32.mrb[84].mxu0 }
 0x38a   : > { %v5602_v43 = vpop.f32.mrb[85].mxu0 }
 0x38b   : > { %v5604_v3 = vpop.f32.mrb[86].mxu0  ;;  %6173 = vmatmul.mubr.bf16.gmra.mrb[20].mxu1 %v17374_v6  ;;  %v17405_v6 = vld [vmem:[%s22880_s2 + $0x4c] ss:$16 sps:$4 sm:$0xff]  }
 0x38c   : > { %v5767_v5 = vpack.c.bf16 %v5604_v3, %v5600_v53  ;;  %v5606_v61 = vpop.f32.mrb[87].mxu0  ;;  %6182 = vmatprep.mubr.bf16.mxu1 %v17375_v41  ;;  %v17407_v41 = vld [vmem:[%s22880_s2 + $0x48] ss:$16 sps:$4 sm:$0xff]   ;;  %v17408_v53 = vld [vmem:[%s22880_s2 + $0x6c] ss:$16 sps:$4 sm:$0xff]  }
 0x38d   : > { %v5768_v60 = vpack.c.bf16 %v5606_v61, %v5602_v43  ;;  %v17410_v43 = vld [vmem:[%s22880_s2 + $0x68] ss:$16 sps:$4 sm:$0xff]   ;;  %v17411_v3 = vld [vmem:[%s22880_s2 + $0x8c] ss:$16 sps:$4 sm:$0xff]  }
 0x38e   : > { %v17414_v61 = vld [vmem:[%s22880_s2 + $0xac] ss:$16 sps:$4 sm:$0xff]  }
 0x38f   : > { %6273 = vmatprep.subr.bf16.mxu1 %v5768_v60  ;;  %v17416_v60 = vld [vmem:[%s22880_s2 + $0xa8] ss:$16 sps:$4 sm:$0xff]  }
 0x390   : > { %6274 = vmatpush1.bf16.msra.mxu1 %v5767_v5  ;;  %v17413_v5 = vld [vmem:[%s22880_s2 + $0x88] ss:$16 sps:$4 sm:$0xff]  }
 0x391   : > { %v5610_v57 = vpop.f32.mrb[88].mxu0 }
 0x392   : > { %v5612_v0 = vpop.f32.mrb[89].mxu0 }
 0x393   : > { %v5614_v25 = vpop.f32.mrb[90].mxu0  ;;  %6183 = vmatmul.mubr.bf16.gmra.mrb[24].mxu1 %v17377_v40  ;;  %v17417_v40 = vld [vmem:[%s22880_s2 + $0xcc] ss:$16 sps:$4 sm:$0xff]  }
 0x394   : > { %v5769_v56 = vpack.c.bf16 %v5614_v25, %v5610_v57  ;;  %v5616_v26 = vpop.f32.mrb[91].mxu0  ;;  %6192 = vmatprep.mubr.bf16.mxu1 %v17378_v28  ;;  %v17419_v28 = vld [vmem:[%s22880_s2 + $0xc8] ss:$16 sps:$4 sm:$0xff]   ;;  %v17420_v57 = vld [vmem:[%s22880_s2 + $0xec] ss:$16 sps:$4 sm:$0xff]  }
 0x395   : > { %v5770_v19 = vpack.c.bf16 %v5616_v26, %v5612_v0  ;;  %v17422_v0 = vld [vmem:[%s22880_s2 + $0xe8] ss:$16 sps:$4 sm:$0xff]   ;;  %v17423_v25 = vld [vmem:[%s22880_s2 + $0x10c] ss:$16 sps:$4 sm:$0xff]  }
 0x396   : > { %v17426_v26 = vld [vmem:[%s22880_s2 + $0x12c] ss:$16 sps:$4 sm:$0xff]  }
 0x397   : > { %6275 = vmatprep.subr.bf16.mxu1 %v5770_v19  ;;  %v17428_v19 = vld [vmem:[%s22880_s2 + $0x128] ss:$16 sps:$4 sm:$0xff]  }
 0x398   : > { %6276 = vmatpush1.bf16.msra.mxu1 %v5769_v56  ;;  %v17425_v56 = vld [vmem:[%s22880_s2 + $0x108] ss:$16 sps:$4 sm:$0xff]  }
 0x399   : > { %v5620_v18 = vpop.f32.mrb[92].mxu0 }
 0x39a   : > { %v5622_v8 = vpop.f32.mrb[93].mxu0 }
 0x39b   : > { %v5624_v58 = vpop.f32.mrb[94].mxu0  ;;  %6193 = vmatmul.mubr.bf16.gmra.mrb[28].mxu1 %v17380_v23  ;;  %v17429_v23 = vld [vmem:[%s22880_s2 + $0x14c] ss:$16 sps:$4 sm:$0xff]  }
 0x39c   : > { %v5771_v42 = vpack.c.bf16 %v5624_v58, %v5620_v18  ;;  %v5626_v20 = vpop.f32.mrb[95].mxu0  ;;  %6202 = vmatprep.mubr.bf16.mxu1 %v17381_v21  ;;  %v17431_v21 = vld [vmem:[%s22880_s2 + $0x148] ss:$16 sps:$4 sm:$0xff]   ;;  %v17432_v18 = vld [vmem:[%s22880_s2 + $0x16c] ss:$16 sps:$4 sm:$0xff]  }
 0x39d   : > { %v5772_v54 = vpack.c.bf16 %v5626_v20, %v5622_v8  ;;  %v17434_v8 = vld [vmem:[%s22880_s2 + $0x168] ss:$16 sps:$4 sm:$0xff]   ;;  %v17435_v58 = vld [vmem:[%s22880_s2 + $0x18c] ss:$16 sps:$4 sm:$0xff]  }
 0x39e   : > { %v17438_v20 = vld [vmem:[%s22880_s2 + $0x1ac] ss:$16 sps:$4 sm:$0xff]  }
 0x39f   : > { %6277 = vmatprep.subr.bf16.mxu1 %v5772_v54  ;;  %v17440_v54 = vld [vmem:[%s22880_s2 + $0x1a8] ss:$16 sps:$4 sm:$0xff]  }
 0x3a0   : > { %6278 = vmatpush1.bf16.msra.mxu1 %v5771_v42  ;;  %v17437_v42 = vld [vmem:[%s22880_s2 + $0x188] ss:$16 sps:$4 sm:$0xff]  }
 0x3a1   : > { %v5630_v39 = vpop.f32.mrb[96].mxu0 }
 0x3a2   : > { %v5632_v46 = vpop.f32.mrb[97].mxu0 }
 0x3a3   : > { %v5634_v4 = vpop.f32.mrb[98].mxu0  ;;  %6203 = vmatmul.mubr.bf16.gmra.mrb[32].mxu1 %v17383_v29  ;;  %v17441_v29 = vld [vmem:[%s22881_s3] ss:$8 sps:$4 sm:$0xff]  }
 0x3a4   : > { %v5773_v9 = vpack.c.bf16 %v5634_v4, %v5630_v39  ;;  %v5636_v17 = vpop.f32.mrb[99].mxu0  ;;  %6212 = vmatprep.mubr.bf16.mxu1 %v17384_v48  ;;  %v17443_v48 = vld [vmem:[%s22881_s3 + $0x4] ss:$8 sps:$4 sm:$0xff]   ;;  %v17444_v39 = vld [vmem:[%s22881_s3 + $0x10] ss:$8 sps:$4 sm:$0xff]  }
 0x3a5   : > { %v5774_v16 = vpack.c.bf16 %v5636_v17, %v5632_v46  ;;  %v17446_v46 = vld [vmem:[%s22881_s3 + $0x14] ss:$8 sps:$4 sm:$0xff]   ;;  %v17447_v4 = vld [vmem:[%s22881_s3 + $0x20] ss:$8 sps:$4 sm:$0xff]   ;;  %v17450_v17 = vld [vmem:[%s22881_s3 + $0x30] ss:$8 sps:$4 sm:$0xff]  }
 0x3a7   : > { %6279 = vmatprep.subr.bf16.mxu1 %v5774_v16  ;;  %v17452_v16 = vld [vmem:[%s22881_s3 + $0x34] ss:$8 sps:$4 sm:$0xff]  }
 0x3a8   : > { %6280 = vmatpush1.bf16.msra.mxu1 %v5773_v9  ;;  %v17449_v9 = vld [vmem:[%s22881_s3 + $0x24] ss:$8 sps:$4 sm:$0xff]  }
 0x3a9   : > { %v5640_v52 = vpop.f32.mrb[100].mxu0 }
 0x3aa   : > { %v5642_v13 = vpop.f32.mrb[101].mxu0 }
 0x3ab   : > { %v5644_v10 = vpop.f32.mrb[102].mxu0  ;;  %6213 = vmatmul.mubr.bf16.gmra.mrb[36].mxu1 %v17386_v32  ;;  %v17663_v32 = vmov 1966171168  }
 0x3ac   : > { %v5775_v11 = vpack.c.bf16 %v5644_v10, %v5640_v52  ;;  %v5646_v14 = vpop.f32.mrb[103].mxu0  ;;  %6222 = vmatprep.mubr.bf16.mxu1 %v17387_v22  ;;  %v6495_v22 = vunpack.c.l.s4 %v17663_v32  ;;  %v23297_v10 = vld [vmem:[#allocation2_spill] sm:$0xff] }
 0x3ad   : > { %v5776_v12 = vpack.c.bf16 %v5646_v14, %v5642_v13 }
 0x3ae   : > { %v6496_v52 = vunpack.c.0.s8 %v6495_v22 }
 0x3af   : > { %6281 = vmatprep.subr.bf16.mxu1 %v5776_v12 }
 0x3b0   : > { %6282 = vmatpush1.bf16.msra.mxu1 %v5775_v11  ;;  %v19557_v11 = vsub.s32 %v6496_v52, %v23297_v10 }
 0x3b1   : > { %v5650_v63 = vpop.f32.mrb[104].mxu0 }
 0x3b2   : > { %v5652_v51 = vpop.f32.mrb[105].mxu0 }
 0x3b3   : > { %v5654_v35 = vpop.f32.mrb[106].mxu0  ;;  %6223 = vmatmul.mubr.bf16.gmra.mrb[40].mxu1 %v17389_v1 }
 0x3b4   : > { %v5777_v59 = vpack.c.bf16 %v5654_v35, %v5650_v63  ;;  %v5656_v24 = vpop.f32.mrb[107].mxu0  ;;  %6232 = vmatprep.mubr.bf16.mxu1 %v17390_v55  ;;  %v17453_v55 = vld [vmem:[%s22881_s3 + $0x40] ss:$8 sps:$4 sm:$0xff]   ;;  %v17455_v63 = vld [vmem:[%s22881_s3 + $0x44] ss:$8 sps:$4 sm:$0xff]  }
 0x3b5   : > { %v5778_v36 = vpack.c.bf16 %v5656_v24, %v5652_v51  ;;  %v17458_v24 = vld [vmem:[%s22881_s3 + $0x54] ss:$8 sps:$4 sm:$0xff]  }
 0x3b7   : > { %6283 = vmatprep.subr.bf16.mxu1 %v5778_v36  ;;  %v17456_v36 = vld [vmem:[%s22881_s3 + $0x50] ss:$8 sps:$4 sm:$0xff]  }
 0x3b8   : > { %6284 = vmatpush1.bf16.msra.mxu1 %v5777_v59 }
 0x3b9   : > { %v5660_v2 = vpop.f32.mrb[108].mxu0 }
 0x3ba   : > { %v5662_v45 = vpop.f32.mrb[109].mxu0 }
 0x3bb   : > { %v5664_v34 = vpop.f32.mrb[110].mxu0  ;;  %6233 = vmatmul.mubr.bf16.gmra.mrb[44].mxu1 %v17392_v15 }
 0x3bc   : > { %v5779_v27 = vpack.c.bf16 %v5664_v34, %v5660_v2  ;;  %v5666_v62 = vpop.f32.mrb[111].mxu0  ;;  %6242 = vmatprep.mubr.bf16.mxu1 %v17393_v7 }
 0x3bd   : > { %v5780_v49 = vpack.c.bf16 %v5666_v62, %v5662_v45 }
 0x3bf   : > { %6285 = vmatprep.subr.bf16.mxu1 %v5780_v49 }
 0x3c0   : > { %6286 = vmatpush1.bf16.msra.mxu1 %v5779_v27 }
 0x3c1   : > { %12012 = vmatprep.subr.bf16.mxu1 %v17443_v48 }
 0x3c3   : > { %6243 = vmatmul.mubr.bf16.gmra.mrb[48].mxu1 %v17395_v47 }
 0x3c4   : > { %6252 = vmatprep.mubr.bf16.mxu1 %v17396_v31 }
 0x3cb   : > { %6253 = vmatmul.mubr.bf16.gmra.mrb[52].mxu1 %v17398_v50 }
 0x3cc   : > { %16317 = vmatprep.mubr.msk.bf16.mxu1 %vm6047_vm4, %v17401_v38 }
 0x3d3   : > { %6296 = vmatmul.mubr.bf16.vlgmr.msra.gmra.mrb[0].mxu1 %v17399_v33 }
 0x3d4   : > { %16318 = vmatprep.mubr.msk.bf16.mxu1 %vm6047_vm4, %v17402_v30  ;;  %12013 = vmatpush1.bf16.msra.mxu1 %v17441_v29 }
 0x3d5   : > { %12014 = vmatprep.subr.bf16.mxu1 %v17446_v46 }
 0x3d8   : > { %12015 = vmatpush1.bf16.msra.mxu1 %v17444_v39 }
 0x3d9   : > { %12016 = vmatprep.subr.bf16.mxu1 %v17449_v9 }
 0x3db   : > { %6306 = vmatmul.mubr.bf16.gmra.mrb[4].mxu1 %v17404_v44 }
 0x3dc   : > { %16319 = vmatprep.mubr.msk.bf16.mxu1 %vm6047_vm4, %v17405_v6  ;;  %12017 = vmatpush1.bf16.msra.mxu1 %v17447_v4 }
 0x3dd   : > { %12018 = vmatprep.subr.bf16.mxu1 %v17452_v16 }
 0x3e0   : > { %12019 = vmatpush1.bf16.msra.mxu1 %v17450_v17 }
 0x3e1   : > { %12020 = vmatprep.subr.bf16.mxu1 %v17455_v63  ;;  %v17461_v63 = vld [vmem:[%s22881_s3 + $0x64] ss:$8 sps:$4 sm:$0xff]  }
 0x3e3   : > { %6316 = vmatmul.mubr.bf16.gmra.mrb[8].mxu1 %v17407_v41 }
 0x3e4   : > { %16320 = vmatprep.mubr.msk.bf16.mxu1 %vm6047_vm4, %v17408_v53  ;;  %12021 = vmatpush1.bf16.msra.mxu1 %v17453_v55  ;;  %v17459_v55 = vld [vmem:[%s22881_s3 + $0x60] ss:$8 sps:$4 sm:$0xff]  }
 0x3e5   : > { %12022 = vmatprep.subr.bf16.mxu1 %v17458_v24 }
 0x3e8   : > { %12023 = vmatpush1.bf16.msra.mxu1 %v17456_v36  ;;  %v17464_v36 = vld [vmem:[%s22881_s3 + $0x74] ss:$8 sps:$4 sm:$0xff]  }
 0x3e9   : > { %12024 = vmatprep.subr.bf16.mxu1 %v17461_v63 }
 0x3eb   : > { %6326 = vmatmul.mubr.bf16.gmra.mrb[12].mxu1 %v17410_v43 }
 0x3ec   : > { %16321 = vmatprep.mubr.msk.bf16.mxu1 %vm6047_vm4, %v17411_v3  ;;  %12025 = vmatpush1.bf16.msra.mxu1 %v17459_v55  ;;  %v17467_v55 = vld [vmem:[%s22881_s3 + $0x84] ss:$8 sps:$4 sm:$0xff]  }
 0x3ed   : > { %12026 = vmatprep.subr.bf16.mxu1 %v17464_v36 }
 0x3f3   : > { %6336 = vmatmul.mubr.bf16.gmra.mrb[16].mxu1 %v17413_v5 }
 0x3f4   : > { %16322 = vmatprep.mubr.msk.bf16.mxu1 %vm6047_vm4, %v17414_v61 }
 0x3fb   : > { %6346 = vmatmul.mubr.bf16.gmra.mrb[20].mxu1 %v17416_v60 }
 0x3fc   : > { %16323 = vmatprep.mubr.msk.bf16.mxu1 %vm6047_vm4, %v17417_v40 }
 0x403   : > { %6356 = vmatmul.mubr.bf16.gmra.mrb[24].mxu1 %v17419_v28 }
 0x404   : > { %16324 = vmatprep.mubr.msk.bf16.mxu1 %vm6047_vm4, %v17420_v57 }
 0x40b   : > { %6366 = vmatmul.mubr.bf16.gmra.mrb[28].mxu1 %v17422_v0 }
 0x40c   : > { %16325 = vmatprep.mubr.msk.bf16.mxu1 %vm6047_vm4, %v17423_v25 }
 0x413   : > { %6376 = vmatmul.mubr.bf16.gmra.mrb[32].mxu1 %v17425_v56 }
 0x414   : > { %16326 = vmatprep.mubr.msk.bf16.mxu1 %vm6047_vm4, %v17426_v26 }
 0x41b   : > { %6386 = vmatmul.mubr.bf16.gmra.mrb[36].mxu1 %v17428_v19 }
 0x41c   : > { %16327 = vmatprep.mubr.msk.bf16.mxu1 %vm6047_vm4, %v17429_v23 }
 0x423   : > { %6396 = vmatmul.mubr.bf16.gmra.mrb[40].mxu1 %v17431_v21 }
 0x424   : > { %16328 = vmatprep.mubr.msk.bf16.mxu1 %vm6047_vm4, %v17432_v18 }
 0x42b   : > { %6406 = vmatmul.mubr.bf16.gmra.mrb[44].mxu1 %v17434_v8 }
 0x42c   : > { %16329 = vmatprep.mubr.msk.bf16.mxu1 %vm6047_vm4, %v17435_v58 }
 0x433   : > { %6416 = vmatmul.mubr.bf16.gmra.mrb[48].mxu1 %v17437_v42 }
 0x434   : > { %16330 = vmatprep.mubr.msk.bf16.mxu1 %vm6047_vm4, %v17438_v20 }
 0x43b   : > { %6426 = vmatmul.mubr.bf16.gmra.mrb[52].mxu1 %v17440_v54 }
 0x4a6   : > { %v6297_v13 = vpop.f32.mrb[0].mxu1 }
 0x4a7   : > { %v6299_v14 = vpop.f32.mrb[1].mxu1 }
 0x4a8   : > { %v16331_v12 = vpack.c.bf16 %v6299_v14, %v6297_v13  ;;  %v6301_v1 = vpop.f32.mrb[2].mxu1 }
 0x4a9   : > { %v6303_v51 = vpop.f32.mrb[3].mxu1 }
 0x4aa   : > { %v6500_v35 = vrot.slane %v16331_v12, %v19557_v11  ;;  %v16332_v59 = vpack.c.bf16 %v6303_v51, %v6301_v1 }
 0x4ac   : > { %v6508_v15 = vcombine.high %v6500_v35, %v6500_v35  ;;  %v6516_v7 = vrot.slane %v6500_v35, %v19557_v11  ;;  %v6507_v2 = vrot.slane %v16332_v59, %v19557_v11 }
 0x4ae   : > { %v6530_v45 = vrot.slane %v6508_v15, %v19557_v11  ;;  %v6538_v34 = vcombine.high %v6516_v7, %v6516_v7  ;;  %v6509_v27 = vcombine.high %v6507_v2, %v6507_v2  ;;  %v6523_v62 = vrot.slane %v6507_v2, %v19557_v11  ;;  %v6307_v49 = vpop.f32.mrb[4].mxu1 }
 0x4af   : > { %v6309_v47 = vpop.f32.mrb[5].mxu1 }
 0x4b0   : > { %v7192_v31 = vcombine.low %v6516_v7, %v6530_v45  ;;  %v16359_v50 = vcombine.high %v6516_v7, %v6530_v45  ;;  %v19576_v38 = vcombine.low %v6530_v45, %v6538_v34  ;;  %v19579_v33 = vrot.slane %v6509_v27, %v19557_v11  ;;  %v6311_v30 = vpop.f32.mrb[6].mxu1 }
 0x4b1   : > { %v19581_v44 = vcombine.high %v6523_v62, %v6523_v62  ;;  %v6540_v6 = vcombine.high %v6530_v45, %v6530_v45  ;;  %v16333_v41 = vpack.c.bf16 %v6309_v47, %v6307_v49  ;;  %v6313_v53 = vpop.f32.mrb[7].mxu1  ;;  %v17462_v47 = vld [vmem:[%s22881_s3 + $0x70] ss:$8 sps:$4 sm:$0xff]  }
 0x4b2   : > { %v7201_v43 = vrot.slane %v7192_v31, %v19557_v11  ;;  %v7208_v3 = vrot.slane %v16359_v50, %v19557_v11  ;;  %v7194_v5 = vcombine.low %v6523_v62, %v19579_v33  ;;  %v16334_v40 = vpack.c.bf16 %v6313_v53, %v6311_v30  ;;  %12027 = vmatpush1.bf16.msra.mxu1 %v17462_v47 }
 0x4b3   : > { %v19586_v61 = vcombine.low %v6540_v6, %v6523_v62  ;;  %v6550_v60 = vrot.slane %v16333_v41, %v19557_v11  ;;  %v8110_v57 = vrot.slane %v19581_v44, %v19557_v11  ;;  %v6541_v23 = vcombine.high %v19579_v33, %v19579_v33  ;;  %12028 = vmatprep.subr.bf16.mxu1 %v17467_v55 }
 0x4b4   : > { %v19590_v28 = vrot.slane %v7194_v5, %v19557_v11  ;;  %v7216_v0 = vcombine.low %v7201_v43, %v7208_v3  ;;  %v7217_v25 = vcombine.high %v7201_v43, %v7208_v3  ;;  %v6557_v19 = vrot.slane %v16334_v40, %v19557_v11 }
 0x4b5   : > { %v6558_v56 = vcombine.high %v6550_v60, %v6550_v60  ;;  %v6566_v26 = vrot.slane %v6550_v60, %v19557_v11 }
 0x4b6   : > { %v6317_v21 = vpop.f32.mrb[8].mxu1  ;;  %v19599_v18 = vrot.slane %v7216_v0, %v19557_v11  ;;  %v8111_v8 = vcombine.low %v19590_v28, %v8110_v57  ;;  %v8112_v58 = vcombine.high %v19590_v28, %v8110_v57  ;;  %v6559_v54 = vcombine.high %v6557_v19, %v6557_v19 }
 0x4b7   : > { %v6580_v42 = vrot.slane %v6558_v56, %v19557_v11  ;;  %v6588_v20 = vcombine.high %v6566_v26, %v6566_v26  ;;  %v6319_v29 = vpop.f32.mrb[9].mxu1  ;;  %v19605_v48 = vrot.slane %v7217_v25, %v19557_v11  ;;  %v7249_v39 = vcombine.low %v6541_v23, %v6566_v26 }
 0x4b8   : > { %v6573_v46 = vrot.slane %v6557_v19, %v19557_v11  ;;  %v16335_v4 = vpack.c.bf16 %v6319_v29, %v6317_v21  ;;  %v6321_v9 = vpop.f32.mrb[10].mxu1  ;;  %v8119_v17 = vrot.slane %v8111_v8, %v19557_v11  ;;  %v19610_v16 = vrot.slane %v6559_v54, %v19557_v11 }
 0x4b9   : > { %v6590_v32 = vcombine.high %v6580_v42, %v6580_v42  ;;  %v6323_v22 = vpop.f32.mrb[11].mxu1  ;;  %v8866_v52 = vcombine.low %v6566_v26, %v6580_v42  ;;  %v19613_v13 = vrot.slane %v8112_v58, %v19557_v11  ;;  %v16371_v1 = vcombine.high %v6566_v26, %v6580_v42 }
 0x4ba   : > { %v6600_v10 = vrot.slane %v16335_v4, %v19557_v11  ;;  %v16336_v14 = vpack.c.bf16 %v6323_v22, %v6321_v9  ;;  %v8127_v12 = vcombine.low %v19599_v18, %v8119_v17  ;;  %v16360_v35 = vcombine.high %v6573_v46, %v19610_v16 }
 0x4bb   : > { %v7251_v51 = vcombine.low %v6590_v32, %v6573_v46  ;;  %v8868_v59 = vcombine.low %v6573_v46, %v19610_v16  ;;  %v19626_v24 = vrot.slane %v8866_v52, %v19557_v11  ;;  %v7250_v15 = vcombine.low %v6580_v42, %v6588_v20 }
 0x4bc   : > { %v6608_v7 = vcombine.high %v6600_v10, %v6600_v10  ;;  %v19632_v2 = vrot.slane %v6600_v10, %v19557_v11  ;;  %v6607_v45 = vrot.slane %v16336_v14, %v19557_v11  ;;  %v8505_v27 = vshrl.u32 %v8127_v12, 16 }
 0x4bd   : > { %23298 = vst [vmem:[#allocation9_spill] sm:$0xff] %v19626_v24  ;;  %v19636_v34 = vrot.slane %v7251_v51, %v19557_v11  ;;  %v8507_v62 = vshll.u32 %v8127_v12, 16  ;;  %v19639_v49 = vrot.slane %v16371_v1, %v19557_v11  ;;  %v19645_v31 = vrot.slane %v16360_v35, %v19557_v11  ;;  %v17465_v1 = vld [vmem:[%s22881_s3 + $0x80] ss:$8 sps:$4 sm:$0xff]  }
 0x4be   : > { %23299 = vst [vmem:[#allocation8_spill] sm:$0xff] %v19632_v2  ;;  %v19648_v50 = vrot.slane %v6608_v7, %v19557_v11  ;;  %v6609_v30 = vcombine.high %v6607_v45, %v6607_v45  ;;  %v19651_v6 = vrot.slane %v6607_v45, %v19557_v11  ;;  %v6327_v41 = vpop.f32.mrb[12].mxu1  ;;  %v19656_v5 = vrot.slane %v8868_v59, %v19557_v11 }
 0x4bf   : > { %23300 = vst [vmem:[#allocation12_spill] sm:$0xff] %v19636_v34  ;;  %23301 = vst [vmem:[#allocation11_spill] sm:$0xff] %v19639_v49  ;;  %v6329_v43 = vpop.f32.mrb[13].mxu1  ;;  %v8509_v3 = vrot.slane %v8507_v62, 1  ;;  %v8890_v60 = vcombine.low %v19626_v24, %v19639_v49  ;;  %v7258_v8 = vrot.slane %v7249_v39, %v19557_v11  ;;  %v7265_v32 = vrot.slane %v7250_v15, %v19557_v11  ;;  %v17470_v15 = vld [vmem:[%s22881_s3 + $0x94] ss:$8 sps:$4 sm:$0xff]  }
 0x4c0   : > { %23302 = vst [vmem:[#allocation14_spill] sm:$0xff] %v19651_v6  ;;  %23303 = vst [vmem:[#allocation20_spill] sm:$0xff] %v19656_v5  ;;  %v7307_v40 = vcombine.low %v19632_v2, %v19648_v50  ;;  %v16361_v57 = vcombine.high %v19632_v2, %v19648_v50  ;;  %v19665_v0 = vrot.slane %v6609_v30, %v19557_v11  ;;  %v6331_v56 = vpop.f32.mrb[14].mxu1  ;;  %12029 = vmatpush1.bf16.msra.mxu1 %v17465_v1 }
 0x4c1   : > { %v6639_v25 = vcombine.high %v19651_v6, %v19651_v6  ;;  %v16337_v26 = vpack.c.bf16 %v6329_v43, %v6327_v41  ;;  %v6333_v19 = vpop.f32.mrb[15].mxu1  ;;  %v8510_v23 = vor.u32 %v8509_v3, %v8505_v27  ;;  %v8899_v21 = vrot.slane %v8890_v60, %v19557_v11  ;;  %12030 = vmatprep.subr.bf16.mxu1 %v17470_v15 }
 0x4c2   : > { %v19672_v58 = vrot.slane %v7307_v40, %v19557_v11  ;;  %v19675_v42 = vrot.slane %v16361_v57, %v19557_v11  ;;  %v19680_v54 = vrot.slane %v19651_v6, %v19557_v11  ;;  %v6641_v29 = vcombine.high %v19665_v0, %v19665_v0 }
 0x4c3   : > { %v7363_v20 = vcombine.low %v19665_v0, %v6639_v25  ;;  %v6650_v46 = vrot.slane %v16337_v26, %v19557_v11  ;;  %v16338_v4 = vpack.c.bf16 %v6333_v19, %v6331_v56  ;;  %8728 = vrot.lane.b32.xlu0 %v8510_v23, %s17664_s22  ;;  %v8913_v39 = vrot.slane %v19656_v5, %v19557_v11  ;;  %v17468_v19 = vld [vmem:[%s22881_s3 + $0x90] ss:$8 sps:$4 sm:$0xff]  }
 0x4c4   : > { %v8135_v22 = vrot.slane %v19610_v16, %v19557_v11  ;;  %v7274_v35 = vcombine.high %v7258_v8, %v7265_v32  ;;  %v7273_v36 = vcombine.low %v7258_v8, %v7265_v32  ;;  %12031 = vmatpush1.bf16.msra.mxu1 %v17468_v19 }
 0x4c5   : > { %v19689_v9 = vrot.slane %v7363_v20, %v19557_v11  ;;  %v6658_v52 = vcombine.high %v6650_v46, %v6650_v46  ;;  %v19697_v10 = vrot.slane %v6650_v46, %v19557_v11  ;;  %v6657_v14 = vrot.slane %v16338_v4, %v19557_v11 }
 0x4c6   : > { %v8921_v12 = vcombine.low %v8899_v21, %v8913_v39  ;;  %v6337_v51 = vpop.f32.mrb[16].mxu1  ;;  %v8137_v59 = vcombine.high %v19636_v34, %v8135_v22  ;;  %v19723_v3 = vrot.slane %v7274_v35, %v19557_v11  ;;  %v8136_v26 = vcombine.low %v19636_v34, %v8135_v22 }
 0x4c7   : > { %v19713_v7 = vrot.slane %v6658_v52, %v19557_v11  ;;  %v6688_v45 = vcombine.high %v19697_v10, %v19697_v10  ;;  %v19718_v27 = vcombine.low %v6641_v29, %v19697_v10  ;;  %v6659_v62 = vcombine.high %v6657_v14, %v6657_v14  ;;  %v6339_v47 = vpop.f32.mrb[17].mxu1 }
 0x4c8   : > { %9725 = vrot.lane.b32.xlu1 %v8921_v12, %s17665_s9  ;;  %v6673_v30 = vrot.slane %v6657_v14, %v19557_v11  ;;  %v16339_v41 = vpack.c.bf16 %v6339_v47, %v6337_v51  ;;  %v6341_v43 = vpop.f32.mrb[18].mxu1  ;;  %23304 = vst [vmem:[#allocation18_spill] sm:$0xff] %v19723_v3  ;;  %v8151_v60 = vrot.slane %v8137_v59, %v19557_v11 }
 0x4c9   : > { %v6690_v40 = vcombine.high %v19713_v7, %v19713_v7  ;;  %v7365_v57 = vcombine.low %v19713_v7, %v6688_v45  ;;  %v6687_v25 = vrot.slane %v6659_v62, %v19557_v11  ;;  %v6343_v56 = vpop.f32.mrb[19].mxu1  ;;  %v19737_v39 = vrot.slane %v7273_v36, %v19557_v11 }
 0x4ca   : > { %v6689_v23 = vcombine.high %v6673_v30, %v6673_v30  ;;  %v6700_v21 = vrot.slane %v16339_v41, %v19557_v11  ;;  %v16340_v8 = vpack.c.bf16 %v6343_v56, %v6341_v43  ;;  %v8153_v20 = vcombine.low %v19723_v3, %v8151_v60  ;;  %v17471_v60 = vld [vmem:[%s22881_s3 + $0xa0] ss:$8 sps:$4 sm:$0xff]  }
 0x4cb   : > { %v7420_v29 = vcombine.low %v6673_v30, %v6687_v25  ;;  %v16362_v46 = vcombine.high %v6673_v30, %v6687_v25  ;;  %v6691_v4 = vcombine.high %v6687_v25, %v6687_v25  ;;  %23305 = vst [vmem:[#allocation17_spill] sm:$0xff] %v19737_v39  ;;  %v19757_v62 = vrot.slane %v7365_v57, %v19557_v11 }
 0x4cc   : > { %v19739_v32 = vcombine.low %v6687_v25, %v6689_v23  ;;  %v6708_v22 = vcombine.high %v6700_v21, %v6700_v21  ;;  %v6716_v52 = vrot.slane %v6700_v21, %v19557_v11  ;;  %v6707_v14 = vrot.slane %v16340_v8, %v19557_v11  ;;  %v17473_v25 = vld [vmem:[%s22881_s3 + $0xa4] ss:$8 sps:$4 sm:$0xff]  }
 0x4cd   : > { %v19744_v12 = vrot.slane %v7420_v29, %v19557_v11  ;;  %v19747_v1 = vrot.slane %v16362_v46, %v19557_v11  ;;  %v8526_v55 = vshrl.u32 %v8153_v20, 16  ;;  %v8528_v51 = vshll.u32 %v8153_v20, 16  ;;  %23310 = vst [vmem:[#allocation16_spill] sm:$0xff] %v19757_v62  ;;  %12032 = vmatprep.subr.bf16.mxu1 %v17473_v25 }
 0x4ce   : > { %23306 = vst [vmem:[#allocation21_spill] sm:$0xff] %v19739_v32  ;;  %v19750_v35 = vrot.slane %v6708_v22, %v19557_v11  ;;  %v19752_v59 = vcombine.high %v6716_v52, %v6716_v52  ;;  %v19754_v36 = vcombine.low %v6691_v4, %v6716_v52  ;;  %v6709_v15 = vcombine.high %v6707_v14, %v6707_v14  ;;  %v6347_v45 = vpop.f32.mrb[20].mxu1 }
 0x4cf   : > { %v19760_v47 = vrot.slane %v6707_v14, %v19557_v11  ;;  %v8530_v30 = vrot.slane %v8528_v51, 1  ;;  %v8144_v41 = vrot.slane %v8136_v26, %v19557_v11  ;;  %v6349_v43 = vpop.f32.mrb[21].mxu1  ;;  %v7330_v14 = vcombine.low %v19645_v31, %v19672_v58  ;;  %12033 = vmatpush1.bf16.msra.mxu1 %v17471_v60 }
 0x4d0   : > { %23307 = vst [vmem:[#allocation19_spill] sm:$0xff] %v19750_v35  ;;  %23308 = vst [vmem:[#allocation25_spill] sm:$0xff] %v19752_v59  ;;  %v6740_v57 = vcombine.high %v19750_v35, %v19750_v35  ;;  %v7422_v19 = vcombine.low %v6716_v52, %v19750_v35  ;;  %v19775_v23 = vrot.slane %v6709_v15, %v19557_v11  ;;  %v6351_v26 = vpop.f32.mrb[22].mxu1 }
 0x4d1   : > { %23309 = vst [vmem:[#allocation24_spill] sm:$0xff] %v19754_v36  ;;  %v19779_v21 = vrot.slane %v19752_v59, %v19557_v11  ;;  %v8531_v8 = vor.u32 %v8530_v30, %v8526_v55  ;;  %v8152_v20 = vcombine.low %v19737_v39, %v8144_v41  ;;  %v16341_v29 = vpack.c.bf16 %v6349_v43, %v6347_v45  ;;  %v6353_v46 = vpop.f32.mrb[23].mxu1  ;;  %v17474_v30 = vld [vmem:[%s22881_s3 + $0xb0] ss:$8 sps:$4 sm:$0xff]   ;;  %v17476_v41 = vld [vmem:[%s22881_s3 + $0xb4] ss:$8 sps:$4 sm:$0xff]  }
 0x4d2   : > { %v19783_v4 = vrot.slane %v7422_v19, %v19557_v11  ;;  %v6739_v22 = vcombine.high %v19760_v47, %v19760_v47  ;;  %v19788_v52 = vcombine.low %v6740_v57, %v19760_v47  ;;  %v6741_v15 = vcombine.high %v19775_v23, %v19775_v23  ;;  %12034 = vmatprep.subr.bf16.mxu1 %v17476_v41 }
 0x4d3   : > { %8734 = vrot.lane.b32.xlu1 %v8531_v8, %s17664_s22  ;;  %v8519_v55 = vshrl.u32 %v8152_v20, 16  ;;  %v8521_v51 = vshll.u32 %v8152_v20, 16  ;;  %v6750_v45 = vrot.slane %v16341_v29, %v19557_v11  ;;  %v19803_v43 = vrot.slane %v7330_v14, %v19557_v11  ;;  %12035 = vmatpush1.bf16.msra.mxu1 %v17474_v30 }
 0x4d4   : > { %v8161_v60 = vcombine.low %v19675_v42, %v19680_v54  ;;  %v16342_v25 = vpack.c.bf16 %v6353_v46, %v6351_v26  ;;  %v7379_v57 = vrot.slane %v19718_v27, %v19557_v11  ;;  %v8185_v29 = vrot.slane %v6690_v40, %v19557_v11 }
 0x4d5   : > { %23311 = vst [vmem:[#allocation15_spill] sm:$0xff] %v19803_v43  ;;  %v8523_v19 = vrot.slane %v8521_v51, 1  ;;  %v6758_v8 = vcombine.high %v6750_v45, %v6750_v45  ;;  %v19810_v20 = vrot.slane %v6750_v45, %v19557_v11 }
 0x4d6   : > { %v8169_v14 = vrot.slane %v8161_v60, %v19557_v11  ;;  %v6757_v63 = vrot.slane %v16342_v25, %v19557_v11  ;;  %v6357_v53 = vpop.f32.mrb[24].mxu1  ;;  %v7388_v26 = vcombine.high %v19689_v9, %v7379_v57  ;;  %v7387_v27 = vcombine.low %v19689_v9, %v7379_v57  ;;  %v17477_v9 = vld [vmem:[%s22881_s3 + $0xc0] ss:$8 sps:$4 sm:$0xff]  }
 0x4d7   : > { %v8524_v46 = vor.u32 %v8523_v19, %v8519_v55  ;;  %v19821_v51 = vrot.slane %v6758_v8, %v19557_v11  ;;  %v7479_v45 = vcombine.low %v6741_v15, %v19810_v20  ;;  %v6359_v56 = vpop.f32.mrb[25].mxu1  ;;  %v8187_v40 = vcombine.high %v19757_v62, %v8185_v29  ;;  %v17479_v55 = vld [vmem:[%s22881_s3 + $0xc4] ss:$8 sps:$4 sm:$0xff]  }
 0x4d8   : > { %v8177_v41 = vcombine.low %v19803_v43, %v8169_v14  ;;  %v6759_v60 = vcombine.high %v6757_v63, %v6757_v63  ;;  %v19827_v25 = vrot.slane %v6757_v63, %v19557_v11  ;;  %v16343_v17 = vpack.c.bf16 %v6359_v56, %v6357_v53  ;;  %v6361_v5 = vpop.f32.mrb[26].mxu1  ;;  %12036 = vmatprep.subr.bf16.mxu1 %v17479_v55 }
 0x4d9   : > { %23312 = vst [vmem:[#allocation26_spill] sm:$0xff] %v19821_v51  ;;  %v19836_v15 = vcombine.low %v19775_v23, %v6739_v22  ;;  %8732 = vrot.lane.b32.xlu0 %v8524_v46, %s17664_s22  ;;  %v19840_v30 = vrot.slane %v7479_v45, %v19557_v11  ;;  %v16363_v53 = vcombine.high %v19810_v20, %v19821_v51  ;;  %v6363_v56 = vpop.f32.mrb[27].mxu1 }
 0x4da   : > { %23313 = vst [vmem:[#allocation35_spill] sm:$0xff] %v19827_v25  ;;  %v8533_v57 = vshrl.u32 %v8177_v41, 16  ;;  %v8535_v19 = vshll.u32 %v8177_v41, 16  ;;  %v19847_v8 = vrot.slane %v6759_v60, %v19557_v11  ;;  %v19850_v22 = vrot.slane %v7388_v26, %v19557_v11  ;;  %12037 = vmatpush1.bf16.msra.mxu1 %v17477_v9 }
 0x4db   : > { %23314 = vst [vmem:[#allocation32_spill] sm:$0xff] %v19840_v30  ;;  %v19853_v14 = vrot.slane %v16363_v53, %v19557_v11  ;;  %v6800_v45 = vrot.slane %v16343_v17, %v19557_v11  ;;  %v8201_v63 = vrot.slane %v8187_v40, %v19557_v11  ;;  %v8186_v60 = vcombine.low %v19757_v62, %v8185_v29 }
 0x4dc   : > { %23315 = vst [vmem:[#allocation28_spill] sm:$0xff] %v19847_v8  ;;  %23316 = vst [vmem:[#allocation27_spill] sm:$0xff] %v19850_v22  ;;  %v8537_v24 = vrot.slane %v8535_v19, 1  ;;  %v7535_v41 = vcombine.low %v19827_v25, %v19847_v8  ;;  %v16364_v26 = vcombine.high %v19827_v25, %v19847_v8  ;;  %v16344_v49 = vpack.c.bf16 %v6363_v56, %v6361_v5 }
 0x4dd   : > { %23317 = vst [vmem:[#allocation30_spill] sm:$0xff] %v19853_v14  ;;  %v6808_v55 = vcombine.high %v6800_v45, %v6800_v45  ;;  %v19865_v53 = vrot.slane %v6800_v45, %v19557_v11  ;;  %v8203_v46 = vcombine.low %v19850_v22, %v8201_v63  ;;  %v19872_v9 = vrot.slane %v7387_v27, %v19557_v11 }
 0x4de   : > { %v8538_v17 = vor.u32 %v8537_v24, %v8533_v57  ;;  %v19869_v40 = vrot.slane %v7535_v41, %v19557_v11  ;;  %v8194_v19 = vrot.slane %v8186_v60, %v19557_v11  ;;  %v6367_v43 = vpop.f32.mrb[28].mxu1  ;;  %v19876_v25 = vrot.slane %v16364_v26, %v19557_v11 }
 0x4df   : > { %23318 = vst [vmem:[#allocation31_spill] sm:$0xff] %v19865_v53  ;;  %23320 = vst [vmem:[#allocation37_spill] sm:$0xff] %v19872_v9  ;;  %v19879_v29 = vrot.slane %v6808_v55, %v19557_v11  ;;  %v6838_v63 = vcombine.high %v19865_v53, %v19865_v53  ;;  %v19885_v24 = vrot.slane %v19865_v53, %v19557_v11  ;;  %v6369_v5 = vpop.f32.mrb[29].mxu1  ;;  %v8556_v27 = vshll.u32 %v8203_v46, 16 }
 0x4e0   : > { %23319 = vst [vmem:[#allocation29_spill] sm:$0xff] %v19869_v40  ;;  %23321 = vst [vmem:[#allocation36_spill] sm:$0xff] %v19876_v25  ;;  %8736 = vrot.lane.b32.xlu0 %v8538_v17, %s17664_s22  ;;  %v8202_v56 = vcombine.low %v19872_v9, %v8194_v19  ;;  %v6807_v57 = vrot.slane %v16344_v49, %v19557_v11  ;;  %v8981_v45 = vcombine.low %v19697_v10, %v19713_v7  ;;  %v6371_v41 = vpop.f32.mrb[30].mxu1  ;;  %v17480_v17 = vld [vmem:[%s22881_s3 + $0xd0] ss:$8 sps:$4 sm:$0xff]  }
 0x4e1   : > { %23322 = vst [vmem:[#allocation38_spill] sm:$0xff] %v19885_v24  ;;  %v6840_v26 = vcombine.high %v19879_v29, %v19879_v29  ;;  %v7591_v60 = vcombine.low %v19879_v29, %v6838_v63  ;;  %v8554_v55 = vshrl.u32 %v8203_v46, 16  ;;  %v16373_v22 = vcombine.high %v19697_v10, %v19713_v7  ;;  %v6373_v62 = vpop.f32.mrb[31].mxu1  ;;  %v17482_v49 = vld [vmem:[%s22881_s3 + $0xd4] ss:$8 sps:$4 sm:$0xff]  }
 0x4e2   : > { %v8558_v9 = vrot.slane %v8556_v27, 1  ;;  %v8549_v8 = vshll.u32 %v8202_v56, 16  ;;  %v6809_v3 = vcombine.high %v6807_v57, %v6807_v57  ;;  %v8547_v63 = vshrl.u32 %v8202_v56, 16  ;;  %12038 = vmatprep.subr.bf16.mxu1 %v17482_v49 }
 0x4e3   : > { %v19906_v46 = vrot.slane %v6807_v57, %v19557_v11  ;;  %v23323_v10 = vcombine.high %v19651_v6, %v19665_v0  ;;  %v19915_v39 = vrot.slane %v8981_v45, %v19557_v11  ;;  %v19921_v56 = vrot.slane %v16373_v22, %v19557_v11  ;;  %12039 = vmatpush1.bf16.msra.mxu1 %v17480_v17 }
 0x4e4   : > { %v8559_v34 = vor.u32 %v8558_v9, %v8554_v55  ;;  %v8551_v36 = vrot.slane %v8549_v8, 1  ;;  %v19918_v27 = vrot.slane %v6809_v3, %v19557_v11  ;;  %v19931_v9 = vrot.slane %v7591_v60, %v19557_v11 }
 0x4e5   : > { %v19912_v7 = vrot.slane %v23323_v10, %v19557_v11  ;;  %23325 = vst [vmem:[#allocation44_spill] sm:$0xff] %v19915_v39  ;;  %23326 = vst [vmem:[#allocation40_spill] sm:$0xff] %v19921_v56  ;;  %v6839_v57 = vcombine.high %v19906_v46, %v19906_v46  ;;  %v19926_v0 = vcombine.low %v6840_v26, %v19906_v46  ;;  %v17483_v26 = vld [vmem:[%s22881_s3 + $0xe0] ss:$8 sps:$4 sm:$0xff]  }
 0x4e6   : > { %v16345_v10 = vpack.c.bf16 %v6369_v5, %v6367_v43  ;;  %8742 = vrot.lane.b32.xlu0 %v8559_v34, %s17664_s22  ;;  %v8552_v3 = vor.u32 %v8551_v36, %v8547_v63  ;;  %v9027_v22 = vrot.slane %v19921_v56, %v19557_v11  ;;  %v19938_v55 = vpop.f32.mrb[32].mxu1  ;;  %v17485_v43 = vld [vmem:[%s22881_s3 + $0xe4] ss:$8 sps:$4 sm:$0xff]   ;;  %v8211_v60 = vcombine.low %v19783_v4, %v19779_v21 }
 0x4e7   : > { %23324 = vst [vmem:[#allocation43_spill] sm:$0xff] %v19912_v7  ;;  %v9004_v45 = vcombine.low %v19912_v7, %v19915_v39  ;;  %v7593_v5 = vcombine.low %v19918_v27, %v6839_v57  ;;  %v19951_v17 = vpop.f32.mrb[33].mxu1  ;;  %v16346_v49 = vpack.c.bf16 %v6373_v62, %v6371_v41  ;;  %v7486_v63 = vrot.slane %v19788_v52, %v19557_v11 }
 0x4e8   : > { %v6850_v36 = vrot.slane %v16345_v10, %v19557_v11  ;;  %8740 = vrot.lane.b32.xlu1 %v8552_v3, %s17664_s22  ;;  %v7493_v19 = vrot.slane %v19836_v15, %v19557_v11  ;;  %v8235_v57 = vrot.slane %v19821_v51, %v19557_v11  ;;  %v23328_v62 = vcombine.low %v19744_v12, %v19747_v1 }
 0x4e9   : > { %v9013_v34 = vrot.slane %v9004_v45, %v19557_v11  ;;  %v6381_v45 = vpop.f32.mrb[34].mxu1  ;;  %v19961_v10 = vrot.slane %v7593_v5, %v19557_v11  ;;  %12040 = vmatprep.subr.bf16.mxu1 %v17485_v43  ;;  %v8219_v15 = vrot.slane %v8211_v60, %v19557_v11  ;;  %v6857_v7 = vrot.slane %v16346_v49, %v19557_v11 }
 0x4ea   : > { %v6858_v8 = vcombine.high %v6850_v36, %v6850_v36  ;;  %v6866_v56 = vrot.slane %v6850_v36, %v19557_v11  ;;  %v19968_v41 = vrot.slane %v23328_v62, %v19557_v11  ;;  %v6383_v52 = vpop.f32.mrb[35].mxu1  ;;  %v7502_v39 = vcombine.high %v7486_v63, %v7493_v19  ;;  %12041 = vmatpush1.bf16.msra.mxu1 %v17483_v26 }
 0x4eb   : > { %23327 = vst [vmem:[#allocation39_spill] sm:$0xff] %v19961_v10  ;;  %v9035_v3 = vcombine.low %v9013_v34, %v9027_v22  ;;  %v8237_v36 = vcombine.high %v19840_v30, %v8235_v57  ;;  %v7501_v35 = vcombine.low %v7486_v63, %v7493_v19  ;;  %v6859_v59 = vcombine.high %v6857_v7, %v6857_v7  ;;  %v17488_v19 = vld [vmem:[%s22881_s3 + $0xf4] ss:$8 sps:$4 sm:$0xff]  }
 0x4ec   : > { %23329 = vst [vmem:[#allocation50_spill] sm:$0xff] %v19968_v41  ;;  %v6880_v5 = vrot.slane %v6858_v8, %v19557_v11  ;;  %v6888_v32 = vcombine.high %v6866_v56, %v6866_v56  ;;  %v8227_v62 = vcombine.low %v19968_v41, %v8219_v15  ;;  %v6873_v43 = vrot.slane %v6857_v7, %v19557_v11  ;;  %v17486_v8 = vld [vmem:[%s22881_s3 + $0xf0] ss:$8 sps:$4 sm:$0xff]  }
 0x4ed   : > { %9733 = vrot.lane.b32.xlu1 %v9035_v3, %s17665_s9  ;;  %v8236_v22 = vcombine.low %v19840_v30, %v8235_v57  ;;  %v19987_v3 = vrot.slane %v6859_v59, %v19557_v11  ;;  %v19992_v57 = vrot.slane %v7502_v39, %v19557_v11  ;;  %v8251_v30 = vrot.slane %v8237_v36, %v19557_v11 }
 0x4ee   : > { %v7648_v34 = vcombine.low %v6866_v56, %v6880_v5  ;;  %v16365_v60 = vcombine.high %v6866_v56, %v6880_v5  ;;  %v19978_v49 = vcombine.low %v6880_v5, %v6888_v32  ;;  %v6890_v26 = vcombine.high %v6880_v5, %v6880_v5  ;;  %v19994_v32 = vpop.f32.mrb[36].mxu1  ;;  %12042 = vmatprep.subr.bf16.mxu1 %v17488_v19 }
 0x4ef   : > { %v8563_v63 = vshll.u32 %v8227_v62, 16  ;;  %23331 = vst [vmem:[#allocation45_spill] sm:$0xff] %v19987_v3  ;;  %v19989_v7 = vcombine.high %v6873_v43, %v6873_v43  ;;  %23333 = vst [vmem:[#allocation49_spill] sm:$0xff] %v19992_v57  ;;  %v20005_v41 = vpop.f32.mrb[37].mxu1  ;;  %v8561_v59 = vshrl.u32 %v8227_v62, 16  ;;  %v6891_v39 = vcombine.high %v19987_v3, %v19987_v3  ;;  %12043 = vmatpush1.bf16.msra.mxu1 %v17486_v8 }
 0x4f0   : > { %23330 = vst [vmem:[#allocation46_spill] sm:$0xff] %v19978_v49  ;;  %v19997_v56 = vrot.slane %v7648_v34, %v19557_v11  ;;  %v20000_v15 = vrot.slane %v16365_v60, %v19557_v11  ;;  %v20002_v5 = vcombine.low %v6890_v26, %v6873_v43  ;;  %v7650_v37 = vcombine.low %v6873_v43, %v19987_v3  ;;  %v20010_v6 = vpop.f32.mrb[38].mxu1 }
 0x4f1   : > { %23332 = vst [vmem:[#allocation48_spill] sm:$0xff] %v19989_v7  ;;  %v8565_v49 = vrot.slane %v8563_v63, 1  ;;  %v20014_v34 = vrot.slane %v19989_v7, %v19557_v11  ;;  %v8253_v60 = vcombine.low %v19992_v57, %v8251_v30  ;;  %v20018_v36 = vrot.slane %v7501_v35, %v19557_v11  ;;  %v6393_v26 = vpop.f32.mrb[39].mxu1 }
 0x4f2   : > { %23334 = vst [vmem:[#allocation47_spill] sm:$0xff] %v19997_v56  ;;  %23335 = vst [vmem:[#allocation53_spill] sm:$0xff] %v20002_v5  ;;  %v8244_v62 = vrot.slane %v8236_v22, %v19557_v11  ;;  %v16347_v43 = vpack.c.bf16 %v19951_v17, %v19938_v55  ;;  %v16348_v8 = vpack.c.bf16 %v6383_v52, %v6381_v45 }
 0x4f3   : > { %23336 = vst [vmem:[#allocation52_spill] sm:$0xff] %v20014_v34  ;;  %23337 = vst [vmem:[#allocation55_spill] sm:$0xff] %v20018_v36  ;;  %v8566_v63 = vor.u32 %v8565_v49, %v8561_v59  ;;  %v20026_v5 = vrot.slane %v7650_v37, %v19557_v11  ;;  %v8584_v3 = vshll.u32 %v8253_v60, 16  ;;  %v9094_v35 = vcombine.low %v19760_v47, %v19775_v23 }
 0x4f4   : > { %v8252_v30 = vcombine.low %v20018_v36, %v8244_v62  ;;  %v6900_v22 = vrot.slane %v16347_v43, %v19557_v11  ;;  %v6907_v19 = vrot.slane %v16348_v8, %v19557_v11  ;;  %v16374_v49 = vcombine.high %v19760_v47, %v19775_v23 }
 0x4f5   : > { %23338 = vst [vmem:[#allocation59_spill] sm:$0xff] %v20026_v5  ;;  %8744 = vrot.lane.b32.xlu0 %v8566_v63, %s17664_s22  ;;  %v23339_v37 = vcombine.low %v19810_v20, %v19821_v51  ;;  %v8582_v17 = vshrl.u32 %v8253_v60, 16  ;;  %v8586_v45 = vrot.slane %v8584_v3, 1  ;;  %v20043_v59 = vrot.slane %v9094_v35, %v19557_v11 }
 0x4f6   : > { %v8577_v52 = vshll.u32 %v8252_v30, 16  ;;  %v8575_v62 = vshrl.u32 %v8252_v30, 16  ;;  %v6908_v63 = vcombine.high %v6900_v22, %v6900_v22  ;;  %v20046_v43 = vrot.slane %v6900_v22, %v19557_v11  ;;  %v20048_v57 = vpop.f32.mrb[40].mxu1 }
 0x4f7   : > { %v20040_v55 = vrot.slane %v23339_v37, %v19557_v11  ;;  %23341 = vst [vmem:[#allocation58_spill] sm:$0xff] %v20043_v59  ;;  %v6909_v8 = vcombine.high %v6907_v19, %v6907_v19  ;;  %v8587_v47 = vor.u32 %v8586_v45, %v8582_v17  ;;  %v20051_v20 = vrot.slane %v6907_v19, %v19557_v11  ;;  %v20056_v3 = vpop.f32.mrb[41].mxu1 }
 0x4f8   : > { %v8579_v23 = vrot.slane %v8577_v52, 1  ;;  %v20054_v60 = vrot.slane %v16374_v49, %v19557_v11  ;;  %v20059_v35 = vrot.slane %v6908_v63, %v19557_v11  ;;  %v6938_v30 = vcombine.high %v20046_v43, %v20046_v43  ;;  %v20068_v17 = vpop.f32.mrb[42].mxu1 }
 0x4f9   : > { %23340 = vst [vmem:[#allocation60_spill] sm:$0xff] %v20040_v55  ;;  %v20064_v22 = vrot.slane %v6909_v8, %v19557_v11  ;;  %v9141_v37 = vrot.slane %v20040_v55, %v19557_v11  ;;  %8750 = vrot.lane.b32.xlu0 %v8587_v47, %s17664_s22  ;;  %v7558_v45 = vcombine.low %v19853_v14, %v19869_v40  ;;  %v20077_v63 = vpop.f32.mrb[43].mxu1 }
 0x4fa   : > { %23342 = vst [vmem:[#allocation62_spill] sm:$0xff] %v20054_v60  ;;  %v8580_v19 = vor.u32 %v8579_v23, %v8575_v62  ;;  %v9118_v49 = vcombine.low %v20043_v59, %v20054_v60  ;;  %v8261_v52 = vcombine.low %v19876_v25, %v19885_v24  ;;  %v20080_v8 = vcombine.low %v6891_v39, %v20046_v43 }
 0x4fb   : > { %23343 = vst [vmem:[#allocation61_spill] sm:$0xff] %v20064_v22  ;;  %v20083_v55 = vcombine.low %v20059_v35, %v6938_v30  ;;  %v6940_v62 = vcombine.high %v20059_v35, %v20059_v35  ;;  %v16366_v47 = vcombine.high %v20051_v20, %v20064_v22  ;;  %v20092_v59 = vrot.slane %v7558_v45, %v19557_v11 }
 0x4fc   : > { %8748 = vrot.lane.b32.xlu1 %v8580_v19, %s17664_s22  ;;  %v9127_v23 = vrot.slane %v9118_v49, %v19557_v11  ;;  %v8269_v60 = vrot.slane %v8261_v52, %v19557_v11  ;;  %v16349_v39 = vpack.c.bf16 %v20005_v41, %v19994_v32  ;;  %v16350_v7 = vpack.c.bf16 %v6393_v26, %v20010_v6 }
 0x4fd   : > { %23344 = vst [vmem:[#allocation57_spill] sm:$0xff] %v20092_v59  ;;  %v7707_v30 = vcombine.low %v6940_v62, %v20051_v20  ;;  %v7607_v19 = vrot.slane %v19926_v0, %v19557_v11  ;;  %v23345_v52 = vcombine.high %v19918_v27, %v19918_v27  ;;  %v20110_v32 = vrot.slane %v16366_v47, %v19557_v11 }
 0x4fe   : > { %v9149_v51 = vcombine.low %v9127_v23, %v9141_v37  ;;  %v8277_v49 = vcombine.low %v20092_v59, %v8269_v60  ;;  %v6950_v45 = vrot.slane %v16349_v39, %v19557_v11  ;;  %v6957_v62 = vrot.slane %v16350_v7, %v19557_v11  ;;  %v20115_v0 = vpop.f32.mrb[44].mxu1 }
 0x4ff   : > { %v8285_v41 = vrot.slane %v23345_v52, %v19557_v11  ;;  %v7616_v6 = vcombine.high %v19931_v9, %v7607_v19  ;;  %v7615_v26 = vcombine.low %v19931_v9, %v7607_v19  ;;  %v20118_v60 = vrot.slane %v7707_v30, %v19557_v11  ;;  %v20124_v47 = vpop.f32.mrb[45].mxu1 }
 0x500   : > { %9741 = vrot.lane.b32.xlu1 %v9149_v51, %s17665_s9  ;;  %v8591_v37 = vshll.u32 %v8277_v49, 16  ;;  %v6958_v23 = vcombine.high %v6950_v45, %v6950_v45  ;;  %v20122_v39 = vrot.slane %v6950_v45, %v19557_v11  ;;  %v6959_v52 = vcombine.high %v6957_v62, %v6957_v62  ;;  %v20133_v30 = vpop.f32.mrb[46].mxu1 }
 0x501   : > { %23346 = vst [vmem:[#allocation56_spill] sm:$0xff] %v20118_v60  ;;  %v20127_v7 = vrot.slane %v6957_v62, %v19557_v11  ;;  %v20130_v9 = vrot.slane %v7616_v6, %v19557_v11  ;;  %v8287_v19 = vcombine.high %v19961_v10, %v8285_v41  ;;  %v8589_v36 = vshrl.u32 %v8277_v49, 16  ;;  %v20140_v25 = vpop.f32.mrb[47].mxu1 }
 0x502   : > { %23347 = vst [vmem:[#allocation3_spill] sm:$0xff] %v20122_v39  ;;  %v8593_v51 = vrot.slane %v8591_v37, 1  ;;  %v20136_v59 = vrot.slane %v6958_v23, %v19557_v11  ;;  %v20143_v62 = vrot.slane %v6959_v52, %v19557_v11  ;;  %v20149_v14 = vrot.slane %v7615_v26, %v19557_v11 }
 0x503   : > { %23348 = vst [vmem:[#allocation5_spill] sm:$0xff] %v20130_v9  ;;  %v6989_v6 = vcombine.high %v20127_v7, %v20127_v7  ;;  %v8301_v24 = vrot.slane %v8287_v19, %v19557_v11  ;;  %v8286_v45 = vcombine.low %v19961_v10, %v8285_v41  ;;  %v20161_v19 = vrot.slane %v20127_v7, %v19557_v11 }
 0x504   : > { %23349 = vst [vmem:[#allocation6_spill] sm:$0xff] %v20136_v59  ;;  %23350 = vst [vmem:[#allocation7_spill] sm:$0xff] %v20149_v14  ;;  %v8594_v49 = vor.u32 %v8593_v51, %v8589_v36  ;;  %v7763_v37 = vcombine.low %v20122_v39, %v20136_v59  ;;  %v16367_v23 = vcombine.high %v20122_v39, %v20136_v59 }
 0x505   : > { %v6991_v52 = vcombine.high %v20143_v62, %v20143_v62  ;;  %v7819_v40 = vcombine.low %v20143_v62, %v6989_v6  ;;  %23351 = vst [vmem:[#allocation10_spill] sm:$0xff] %v20161_v19  ;;  %v8303_v26 = vcombine.low %v20130_v9, %v8301_v24  ;;  %v8294_v41 = vrot.slane %v8286_v45, %v19557_v11 }
 0x506   : > { %8752 = vrot.lane.b32.xlu0 %v8594_v49, %s17664_s22  ;;  %v20166_v36 = vrot.slane %v7763_v37, %v19557_v11  ;;  %v9209_v10 = vcombine.low %v19906_v46, %v19918_v27  ;;  %v20174_v6 = vrot.slane %v16367_v23, %v19557_v11  ;;  %v16376_v49 = vcombine.high %v19906_v46, %v19918_v27  ;;  %v20181_v37 = vpop.f32.mrb[48].mxu1 }
 0x507   : > { %v20177_v39 = vrot.slane %v7819_v40, %v19557_v11  ;;  %v8612_v24 = vshll.u32 %v8303_v26, 16  ;;  %v8302_v9 = vcombine.low %v20149_v14, %v8294_v41  ;;  %v23353_v45 = vcombine.high %v19865_v53, %v19879_v29  ;;  %v20195_v59 = vpop.f32.mrb[49].mxu1 }
 0x508   : > { %23352 = vst [vmem:[#allocation13_spill] sm:$0xff] %v20174_v6  ;;  %v20191_v23 = vrot.slane %v9209_v10, %v19557_v11  ;;  %v16351_v40 = vpack.c.bf16 %v20056_v3, %v20048_v57  ;;  %v8610_v2 = vshrl.u32 %v8303_v26, 16  ;;  %v20198_v27 = vrot.slane %v16376_v49, %v19557_v11  ;;  %v20202_v14 = vpop.f32.mrb[50].mxu1 }
 0x509   : > { %v20188_v51 = vrot.slane %v23353_v45, %v19557_v11  ;;  %v8614_v46 = vrot.slane %v8612_v24, 1  ;;  %v16352_v41 = vpack.c.bf16 %v20077_v63, %v20068_v17  ;;  %v8605_v29 = vshll.u32 %v8302_v9, 16  ;;  %v20213_v26 = vpop.f32.mrb[51].mxu1 }
 0x50a   : > { %23355 = vst [vmem:[#allocation23_spill] sm:$0xff] %v20191_v23  ;;  %23356 = vst [vmem:[#allocation33_spill] sm:$0xff] %v20198_v27  ;;  %v7000_v45 = vrot.slane %v16351_v40, %v19557_v11  ;;  %v23357_v57 = vcombine.low %v19997_v56, %v20000_v15  ;;  %v8603_v49 = vshrl.u32 %v8302_v9, 16  ;;  %v8311_v63 = vcombine.low %v20026_v5, %v20014_v34 }
 0x50b   : > { %23354 = vst [vmem:[#allocation22_spill] sm:$0xff] %v20188_v51  ;;  %v9232_v10 = vcombine.low %v20188_v51, %v20191_v23  ;;  %v8615_v24 = vor.u32 %v8614_v46, %v8610_v2  ;;  %v7007_v17 = vrot.slane %v16352_v41, %v19557_v11  ;;  %v8607_v53 = vrot.slane %v8605_v29, 1 }
 0x50c   : > { %v20211_v3 = vrot.slane %v23357_v57, %v19557_v11  ;;  %v7008_v23 = vcombine.high %v7000_v45, %v7000_v45  ;;  %v20220_v40 = vrot.slane %v7000_v45, %v19557_v11  ;;  %v8319_v2 = vrot.slane %v8311_v63, %v19557_v11 }
 0x50d   : > { %v9241_v51 = vrot.slane %v9232_v10, %v19557_v11  ;;  %8758 = vrot.lane.b32.xlu0 %v8615_v24, %s17664_s22  ;;  %v7009_v57 = vcombine.high %v7007_v17, %v7007_v17  ;;  %v7023_v56 = vrot.slane %v7007_v17, %v19557_v11  ;;  %v16353_v9 = vpack.c.bf16 %v20124_v47, %v20115_v0 }
 0x50e   : > { %23358 = vst [vmem:[#allocation34_spill] sm:$0xff] %v20211_v3  ;;  %v8608_v46 = vor.u32 %v8607_v53, %v8603_v49  ;;  %v9255_v41 = vrot.slane %v20198_v27, %v19557_v11  ;;  %v20230_v29 = vrot.slane %v7008_v23, %v19557_v11  ;;  %v7038_v10 = vcombine.high %v20220_v40, %v20220_v40  ;;  %v20239_v5 = vpop.f32.mrb[52].mxu1 }
 0x50f   : > { %v20235_v45 = vcombine.low %v6991_v52, %v20220_v40  ;;  %v7037_v24 = vrot.slane %v7009_v57, %v19557_v11  ;;  %v7039_v17 = vcombine.high %v7023_v56, %v7023_v56  ;;  %v8327_v63 = vcombine.low %v20211_v3, %v8319_v2  ;;  %v20246_v49 = vpop.f32.mrb[53].mxu1 }
 0x510   : > { %8756 = vrot.lane.b32.xlu1 %v8608_v46, %s17664_s22  ;;  %v9263_v53 = vcombine.low %v9241_v51, %v9255_v41  ;;  %v7821_v0 = vcombine.low %v20230_v29, %v7038_v10  ;;  %v7050_v47 = vrot.slane %v16353_v9, %v19557_v11  ;;  %v16354_v23 = vpack.c.bf16 %v20140_v25, %v20133_v30  ;;  %v20252_v3 = vpop.f32.mrb[54].mxu1  ;;  %v17491_v51 = vld [vmem:[%s22881_s3 + $0x104] ss:$8 sps:$4 sm:$0xff]  }
 0x511   : > { %v7876_v57 = vcombine.low %v7023_v56, %v7037_v24  ;;  %v16368_v27 = vcombine.high %v7023_v56, %v7037_v24  ;;  %v20250_v2 = vcombine.low %v7037_v24, %v7039_v17  ;;  %v8617_v46 = vshrl.u32 %v8327_v63, 16  ;;  %v20257_v25 = vpop.f32.mrb[55].mxu1  ;;  %12165 = vmatprep.subr.bf16.mxu1 %v17491_v51 }
 0x512   : > { %v8619_v9 = vshll.u32 %v8327_v63, 16  ;;  %v7041_v41 = vcombine.high %v7037_v24, %v7037_v24  ;;  %v7058_v10 = vcombine.high %v7050_v47, %v7050_v47  ;;  %v7066_v56 = vrot.slane %v7050_v47, %v19557_v11 }
 0x513   : > { %23359 = vst [vmem:[#allocation41_spill] sm:$0xff] %v20250_v2  ;;  %v20260_v30 = vrot.slane %v7876_v57, %v19557_v11  ;;  %v20263_v52 = vrot.slane %v16368_v27, %v19557_v11  ;;  %v7057_v17 = vrot.slane %v16354_v23, %v19557_v11  ;;  %v20269_v2 = vrot.slane %v7821_v0, %v19557_v11 }
 0x514   : > { %9749 = vrot.lane.b32.xlu1 %v9263_v53, %s17665_s9  ;;  %v8621_v24 = vrot.slane %v8619_v9, 1  ;;  %v20272_v63 = vrot.slane %v7058_v10, %v19557_v11  ;;  %v7721_v57 = vrot.slane %v20083_v55, %v19557_v11  ;;  %v20276_v34 = vcombine.high %v7066_v56, %v7066_v56 }
 0x515   : > { %23360 = vst [vmem:[#allocation42_spill] sm:$0xff] %v20269_v2  ;;  %v20278_v27 = vcombine.low %v7041_v41, %v7066_v56  ;;  %v7059_v47 = vcombine.high %v7057_v17, %v7057_v17  ;;  %v7714_v23 = vrot.slane %v20080_v8, %v19557_v11  ;;  %v20286_v9 = vrot.slane %v7057_v17, %v19557_v11 }
 0x516   : > { %23361 = vst [vmem:[#allocation51_spill] sm:$0xff] %v20272_v63  ;;  %23362 = vst [vmem:[#allocation54_spill] sm:$0xff] %v20276_v34  ;;  %v8622_v51 = vor.u32 %v8621_v24, %v8617_v46  ;;  %v7090_v53 = vcombine.high %v20272_v63, %v20272_v63  ;;  %v7878_v0 = vcombine.low %v7066_v56, %v20272_v63 }
 0x517   : > { %23363 = vst [vmem:[#allocation2_spill] sm:$0xff] %v20278_v27  ;;  %v20291_v10 = vrot.slane %v7059_v47, %v19557_v11  ;;  %v7730_v41 = vcombine.high %v7714_v23, %v7721_v57  ;;  %v8335_v27 = vrot.slane %v20064_v22, %v19557_v11  ;;  %v20301_v46 = vrot.slane %v20276_v34, %v19557_v11 }
 0x518   : > { %8760 = vrot.lane.b32.xlu0 %v8622_v51, %s17664_s22  ;;  %v20297_v8 = vrot.slane %v7878_v0, %v19557_v11  ;;  %v7089_v56 = vcombine.high %v20286_v9, %v20286_v9  ;;  %v7729_v17 = vcombine.low %v7714_v23, %v7721_v57  ;;  %v20306_v24 = vcombine.low %v7090_v53, %v20286_v9 }
 0x519   : > { %v8337_v47 = vcombine.high %v20118_v60, %v8335_v27  ;;  %v8336_v55 = vcombine.low %v20118_v60, %v8335_v27  ;;  %v9322_v51 = vcombine.low %v20046_v43, %v20059_v35  ;;  %v20313_v0 = vrot.slane %v7730_v41, %v19557_v11 }
 0x51a   : > { %23364 = vst [vmem:[#allocation63_spill] sm:$0xff] %v20297_v8  ;;  %v20316_v63 = vrot.slane %v7729_v17, %v19557_v11  ;;  %v16377_v34 = vcombine.high %v20046_v43, %v20059_v35  ;;  %v23367_v57 = vcombine.low %v20051_v20, %v20064_v22  ;;  %v7091_v41 = vcombine.high %v20291_v10, %v20291_v10 }
 0x51b   : > { %23365 = vst [vmem:[#allocation64_spill] sm:$0xff] %v20313_v0  ;;  %v8351_v27 = vrot.slane %v8337_v47, %v19557_v11  ;;  %v8344_v53 = vrot.slane %v8336_v55, %v19557_v11  ;;  %v20329_v60 = vrot.slane %v9322_v51, %v19557_v11  ;;  %v16355_v20 = vpack.c.bf16 %v20195_v59, %v20181_v37 }
 0x51c   : > { %23366 = vst [vmem:[#allocation65_spill] sm:$0xff] %v20316_v63  ;;  %v20324_v23 = vrot.slane %v23367_v57, %v19557_v11  ;;  %v20334_v17 = vrot.slane %v16377_v34, %v19557_v11  ;;  %v7786_v35 = vcombine.low %v20110_v32, %v20166_v36  ;;  %v8361_v51 = vcombine.low %v20174_v6, %v20161_v19 }
 0x51d   : > { %23369 = vst [vmem:[#allocation67_spill] sm:$0xff] %v20329_v60  ;;  %v8353_v55 = vcombine.low %v20313_v0, %v8351_v27  ;;  %v8352_v47 = vcombine.low %v20316_v63, %v8344_v53  ;;  %v16356_v34 = vpack.c.bf16 %v20213_v26, %v20202_v14  ;;  %v16357_v37 = vpack.c.bf16 %v20246_v49, %v20239_v5 }
 0x51e   : > { %23368 = vst [vmem:[#allocation66_spill] sm:$0xff] %v20324_v23  ;;  %23370 = vst [vmem:[#allocation68_spill] sm:$0xff] %v20334_v17  ;;  %v9369_v43 = vrot.slane %v20324_v23, %v19557_v11  ;;  %v9346_v57 = vcombine.low %v20329_v60, %v20334_v17  ;;  %v7100_v23 = vrot.slane %v16355_v20, %v19557_v11 }
 0x51f   : > { %v20352_v59 = vrot.slane %v7786_v35, %v19557_v11  ;;  %v8638_v27 = vshrl.u32 %v8353_v55, 16  ;;  %v8640_v0 = vshll.u32 %v8353_v55, 16  ;;  %v8631_v53 = vshrl.u32 %v8352_v47, 16 }
 0x520   : > { %v8633_v63 = vshll.u32 %v8352_v47, 16  ;;  %v9355_v22 = vrot.slane %v9346_v57, %v19557_v11  ;;  %v7108_v6 = vcombine.high %v7100_v23, %v7100_v23  ;;  %v20358_v14 = vrot.slane %v7100_v23, %v19557_v11 }
 0x521   : > { %23371 = vst [vmem:[#allocation69_spill] sm:$0xff] %v20352_v59  ;;  %v8369_v26 = vrot.slane %v8361_v51, %v19557_v11  ;;  %v8642_v60 = vrot.slane %v8640_v0, 1  ;;  %v7107_v35 = vrot.slane %v16356_v34, %v19557_v11  ;;  %v7150_v17 = vrot.slane %v16357_v37, %v19557_v11 }
 0x522   : > { %v8635_v20 = vrot.slane %v8633_v63, 1  ;;  %v20364_v5 = vcombine.low %v20291_v10, %v7089_v56  ;;  %v20367_v49 = vrot.slane %v7108_v6, %v19557_v11  ;;  %v7935_v55 = vcombine.low %v7091_v41, %v20358_v14 }
 0x523   : > { %v8377_v47 = vcombine.low %v20352_v59, %v8369_v26  ;;  %v8643_v23 = vor.u32 %v8642_v60, %v8638_v27  ;;  %v7109_v19 = vcombine.high %v7107_v35, %v7107_v35  ;;  %v20372_v0 = vrot.slane %v7107_v35, %v19557_v11 }
 0x524   : > { %v8636_v57 = vor.u32 %v8635_v20, %v8631_v53  ;;  %v9377_v63 = vcombine.low %v9355_v22, %v9369_v43  ;;  %v20375_v51 = vrot.slane %v7935_v55, %v19557_v11  ;;  %v16369_v56 = vcombine.high %v20358_v14, %v20367_v49 }
 0x525   : > { %23372 = vst [vmem:[#allocation70_spill] sm:$0xff] %v20372_v0  ;;  %8766 = vrot.lane.b32.xlu0 %v8643_v23, %s17664_s22  ;;  %v8645_v60 = vshrl.u32 %v8377_v47, 16  ;;  %v8647_v41 = vshll.u32 %v8377_v47, 16  ;;  %v20384_v34 = vrot.slane %v7109_v19, %v19557_v11  ;;  %v7158_v37 = vcombine.high %v7150_v17, %v7150_v17 }
 0x526   : > { %23373 = vst [vmem:[#allocation71_spill] sm:$0xff] %v20375_v51  ;;  %8764 = vrot.lane.b32.xlu1 %v8636_v57, %s17664_s22  ;;  %v20389_v43 = vrot.slane %v7150_v17, %v19557_v11  ;;  %v7835_v27 = vrot.slane %v20235_v45, %v19557_v11  ;;  %v23375_v53 = vcombine.high %v20230_v29, %v20230_v29 }
 0x527   : > { %23374 = vst [vmem:[#allocation72_spill] sm:$0xff] %v20384_v34  ;;  %v8649_v20 = vrot.slane %v8647_v41, 1  ;;  %v7991_v19 = vcombine.low %v20372_v0, %v20384_v34  ;;  %v16370_v35 = vcombine.high %v20372_v0, %v20384_v34  ;;  %v20402_v55 = vrot.slane %v7158_v37, %v19557_v11 }
 0x528   : > { %v8385_v26 = vrot.slane %v23375_v53, %v19557_v11  ;;  %v20405_v17 = vrot.slane %v16369_v56, %v19557_v11  ;;  %v7188_v45 = vcombine.high %v20389_v43, %v20389_v43  ;;  %v7844_v47 = vcombine.high %v20177_v39, %v7835_v27 }
 0x529   : > { %v8650_v57 = vor.u32 %v8649_v20, %v8645_v60  ;;  %v20413_v41 = vrot.slane %v7991_v19, %v19557_v11  ;;  %v20416_v53 = vrot.slane %v16370_v35, %v19557_v11  ;;  %v20420_v56 = vrot.slane %v20389_v43, %v19557_v11 }
 0x52a   : > { %v8387_v23 = vcombine.high %v20269_v2, %v8385_v26  ;;  %9757 = vrot.lane.b32.xlu1 %v9377_v63, %s17665_s9  ;;  %v7190_v37 = vcombine.high %v20402_v55, %v20402_v55  ;;  %v8047_v22 = vcombine.low %v20402_v55, %v7188_v45  ;;  %v20426_v6 = vrot.slane %v7844_v47, %v19557_v11 }
 0x52b   : > { %23376 = vst [vmem:[#allocation73_spill] sm:$0xff] %v20416_v53  ;;  %8768 = vrot.lane.b32.xlu0 %v8650_v57, %s17664_s22  ;;  %v7843_v60 = vcombine.low %v20177_v39, %v7835_v27  ;;  %v8386_v20 = vcombine.low %v20269_v2, %v8385_v26  ;;  %v16358_v19 = vpack.c.bf16 %v20257_v25, %v20252_v3 }
 0x52c   : > { %23377 = vst [vmem:[#allocation74_spill] sm:$0xff] %v20426_v6  ;;  %v8401_v63 = vrot.slane %v8387_v23, %v19557_v11  ;;  %v9437_v35 = vcombine.low %v20220_v40, %v20230_v29  ;;  %v20437_v59 = vrot.slane %v8047_v22, %v19557_v11  ;;  %v16379_v47 = vcombine.high %v20220_v40, %v20230_v29 }
 0x52d   : > { %v23378_v39 = vcombine.high %v20127_v7, %v20143_v62  ;;  %v20449_v26 = vrot.slane %v7843_v60, %v19557_v11  ;;  %v8394_v3 = vrot.slane %v8386_v20, %v19557_v11  ;;  %v7157_v25 = vrot.slane %v16358_v19, %v19557_v11 }
 0x52e   : > { %v8403_v45 = vcombine.low %v20426_v6, %v8401_v63  ;;  %v20454_v22 = vrot.slane %v9437_v35, %v19557_v11  ;;  %v20457_v40 = vrot.slane %v16379_v47, %v19557_v11  ;;  %v23383_v62 = vcombine.low %v20260_v30, %v20263_v52 }
 0x52f   : > { %v20446_v27 = vrot.slane %v23378_v39, %v19557_v11  ;;  %23380 = vst [vmem:[#allocation76_spill] sm:$0xff] %v20449_v26  ;;  %v8402_v63 = vcombine.low %v20449_v26, %v8394_v3  ;;  %v7159_v60 = vcombine.high %v7157_v25, %v7157_v25  ;;  %v20467_v20 = vrot.slane %v7157_v25, %v19557_v11 }
 0x530   : > { %23381 = vst [vmem:[#allocation77_spill] sm:$0xff] %v20454_v22  ;;  %v8666_v23 = vshrl.u32 %v8403_v45, 16  ;;  %v8668_v57 = vshll.u32 %v8403_v45, 16  ;;  %23382 = vst [vmem:[#allocation78_spill] sm:$0xff] %v20457_v40  ;;  %v20463_v29 = vrot.slane %v23383_v62, %v19557_v11  ;;  %v9483_v45 = vrot.slane %v20457_v40, %v19557_v11 }
 0x531   : > { %23379 = vst [vmem:[#allocation75_spill] sm:$0xff] %v20446_v27  ;;  %v9460_v19 = vcombine.low %v20446_v27, %v20454_v22  ;;  %v8411_v47 = vcombine.low %v20297_v8, %v20301_v46  ;;  %v7942_v39 = vrot.slane %v20306_v24, %v19557_v11  ;;  %v8659_v62 = vshrl.u32 %v8402_v63, 16 }
 0x532   : > { %23384 = vst [vmem:[#allocation79_spill] sm:$0xff] %v20463_v29  ;;  %v8670_v35 = vrot.slane %v8668_v57, 1  ;;  %v8661_v6 = vshll.u32 %v8402_v63, 16  ;;  %v20478_v3 = vrot.slane %v7159_v60, %v19557_v11  ;;  %v7189_v25 = vcombine.high %v20467_v20, %v20467_v20 }
 0x533   : > { %v8048_v57 = vcombine.low %v7190_v37, %v20467_v20  ;;  %v9469_v2 = vrot.slane %v9460_v19, %v19557_v11  ;;  %v8419_v40 = vrot.slane %v8411_v47, %v19557_v11  ;;  %v7949_v63 = vrot.slane %v20364_v5, %v19557_v11 }
 0x534   : > { %v8671_v26 = vor.u32 %v8670_v35, %v8666_v23  ;;  %v8663_v27 = vrot.slane %v8661_v6, 1  ;;  %v7191_v22 = vcombine.high %v20478_v3, %v20478_v3  ;;  %v8049_v24 = vcombine.low %v20478_v3, %v7189_v25 }
 0x535   : > { %v9491_v60 = vcombine.low %v9469_v2, %v9483_v45  ;;  %v8427_v23 = vcombine.low %v20463_v29, %v8419_v40  ;;  %v8435_v37 = vrot.slane %v20367_v49, %v19557_v11  ;;  %v9550_v19 = vcombine.low %v20286_v9, %v20291_v10 }
 0x536   : > { %8774 = vrot.lane.b32.xlu0 %v8671_v26, %s17664_s22  ;;  %v8664_v6 = vor.u32 %v8663_v27, %v8659_v62  ;;  %v20497_v35 = vrot.slane %v8049_v24, %v19557_v11  ;;  %v7958_v47 = vcombine.high %v7942_v39, %v7949_v63  ;;  %v7957_v25 = vcombine.low %v7942_v39, %v7949_v63 }
 0x537   : > { %v8673_v0 = vshrl.u32 %v8427_v23, 16  ;;  %v8675_v34 = vshll.u32 %v8427_v23, 16  ;;  %v8437_v5 = vcombine.high %v20375_v51, %v8435_v37  ;;  %v8436_v2 = vcombine.low %v20375_v51, %v8435_v37 }
 0x538   : > { %23385 = vst [vmem:[#allocation80_spill] sm:$0xff] %v20497_v35  ;;  %8772 = vrot.lane.b32.xlu1 %v8664_v6, %s17664_s22  ;;  %v20503_v26 = vrot.slane %v7958_v47, %v19557_v11  ;;  %v20506_v40 = vrot.slane %v7957_v25, %v19557_v11  ;;  %v16380_v27 = vcombine.high %v20286_v9, %v20291_v10 }
 0x539   : > { %v20511_v45 = vrot.slane %v9550_v19, %v19557_v11  ;;  %v8677_v39 = vrot.slane %v8675_v34, 1  ;;  %v8451_v62 = vrot.slane %v8437_v5, %v19557_v11  ;;  %v8444_v24 = vrot.slane %v8436_v2, %v19557_v11 }
 0x53a   : > { %23386 = vst [vmem:[#allocation81_spill] sm:$0xff] %v20503_v26  ;;  %23387 = vst [vmem:[#allocation82_spill] sm:$0xff] %v20506_v40  ;;  %v23388_v63 = vcombine.low %v20358_v14, %v20367_v49  ;;  %v20522_v37 = vrot.slane %v16380_v27, %v19557_v11  ;;  %v8014_v9 = vcombine.low %v20405_v17, %v20413_v41 }
 0x53b   : > { %v8461_v10 = vcombine.low %v20416_v53, %v20420_v56  ;;  %v8063_v34 = vrot.slane %v8048_v57, %v19557_v11  ;;  %v8678_v19 = vor.u32 %v8677_v39, %v8673_v0  ;;  %v8453_v6 = vcombine.low %v20503_v26, %v8451_v62 }
 0x53c   : > { %v20519_v23 = vrot.slane %v23388_v63, %v19557_v11  ;;  %v8452_v47 = vcombine.low %v20506_v40, %v8444_v24  ;;  %9765 = vrot.lane.b32.xlu1 %v9491_v60, %s17665_s9  ;;  %v9574_v25 = vcombine.low %v20511_v45, %v20522_v37  ;;  %v20537_v5 = vrot.slane %v8014_v9, %v19557_v11 }
 0x53d   : > { %v8469_v2 = vrot.slane %v8461_v10, %v19557_v11  ;;  %v8072_v57 = vcombine.high %v20437_v59, %v8063_v34  ;;  %v16381_v0 = vcombine.high %v20389_v43, %v20402_v55  ;;  %8776 = vrot.lane.b32.xlu0 %v8678_v19, %s17664_s22  ;;  %v8694_v27 = vshrl.u32 %v8453_v6, 16 }
 0x53e   : > { %v9597_v14 = vrot.slane %v20519_v23, %v19557_v11  ;;  %23389 = vst [vmem:[#allocation83_spill] sm:$0xff] %v20537_v5  ;;  %v8696_v39 = vshll.u32 %v8453_v6, 16  ;;  %v8689_v62 = vshll.u32 %v8452_v47, 16  ;;  %v8687_v24 = vshrl.u32 %v8452_v47, 16 }
 0x53f   : > { %v9583_v60 = vrot.slane %v9574_v25, %v19557_v11  ;;  %v8477_v63 = vcombine.low %v20537_v5, %v8469_v2  ;;  %v8485_v9 = vrot.slane %v7191_v22, %v19557_v11  ;;  %v8071_v10 = vcombine.low %v20437_v59, %v8063_v34 }
 0x540   : > { %v8698_v40 = vrot.slane %v8696_v39, 1  ;;  %v8691_v26 = vrot.slane %v8689_v62, 1  ;;  %v8128_v29 = vcombine.low %v19605_v48, %v19613_v13  ;;  %v20551_v19 = vrot.slane %v8072_v57, %v19557_v11 }
 0x541   : > { %v9605_v55 = vcombine.low %v9583_v60, %v9597_v14  ;;  %v8703_v51 = vshll.u32 %v8477_v63, 16  ;;  %v8487_v6 = vcombine.high %v20497_v35, %v8485_v9  ;;  %v20555_v2 = vrot.slane %v8071_v10, %v19557_v11 }
 0x542   : > { %23390 = vst [vmem:[#allocation84_spill] sm:$0xff] %v20551_v19  ;;  %v8699_v47 = vor.u32 %v8698_v40, %v8694_v27  ;;  %v8692_v25 = vor.u32 %v8691_v26, %v8687_v24  ;;  %v8486_v22 = vcombine.low %v20497_v35, %v8485_v9  ;;  %v8701_v39 = vshrl.u32 %v8477_v63, 16  ;;  %v23413_v35 = vld [vmem:[#allocation26_spill] sm:$0xff] }
 0x543   : > { %23391 = vst [vmem:[#allocation85_spill] sm:$0xff] %v20555_v2  ;;  %v8705_v62 = vrot.slane %v8703_v51, 1  ;;  %v8501_v59 = vrot.slane %v8487_v6, %v19557_v11  ;;  %v8514_v34 = vshll.u32 %v8128_v29, 16  ;;  %v8512_v14 = vshrl.u32 %v8128_v29, 16 }
 0x544   : > { %8782 = vrot.lane.b32.xlu0 %v8699_v47, %s17664_s22  ;;  %8780 = vrot.lane.b32.xlu1 %v8692_v25, %s17664_s22  ;;  %v8494_v13 = vrot.slane %v8486_v22, %v19557_v11  ;;  %v9665_v26 = vcombine.low %v20467_v20, %v20478_v3  ;;  %v16382_v40 = vcombine.high %v20467_v20, %v20478_v3 }
 0x545   : > { %v8706_v57 = vor.u32 %v8705_v62, %v8701_v39  ;;  %v8503_v27 = vcombine.low %v20551_v19, %v8501_v59  ;;  %v8516_v51 = vrot.slane %v8514_v34, 1  ;;  %v20568_v24 = vrot.slane %v16381_v0, %v19557_v11  ;;  %v23411_v19 = vld [vmem:[#allocation52_spill] sm:$0xff] }
 0x546   : > { %v8502_v60 = vcombine.low %v20555_v2, %v8494_v13  ;;  %v20572_v63 = vrot.slane %v9665_v26, %v19557_v11  ;;  %v20575_v29 = vrot.slane %v16382_v40, %v19557_v11  ;;  %v7331_v9 = vcombine.high %v19645_v31, %v19672_v58 }
 0x547   : > { %v8722_v20 = vshrl.u32 %v8503_v27, 16  ;;  %v8724_v3 = vshll.u32 %v8503_v27, 16  ;;  %v8517_v10 = vor.u32 %v8516_v51, %v8512_v14  ;;  %v8162_v6 = vcombine.high %v19675_v42, %v19680_v54 }
 0x548   : > { %23392 = vst [vmem:[#allocation86_spill] sm:$0xff] %v20575_v29  ;;  %9773 = vrot.lane.b32.xlu1 %v9605_v55, %s17665_s9  ;;  %8784 = vrot.lane.b32.xlu0 %v8706_v57, %s17664_s22  ;;  %v8715_v0 = vshrl.u32 %v8502_v60, 16  ;;  %v8717_v47 = vshll.u32 %v8502_v60, 16  ;;  %v9688_v25 = vcombine.low %v20568_v24, %v20572_v63  ;;  %v9711_v22 = vrot.slane %v20575_v29, %v19557_v11 }
 0x549   : > { %v8726_v31 = vrot.slane %v8724_v3, 1  ;;  %v20588_v58 = vrot.slane %v7331_v9, %v19557_v11  ;;  %v8176_v39 = vrot.slane %v8162_v6, %v19557_v11  ;;  %v8811_v54 = vcombine.low %v19579_v33, %v19581_v44 }
 0x54a   : > { %v8719_v55 = vrot.slane %v8717_v47, 1  ;;  %v9697_v62 = vrot.slane %v9688_v25, %v19557_v11  ;;  %v20596_v59 = vrot.slane %v19576_v38, %v19557_v11  ;;  %v20600_v34 = vrot.slane %v19586_v61, %v19557_v11 }
 0x54b   : > { %v8727_v13 = vor.u32 %v8726_v31, %v8722_v20  ;;  %v8178_v14 = vcombine.low %v20588_v58, %v8176_v39  ;;  %v20604_v26 = vrot.slane %v8811_v54, %v19557_v11  ;;  %v7218_v33 = vcombine.high %v19590_v28, %v19590_v28  ;;  %v20618_v20 = vpop.permute.xlu0 %8728  ;;  %v20630_v39 = vpop.permute.xlu1 %9725 }
 0x54c   : > { %v8720_v44 = vor.u32 %v8719_v55, %v8715_v0  ;;  %v9719_v40 = vcombine.low %v9697_v62, %v9711_v22  ;;  %v8833_v57 = vcombine.low %v20596_v59, %v20600_v34  ;;  %v7239_v38 = vrot.slane %v19590_v28, %v19557_v11  ;;  %23393 = vst [vmem:[#allocation87_spill] sm:$0xff] %v20618_v20 }
 0x54d   : > { %8790 = vrot.lane.b32.xlu0 %v8727_v13, %s17664_s22  ;;  %v8540_v61 = vshrl.u32 %v8178_v14, 16  ;;  %v8542_v27 = vshll.u32 %v8178_v14, 16  ;;  %v8856_v51 = vrot.slane %v20604_v26, %v19557_v11  ;;  %v7246_v60 = vrot.slane %v7218_v33, %v19557_v11  ;;  %23394 = vst [vmem:[#allocation88_spill] sm:$0xff] %v20630_v39  ;;  %v23397_v13 = vld [vmem:[#allocation14_spill] sm:$0xff] }
 0x54e   : > { %8788 = vrot.lane.b32.xlu1 %v8720_v44, %s17664_s22  ;;  %v8842_v9 = vrot.slane %v8833_v57, %v19557_v11  ;;  %v7247_v3 = vcombine.low %v19599_v18, %v7239_v38  ;;  %v7445_v28 = vcombine.high %v19744_v12, %v19747_v1  ;;  %v8212_v6 = vcombine.high %v19783_v4, %v19779_v21  ;;  %v23395_v1 = vld [vmem:[#allocation8_spill] sm:$0xff] }
 0x54f   : > { %v8544_v0 = vrot.slane %v8542_v27, 1  ;;  %v7248_v47 = vcombine.low %v19605_v48, %v7246_v60  ;;  %v6591_v25 = vcombine.high %v19610_v16, %v19610_v16  ;;  %v6640_v22 = vcombine.high %v19648_v50, %v19648_v50  ;;  %v23399_v27 = vld [vmem:[#allocation30_spill] sm:$0xff] }
 0x550   : > { %v8864_v31 = vcombine.low %v8842_v9, %v8856_v51  ;;  %v20633_v54 = vrot.slane %v7445_v28, %v19557_v11  ;;  %v8226_v12 = vrot.slane %v8212_v6, %v19557_v11  ;;  %v23396_v21 = vcombine.high %v23395_v1, %v23395_v1  ;;  %v23400_v60 = vld [vmem:[#allocation38_spill] sm:$0xff]  ;;  %v23401_v9 = vld [vmem:[#allocation36_spill] sm:$0xff] }
 0x551   : > { %8730 = vrot.lane.b32.xlu0 %v8517_v10, %s17664_s22  ;;  %v8545_v48 = vor.u32 %v8544_v0, %v8540_v61  ;;  %v9805_v16 = vsel %vm8792_vm5, %v7248_v47, %v20618_v20  ;;  %v8923_v62 = vcombine.low %v6591_v25, %v23395_v1  ;;  %v8925_v14 = vcombine.low %v6640_v22, %v23397_v13  ;;  %v23398_v61 = vld [vmem:[#allocation29_spill] sm:$0xff]  ;;  %v23402_v28 = vld [vmem:[#allocation4_spill] sm:$0xff]  ;;  %v8735_v47 = vpop.permute.xlu1 %8734 }
 0x552   : > { %v8924_v55 = vcombine.low %v19648_v50, %v23396_v21  ;;  %9781 = vrot.lane.b32.xlu1 %v9719_v40, %s17665_s9  ;;  %v16383_v33 = vcombine.low %v19599_v18, %v9805_v16  ;;  %v9932_v44 = vcombine.high %v7247_v3, %v9805_v16  ;;  %v8228_v57 = vcombine.low %v20633_v54, %v8226_v12  ;;  %v23404_v16 = vld [vmem:[#allocation19_spill] sm:$0xff]  ;;  %v23405_v13 = vld [vmem:[#allocation21_spill] sm:$0xff] }
 0x553   : > { %v20652_v50 = vrot.slane %v8923_v62, %v19557_v11  ;;  %v20655_v10 = vrot.slane %v8925_v14, %v19557_v11  ;;  %v7559_v51 = vcombine.high %v23399_v27, %v23398_v61  ;;  %v8262_v40 = vcombine.high %v23401_v9, %v23400_v60  ;;  %v23406_v14 = vld [vmem:[#allocation24_spill] sm:$0xff] }
 0x554   : > { %v20649_v38 = vrot.slane %v8924_v55, %v19557_v11  ;;  %v20662_v18 = vrot.slane %v16383_v33, %v23402_v28  ;;  %v20665_v3 = vrot.slane %v9932_v44, %v23402_v28  ;;  %v8568_v6 = vshrl.u32 %v8228_v57, 16  ;;  %v23403_v55 = vld [vmem:[#allocation25_spill] sm:$0xff] }
 0x555   : > { %v8570_v0 = vshll.u32 %v8228_v57, 16  ;;  %8738 = vrot.lane.b32.xlu0 %v8545_v48, %s17664_s22  ;;  %v8970_v22 = vrot.slane %v20655_v10, %v19557_v11  ;;  %v20673_v12 = vrot.slane %v7559_v51, %v19557_v11  ;;  %v8276_v1 = vrot.slane %v8262_v40, %v19557_v11  ;;  %v8733_v51 = vpop.permute.xlu0 %8732 }
 0x556   : > { %v8947_v25 = vcombine.low %v20652_v50, %v20649_v38  ;;  %9721 = vrot.lane.b32.xlu1 %v8864_v31, %s17665_s9  ;;  %v9039_v62 = vcombine.low %v23404_v16, %v23403_v55  ;;  %v20681_v48 = vrot.slane %v23405_v13, %v19557_v11  ;;  %v20685_v33 = vrot.slane %v23406_v14, %v19557_v11  ;;  %v23407_v31 = vld [vmem:[#allocation12_spill] sm:$0xff] }
 0x557   : > { %v8572_v21 = vrot.slane %v8570_v0, 1  ;;  %v8278_v57 = vcombine.low %v20673_v12, %v8276_v1  ;;  %v9856_v61 = vsel %vm6047_vm4, %v8735_v47, %v20630_v39  ;;  %v7275_v27 = vcombine.high %v23407_v31, %v23407_v31 }
 0x558   : > { %v8956_v44 = vrot.slane %v8947_v25, %v19557_v11  ;;  %v20694_v40 = vrot.slane %v9039_v62, %v19557_v11  ;;  %v9061_v0 = vcombine.low %v20681_v48, %v20685_v33  ;;  %v7296_v55 = vrot.slane %v23407_v31, %v19557_v11  ;;  %v23409_v31 = vld [vmem:[#allocation18_spill] sm:$0xff] }
 0x559   : > { %v8573_v60 = vor.u32 %v8572_v21, %v8568_v6  ;;  %v8596_v16 = vshrl.u32 %v8278_v57, 16  ;;  %v8598_v1 = vshll.u32 %v8278_v57, 16  ;;  %v7303_v13 = vrot.slane %v7275_v27, %v19557_v11  ;;  %v23408_v21 = vld [vmem:[#allocation17_spill] sm:$0xff]  ;;  %v23410_v27 = vld [vmem:[#allocation47_spill] sm:$0xff] }
 0x55a   : > { %v8978_v25 = vcombine.low %v8956_v44, %v8970_v22  ;;  %v9070_v14 = vrot.slane %v9061_v0, %v19557_v11  ;;  %v9084_v6 = vrot.slane %v20694_v40, %v19557_v11  ;;  %v7304_v62 = vcombine.low %v23408_v21, %v7296_v55  ;;  %v23412_v0 = vld [vmem:[#allocation59_spill] sm:$0xff] }
 0x55b   : > { %8746 = vrot.lane.b32.xlu0 %v8573_v60, %s17664_s22  ;;  %v8794_v39 = vsel %vm8792_vm5, %v8733_v51, %v8735_v47  ;;  %v8600_v20 = vrot.slane %v8598_v1, 1  ;;  %v7305_v22 = vcombine.low %v23409_v31, %v7303_v13  ;;  %v7673_v60 = vcombine.high %v23410_v27, %v20000_v15  ;;  %v23426_v27 = vld [vmem:[#allocation45_spill] sm:$0xff] }
 0x55c   : > { %9729 = vrot.lane.b32.xlu1 %v8978_v25, %s17665_s9  ;;  %v9985_v44 = vcombine.low %v8794_v39, %v9856_v61  ;;  %v9986_v57 = vcombine.high %v8794_v39, %v9856_v61  ;;  %v9092_v2 = vcombine.low %v9070_v14, %v9084_v6  ;;  %v8312_v5 = vcombine.high %v23412_v0, %v23411_v19 }
 0x55d   : > { %v6790_v29 = vcombine.high %v23413_v35, %v23413_v35  ;;  %v8601_v55 = vor.u32 %v8600_v20, %v8596_v16  ;;  %v9808_v47 = vsel %vm8792_vm5, %v7305_v22, %v8733_v51  ;;  %v20724_v15 = vrot.slane %v7673_v60, %v19557_v11  ;;  %v23416_v35 = vld [vmem:[#allocation28_spill] sm:$0xff]  ;;  %v23417_v51 = vld [vmem:[#allocation35_spill] sm:$0xff] }
 0x55e   : > { %v20717_v25 = vrot.slane %v9985_v44, %v23402_v28  ;;  %v20720_v1 = vrot.slane %v9986_v57, %v23402_v28  ;;  %v16384_v39 = vcombine.low %v23408_v21, %v9808_v47  ;;  %v9984_v61 = vcombine.high %v7304_v62, %v9808_v47  ;;  %v23420_v62 = vld [vmem:[#allocation31_spill] sm:$0xff] }
 0x55f   : > { %v8326_v19 = vrot.slane %v8312_v5, %v19557_v11  ;;  %8754 = vrot.lane.b32.xlu0 %v8601_v55, %s17664_s22  ;;  %v6791_v20 = vcombine.high %v23416_v35, %v23416_v35  ;;  %v9151_v16 = vcombine.low %v6790_v29, %v23417_v51  ;;  %v23418_v13 = vcombine.high %v23417_v51, %v23417_v51  ;;  %v20766_v51 = vpop.permute.xlu0 %8736 }
 0x560   : > { %23414 = vst [vmem:[#allocation8_spill] sm:$0xff] %v20717_v25  ;;  %23415 = vst [vmem:[#allocation14_spill] sm:$0xff] %v20720_v1  ;;  %9737 = vrot.lane.b32.xlu1 %v9092_v2, %s17665_s9  ;;  %v9993_v6 = vrot.slane %v16384_v39, %v23402_v28  ;;  %v20738_v21 = vrot.slane %v9984_v61, %v23402_v28  ;;  %v7332_v2 = vcombine.high %v19675_v42, %v19675_v42 }
 0x561   : > { %v9152_v14 = vcombine.low %v23416_v35, %v23418_v13  ;;  %v8328_v5 = vcombine.low %v20724_v15, %v8326_v19  ;;  %v9153_v31 = vcombine.low %v6791_v20, %v23420_v62  ;;  %v20745_v22 = vrot.slane %v9151_v16, %v19557_v11  ;;  %23422 = vst [vmem:[#allocation30_spill] sm:$0xff] %v20766_v51  ;;  %v23423_v16 = vld [vmem:[#allocation10_spill] sm:$0xff]  ;;  %v23424_v13 = vld [vmem:[#allocation13_spill] sm:$0xff] }
 0x562   : > { %23419 = vst [vmem:[#allocation29_spill] sm:$0xff] %v20738_v21  ;;  %v7353_v44 = vrot.slane %v19675_v42, %v19557_v11  ;;  %v10016_v57 = vcombine.high %v9993_v6, %v20717_v25  ;;  %v16399_v60 = vcombine.low %v20665_v3, %v9993_v6  ;;  %v7360_v19 = vrot.slane %v7332_v2, %v19557_v11  ;;  %v23421_v42 = vld [vmem:[#allocation15_spill] sm:$0xff] }
 0x563   : > { %v20748_v29 = vrot.slane %v9152_v14, %v19557_v11  ;;  %v8624_v55 = vshrl.u32 %v8328_v5, 16  ;;  %v8626_v47 = vshll.u32 %v8328_v5, 16  ;;  %v20757_v39 = vrot.slane %v9153_v31, %v19557_v11 }
 0x564   : > { %v20763_v35 = vcombine.low %v10016_v57, %v20738_v21  ;;  %v7361_v20 = vcombine.low %v23421_v42, %v7353_v44  ;;  %v7787_v3 = vcombine.high %v20110_v32, %v20166_v36  ;;  %v8362_v14 = vcombine.high %v23424_v13, %v23423_v16  ;;  %v23425_v57 = vld [vmem:[#allocation48_spill] sm:$0xff]  ;;  %v23427_v32 = vld [vmem:[#allocation46_spill] sm:$0xff]  ;;  %v23428_v21 = vld [vmem:[#allocation53_spill] sm:$0xff] }
 0x565   : > { %v9175_v61 = vcombine.low %v20745_v22, %v20748_v29  ;;  %v8628_v6 = vrot.slane %v8626_v47, 1  ;;  %v9198_v62 = vrot.slane %v20757_v39, %v19557_v11  ;;  %v7362_v2 = vcombine.low %v20588_v58, %v7360_v19 }
 0x566   : > { %v20777_v31 = vrot.slane %v7787_v3, %v19557_v11  ;;  %v8376_v44 = vrot.slane %v8362_v14, %v19557_v11  ;;  %v9267_v1 = vcombine.low %v23426_v27, %v23425_v57  ;;  %v20784_v36 = vrot.slane %v23427_v32, %v19557_v11  ;;  %v23429_v57 = vld [vmem:[#allocation61_spill] sm:$0xff]  ;;  %v23430_v32 = vld [vmem:[#allocation6_spill] sm:$0xff] }
 0x567   : > { %v9184_v5 = vrot.slane %v9175_v61, %v19557_v11  ;;  %v8629_v47 = vor.u32 %v8628_v6, %v8624_v55  ;;  %v9811_v61 = vsel %vm8792_vm5, %v7362_v2, %v20766_v51  ;;  %v20790_v58 = vrot.slane %v23428_v21, %v19557_v11 }
 0x568   : > { %v16385_v19 = vcombine.low %v23421_v42, %v9811_v61  ;;  %v10036_v3 = vcombine.high %v7361_v20, %v9811_v61  ;;  %v8378_v14 = vcombine.low %v20777_v31, %v8376_v44  ;;  %v20795_v27 = vrot.slane %v9267_v1, %v19557_v11 }
 0x569   : > { %v9206_v16 = vcombine.low %v9184_v5, %v9198_v62  ;;  %8762 = vrot.lane.b32.xlu0 %v8629_v47, %s17664_s22  ;;  %v9289_v55 = vcombine.low %v20784_v36, %v20790_v58  ;;  %v7901_v6 = vcombine.high %v20260_v30, %v20263_v52  ;;  %v8412_v21 = vcombine.high %v20297_v8, %v20301_v46  ;;  %v8743_v8 = vpop.permute.xlu0 %8742 }
 0x56a   : > { %v10045_v42 = vrot.slane %v16385_v19, %v23402_v28  ;;  %v20807_v20 = vrot.slane %v10036_v3, %v23402_v28  ;;  %v8652_v1 = vshrl.u32 %v8378_v14, 16  ;;  %v8654_v5 = vshll.u32 %v8378_v14, 16 }
 0x56b   : > { %9745 = vrot.lane.b32.xlu1 %v9206_v16, %s17665_s9  ;;  %v9298_v62 = vrot.slane %v9289_v55, %v19557_v11  ;;  %v9312_v2 = vrot.slane %v20795_v27, %v19557_v11  ;;  %v20813_v44 = vrot.slane %v7901_v6, %v19557_v11  ;;  %v8426_v52 = vrot.slane %v8412_v21, %v19557_v11  ;;  %v23431_v16 = vld [vmem:[#allocation3_spill] sm:$0xff]  ;;  %v8741_v21 = vpop.permute.xlu1 %8740 }
 0x56c   : > { %v8656_v30 = vrot.slane %v8654_v5, 1  ;;  %v6941_v46 = vcombine.high %v23429_v57, %v23429_v57  ;;  %v6990_v47 = vcombine.high %v23430_v32, %v23430_v32  ;;  %v23432_v61 = vcombine.high %v23431_v16, %v23431_v16 }
 0x56d   : > { %v9320_v3 = vcombine.low %v9298_v62, %v9312_v2  ;;  %v8428_v14 = vcombine.low %v20813_v44, %v8426_v52  ;;  %v10857_v55 = vrot.slane %v20662_v18, %v23402_v28  ;;  %v10871_v6 = vrot.slane %v16399_v60, %v23402_v28  ;;  %v17489_v18 = vld [vmem:[%s22881_s3 + $0x100] ss:$8 sps:$4 sm:$0xff]  }
 0x56e   : > { %v9380_v19 = vcombine.low %v23430_v32, %v23432_v61  ;;  %v8657_v5 = vor.u32 %v8656_v30, %v8652_v1  ;;  %v9379_v57 = vcombine.low %v6941_v46, %v23431_v16  ;;  %v9381_v51 = vcombine.low %v6990_v47, %v20127_v7  ;;  %v23433_v1 = vld [vmem:[#allocation16_spill] sm:$0xff] }
 0x56f   : > { %9753 = vrot.lane.b32.xlu1 %v9320_v3, %s17665_s9  ;;  %v8680_v62 = vshrl.u32 %v8428_v14, 16  ;;  %v8682_v2 = vshll.u32 %v8428_v14, 16  ;;  %v10879_v52 = vcombine.low %v10857_v55, %v10871_v6  ;;  %v10880_v32 = vcombine.high %v10857_v55, %v10871_v6  ;;  %v17494_v47 = vld [vmem:[%s22881_s3 + $0x114] ss:$8 sps:$4 sm:$0xff]  }
 0x570   : > { %v20831_v25 = vrot.slane %v9380_v19, %v19557_v11  ;;  %8770 = vrot.lane.b32.xlu0 %v8657_v5, %s17664_s22  ;;  %v20839_v60 = vrot.slane %v9379_v57, %v19557_v11  ;;  %v20842_v7 = vrot.slane %v9381_v51, %v19557_v11  ;;  %v7389_v30 = vcombine.high %v23433_v1, %v23433_v1  ;;  %v23434_v6 = vld [vmem:[#allocation37_spill] sm:$0xff] }
 0x571   : > { %v7410_v46 = vrot.slane %v23433_v1, %v19557_v11  ;;  %v8684_v16 = vrot.slane %v8682_v2, 1  ;;  %12044 = vmatprep.mubr.bf16.mxu1 %v10880_v32  ;;  %v8796_v61 = vsel %vm8792_vm5, %v8741_v21, %v8743_v8  ;;  %v8015_v19 = vcombine.high %v20405_v17, %v20413_v41  ;;  %v23435_v41 = vld [vmem:[#allocation54_spill] sm:$0xff]  ;;  %v23436_v32 = vld [vmem:[#allocation51_spill] sm:$0xff]  ;;  %v20868_v1 = vpop.permute.xlu1 %9733 }
 0x572   : > { %v8462_v51 = vcombine.high %v20416_v53, %v20420_v56  ;;  %v9403_v3 = vcombine.low %v20839_v60, %v20831_v25  ;;  %v9426_v14 = vrot.slane %v20842_v7, %v19557_v11  ;;  %12045 = vmatmul.mubr.bf16.vlgmr.msra.gmra.mrb[56].mxu1 %v10879_v52  ;;  %v7417_v55 = vrot.slane %v7389_v30, %v19557_v11  ;;  %v17492_v52 = vld [vmem:[%s22881_s3 + $0x110] ss:$8 sps:$4 sm:$0xff]   ;;  %v23437_v53 = vld [vmem:[#allocation27_spill] sm:$0xff] }
 0x573   : > { %v7418_v5 = vcombine.low %v23434_v6, %v7410_v46  ;;  %v8685_v57 = vor.u32 %v8684_v16, %v8680_v62  ;;  %v20863_v2 = vrot.slane %v8015_v19, %v19557_v11  ;;  %v9495_v56 = vcombine.low %v23436_v32, %v23435_v41  ;;  %12166 = vmatpush1.bf16.msra.mxu1 %v17489_v18  ;;  %v23438_v62 = vld [vmem:[#allocation41_spill] sm:$0xff]  ;;  %v23439_v19 = vld [vmem:[#allocation2_spill] sm:$0xff] }
 0x574   : > { %v8476_v17 = vrot.slane %v8462_v51, %v19557_v11  ;;  %v9412_v30 = vrot.slane %v9403_v3, %v19557_v11  ;;  %v7419_v46 = vcombine.low %v23437_v53, %v7417_v55  ;;  %v20877_v16 = vrot.slane %v23438_v62, %v19557_v11  ;;  %12167 = vmatprep.subr.bf16.mxu1 %v17494_v47  ;;  %v17497_v55 = vld [vmem:[%s22881_s3 + $0x124] ss:$8 sps:$4 sm:$0xff]  }
 0x575   : > { %v20881_v51 = vrot.slane %v23439_v19, %v19557_v11  ;;  %8778 = vrot.lane.b32.xlu0 %v8685_v57, %s17664_s22  ;;  %v20886_v41 = vrot.slane %v9495_v56, %v19557_v11  ;;  %v10911_v3 = vrot.slane %v20763_v35, %v23402_v28  ;;  %v10925_v53 = vrot.slane %v10045_v42, %v23402_v28  ;;  %v17495_v42 = vld [vmem:[%s22881_s3 + $0x120] ss:$8 sps:$4 sm:$0xff]  }
 0x576   : > { %v8478_v18 = vcombine.low %v20863_v2, %v8476_v17  ;;  %v9434_v32 = vcombine.low %v9412_v30, %v9426_v14  ;;  %v9814_v62 = vsel %vm8792_vm5, %v7419_v46, %v8741_v21  ;;  %v9862_v57 = vsel %vm6047_vm4, %v8743_v8, %v20868_v1 }
 0x577   : > { %v9517_v47 = vcombine.low %v20877_v16, %v20881_v51  ;;  %v16386_v17 = vcombine.low %v23434_v6, %v9814_v62  ;;  %v10088_v56 = vcombine.high %v7418_v5, %v9814_v62  ;;  %12168 = vmatpush1.bf16.msra.mxu1 %v17492_v52  ;;  %v9540_v14 = vrot.slane %v20886_v41, %v19557_v11 }
 0x578   : > { %v8708_v19 = vshrl.u32 %v8478_v18, 16  ;;  %v8710_v35 = vshll.u32 %v8478_v18, 16  ;;  %9761 = vrot.lane.b32.xlu1 %v9434_v32, %s17665_s9  ;;  %v10934_v30 = vcombine.high %v10911_v3, %v10925_v53  ;;  %v10089_v46 = vcombine.low %v8796_v61, %v9862_v57  ;;  %12169 = vmatprep.subr.bf16.mxu1 %v17497_v55 }
 0x579   : > { %v9526_v21 = vrot.slane %v9517_v47, %v19557_v11  ;;  %v20908_v8 = vrot.slane %v16386_v17, %v23402_v28  ;;  %v20911_v6 = vrot.slane %v10088_v56, %v23402_v28  ;;  %v10090_v52 = vcombine.high %v8796_v61, %v9862_v57  ;;  %v17500_v17 = vld [vmem:[%s22881_s3 + $0x134] ss:$8 sps:$4 sm:$0xff]  }
 0x57a   : > { %v8712_v5 = vrot.slane %v8710_v35, 1  ;;  %12054 = vmatprep.mubr.bf16.mxu1 %v10934_v30  ;;  %v20914_v32 = vrot.slane %v10089_v46, %v23402_v28  ;;  %v8834_v62 = vcombine.high %v20596_v59, %v20600_v34  ;;  %v8835_v47 = vcombine.high %v20604_v26, %v20604_v26  ;;  %v23440_v35 = vld [vmem:[#allocation72_spill] sm:$0xff] }
 0x57b   : > { %v9548_v18 = vcombine.low %v9526_v21, %v9540_v14  ;;  %v20926_v55 = vrot.slane %v10090_v52, %v23402_v28  ;;  %v7140_v57 = vcombine.high %v20367_v49, %v20367_v49  ;;  %12170 = vmatpush1.bf16.msra.mxu1 %v17495_v42  ;;  %v7141_v21 = vcombine.high %v23440_v35, %v23440_v35  ;;  %v23441_v42 = vld [vmem:[#allocation70_spill] sm:$0xff]  ;;  %v23449_v49 = vld [vmem:[#allocation43_spill] sm:$0xff] }
 0x57c   : > { %v8713_v61 = vor.u32 %v8712_v5, %v8708_v19  ;;  %v10120_v59 = vcombine.high %v20908_v8, %v20914_v32  ;;  %v8849_v34 = vrot.slane %v8834_v62, %v19557_v11  ;;  %v8863_v26 = vrot.slane %v8835_v47, %v19557_v11  ;;  %v17498_v19 = vld [vmem:[%s22881_s3 + $0x130] ss:$8 sps:$4 sm:$0xff]   ;;  %12171 = vmatprep.subr.bf16.mxu1 %v17500_v17 }
 0x57d   : > { %9769 = vrot.lane.b32.xlu1 %v9548_v18, %s17665_s9  ;;  %v9607_v14 = vcombine.low %v7140_v57, %v23441_v42  ;;  %v23442_v30 = vcombine.high %v23441_v42, %v23441_v42  ;;  %v10933_v5 = vcombine.low %v10911_v3, %v10925_v53  ;;  %v9609_v18 = vcombine.low %v7141_v21, %v20389_v43  ;;  %v20969_v53 = vpop.permute.xlu0 %8744  ;;  %v23444_v21 = vld [vmem:[#allocation11_spill] sm:$0xff]  ;;  %v23445_v42 = vld [vmem:[#allocation9_spill] sm:$0xff] }
 0x57e   : > { %8786 = vrot.lane.b32.xlu0 %v8713_v61, %s17664_s22  ;;  %v8865_v52 = vcombine.low %v8849_v34, %v8863_v26  ;;  %v7446_v62 = vcombine.high %v19783_v4, %v19783_v4  ;;  %v7467_v47 = vrot.slane %v19783_v4, %v19557_v11  ;;  %v17503_v61 = vld [vmem:[%s22881_s3 + $0x144] ss:$8 sps:$4 sm:$0xff]   ;;  %v8948_v43 = vcombine.high %v20652_v50, %v20649_v38  ;;  %v17501_v38 = vld [vmem:[%s22881_s3 + $0x140] ss:$8 sps:$4 sm:$0xff]  }
 0x57f   : > { %v9608_v46 = vcombine.low %v23440_v35, %v23442_v30  ;;  %v20957_v57 = vrot.slane %v9607_v14, %v19557_v11  ;;  %12055 = vmatmul.mubr.bf16.gmra.mrb[60].mxu1 %v10933_v5  ;;  %v8949_v3 = vcombine.high %v20655_v10, %v20655_v10  ;;  %v20967_v4 = vrot.slane %v9609_v18, %v19557_v11  ;;  %v23443_v34 = vld [vmem:[#allocation50_spill] sm:$0xff] }
 0x580   : > { %v7474_v17 = vrot.slane %v7446_v62, %v19557_v11  ;;  %v7475_v26 = vcombine.low %v23443_v34, %v7467_v47  ;;  %v8891_v14 = vcombine.high %v23445_v42, %v23444_v21  ;;  %12172 = vmatpush1.bf16.msra.mxu1 %v17498_v19  ;;  %v8963_v10 = vrot.slane %v8948_v43, %v19557_v11  ;;  %v8749_v62 = vpop.permute.xlu1 %8748  ;;  %v17506_v43 = vld [vmem:[%s22881_s3 + $0x154] ss:$8 sps:$4 sm:$0xff]  }
 0x581   : > { %v20960_v35 = vrot.slane %v9608_v46, %v19557_v11  ;;  %v8977_v30 = vrot.slane %v8949_v3, %v19557_v11  ;;  %v23446_v46 = vld [vmem:[#allocation20_spill] sm:$0xff]  ;;  %v9654_v19 = vrot.slane %v20967_v4, %v19557_v11  ;;  %v9062_v21 = vcombine.high %v20681_v48, %v20685_v33  ;;  %12173 = vmatprep.subr.bf16.mxu1 %v17503_v61 }
 0x582   : > { %9723 = vrot.lane.b32.xlu0 %v8865_v52, %s17665_s9  ;;  %v23447_v5 = vcombine.high %v23446_v46, %v23446_v46  ;;  %v7476_v47 = vcombine.low %v20633_v54, %v7474_v17  ;;  %v8906_v52 = vrot.slane %v8891_v14, %v19557_v11  ;;  %v9063_v46 = vcombine.high %v20694_v40, %v20694_v40  ;;  %v23450_v33 = vld [vmem:[#allocation40_spill] sm:$0xff]  ;;  %v8751_v14 = vpop.permute.xlu0 %8750 }
 0x583   : > { %v9631_v50 = vcombine.low %v20957_v57, %v20960_v35  ;;  %v8979_v42 = vcombine.low %v8963_v10, %v8977_v30  ;;  %v9077_v48 = vrot.slane %v9062_v21, %v19557_v11  ;;  %v9006_v61 = vcombine.high %v23450_v33, %v23450_v33 }
 0x584   : > { %v8920_v18 = vrot.slane %v23447_v5, %v19557_v11  ;;  %v23448_v5 = vld [vmem:[#allocation44_spill] sm:$0xff]  ;;  %v9817_v54 = vsel %vm8792_vm5, %v7476_v47, %v20969_v53  ;;  %12174 = vmatpush1.bf16.msra.mxu1 %v17501_v38  ;;  %v9176_v33 = vcombine.high %v20745_v22, %v20748_v29  ;;  %v16405_v22 = vcombine.low %v10120_v59, %v20911_v6 }
 0x585   : > { %v9640_v3 = vrot.slane %v9631_v50, %v19557_v11  ;;  %v9005_v56 = vcombine.high %v23449_v49, %v23448_v5  ;;  %v17504_v50 = vld [vmem:[%s22881_s3 + $0x150] ss:$8 sps:$4 sm:$0xff]   ;;  %v16387_v40 = vcombine.low %v23443_v34, %v9817_v54  ;;  %v10140_v30 = vcombine.high %v7475_v26, %v9817_v54  ;;  %12175 = vmatprep.subr.bf16.mxu1 %v17506_v43  ;;  %v17509_v34 = vld [vmem:[%s22881_s3 + $0x164] ss:$8 sps:$4 sm:$0xff]   ;;  %v17512_v29 = vld [vmem:[%s22881_s3 + $0x174] ss:$8 sps:$4 sm:$0xff]  }
 0x586   : > { %v8922_v17 = vcombine.low %v8906_v52, %v8920_v18  ;;  %9731 = vrot.lane.b32.xlu0 %v8979_v42, %s17665_s9  ;;  %v9091_v49 = vrot.slane %v9063_v46, %v19557_v11  ;;  %v9034_v47 = vrot.slane %v9006_v61, %v19557_v11  ;;  %v23451_v52 = vld [vmem:[#allocation32_spill] sm:$0xff]  ;;  %v21029_v42 = vpop.permute.xlu1 %9741  ;;  %v23452_v5 = vld [vmem:[#allocation55_spill] sm:$0xff] }
 0x587   : > { %v9662_v10 = vcombine.low %v9640_v3, %v9654_v19  ;;  %v9020_v18 = vrot.slane %v9005_v56, %v19557_v11  ;;  %v7503_v21 = vcombine.high %v23451_v52, %v23451_v52  ;;  %v7524_v38 = vrot.slane %v23451_v52, %v19557_v11  ;;  %v17507_v61 = vld [vmem:[%s22881_s3 + $0x160] ss:$8 sps:$4 sm:$0xff]  }
 0x588   : > { %v21023_v26 = vrot.slane %v16387_v40, %v23402_v28  ;;  %v21026_v56 = vrot.slane %v10140_v30, %v23402_v28  ;;  %v9093_v19 = vcombine.low %v9077_v48, %v9091_v49  ;;  %v8798_v3 = vsel %vm8792_vm5, %v8749_v62, %v8751_v14  ;;  %12176 = vmatpush1.bf16.msra.mxu1 %v17504_v50  ;;  %v23454_v40 = vld [vmem:[#allocation58_spill] sm:$0xff]  ;;  %v23455_v49 = vld [vmem:[#allocation60_spill] sm:$0xff]  ;;  %v23456_v50 = vld [vmem:[#allocation49_spill] sm:$0xff] }
 0x589   : > { %9777 = vrot.lane.b32.xlu1 %v9662_v10, %s17665_s9  ;;  %v9036_v46 = vcombine.low %v9020_v18, %v9034_v47  ;;  %v7531_v43 = vrot.slane %v7503_v21, %v19557_v11  ;;  %v7532_v54 = vcombine.low %v23452_v5, %v7524_v38  ;;  %v9177_v48 = vcombine.high %v20757_v39, %v20757_v39  ;;  %v23453_v10 = vld [vmem:[#allocation62_spill] sm:$0xff] }
 0x58a   : > { %9739 = vrot.lane.b32.xlu0 %v9093_v19, %s17665_s9  ;;  %v9119_v30 = vcombine.high %v23454_v40, %v23453_v10  ;;  %v9120_v18 = vcombine.high %v23455_v49, %v23455_v49  ;;  %v9191_v52 = vrot.slane %v9176_v33, %v19557_v11  ;;  %v23457_v39 = vcombine.low %v20807_v20, %v20908_v8 }
 0x58b   : > { %v7533_v47 = vcombine.low %v23456_v50, %v7531_v43  ;;  %v9868_v38 = vsel %vm6047_vm4, %v8751_v14, %v21029_v42  ;;  %12177 = vmatprep.subr.bf16.mxu1 %v17509_v34  ;;  %v9205_v59 = vrot.slane %v9177_v48, %v19557_v11  ;;  %v10979_v43 = vrot.slane %v16405_v22, %v23402_v28  ;;  %v23458_v50 = vld [vmem:[#allocation23_spill] sm:$0xff] }
 0x58c   : > { %v10965_v21 = vrot.slane %v23457_v39, %v23402_v28  ;;  %v9134_v19 = vrot.slane %v9119_v30, %v19557_v11  ;;  %v9148_v10 = vrot.slane %v9120_v18, %v19557_v11  ;;  %v10193_v40 = vcombine.low %v8798_v3, %v9868_v38  ;;  %12178 = vmatpush1.bf16.msra.mxu1 %v17507_v61  ;;  %v17515_v39 = vld [vmem:[%s22881_s3 + $0x184] ss:$8 sps:$4 sm:$0xff]  }
 0x58d   : > { %9727 = vrot.lane.b32.xlu1 %v8922_v17, %s17665_s9  ;;  %v9820_v33 = vsel %vm8792_vm5, %v7533_v47, %v8749_v62  ;;  %v10194_v49 = vcombine.high %v8798_v3, %v9868_v38  ;;  %v7560_v20 = vcombine.high %v23401_v9, %v23401_v9  ;;  %v9207_v17 = vcombine.low %v9191_v52, %v9205_v59  ;;  %v17510_v3 = vld [vmem:[%s22881_s3 + $0x170] ss:$8 sps:$4 sm:$0xff]   ;;  %v23459_v47 = vld [vmem:[#allocation22_spill] sm:$0xff] }
 0x58e   : > { %v16388_v8 = vcombine.low %v23452_v5, %v9820_v33  ;;  %v10192_v14 = vcombine.high %v7532_v54, %v9820_v33  ;;  %v9150_v34 = vcombine.low %v9134_v19, %v9148_v10  ;;  %12179 = vmatprep.subr.bf16.mxu1 %v17512_v29  ;;  %v10988_v48 = vcombine.high %v10965_v21, %v10979_v43  ;;  %v21112_v33 = vpop.permute.xlu1 %8756 }
 0x58f   : > { %v21070_v30 = vrot.slane %v10193_v40, %v23402_v28  ;;  %v21073_v18 = vrot.slane %v10194_v49, %v23402_v28  ;;  %v10987_v62 = vcombine.low %v10965_v21, %v10979_v43  ;;  %9747 = vrot.lane.b32.xlu0 %v9207_v17, %s17665_s9  ;;  %v7581_v61 = vrot.slane %v23401_v9, %v19557_v11  ;;  %v23461_v43 = vld [vmem:[#allocation33_spill] sm:$0xff]  ;;  %v17513_v17 = vld [vmem:[%s22881_s3 + $0x180] ss:$8 sps:$4 sm:$0xff]  }
 0x590   : > { %v21080_v5 = vrot.slane %v16388_v8, %v23402_v28  ;;  %v21083_v54 = vrot.slane %v10192_v14, %v23402_v28  ;;  %12064 = vmatprep.mubr.bf16.mxu1 %v10988_v48  ;;  %v7588_v22 = vrot.slane %v7560_v20, %v19557_v11  ;;  %v9290_v29 = vcombine.high %v20784_v36, %v20790_v58  ;;  %v23460_v36 = vld [vmem:[#allocation57_spill] sm:$0xff]  ;;  %v23462_v20 = vld [vmem:[#allocation68_spill] sm:$0xff]  ;;  %v23463_v8 = vld [vmem:[#allocation67_spill] sm:$0xff] }
 0x591   : > { %9735 = vrot.lane.b32.xlu1 %v9036_v46, %s17665_s9  ;;  %v9291_v46 = vcombine.high %v20795_v27, %v20795_v27  ;;  %v9233_v52 = vcombine.high %v23459_v47, %v23458_v50  ;;  %12065 = vmatmul.mubr.bf16.gmra.mrb[64].mxu1 %v10987_v62  ;;  %v7589_v58 = vcombine.low %v23460_v36, %v7581_v61  ;;  %v21105_v27 = vpop.permute.xlu0 %8752 }
 0x592   : > { %v16407_v21 = vcombine.low %v21026_v56, %v21080_v5  ;;  %v10224_v9 = vcombine.high %v21080_v5, %v21070_v30  ;;  %v10225_v38 = vcombine.low %v21083_v54, %v21073_v18  ;;  %v7590_v59 = vcombine.low %v20673_v12, %v7588_v22  ;;  %12180 = vmatpush1.bf16.msra.mxu1 %v17510_v3  ;;  %v23464_v3 = vld [vmem:[#allocation66_spill] sm:$0xff] }
 0x593   : > { %v9305_v19 = vrot.slane %v9290_v29, %v19557_v11  ;;  %v9319_v10 = vrot.slane %v9291_v46, %v19557_v11  ;;  %v9234_v56 = vcombine.high %v23461_v43, %v23461_v43  ;;  %v9248_v40 = vrot.slane %v9233_v52, %v19557_v11  ;;  %12181 = vmatprep.subr.bf16.mxu1 %v17515_v39  ;;  %v17518_v29 = vld [vmem:[%s22881_s3 + $0x194] ss:$8 sps:$4 sm:$0xff]  }
 0x594   : > { %v9404_v49 = vcombine.high %v20839_v60, %v20831_v25  ;;  %v9405_v12 = vcombine.high %v20842_v7, %v20842_v7  ;;  %v9347_v14 = vcombine.high %v23463_v8, %v23462_v20  ;;  %v9823_v48 = vsel %vm8792_vm5, %v7590_v59, %v21105_v27  ;;  %v17516_v8 = vld [vmem:[%s22881_s3 + $0x190] ss:$8 sps:$4 sm:$0xff]  }
 0x595   : > { %9743 = vrot.lane.b32.xlu1 %v9150_v34, %s17665_s9  ;;  %v9321_v62 = vcombine.low %v9305_v19, %v9319_v10  ;;  %v9262_v34 = vrot.slane %v9234_v56, %v19557_v11  ;;  %v9348_v5 = vcombine.high %v23464_v3, %v23464_v3  ;;  %v16389_v25 = vcombine.low %v23460_v36, %v9823_v48  ;;  %v8759_v22 = vpop.permute.xlu0 %8758  ;;  %v23465_v10 = vld [vmem:[#allocation39_spill] sm:$0xff] }
 0x596   : > { %v10244_v60 = vcombine.high %v7589_v58, %v9823_v48  ;;  %v9419_v7 = vrot.slane %v9404_v49, %v19557_v11  ;;  %v9433_v61 = vrot.slane %v9405_v12, %v19557_v11  ;;  %v9362_v50 = vrot.slane %v9347_v14, %v19557_v11  ;;  %12182 = vmatpush1.bf16.msra.mxu1 %v17513_v17  ;;  %v23466_v17 = vld [vmem:[#allocation7_spill] sm:$0xff] }
 0x597   : > { %9755 = vrot.lane.b32.xlu0 %v9321_v62, %s17665_s9  ;;  %v9264_v46 = vcombine.low %v9248_v40, %v9262_v34  ;;  %v9376_v47 = vrot.slane %v9348_v5, %v19557_v11  ;;  %v11019_v52 = vrot.slane %v21023_v26, %v23402_v28  ;;  %v10253_v39 = vrot.slane %v16389_v25, %v23402_v28  ;;  %v21153_v40 = vpop.permute.xlu1 %9749  ;;  %v23467_v62 = vld [vmem:[#allocation77_spill] sm:$0xff]  ;;  %v23468_v34 = vld [vmem:[#allocation75_spill] sm:$0xff]  ;;  %v23469_v5 = vld [vmem:[#allocation78_spill] sm:$0xff] }
 0x598   : > { %v21143_v36 = vrot.slane %v10244_v60, %v23402_v28  ;;  %v9435_v58 = vcombine.low %v9419_v7, %v9433_v61  ;;  %v11033_v59 = vrot.slane %v16407_v21, %v23402_v28  ;;  %v7617_v43 = vcombine.high %v23465_v10, %v23465_v10  ;;  %12183 = vmatprep.subr.bf16.mxu1 %v17518_v29  ;;  %v23470_v61 = vld [vmem:[#allocation5_spill] sm:$0xff] }
 0x599   : > { %9751 = vrot.lane.b32.xlu1 %v9264_v46, %s17665_s9  ;;  %v9378_v19 = vcombine.low %v9362_v50, %v9376_v47  ;;  %v7638_v56 = vrot.slane %v23465_v10, %v19557_v11  ;;  %v8800_v26 = vsel %vm8792_vm5, %v21112_v33, %v8759_v22  ;;  %v9518_v21 = vcombine.high %v20877_v16, %v20881_v51  ;;  %v17521_v51 = vld [vmem:[%s22881_s3 + $0x1a4] ss:$8 sps:$4 sm:$0xff]  }
 0x59a   : > { %v11042_v49 = vcombine.high %v11019_v52, %v11033_v59  ;;  %v11041_v12 = vcombine.low %v11019_v52, %v11033_v59  ;;  %v9519_v20 = vcombine.high %v20886_v41, %v20886_v41  ;;  %v7645_v14 = vrot.slane %v7617_v43, %v19557_v11  ;;  %12184 = vmatpush1.bf16.msra.mxu1 %v17516_v8 }
 0x59b   : > { %9763 = vrot.lane.b32.xlu0 %v9435_v58, %s17665_s9  ;;  %v7646_v48 = vcombine.low %v23466_v17, %v7638_v56  ;;  %v9461_v3 = vcombine.high %v23468_v34, %v23467_v62  ;;  %v9462_v16 = vcombine.high %v23469_v5, %v23469_v5  ;;  %v9533_v41 = vrot.slane %v9518_v21, %v19557_v11  ;;  %v21198_v21 = vpop.permute.xlu0 %8760 }
 0x59c   : > { %12074 = vmatprep.mubr.bf16.mxu1 %v11042_v49  ;;  %v9547_v25 = vrot.slane %v9519_v20, %v19557_v11  ;;  %v9874_v60 = vsel %vm6047_vm4, %v8759_v22, %v21153_v40  ;;  %v16409_v7 = vcombine.low %v10224_v9, %v21083_v54  ;;  %v7647_v29 = vcombine.low %v23470_v61, %v7645_v14  ;;  %v17519_v22 = vld [vmem:[%s22881_s3 + $0x1a0] ss:$8 sps:$4 sm:$0xff]   ;;  %v17557_v54 = vld [vmem:[%s22881_s3 + $0x264] ss:$8 sps:$4 sm:$0xff]  }
 0x59d   : > { %9759 = vrot.lane.b32.xlu1 %v9378_v19, %s17665_s9  ;;  %12075 = vmatmul.mubr.bf16.gmra.mrb[68].mxu1 %v11041_v12  ;;  %v9476_v46 = vrot.slane %v9461_v3, %v19557_v11  ;;  %v9490_v50 = vrot.slane %v9462_v16, %v19557_v11  ;;  %v10297_v52 = vcombine.low %v8800_v26, %v9874_v60 }
 0x59e   : > { %v9549_v47 = vcombine.low %v9533_v41, %v9547_v25  ;;  %v10298_v58 = vcombine.high %v8800_v26, %v9874_v60  ;;  %v11073_v59 = vrot.slane %v16409_v7, %v23402_v28  ;;  %v9826_v9 = vsel %vm8792_vm5, %v7647_v29, %v21112_v33  ;;  %12185 = vmatprep.subr.bf16.mxu1 %v17521_v51  ;;  %v21200_v33 = vpop.permute.xlu1 %8764  ;;  %v23471_v7 = vld [vmem:[#allocation34_spill] sm:$0xff] }
 0x59f   : > { %v9492_v19 = vcombine.low %v9476_v46, %v9490_v50  ;;  %v11087_v10 = vrot.slane %v10253_v39, %v23402_v28  ;;  %v9632_v43 = vcombine.high %v20957_v57, %v20960_v35  ;;  %v16390_v56 = vcombine.low %v23466_v17, %v9826_v9  ;;  %v17524_v57 = vld [vmem:[%s22881_s3 + $0x1b4] ss:$8 sps:$4 sm:$0xff]   ;;  %12186 = vmatpush1.bf16.msra.mxu1 %v17519_v22  ;;  %v8767_v41 = vpop.permute.xlu0 %8766  ;;  %v23472_v46 = vld [vmem:[#allocation86_spill] sm:$0xff] }
 0x5a0   : > { %v10296_v26 = vcombine.high %v7646_v48, %v9826_v9  ;;  %9771 = vrot.lane.b32.xlu0 %v9549_v47, %s17665_s9  ;;  %v21193_v49 = vrot.slane %v10297_v52, %v23402_v28  ;;  %v21196_v12 = vrot.slane %v10298_v58, %v23402_v28  ;;  %v9633_v39 = vcombine.high %v20967_v4, %v20967_v4  ;;  %v17522_v4 = vld [vmem:[%s22881_s3 + $0x1b0] ss:$8 sps:$4 sm:$0xff]  }
 0x5a1   : > { %9767 = vrot.lane.b32.xlu1 %v9492_v19, %s17665_s9  ;;  %v11096_v35 = vcombine.high %v11073_v59, %v11087_v10  ;;  %v9647_v20 = vrot.slane %v9632_v43, %v19557_v11  ;;  %v9575_v8 = vcombine.high %v20511_v45, %v20522_v37  ;;  %v10305_v14 = vrot.slane %v16390_v56, %v23402_v28  ;;  %v23473_v47 = vld [vmem:[#allocation56_spill] sm:$0xff] }
 0x5a2   : > { %v21213_v17 = vrot.slane %v10296_v26, %v23402_v28  ;;  %v9576_v48 = vcombine.high %v20519_v23, %v20519_v23  ;;  %v7674_v62 = vcombine.high %v23412_v0, %v23412_v0  ;;  %v9661_v34 = vrot.slane %v9633_v39, %v19557_v11  ;;  %12187 = vmatprep.subr.bf16.mxu1 %v17524_v57  ;;  %v23474_v26 = vld [vmem:[#allocation65_spill] sm:$0xff] }
 0x5a3   : > { %12084 = vmatprep.mubr.bf16.mxu1 %v11096_v35  ;;  %v9590_v45 = vrot.slane %v9575_v8, %v19557_v11  ;;  %v7695_v37 = vrot.slane %v23412_v0, %v19557_v11  ;;  %v11095_v3 = vcombine.low %v11073_v59, %v11087_v10  ;;  %v16411_v5 = vcombine.low %v21143_v36, %v10305_v14  ;;  %v17527_v36 = vld [vmem:[%s22881_s3 + $0x1c4] ss:$8 sps:$4 sm:$0xff]   ;;  %v21244_v59 = vpop.permute.xlu1 %9757  ;;  %v17530_v10 = vld [vmem:[%s22881_s3 + $0x1d4] ss:$8 sps:$4 sm:$0xff]  }
 0x5a4   : > { %v10328_v23 = vcombine.high %v10305_v14, %v21193_v49  ;;  %v10329_v16 = vcombine.low %v21213_v17, %v21196_v12  ;;  %v9604_v51 = vrot.slane %v9576_v48, %v19557_v11  ;;  %v9663_v25 = vcombine.low %v9647_v20, %v9661_v34  ;;  %12188 = vmatpush1.bf16.msra.mxu1 %v17522_v4  ;;  %v23475_v4 = vld [vmem:[#allocation64_spill] sm:$0xff] }
 0x5a5   : > { %v7702_v60 = vrot.slane %v7674_v62, %v19557_v11  ;;  %v7703_v61 = vcombine.low %v23471_v7, %v7695_v37  ;;  %12085 = vmatmul.mubr.bf16.gmra.mrb[72].mxu1 %v11095_v3  ;;  %v9689_v0 = vcombine.high %v20568_v24, %v20572_v63  ;;  %v9690_v50 = vcombine.high %v23472_v46, %v23472_v46  ;;  %v17525_v24 = vld [vmem:[%s22881_s3 + $0x1c0] ss:$8 sps:$4 sm:$0xff]  }
 0x5a6   : > { %v9606_v29 = vcombine.low %v9590_v45, %v9604_v51  ;;  %v7731_v52 = vcombine.high %v23473_v47, %v23473_v47  ;;  %v7752_v58 = vrot.slane %v23473_v47, %v19557_v11  ;;  %9779 = vrot.lane.b32.xlu0 %v9663_v25, %s17665_s9  ;;  %v8802_v9 = vsel %vm8792_vm5, %v21200_v33, %v8767_v41  ;;  %v21272_v45 = vpop.permute.xlu0 %8768  ;;  %v17528_v51 = vld [vmem:[%s22881_s3 + $0x1d0] ss:$8 sps:$4 sm:$0xff]   ;;  %v23476_v47 = vld [vmem:[#allocation42_spill] sm:$0xff] }
 0x5a7   : > { %v7704_v63 = vcombine.low %v20724_v15, %v7702_v60  ;;  %v9704_v22 = vrot.slane %v9689_v0, %v19557_v11  ;;  %v16413_v19 = vcombine.low %v10328_v23, %v21213_v17  ;;  %v9718_v43 = vrot.slane %v9690_v50, %v19557_v11  ;;  %12189 = vmatprep.subr.bf16.mxu1 %v17527_v36 }
 0x5a8   : > { %9775 = vrot.lane.b32.xlu1 %v9606_v29, %s17665_s9  ;;  %v7759_v56 = vrot.slane %v7731_v52, %v19557_v11  ;;  %v7760_v57 = vcombine.low %v23474_v26, %v7752_v58  ;;  %v11127_v15 = vrot.slane %v16411_v5, %v23402_v28  ;;  %v9880_v20 = vsel %vm6047_vm4, %v8767_v41, %v21244_v59 }
 0x5a9   : > { %v9829_v35 = vsel %vm8792_vm5, %v7704_v63, %v21198_v21  ;;  %v11141_v39 = vrot.slane %v16413_v19, %v23402_v28  ;;  %v7788_v8 = vcombine.high %v23424_v13, %v23424_v13  ;;  %v9720_v62 = vcombine.low %v9704_v22, %v9718_v43  ;;  %12190 = vmatpush1.bf16.msra.mxu1 %v17525_v24  ;;  %v23477_v63 = vld [vmem:[#allocation69_spill] sm:$0xff]  ;;  %v17531_v19 = vld [vmem:[%s22881_s3 + $0x1e0] ss:$8 sps:$4 sm:$0xff]  }
 0x5aa   : > { %v16391_v14 = vcombine.low %v23471_v7, %v9829_v35  ;;  %v10348_v48 = vcombine.high %v7703_v61, %v9829_v35  ;;  %v7761_v34 = vcombine.low %v23475_v4, %v7759_v56  ;;  %v10401_v5 = vcombine.low %v8802_v9, %v9880_v20  ;;  %12191 = vmatprep.subr.bf16.mxu1 %v17530_v10  ;;  %v8773_v7 = vpop.permute.xlu1 %8772  ;;  %v17533_v61 = vld [vmem:[%s22881_s3 + $0x1e4] ss:$8 sps:$4 sm:$0xff]   ;;  %v8775_v50 = vpop.permute.xlu0 %8774  ;;  %v17536_v35 = vld [vmem:[%s22881_s3 + $0x1f4] ss:$8 sps:$4 sm:$0xff]  }
 0x5ab   : > { %v11150_v37 = vcombine.high %v11127_v15, %v11141_v39  ;;  %v11149_v3 = vcombine.low %v11127_v15, %v11141_v39  ;;  %v10402_v23 = vcombine.high %v8802_v9, %v9880_v20  ;;  %v7809_v60 = vrot.slane %v23424_v13, %v19557_v11  ;;  %v23480_v4 = vld [vmem:[#allocation74_spill] sm:$0xff] }
 0x5ac   : > { %v10357_v41 = vrot.slane %v16391_v14, %v23402_v28  ;;  %9783 = vrot.lane.b32.xlu1 %v9720_v62, %s17665_s9  ;;  %v9832_v25 = vsel %vm8792_vm5, %v7761_v34, %v21200_v33  ;;  %v21288_v29 = vrot.slane %v10401_v5, %v23402_v28  ;;  %v10364_v33 = vrot.slane %v10348_v48, %v23402_v28  ;;  %v23479_v48 = vld [vmem:[#allocation76_spill] sm:$0xff] }
 0x5ad   : > { %v16392_v0 = vcombine.low %v23474_v26, %v9832_v25  ;;  %v10400_v36 = vcombine.high %v7760_v57, %v9832_v25  ;;  %12094 = vmatprep.mubr.bf16.mxu1 %v11150_v37  ;;  %v21291_v46 = vrot.slane %v10402_v23, %v23402_v28  ;;  %v7816_v13 = vrot.slane %v7788_v8, %v19557_v11  ;;  %v23478_v57 = vld [vmem:[#allocation63_spill] sm:$0xff] }
 0x5ae   : > { %12095 = vmatmul.mubr.bf16.gmra.mrb[76].mxu1 %v11149_v3  ;;  %v7845_v52 = vcombine.high %v23476_v47, %v23476_v47  ;;  %v7817_v22 = vcombine.low %v23477_v63, %v7809_v60  ;;  %v7866_v9 = vrot.slane %v23476_v47, %v19557_v11  ;;  %v11181_v43 = vrot.slane %v10357_v41, %v23402_v28  ;;  %v21310_v26 = vpop.permute.xlu1 %9765  ;;  %v17534_v47 = vld [vmem:[%s22881_s3 + $0x1f0] ss:$8 sps:$4 sm:$0xff]  }
 0x5af   : > { %v10409_v58 = vrot.slane %v16392_v0, %v23402_v28  ;;  %v21299_v24 = vrot.slane %v10400_v36, %v23402_v28  ;;  %12192 = vmatpush1.bf16.msra.mxu1 %v17528_v51  ;;  %v7818_v10 = vcombine.low %v20777_v31, %v7816_v13  ;;  %v7902_v15 = vcombine.high %v23478_v57, %v23478_v57  ;;  %v21332_v0 = vpop.permute.xlu0 %8776 }
 0x5b0   : > { %v7873_v56 = vrot.slane %v7845_v52, %v19557_v11  ;;  %12193 = vmatprep.subr.bf16.mxu1 %v17533_v61  ;;  %v8804_v8 = vsel %vm8792_vm5, %v8773_v7, %v8775_v50  ;;  %v7874_v62 = vcombine.low %v23479_v48, %v7866_v9  ;;  %v9886_v37 = vsel %vm6047_vm4, %v8775_v50, %v21310_v26 }
 0x5b1   : > { %v16415_v39 = vcombine.low %v10364_v33, %v10409_v58  ;;  %v10432_v20 = vcombine.high %v10409_v58, %v21288_v29  ;;  %v10433_v31 = vcombine.low %v21299_v24, %v21291_v46  ;;  %v9835_v14 = vsel %vm8792_vm5, %v7818_v10, %v21272_v45 }
 0x5b2   : > { %v7875_v34 = vcombine.low %v23480_v4, %v7873_v56  ;;  %v16393_v3 = vcombine.low %v23477_v63, %v9835_v14  ;;  %v7930_v51 = vrot.slane %v7902_v15, %v19557_v11  ;;  %v10452_v41 = vcombine.high %v7817_v22, %v9835_v14  ;;  %v17539_v22 = vld [vmem:[%s22881_s3 + $0x204] ss:$8 sps:$4 sm:$0xff]  }
 0x5b3   : > { %v11195_v5 = vrot.slane %v16415_v39, %v23402_v28  ;;  %v16417_v23 = vcombine.low %v10432_v20, %v21299_v24  ;;  %12194 = vmatpush1.bf16.msra.mxu1 %v17531_v19  ;;  %v10505_v60 = vcombine.low %v8804_v8, %v9886_v37  ;;  %v10506_v61 = vcombine.high %v8804_v8, %v9886_v37  ;;  %v23482_v37 = vld [vmem:[#allocation79_spill] sm:$0xff] }
 0x5b4   : > { %v9838_v25 = vsel %vm8792_vm5, %v7875_v34, %v8773_v7  ;;  %12195 = vmatprep.subr.bf16.mxu1 %v17536_v35  ;;  %v10461_v36 = vrot.slane %v16393_v3, %v23402_v28  ;;  %v7923_v50 = vrot.slane %v23478_v57, %v19557_v11  ;;  %v7932_v10 = vcombine.low %v20813_v44, %v7930_v51 }
 0x5b5   : > { %v11204_v33 = vcombine.high %v11181_v43, %v11195_v5  ;;  %v11203_v13 = vcombine.low %v11181_v43, %v11195_v5  ;;  %v16394_v52 = vcombine.low %v23479_v48, %v9838_v25  ;;  %v10504_v58 = vcombine.high %v7874_v62, %v9838_v25  ;;  %v23481_v43 = vld [vmem:[#allocation71_spill] sm:$0xff] }
 0x5b6   : > { %v11235_v7 = vrot.slane %v16417_v23, %v23402_v28  ;;  %v21343_v63 = vrot.slane %v10505_v60, %v23402_v28  ;;  %v11249_v9 = vrot.slane %v10461_v36, %v23402_v28  ;;  %v21350_v19 = vrot.slane %v10506_v61, %v23402_v28  ;;  %v8781_v57 = vpop.permute.xlu1 %8780  ;;  %v8783_v20 = vpop.permute.xlu0 %8782  ;;  %v23483_v23 = vld [vmem:[#allocation81_spill] sm:$0xff] }
 0x5b7   : > { %12104 = vmatprep.mubr.bf16.mxu1 %v11204_v33  ;;  %v7959_v56 = vcombine.high %v23481_v43, %v23481_v43  ;;  %v10468_v15 = vrot.slane %v10452_v41, %v23402_v28  ;;  %v10513_v35 = vrot.slane %v16394_v52, %v23402_v28  ;;  %v21358_v39 = vrot.slane %v10504_v58, %v23402_v28  ;;  %v23484_v60 = vld [vmem:[#allocation73_spill] sm:$0xff]  ;;  %v23485_v33 = vld [vmem:[#allocation82_spill] sm:$0xff] }
 0x5b8   : > { %12105 = vmatmul.mubr.bf16.gmra.mrb[80].mxu1 %v11203_v13  ;;  %v7980_v8 = vrot.slane %v23481_v43, %v19557_v11  ;;  %v11258_v14 = vcombine.high %v11235_v7, %v11249_v9  ;;  %v9841_v44 = vsel %vm8792_vm5, %v7932_v10, %v21332_v0  ;;  %v7931_v3 = vcombine.low %v23482_v37, %v7923_v50 }
 0x5b9   : > { %v7987_v48 = vrot.slane %v7959_v56, %v19557_v11  ;;  %12196 = vmatpush1.bf16.msra.mxu1 %v17534_v47  ;;  %v16419_v62 = vcombine.low %v10468_v15, %v10513_v35  ;;  %v10536_v4 = vcombine.high %v10513_v35, %v21343_v63  ;;  %v10537_v34 = vcombine.low %v21358_v39, %v21350_v19 }
 0x5ba   : > { %12318 = vmatprep.subr.bf16.mxu1 %v17539_v22  ;;  %12114 = vmatprep.mubr.bf16.mxu1 %v11258_v14  ;;  %v16395_v5 = vcombine.low %v23482_v37, %v9841_v44  ;;  %v8806_v41 = vsel %vm8792_vm5, %v8781_v57, %v8783_v20  ;;  %v21372_v25 = vpop.permute.xlu1 %9773  ;;  %v8016_v61 = vcombine.high %v23484_v60, %v23484_v60  ;;  %v21384_v14 = vpop.permute.xlu0 %8784  ;;  %v23486_v37 = vld [vmem:[#allocation80_spill] sm:$0xff] }
 0x5bb   : > { %v7989_v51 = vcombine.low %v23483_v23, %v7987_v48  ;;  %v10556_v36 = vcombine.high %v7931_v3, %v9841_v44  ;;  %v7988_v13 = vcombine.low %v23485_v33, %v7980_v8  ;;  %v16421_v47 = vcombine.low %v10536_v4, %v21358_v39 }
 0x5bc   : > { %v9892_v50 = vsel %vm6047_vm4, %v8783_v20, %v21372_v25  ;;  %v11257_v52 = vcombine.low %v11235_v7, %v11249_v9  ;;  %v11289_v15 = vrot.slane %v16419_v62, %v23402_v28  ;;  %v10565_v8 = vrot.slane %v16395_v5, %v23402_v28 }
 0x5bd   : > { %v9844_v58 = vsel %vm8792_vm5, %v7989_v51, %v8781_v57  ;;  %v10609_v22 = vcombine.low %v8806_v41, %v9892_v50  ;;  %v10610_v10 = vcombine.high %v8806_v41, %v9892_v50  ;;  %v11303_v35 = vrot.slane %v16421_v47, %v23402_v28  ;;  %v23487_v50 = vld [vmem:[#allocation83_spill] sm:$0xff] }
 0x5be   : > { %v16396_v43 = vcombine.low %v23485_v33, %v9844_v58  ;;  %v10608_v56 = vcombine.high %v7988_v13, %v9844_v58  ;;  %v8044_v9 = vrot.slane %v8016_v61, %v19557_v11  ;;  %v10572_v57 = vrot.slane %v10556_v36, %v23402_v28 }
 0x5bf   : > { %v21388_v44 = vrot.slane %v10609_v22, %v23402_v28  ;;  %v21391_v7 = vrot.slane %v10610_v10, %v23402_v28  ;;  %v11312_v62 = vcombine.high %v11289_v15, %v11303_v35  ;;  %v8073_v3 = vcombine.high %v23486_v37, %v23486_v37  ;;  %v8791_v61 = vpop.permute.xlu0 %8790 }
 0x5c0   : > { %12115 = vmatmul.mubr.bf16.gmra.mrb[84].mxu1 %v11257_v52  ;;  %v10617_v20 = vrot.slane %v16396_v43, %v23402_v28  ;;  %v21397_v48 = vrot.slane %v10608_v56, %v23402_v28  ;;  %v8046_v4 = vcombine.low %v20863_v2, %v8044_v9  ;;  %v8789_v5 = vpop.permute.xlu1 %8788  ;;  %v8037_v36 = vrot.slane %v23484_v60, %v19557_v11  ;;  %v23488_v43 = vld [vmem:[#allocation84_spill] sm:$0xff] }
 0x5c1   : > { %12124 = vmatprep.mubr.bf16.mxu1 %v11312_v62  ;;  %v11343_v2 = vrot.slane %v10565_v8, %v23402_v28  ;;  %v8101_v13 = vrot.slane %v8073_v3, %v19557_v11  ;;  %v11311_v47 = vcombine.low %v11289_v15, %v11303_v35  ;;  %v8094_v22 = vrot.slane %v23486_v37, %v19557_v11  ;;  %v23489_v8 = vld [vmem:[#allocation85_spill] sm:$0xff] }
 0x5c2   : > { %v16423_v23 = vcombine.low %v10572_v57, %v10617_v20  ;;  %v10640_v51 = vcombine.high %v10617_v20, %v21388_v44  ;;  %v10641_v41 = vcombine.low %v21397_v48, %v21391_v7  ;;  %v9847_v33 = vsel %vm8792_vm5, %v8046_v4, %v21384_v14 }
 0x5c3   : > { %v16397_v52 = vcombine.low %v23487_v50, %v9847_v33  ;;  %v8045_v10 = vcombine.low %v23487_v50, %v8037_v36  ;;  %v8103_v56 = vcombine.low %v23488_v43, %v8101_v13  ;;  %v8102_v57 = vcombine.low %v23489_v8, %v8094_v22 }
 0x5c4   : > { %v11357_v58 = vrot.slane %v16423_v23, %v23402_v28  ;;  %v21417_v60 = vpop.permute.xlu1 %9781  ;;  %v16425_v7 = vcombine.low %v10640_v51, %v21397_v48  ;;  %v8808_v15 = vsel %vm8792_vm5, %v8789_v5, %v8791_v61  ;;  %v8731_v23 = vpop.permute.xlu0 %8730  ;;  %v21466_v24 = vcombine.high %v21388_v44, %v10641_v41 }
 0x5c5   : > { %v10660_v35 = vcombine.high %v8045_v10, %v9847_v33  ;;  %v10669_v20 = vrot.slane %v16397_v52, %v23402_v28  ;;  %v9850_v62 = vsel %vm8792_vm5, %v8103_v56, %v8789_v5  ;;  %v9898_v4 = vsel %vm6047_vm4, %v8791_v61, %v21417_v60  ;;  %v23490_v52 = vld [vmem:[#allocation87_spill] sm:$0xff] }
 0x5c6   : > { %v11366_v9 = vcombine.high %v11343_v2, %v11357_v58  ;;  %v16398_v37 = vcombine.low %v23489_v8, %v9850_v62  ;;  %v10712_v3 = vcombine.high %v8102_v57, %v9850_v62  ;;  %v10713_v36 = vcombine.low %v8808_v15, %v9898_v4  ;;  %v23491_v62 = vld [vmem:[#allocation8_spill] sm:$0xff] }
 0x5c7   : > { %v10714_v48 = vcombine.high %v8808_v15, %v9898_v4  ;;  %v11397_v51 = vrot.slane %v16425_v7, %v23402_v28  ;;  %v21434_v5 = vcombine.high %v21193_v49, %v10329_v16  ;;  %v8793_v22 = vsel %vm8792_vm5, %v23490_v52, %v8731_v23 }
 0x5c8   : > { %12125 = vmatmul.mubr.bf16.gmra.mrb[88].mxu1 %v11311_v47  ;;  %v21428_v13 = vpop.permute.xlu1 %9721  ;;  %v10721_v61 = vrot.slane %v16398_v37, %v23402_v28  ;;  %v10728_v33 = vrot.slane %v10712_v3, %v23402_v28  ;;  %v21439_v47 = vrot.slane %v10713_v36, %v23402_v28  ;;  %v11411_v10 = vrot.slane %v10669_v20, %v23402_v28  ;;  %v8739_v15 = vpop.permute.xlu0 %8738 }
 0x5c9   : > { %12134 = vmatprep.mubr.bf16.mxu1 %v11366_v9  ;;  %v10742_v50 = vrot.slane %v10714_v48, %v23402_v28  ;;  %v9853_v12 = vsel %vm6047_vm4, %v8731_v23, %v21428_v13  ;;  %v10676_v17 = vrot.slane %v10660_v35, %v23402_v28  ;;  %v11365_v16 = vcombine.low %v11343_v2, %v11357_v58 }
 0x5ca   : > { %v10744_v43 = vcombine.high %v10721_v61, %v21439_v47  ;;  %v11420_v7 = vcombine.high %v11397_v51, %v11411_v10  ;;  %v9934_v9 = vcombine.high %v8793_v22, %v9853_v12  ;;  %v21453_v8 = vcombine.high %v21288_v29, %v10433_v31 }
 0x5cb   : > { %v10745_v56 = vcombine.low %v10728_v33, %v10742_v50  ;;  %v21459_v57 = vcombine.high %v21343_v63, %v10537_v34  ;;  %v16427_v2 = vcombine.low %v10676_v17, %v10721_v61  ;;  %v9933_v19 = vcombine.low %v8793_v22, %v9853_v12  ;;  %v23492_v61 = vld [vmem:[#allocation30_spill] sm:$0xff] }
 0x5cc   : > { %v16429_v35 = vcombine.low %v10744_v43, %v10728_v33  ;;  %v9962_v20 = vrot.slane %v9934_v9, %v23402_v28  ;;  %v11419_v3 = vcombine.low %v11397_v51, %v11411_v10  ;;  %v8795_v33 = vsel %vm8792_vm5, %v23492_v61, %v8739_v15 }
 0x5cd   : > { %v21469_v31 = vcombine.high %v21439_v47, %v10745_v56  ;;  %v11451_v39 = vrot.slane %v16427_v2, %v23402_v28  ;;  %v8747_v34 = vpop.permute.xlu0 %8746  ;;  %v9955_v36 = vrot.slane %v9933_v19, %v23402_v28 }
 0x5ce   : > { %v21461_v58 = vpop.permute.xlu1 %9729  ;;  %v11465_v46 = vrot.slane %v16429_v35, %v23402_v28  ;;  %v16400_v4 = vcombine.low %v9962_v20, %v23491_v62  ;;  %v23493_v35 = vld [vmem:[#allocation29_spill] sm:$0xff] }
 0x5cf   : > { %v9859_v41 = vsel %vm6047_vm4, %v8739_v15, %v21461_v58  ;;  %v10864_v22 = vrot.slane %v9955_v36, %v23402_v28 }
 0x5d0   : > { %12135 = vmatmul.mubr.bf16.gmra.mrb[92].mxu1 %v11365_v16  ;;  %v11474_v37 = vcombine.high %v11451_v39, %v11465_v46  ;;  %v10878_v48 = vrot.slane %v16400_v4, %v23402_v28  ;;  %v10037_v52 = vcombine.low %v8795_v33, %v9859_v41  ;;  %v11473_v12 = vcombine.low %v11451_v39, %v11465_v46 }
 0x5d1   : > { %12144 = vmatprep.mubr.bf16.mxu1 %v11420_v7  ;;  %v8755_v50 = vpop.permute.xlu0 %8754  ;;  %v10038_v56 = vcombine.high %v8795_v33, %v9859_v41  ;;  %v21520_v41 = vrot.slane %v21434_v5, %v23402_v28  ;;  %v23496_v5 = vcombine.low %v20911_v6, %v20926_v55 }
 0x5d2   : > { %v21473_v23 = vpop.permute.xlu1 %9737  ;;  %v21486_v10 = vsel %vm8792_vm5, %v21105_v27, %v8755_v50  ;;  %v10882_v17 = vcombine.high %v10864_v22, %v10878_v48  ;;  %v10059_v7 = vrot.slane %v10037_v52, %v23402_v28  ;;  %v23494_v27 = vld [vmem:[#allocation14_spill] sm:$0xff]  ;;  %v10881_v33 = vcombine.low %v10864_v22, %v10878_v48  ;;  %v17540_v22 = vld [vmem:[%s22881_s3 + $0x210] ss:$8 sps:$4 sm:$0xff]  }
 0x5d3   : > { %v23495_v2 = vcombine.low %v23493_v35, %v23494_v27  ;;  %v10066_v19 = vrot.slane %v10038_v56, %v23402_v28  ;;  %v9865_v39 = vsel %vm6047_vm4, %v8747_v34, %v21473_v23  ;;  %v16406_v48 = vcombine.high %v20914_v32, %v23496_v5  ;;  %v17545_v56 = vld [vmem:[%s22881_s3 + $0x224] ss:$8 sps:$4 sm:$0xff]  }
 0x5d4   : > { %v10932_v4 = vrot.slane %v10059_v7, %v23402_v28 }
 0x5d5   : > { %v16402_v20 = vcombine.high %v23491_v62, %v23495_v2  ;;  %v17537_v62 = vld [vmem:[%s22881_s3 + $0x200] ss:$8 sps:$4 sm:$0xff]  }
 0x5d7   : > { %v10918_v36 = vrot.slane %v16402_v20, %v23402_v28  ;;  %v10986_v20 = vrot.slane %v16406_v48, %v23402_v28  ;;  %v17546_v48 = vld [vmem:[%s22881_s3 + $0x230] ss:$8 sps:$4 sm:$0xff]  }
 0x5d8   : > { %12145 = vmatmul.mubr.bf16.gmra.mrb[96].mxu1 %v11419_v3 }
 0x5d9   : > { %12154 = vmatprep.mubr.bf16.mxu1 %v11474_v37  ;;  %v8797_v37 = vsel %vm8792_vm5, %v20969_v53, %v8747_v34  ;;  %v17542_v53 = vld [vmem:[%s22881_s3 + $0x214] ss:$8 sps:$4 sm:$0xff]   ;;  %v16404_v34 = vcombine.low %v10066_v19, %v20914_v32  ;;  %v10936_v52 = vcombine.high %v10918_v36, %v10932_v4  ;;  %v10935_v19 = vcombine.low %v10918_v36, %v10932_v4 }
 0x5da   : > { %v10142_v61 = vcombine.high %v8797_v37, %v9865_v39  ;;  %v10141_v55 = vcombine.low %v8797_v37, %v9865_v39  ;;  %v17548_v37 = vld [vmem:[%s22881_s3 + $0x234] ss:$8 sps:$4 sm:$0xff]  }
 0x5db   : > { %v21496_v15 = vpop.permute.xlu0 %8762 }
 0x5dc   : > { %v10163_v36 = vrot.slane %v10141_v55, %v23402_v28 }
 0x5dd   : > { %v21482_v51 = vpop.permute.xlu1 %9745 }
 0x5de   : > { %v21490_v16 = vsel %vm6047_vm4, %v8755_v50, %v21482_v51 }
 0x5df   : > { %v10246_v43 = vcombine.high %v21486_v10, %v21490_v16 }
 0x5e0   : > { %12155 = vmatmul.mubr.bf16.gmra.mrb[100].mxu1 %v11473_v12 }
 0x5e1   : > { %v10274_v9 = vrot.slane %v10246_v43, %v23402_v28  ;;  %12197 = vmatprep.mubr.bf16.mxu1 %v10882_v17  ;;  %v21509_v3 = vpop.permute.xlu1 %9753  ;;  %v10170_v43 = vrot.slane %v10142_v61, %v23402_v28 }
 0x5e2   : > { %v8771_v50 = vpop.permute.xlu0 %8770 }
 0x5e3   : > { %v16412_v46 = vcombine.low %v10274_v9, %v21193_v49  ;;  %v10972_v9 = vrot.slane %v16404_v34, %v23402_v28  ;;  %v8803_v6 = vsel %vm8792_vm5, %v21272_v45, %v8771_v50 }
 0x5e5   : > { %v21516_v49 = vrot.slane %v16412_v46, %v23402_v28  ;;  %v16408_v46 = vcombine.low %v10170_v43, %v21070_v30  ;;  %v10990_v39 = vcombine.high %v10972_v9, %v10986_v20  ;;  %v10245_v43 = vcombine.low %v21486_v10, %v21490_v16 }
 0x5e6   : > { %v11026_v16 = vrot.slane %v10163_v36, %v23402_v28 }
 0x5e7   : > { %v11152_v12 = vcombine.high %v21516_v49, %v21520_v41  ;;  %v11151_v17 = vcombine.low %v21516_v49, %v21520_v41  ;;  %v8779_v35 = vpop.permute.xlu0 %8778  ;;  %v11040_v5 = vrot.slane %v16408_v46, %v23402_v28  ;;  %v17549_v46 = vld [vmem:[%s22881_s3 + $0x240] ss:$8 sps:$4 sm:$0xff]  }
 0x5e8   : > { %12198 = vmatmul.mubr.bf16.vlgmr.msra.gmra.mrb[56].mxu1 %v10881_v33 }
 0x5e9   : > { %12207 = vmatprep.mubr.bf16.mxu1 %v10936_v52  ;;  %12319 = vmatpush1.bf16.msra.mxu1 %v17537_v62  ;;  %v17543_v62 = vld [vmem:[%s22881_s3 + $0x220] ss:$8 sps:$4 sm:$0xff]  }
 0x5ea   : > { %12320 = vmatprep.subr.bf16.mxu1 %v17542_v53  ;;  %v21541_v7 = vpop.permute.xlu1 %9761  ;;  %v8805_v53 = vsel %vm8792_vm5, %v21332_v0, %v8779_v35  ;;  %v21572_v0 = vrot.slane %v21453_v8, %v23402_v28  ;;  %v17551_v8 = vld [vmem:[%s22881_s3 + $0x244] ss:$8 sps:$4 sm:$0xff]  }
 0x5eb   : > { %v9883_v32 = vsel %vm6047_vm4, %v8771_v50, %v21541_v7 }
 0x5ec   : > { %v10453_v27 = vcombine.low %v8803_v6, %v9883_v32  ;;  %v10454_v2 = vcombine.high %v8803_v6, %v9883_v32 }
 0x5ed   : > { %12321 = vmatpush1.bf16.msra.mxu1 %v17540_v22 }
 0x5ee   : > { %12322 = vmatprep.subr.bf16.mxu1 %v17545_v56  ;;  %v10475_v45 = vrot.slane %v10453_v27, %v23402_v28  ;;  %v10482_v61 = vrot.slane %v10454_v2, %v23402_v28  ;;  %v10989_v2 = vcombine.low %v10972_v9, %v10986_v20  ;;  %v16410_v20 = vcombine.high %v21070_v30, %v10225_v38 }
 0x5ef   : > { %v21555_v33 = vpop.permute.xlu1 %9769  ;;  %v9877_v38 = vsel %vm6047_vm4, %v21496_v15, %v21509_v3 }
 0x5f0   : > { %v9889_v4 = vsel %vm6047_vm4, %v8779_v35, %v21555_v33  ;;  %12208 = vmatmul.mubr.bf16.gmra.mrb[60].mxu1 %v10935_v19  ;;  %v16420_v34 = vcombine.low %v10482_v61, %v21343_v63  ;;  %v21575_v22 = vrot.slane %v10475_v45, %v23402_v28  ;;  %v21579_v63 = vrot.slane %v21459_v57, %v23402_v28  ;;  %v8787_v9 = vpop.permute.xlu0 %8786 }
 0x5f1   : > { %v10557_v50 = vcombine.low %v8805_v53, %v9889_v4  ;;  %v10558_v52 = vcombine.high %v8805_v53, %v9889_v4  ;;  %12217 = vmatprep.mubr.bf16.mxu1 %v10990_v39  ;;  %12323 = vmatpush1.bf16.msra.mxu1 %v17543_v62  ;;  %v10267_v19 = vrot.slane %v10245_v43, %v23402_v28  ;;  %v17552_v4 = vld [vmem:[%s22881_s3 + $0x250] ss:$8 sps:$4 sm:$0xff]  }
 0x5f2   : > { %12324 = vmatprep.subr.bf16.mxu1 %v17548_v37  ;;  %v21589_v32 = vrot.slane %v16420_v34, %v23402_v28  ;;  %v11260_v55 = vcombine.high %v21572_v0, %v21575_v22  ;;  %v11259_v57 = vcombine.low %v21572_v0, %v21575_v22  ;;  %v11044_v62 = vcombine.high %v11026_v16, %v11040_v5 }
 0x5f3   : > { %v10579_v56 = vrot.slane %v10557_v50, %v23402_v28  ;;  %v10586_v6 = vrot.slane %v10558_v52, %v23402_v28  ;;  %v8807_v36 = vsel %vm8792_vm5, %v21384_v14, %v8787_v9  ;;  %v11094_v30 = vrot.slane %v10267_v19, %v23402_v28 }
 0x5f4   : > { %v11314_v35 = vcombine.high %v21589_v32, %v21579_v63  ;;  %v11313_v27 = vcombine.low %v21589_v32, %v21579_v63  ;;  %v11080_v52 = vrot.slane %v16410_v20, %v23402_v28  ;;  %v8801_v14 = vsel %vm8792_vm5, %v21198_v21, %v21496_v15 }
 0x5f5   : > { %v16424_v10 = vcombine.low %v10586_v6, %v21388_v44  ;;  %12325 = vmatpush1.bf16.msra.mxu1 %v17546_v48  ;;  %v17554_v44 = vld [vmem:[%s22881_s3 + $0x254] ss:$8 sps:$4 sm:$0xff]   ;;  %v21609_v45 = vrot.slane %v10579_v56, %v23402_v28  ;;  %v11043_v56 = vcombine.low %v11026_v16, %v11040_v5  ;;  %v17555_v6 = vld [vmem:[%s22881_s3 + $0x260] ss:$8 sps:$4 sm:$0xff]   ;;  %v11404_v21 = vrot.slane %v21466_v24, %v23402_v28  ;;  %v17558_v5 = vld [vmem:[%s22881_s3 + $0x270] ss:$8 sps:$4 sm:$0xff]  }
 0x5f6   : > { %12326 = vmatprep.subr.bf16.mxu1 %v17551_v8  ;;  %v10350_v8 = vcombine.high %v8801_v14, %v9877_v38  ;;  %v21666_v24 = vrot.slane %v21469_v31, %v23402_v28  ;;  %v11097_v20 = vcombine.low %v11080_v52, %v11094_v30  ;;  %v17566_v31 = vld [vmem:[%s22881_s3 + $0x294] ss:$8 sps:$4 sm:$0xff]  }
 0x5f7   : > { %v21612_v61 = vrot.slane %v16424_v10, %v23402_v28  ;;  %v11098_v10 = vcombine.high %v11080_v52, %v11094_v30 }
 0x5f8   : > { %12218 = vmatmul.mubr.bf16.gmra.mrb[64].mxu1 %v10989_v2  ;;  %v17560_v2 = vld [vmem:[%s22881_s3 + $0x274] ss:$8 sps:$4 sm:$0xff]   ;;  %v10378_v19 = vrot.slane %v10350_v8, %v23402_v28 }
 0x5f9   : > { %12227 = vmatprep.mubr.bf16.mxu1 %v11044_v62  ;;  %v11368_v39 = vcombine.high %v21609_v45, %v21612_v61  ;;  %v11367_v37 = vcombine.low %v21609_v45, %v21612_v61  ;;  %12327 = vmatpush1.bf16.msra.mxu1 %v17549_v46 }
 0x5fa   : > { %12328 = vmatprep.subr.bf16.mxu1 %v17554_v44  ;;  %v10349_v44 = vcombine.low %v8801_v14, %v9877_v38 }
 0x5fb   : > { %v21622_v53 = vpop.permute.xlu1 %9777 }
 0x5fc   : > { %v9895_v18 = vsel %vm6047_vm4, %v8787_v9, %v21622_v53  ;;  %v10371_v30 = vrot.slane %v10349_v44, %v23402_v28 }
 0x5fd   : > { %v10661_v34 = vcombine.low %v8807_v36, %v9895_v18  ;;  %v10662_v50 = vcombine.high %v8807_v36, %v9895_v18  ;;  %12329 = vmatpush1.bf16.msra.mxu1 %v17552_v4  ;;  %v17561_v36 = vld [vmem:[%s22881_s3 + $0x280] ss:$8 sps:$4 sm:$0xff]   ;;  %v16416_v18 = vcombine.low %v10378_v19, %v21288_v29  ;;  %v17564_v29 = vld [vmem:[%s22881_s3 + $0x290] ss:$8 sps:$4 sm:$0xff]  }
 0x5fe   : > { %12330 = vmatprep.subr.bf16.mxu1 %v17557_v54 }
 0x5ff   : > { %v10683_v48 = vrot.slane %v10661_v34, %v23402_v28  ;;  %v10690_v43 = vrot.slane %v10662_v50, %v23402_v28  ;;  %v11202_v38 = vrot.slane %v16416_v18, %v23402_v28  ;;  %v11188_v34 = vrot.slane %v10371_v30, %v23402_v28  ;;  %v9728_v49 = vpop.permute.xlu1 %9727 }
 0x600   : > { %12228 = vmatmul.mubr.bf16.gmra.mrb[68].mxu1 %v11043_v56 }
 0x601   : > { %v16428_v46 = vcombine.low %v10690_v43, %v21439_v47  ;;  %12237 = vmatprep.mubr.bf16.mxu1 %v11098_v10  ;;  %v11418_v15 = vrot.slane %v10683_v48, %v23402_v28  ;;  %12331 = vmatpush1.bf16.msra.mxu1 %v17555_v6  ;;  %v17563_v47 = vld [vmem:[%s22881_s3 + $0x284] ss:$8 sps:$4 sm:$0xff]   ;;  %v11206_v50 = vcombine.high %v11188_v34, %v11202_v38 }
 0x602   : > { %12332 = vmatprep.subr.bf16.mxu1 %v17560_v2  ;;  %v11205_v52 = vcombine.low %v11188_v34, %v11202_v38 }
 0x603   : > { %v21658_v16 = vrot.slane %v16428_v46, %v23402_v28  ;;  %v11422_v62 = vcombine.high %v11404_v21, %v11418_v15  ;;  %v11421_v9 = vcombine.low %v11404_v21, %v11418_v15  ;;  %v9736_v48 = vpop.permute.xlu1 %9735 }
 0x605   : > { %12333 = vmatpush1.bf16.msra.mxu1 %v17558_v5  ;;  %v11476_v4 = vcombine.high %v21658_v16, %v21666_v24  ;;  %v11475_v54 = vcombine.low %v21658_v16, %v21666_v24 }
 0x606   : > { %12334 = vmatprep.subr.bf16.mxu1 %v17563_v47 }
 0x608   : > { %12238 = vmatmul.mubr.bf16.gmra.mrb[72].mxu1 %v11097_v20 }
 0x609   : > { %12247 = vmatprep.mubr.bf16.mxu1 %v11152_v12  ;;  %12335 = vmatpush1.bf16.msra.mxu1 %v17561_v36  ;;  %v9724_v12 = vpop.permute.xlu0 %9723 }
 0x60a   : > { %12336 = vmatprep.subr.bf16.mxu1 %v17566_v31  ;;  %v9786_v41 = vsel %vm6047_vm4, %v21428_v13, %v9724_v12 }
 0x60b   : > { %v9966_v22 = vcombine.low %v9786_v41, %v9724_v12  ;;  %v9967_v63 = vcombine.high %v9786_v41, %v9724_v12 }
 0x60d   : > { %12337 = vmatpush1.bf16.msra.mxu1 %v17564_v29  ;;  %v9974_v32 = vrot.slane %v9966_v22, %v23402_v28 }
 0x60f   : > { %v9982_v14 = vcombine.high %v9974_v32, %v9974_v32 }
 0x610   : > { %12248 = vmatmul.mubr.bf16.gmra.mrb[76].mxu1 %v11151_v17  ;;  %v23497_v17 = vld [vmem:[#allocation88_spill] sm:$0xff] }
 0x611   : > { %12257 = vmatprep.mubr.bf16.mxu1 %v11206_v50  ;;  %v9787_v0 = vsel %vm6047_vm4, %v23497_v17, %v9728_v49  ;;  %v10883_v45 = vcombine.low %v9974_v32, %v9982_v14 }
 0x612   : > { %v10019_v61 = vcombine.high %v9787_v0, %v9728_v49 }
 0x613   : > { %v10891_v46 = vrot.slane %v10883_v45, %v23402_v28 }
 0x614   : > { %v10033_v2 = vrot.slane %v10019_v61, %v23402_v28 }
 0x618   : > { %12258 = vmatmul.mubr.bf16.gmra.mrb[80].mxu1 %v11205_v52 }
 0x619   : > { %12267 = vmatprep.mubr.bf16.mxu1 %v11260_v55  ;;  %v9732_v55 = vpop.permute.xlu0 %9731 }
 0x61d   : > { %v9740_v5 = vpop.permute.xlu0 %9739 }
 0x61e   : > { %v9790_v47 = vsel %vm6047_vm4, %v21473_v23, %v9740_v5 }
 0x61f   : > { %v10174_v36 = vcombine.low %v9790_v47, %v9740_v5  ;;  %v10175_v50 = vcombine.high %v9790_v47, %v9740_v5 }
 0x620   : > { %12268 = vmatmul.mubr.bf16.gmra.mrb[84].mxu1 %v11259_v57  ;;  %v10018_v57 = vcombine.low %v9787_v0, %v9728_v49 }
 0x621   : > { %12277 = vmatprep.mubr.bf16.mxu1 %v11314_v35  ;;  %v9788_v35 = vsel %vm6047_vm4, %v21461_v58, %v9732_v55  ;;  %v9789_v58 = vsel %vm6047_vm4, %v20868_v1, %v9736_v48  ;;  %v10182_v52 = vrot.slane %v10174_v36, %v23402_v28  ;;  %v10189_v17 = vrot.slane %v10175_v50, %v23402_v28 }
 0x622   : > { %v10026_v13 = vrot.slane %v10018_v57, %v23402_v28  ;;  %v10122_v8 = vcombine.low %v9789_v58, %v9736_v48  ;;  %v10123_v19 = vcombine.high %v9789_v58, %v9736_v48  ;;  %v10071_v24 = vcombine.high %v9788_v35, %v9732_v55 }
 0x623   : > { %v10190_v0 = vcombine.high %v10182_v52, %v10182_v52 }
 0x624   : > { %v10034_v6 = vcombine.high %v10026_v13, %v10026_v13  ;;  %v10130_v16 = vrot.slane %v10122_v8, %v23402_v28  ;;  %v10137_v18 = vrot.slane %v10123_v19, %v23402_v28  ;;  %v10085_v30 = vrot.slane %v10071_v24, %v23402_v28 }
 0x626   : > { %v10937_v15 = vcombine.low %v10034_v6, %v10033_v2  ;;  %v10138_v44 = vcombine.high %v10130_v16, %v10130_v16  ;;  %v10991_v12 = vcombine.low %v10085_v30, %v10130_v16 }
 0x628   : > { %12278 = vmatmul.mubr.bf16.gmra.mrb[88].mxu1 %v11313_v27  ;;  %v10070_v27 = vcombine.low %v9788_v35, %v9732_v55  ;;  %v10992_v29 = vcombine.low %v10138_v44, %v10137_v18  ;;  %v10999_v55 = vrot.slane %v10991_v12, %v23402_v28 }
 0x629   : > { %12287 = vmatprep.mubr.bf16.mxu1 %v11368_v39  ;;  %v9981_v39 = vrot.slane %v9967_v63, %v23402_v28 }
 0x62a   : > { %v10078_v43 = vrot.slane %v10070_v27, %v23402_v28  ;;  %v11006_v41 = vrot.slane %v10992_v29, %v23402_v28  ;;  %v11045_v27 = vcombine.low %v10182_v52, %v10190_v0 }
 0x62b   : > { %v10884_v56 = vcombine.low %v9981_v39, %v10026_v13 }
 0x62c   : > { %v11008_v63 = vcombine.high %v10999_v55, %v11006_v41  ;;  %v11053_v58 = vrot.slane %v11045_v27, %v23402_v28  ;;  %v11007_v45 = vcombine.low %v10999_v55, %v11006_v41 }
 0x62d   : > { %v10898_v10 = vrot.slane %v10884_v56, %v23402_v28 }
 0x62f   : > { %v10900_v1 = vcombine.high %v10891_v46, %v10898_v10  ;;  %v10899_v31 = vcombine.low %v10891_v46, %v10898_v10 }
 0x630   : > { %12288 = vmatmul.mubr.bf16.gmra.mrb[92].mxu1 %v11367_v37  ;;  %v10086_v37 = vcombine.high %v10078_v43, %v10078_v43 }
 0x631   : > { %12297 = vmatprep.mubr.bf16.mxu1 %v11422_v62  ;;  %v9744_v62 = vpop.permute.xlu1 %9743 }
 0x632   : > { %v10938_v21 = vcombine.low %v10078_v43, %v10086_v37 }
 0x634   : > { %v10952_v20 = vrot.slane %v10938_v21, %v23402_v28 }
 0x635   : > { %v9752_v22 = vpop.permute.xlu1 %9751 }
 0x636   : > { %v9793_v32 = vsel %vm6047_vm4, %v21153_v40, %v9752_v22 }
 0x637   : > { %v10330_v48 = vcombine.low %v9793_v32, %v9752_v22  ;;  %v10331_v10 = vcombine.high %v9793_v32, %v9752_v22 }
 0x638   : > { %12298 = vmatmul.mubr.bf16.gmra.mrb[96].mxu1 %v11421_v9  ;;  %v10945_v9 = vrot.slane %v10937_v15, %v23402_v28 }
 0x639   : > { %12307 = vmatprep.mubr.bf16.mxu1 %v11476_v4  ;;  %v9791_v4 = vsel %vm6047_vm4, %v21029_v42, %v9744_v62  ;;  %v10338_v40 = vrot.slane %v10330_v48, %v23402_v28  ;;  %v9760_v2 = vpop.permute.xlu1 %9759 }
 0x63a   : > { %v10226_v38 = vcombine.low %v9791_v4, %v9744_v62  ;;  %v10954_v34 = vcombine.high %v10945_v9, %v10952_v20  ;;  %v10953_v57 = vcombine.low %v10945_v9, %v10952_v20  ;;  %v10227_v13 = vcombine.high %v9791_v4, %v9744_v62 }
 0x63b   : > { %v10346_v15 = vcombine.high %v10338_v40, %v10338_v40  ;;  %v10345_v62 = vrot.slane %v10331_v10, %v23402_v28 }
 0x63c   : > { %v10234_v49 = vrot.slane %v10226_v38, %v23402_v28  ;;  %v10241_v56 = vrot.slane %v10227_v13, %v23402_v28 }
 0x63d   : > { %v11154_v9 = vcombine.low %v10346_v15, %v10345_v62 }
 0x63e   : > { %v11046_v35 = vcombine.low %v10189_v17, %v10234_v49  ;;  %v10242_v14 = vcombine.high %v10234_v49, %v10234_v49 }
 0x63f   : > { %v11168_v30 = vrot.slane %v11154_v9, %v23402_v28 }
 0x640   : > { %12308 = vmatmul.mubr.bf16.gmra.mrb[100].mxu1 %v11475_v54  ;;  %v9748_v54 = vpop.permute.xlu0 %9747  ;;  %v11060_v43 = vrot.slane %v11046_v35, %v23402_v28  ;;  %v11099_v37 = vcombine.low %v10242_v14, %v10241_v56 }
 0x641   : > { %16515 = vmatprep.mubr.msk.bf16.mxu1 %vm11975_vm6, %v10900_v1  ;;  %v9792_v23 = vsel %vm6047_vm4, %v21482_v51, %v9748_v54  ;;  %v9795_v1 = vsel %vm6047_vm4, %v21244_v59, %v9760_v2 }
 0x642   : > { %v10278_v42 = vcombine.low %v9792_v23, %v9748_v54  ;;  %v11062_v8 = vcombine.high %v11053_v58, %v11060_v43  ;;  %v10279_v21 = vcombine.high %v9792_v23, %v9748_v54  ;;  %v11107_v5 = vrot.slane %v11099_v37, %v23402_v28 }
 0x643   : > { %v11061_v24 = vcombine.low %v11053_v58, %v11060_v43  ;;  %v10434_v20 = vcombine.low %v9795_v1, %v9760_v2  ;;  %v10435_v41 = vcombine.high %v9795_v1, %v9760_v2 }
 0x644   : > { %v10286_v51 = vrot.slane %v10278_v42, %v23402_v28  ;;  %v9756_v6 = vpop.permute.xlu0 %9755  ;;  %v10293_v44 = vrot.slane %v10279_v21, %v23402_v28 }
 0x645   : > { %v9794_v46 = vsel %vm6047_vm4, %v21509_v3, %v9756_v6 }
 0x646   : > { %v10294_v39 = vcombine.high %v10286_v51, %v10286_v51  ;;  %v10382_v19 = vcombine.low %v9794_v46, %v9756_v6  ;;  %v10383_v36 = vcombine.high %v9794_v46, %v9756_v6  ;;  %v11153_v54 = vcombine.low %v10293_v44, %v10338_v40 }
 0x648   : > { %12351 = vmatmul.mubr.bf16.vlgmr.msra.gmra.mrb[56].mxu1 %v10899_v31  ;;  %v11100_v61 = vcombine.low %v10286_v51, %v10294_v39  ;;  %v9764_v47 = vpop.permute.xlu0 %9763  ;;  %v10390_v18 = vrot.slane %v10382_v19, %v23402_v28  ;;  %v10442_v31 = vrot.slane %v10434_v20, %v23402_v28  ;;  %v10397_v29 = vrot.slane %v10383_v36, %v23402_v28 }
 0x649   : > { %16516 = vmatprep.mubr.msk.bf16.mxu1 %vm11975_vm6, %v10954_v34  ;;  %v9796_v3 = vsel %vm6047_vm4, %v21541_v7, %v9764_v47  ;;  %v9768_v34 = vpop.permute.xlu1 %9767  ;;  %v11161_v23 = vrot.slane %v11153_v54, %v23402_v28 }
 0x64a   : > { %v11114_v16 = vrot.slane %v11100_v61, %v23402_v28  ;;  %v10486_v59 = vcombine.low %v9796_v3, %v9764_v47  ;;  %v10398_v38 = vcombine.high %v10390_v18, %v10390_v18  ;;  %v11208_v52 = vcombine.low %v10397_v29, %v10442_v31 }
 0x64b   : > { %v11170_v12 = vcombine.high %v11161_v23, %v11168_v30  ;;  %v9797_v42 = vsel %vm6047_vm4, %v21310_v26, %v9768_v34  ;;  %v10450_v0 = vcombine.high %v10442_v31, %v10442_v31  ;;  %v11169_v35 = vcombine.low %v11161_v23, %v11168_v30 }
 0x64c   : > { %v11116_v4 = vcombine.high %v11107_v5, %v11114_v16  ;;  %v11115_v50 = vcombine.low %v11107_v5, %v11114_v16  ;;  %v10494_v7 = vrot.slane %v10486_v59, %v23402_v28  ;;  %v11207_v49 = vcombine.low %v10390_v18, %v10398_v38  ;;  %v9772_v27 = vpop.permute.xlu0 %9771 }
 0x64d   : > { %v10538_v22 = vcombine.low %v9797_v42, %v9768_v34  ;;  %v11222_v55 = vrot.slane %v11208_v52, %v23402_v28  ;;  %v10539_v39 = vcombine.high %v9797_v42, %v9768_v34  ;;  %v9776_v14 = vpop.permute.xlu1 %9775  ;;  %v9798_v48 = vsel %vm6047_vm4, %v21555_v33, %v9772_v27 }
 0x64e   : > { %v10502_v17 = vcombine.high %v10494_v7, %v10494_v7  ;;  %v11215_v51 = vrot.slane %v11207_v49, %v23402_v28  ;;  %v10487_v43 = vcombine.high %v9796_v3, %v9764_v47  ;;  %v9799_v61 = vsel %vm6047_vm4, %v21372_v25, %v9776_v14 }
 0x64f   : > { %v10546_v26 = vrot.slane %v10538_v22, %v23402_v28  ;;  %v10590_v37 = vcombine.low %v9798_v48, %v9772_v27  ;;  %v10553_v6 = vrot.slane %v10539_v39, %v23402_v28  ;;  %v10642_v46 = vcombine.low %v9799_v61, %v9776_v14 }
 0x650   : > { %12361 = vmatmul.mubr.bf16.gmra.mrb[60].mxu1 %v10953_v57  ;;  %v10449_v57 = vrot.slane %v10435_v41, %v23402_v28  ;;  %v11224_v13 = vcombine.high %v11215_v51, %v11222_v55  ;;  %v9780_v40 = vpop.permute.xlu0 %9779  ;;  %v10501_v10 = vrot.slane %v10487_v43, %v23402_v28  ;;  %v10591_v15 = vcombine.high %v9798_v48, %v9772_v27 }
 0x651   : > { %16517 = vmatprep.mubr.msk.bf16.mxu1 %vm11975_vm6, %v11008_v63  ;;  %v11262_v63 = vcombine.low %v10494_v7, %v10502_v17  ;;  %v10554_v56 = vcombine.high %v10546_v26, %v10546_v26  ;;  %v9800_v33 = vsel %vm6047_vm4, %v21622_v53, %v9780_v40  ;;  %v10598_v5 = vrot.slane %v10590_v37, %v23402_v28 }
 0x652   : > { %v11261_v32 = vcombine.low %v10450_v0, %v10449_v57  ;;  %v11315_v16 = vcombine.low %v10501_v10, %v10546_v26  ;;  %v10694_v25 = vcombine.low %v9800_v33, %v9780_v40  ;;  %v10650_v1 = vrot.slane %v10642_v46, %v23402_v28 }
 0x653   : > { %v11316_v2 = vcombine.low %v10554_v56, %v10553_v6  ;;  %v10605_v62 = vrot.slane %v10591_v15, %v23402_v28  ;;  %v10606_v47 = vcombine.high %v10598_v5, %v10598_v5  ;;  %v10643_v18 = vcombine.high %v9799_v61, %v9776_v14 }
 0x654   : > { %v11269_v58 = vrot.slane %v11261_v32, %v23402_v28  ;;  %v11323_v44 = vrot.slane %v11315_v16, %v23402_v28  ;;  %v10702_v53 = vrot.slane %v10694_v25, %v23402_v28  ;;  %v10658_v59 = vcombine.high %v10650_v1, %v10650_v1 }
 0x655   : > { %v11330_v19 = vrot.slane %v11316_v2, %v23402_v28  ;;  %v11370_v20 = vcombine.low %v10605_v62, %v10650_v1  ;;  %v11369_v36 = vcombine.low %v10598_v5, %v10606_v47  ;;  %v10657_v29 = vrot.slane %v10643_v18, %v23402_v28 }
 0x656   : > { %v10710_v54 = vcombine.high %v10702_v53, %v10702_v53 }
 0x657   : > { %v11384_v30 = vrot.slane %v11370_v20, %v23402_v28  ;;  %v11377_v38 = vrot.slane %v11369_v36, %v23402_v28  ;;  %v11331_v34 = vcombine.low %v11323_v44, %v11330_v19 }
 0x658   : > { %12371 = vmatmul.mubr.bf16.gmra.mrb[64].mxu1 %v11007_v45  ;;  %v11276_v45 = vrot.slane %v11262_v63, %v23402_v28  ;;  %v11424_v23 = vcombine.low %v10702_v53, %v10710_v54 }
 0x659   : > { %16518 = vmatprep.mubr.msk.bf16.mxu1 %vm11975_vm6, %v11062_v8  ;;  %v11223_v8 = vcombine.low %v11215_v51, %v11222_v55  ;;  %v11385_v0 = vcombine.low %v11377_v38, %v11384_v30 }
 0x65a   : > { %v11278_v21 = vcombine.high %v11269_v58, %v11276_v45  ;;  %v11277_v9 = vcombine.low %v11269_v58, %v11276_v45  ;;  %v11438_v41 = vrot.slane %v11424_v23, %v23402_v28 }
 0x660   : > { %12381 = vmatmul.mubr.bf16.gmra.mrb[68].mxu1 %v11061_v24  ;;  %v9784_v24 = vpop.permute.xlu1 %9783 }
 0x661   : > { %16519 = vmatprep.mubr.msk.bf16.mxu1 %vm11975_vm6, %v11116_v4  ;;  %v11332_v4 = vcombine.high %v11323_v44, %v11330_v19  ;;  %v9801_v3 = vsel %vm6047_vm4, %v21417_v60, %v9784_v24  ;;  %v11386_v60 = vcombine.high %v11377_v38, %v11384_v30 }
 0x662   : > { %v10746_v31 = vcombine.low %v9801_v3, %v9784_v24  ;;  %v10747_v52 = vcombine.high %v9801_v3, %v9784_v24 }
 0x664   : > { %v10754_v7 = vrot.slane %v10746_v31, %v23402_v28  ;;  %v10761_v17 = vrot.slane %v10747_v52, %v23402_v28 }
 0x666   : > { %v10762_v42 = vcombine.high %v10754_v7, %v10754_v7 }
 0x668   : > { %12391 = vmatmul.mubr.bf16.gmra.mrb[72].mxu1 %v11115_v50  ;;  %v11423_v50 = vcombine.low %v10658_v59, %v10657_v29  ;;  %v11478_v55 = vcombine.low %v10762_v42, %v10761_v17 }
 0x669   : > { %16520 = vmatprep.mubr.msk.bf16.mxu1 %vm11975_vm6, %v11170_v12  ;;  %v10695_v12 = vcombine.high %v9800_v33, %v9780_v40 }
 0x66a   : > { %v11431_v49 = vrot.slane %v11423_v50, %v23402_v28 }
 0x66b   : > { %v10709_v22 = vrot.slane %v10695_v12, %v23402_v28 }
 0x66c   : > { %v11440_v57 = vcombine.high %v11431_v49, %v11438_v41  ;;  %v11439_v32 = vcombine.low %v11431_v49, %v11438_v41 }
 0x66d   : > { %v11477_v51 = vcombine.low %v10709_v22, %v10754_v7 }
 0x66f   : > { %v11485_v63 = vrot.slane %v11477_v51, %v23402_v28 }
 0x670   : > { %12401 = vmatmul.mubr.bf16.gmra.mrb[76].mxu1 %v11169_v35  ;;  %v11492_v35 = vrot.slane %v11478_v55, %v23402_v28 }
 0x671   : > { %16521 = vmatprep.mubr.msk.bf16.mxu1 %vm11975_vm6, %v11224_v13  ;;  %v17569_v13 = vld [vmem:[%s22882_s4 + $0x4] ss:$8 sps:$4 sm:$0xff]  }
 0x672   : > { %v11494_v27 = vcombine.high %v11485_v63, %v11492_v35  ;;  %v11493_v26 = vcombine.low %v11485_v63, %v11492_v35 }
 0x678   : > { %12411 = vmatmul.mubr.bf16.gmra.mrb[80].mxu1 %v11223_v8 }
 0x679   : > { %16522 = vmatprep.mubr.msk.bf16.mxu1 %vm11975_vm6, %v11278_v21 }
 0x680   : > { %12421 = vmatmul.mubr.bf16.gmra.mrb[84].mxu1 %v11277_v9 }
 0x681   : > { %16523 = vmatprep.mubr.msk.bf16.mxu1 %vm11975_vm6, %v11332_v4 }
 0x688   : > { %12431 = vmatmul.mubr.bf16.gmra.mrb[88].mxu1 %v11331_v34 }
 0x689   : > { %16524 = vmatprep.mubr.msk.bf16.mxu1 %vm11975_vm6, %v11386_v60 }
 0x690   : > { %12441 = vmatmul.mubr.bf16.gmra.mrb[92].mxu1 %v11385_v0 }
 0x691   : > { %16525 = vmatprep.mubr.msk.bf16.mxu1 %vm11975_vm6, %v11440_v57 }
 0x698   : > { %12451 = vmatmul.mubr.bf16.gmra.mrb[96].mxu1 %v11439_v32 }
 0x699   : > { %16526 = vmatprep.mubr.msk.bf16.mxu1 %vm11975_vm6, %v11494_v27 }
 0x6a0   : > { %12461 = vmatmul.mubr.bf16.gmra.mrb[100].mxu1 %v11493_v26 }
 0x6a1   : > { %16539 = vmatprep.mubr.msk.bf16.mxu1 %vm6047_vm4, %v17569_v13 }
 0x71b   : > { %v12352_v39 = vpop.f32.mrb[56].mxu1 }
 0x71c   : > { %v12354_v14 = vpop.f32.mrb[57].mxu1 }
 0x71d   : > { %v12356_v48 = vpop.f32.mrb[58].mxu1 }
 0x71e   : > { %v12483_v43 = vpack.c.bf16 %v12356_v48, %v12352_v39  ;;  %v12358_v56 = vpop.f32.mrb[59].mxu1 }
 0x71f   : > { %v12484_v58 = vpack.c.bf16 %v12358_v56, %v12354_v14 }
 0x721   : > { %12579 = vmatprep.subr.bf16.mxu1 %v12484_v58 }
 0x722   : > { %12580 = vmatpush1.bf16.msra.mxu1 %v12483_v43 }
 0x723   : > { %v12362_v45 = vpop.f32.mrb[60].mxu1 }
 0x724   : > { %v12364_v61 = vpop.f32.mrb[61].mxu1 }
 0x725   : > { %v12366_v37 = vpop.f32.mrb[62].mxu1 }
 0x726   : > { %v12485_v6 = vpack.c.bf16 %v12366_v37, %v12362_v45  ;;  %v12368_v40 = vpop.f32.mrb[63].mxu1 }
 0x727   : > { %v12486_v8 = vpack.c.bf16 %v12368_v40, %v12364_v61  ;;  %v17567_v40 = vld [vmem:[%s22882_s4] ss:$8 sps:$4 sm:$0xff]  }
 0x729   : > { %12581 = vmatprep.subr.bf16.mxu1 %v12486_v8  ;;  %v17570_v8 = vld [vmem:[%s22882_s4 + $0x14] ss:$8 sps:$4 sm:$0xff]  }
 0x72a   : > { %12582 = vmatpush1.bf16.msra.mxu1 %v12485_v6 }
 0x72b   : > { %v12372_v10 = vpop.f32.mrb[64].mxu1 }
 0x72c   : > { %v12374_v2 = vpop.f32.mrb[65].mxu1 }
 0x72d   : > { %v12376_v46 = vpop.f32.mrb[66].mxu1 }
 0x72e   : > { %v12487_v21 = vpack.c.bf16 %v12376_v46, %v12372_v10  ;;  %v12378_v33 = vpop.f32.mrb[67].mxu1  ;;  %v17572_v10 = vld [vmem:[%s22882_s4 + $0x10] ss:$8 sps:$4 sm:$0xff]   ;;  %v17575_v46 = vld [vmem:[%s22882_s4 + $0x20] ss:$8 sps:$4 sm:$0xff]  }
 0x72f   : > { %v12488_v15 = vpack.c.bf16 %v12378_v33, %v12374_v2  ;;  %v17573_v2 = vld [vmem:[%s22882_s4 + $0x24] ss:$8 sps:$4 sm:$0xff]   ;;  %v17578_v33 = vld [vmem:[%s22882_s4 + $0x30] ss:$8 sps:$4 sm:$0xff]  }
 0x731   : > { %12583 = vmatprep.subr.bf16.mxu1 %v12488_v15  ;;  %v17579_v15 = vld [vmem:[%s22882_s4 + $0x44] ss:$8 sps:$4 sm:$0xff]  }
 0x732   : > { %12584 = vmatpush1.bf16.msra.mxu1 %v12487_v21  ;;  %v17576_v21 = vld [vmem:[%s22882_s4 + $0x34] ss:$8 sps:$4 sm:$0xff]  }
 0x733   : > { %v12382_v5 = vpop.f32.mrb[68].mxu1 }
 0x734   : > { %v12384_v16 = vpop.f32.mrb[69].mxu1 }
 0x735   : > { %v12386_v25 = vpop.f32.mrb[70].mxu1 }
 0x736   : > { %v12489_v1 = vpack.c.bf16 %v12386_v25, %v12382_v5  ;;  %v12388_v19 = vpop.f32.mrb[71].mxu1  ;;  %v17581_v5 = vld [vmem:[%s22882_s4 + $0x40] ss:$8 sps:$4 sm:$0xff]   ;;  %v17584_v25 = vld [vmem:[%s22882_s4 + $0x50] ss:$8 sps:$4 sm:$0xff]  }
 0x737   : > { %v12490_v62 = vpack.c.bf16 %v12388_v19, %v12384_v16  ;;  %v17582_v16 = vld [vmem:[%s22882_s4 + $0x54] ss:$8 sps:$4 sm:$0xff]   ;;  %v17586_v19 = vld [vmem:[%s22883_s5] sm:$0xff]  }
 0x739   : > { %12585 = vmatprep.subr.bf16.mxu1 %v12490_v62  ;;  %v17587_v62 = vld [vmem:[%s22883_s5 + $0x48] sm:$0xff]  }
 0x73a   : > { %12586 = vmatpush1.bf16.msra.mxu1 %v12489_v1  ;;  %v17585_v1 = vld [vmem:[%s22883_s5 + $0x40] sm:$0xff]  }
 0x73b   : > { %v12392_v47 = vpop.f32.mrb[72].mxu1 }
 0x73c   : > { %v12394_v24 = vpop.f32.mrb[73].mxu1 }
 0x73d   : > { %v12396_v44 = vpop.f32.mrb[74].mxu1 }
 0x73e   : > { %v12491_v9 = vpack.c.bf16 %v12396_v44, %v12392_v47  ;;  %v12398_v53 = vpop.f32.mrb[75].mxu1  ;;  %v17588_v47 = vld [vmem:[%s22883_s5 + $0x8] sm:$0xff]   ;;  %v17590_v44 = vld [vmem:[%s22883_s5 + $0x10] sm:$0xff]  }
 0x73f   : > { %v12492_v20 = vpack.c.bf16 %v12398_v53, %v12394_v24  ;;  %v17589_v24 = vld [vmem:[%s22883_s5 + $0x50] sm:$0xff]  }
 0x741   : > { %12587 = vmatprep.subr.bf16.mxu1 %v12492_v20 }
 0x742   : > { %12588 = vmatpush1.bf16.msra.mxu1 %v12491_v9 }
 0x743   : > { %v12402_v4 = vpop.f32.mrb[76].mxu1 }
 0x744   : > { %v12404_v3 = vpop.f32.mrb[77].mxu1 }
 0x745   : > { %v12406_v36 = vpop.f32.mrb[78].mxu1 }
 0x746   : > { %v12493_v18 = vpack.c.bf16 %v12406_v36, %v12402_v4  ;;  %v12408_v54 = vpop.f32.mrb[79].mxu1 }
 0x747   : > { %v12494_v59 = vpack.c.bf16 %v12408_v54, %v12404_v3 }
 0x749   : > { %12589 = vmatprep.subr.bf16.mxu1 %v12494_v59 }
 0x74a   : > { %12590 = vmatpush1.bf16.msra.mxu1 %v12493_v18 }
 0x74b   : > { %v12412_v31 = vpop.f32.mrb[80].mxu1 }
 0x74c   : > { %v12414_v30 = vpop.f32.mrb[81].mxu1 }
 0x74d   : > { %v12416_v29 = vpop.f32.mrb[82].mxu1 }
 0x74e   : > { %v12495_v38 = vpack.c.bf16 %v12416_v29, %v12412_v31  ;;  %v12418_v34 = vpop.f32.mrb[83].mxu1 }
 0x74f   : > { %v12496_v23 = vpack.c.bf16 %v12418_v34, %v12414_v30 }
 0x751   : > { %12591 = vmatprep.subr.bf16.mxu1 %v12496_v23 }
 0x752   : > { %12592 = vmatpush1.bf16.msra.mxu1 %v12495_v38 }
 0x753   : > { %v12422_v50 = vpop.f32.mrb[84].mxu1 }
 0x754   : > { %v12424_v7 = vpop.f32.mrb[85].mxu1 }
 0x755   : > { %v12426_v60 = vpop.f32.mrb[86].mxu1 }
 0x756   : > { %v12497_v52 = vpack.c.bf16 %v12426_v60, %v12422_v50  ;;  %v12428_v12 = vpop.f32.mrb[87].mxu1 }
 0x757   : > { %v12498_v42 = vpack.c.bf16 %v12428_v12, %v12424_v7 }
 0x759   : > { %12593 = vmatprep.subr.bf16.mxu1 %v12498_v42 }
 0x75a   : > { %12594 = vmatpush1.bf16.msra.mxu1 %v12497_v52 }
 0x75b   : > { %v12432_v49 = vpop.f32.mrb[88].mxu1 }
 0x75c   : > { %v12434_v41 = vpop.f32.mrb[89].mxu1 }
 0x75d   : > { %v12436_v17 = vpop.f32.mrb[90].mxu1 }
 0x75e   : > { %v12499_v0 = vpack.c.bf16 %v12436_v17, %v12432_v49  ;;  %v12438_v22 = vpop.f32.mrb[91].mxu1 }
 0x75f   : > { %v12500_v55 = vpack.c.bf16 %v12438_v22, %v12434_v41 }
 0x761   : > { %12595 = vmatprep.subr.bf16.mxu1 %v12500_v55 }
 0x762   : > { %12596 = vmatpush1.bf16.msra.mxu1 %v12499_v0 }
 0x763   : > { %v12442_v57 = vpop.f32.mrb[92].mxu1 }
 0x764   : > { %v12444_v51 = vpop.f32.mrb[93].mxu1 }
 0x765   : > { %v12446_v35 = vpop.f32.mrb[94].mxu1 }
 0x766   : > { %v12501_v63 = vpack.c.bf16 %v12446_v35, %v12442_v57  ;;  %v12448_v32 = vpop.f32.mrb[95].mxu1 }
 0x767   : > { %v12502_v27 = vpack.c.bf16 %v12448_v32, %v12444_v51 }
 0x769   : > { %12597 = vmatprep.subr.bf16.mxu1 %v12502_v27 }
 0x76a   : > { %12598 = vmatpush1.bf16.msra.mxu1 %v12501_v63 }
 0x76b   : > { %v12452_v26 = vpop.f32.mrb[96].mxu1 }
 0x76c   : > { %v12454_v13 = vpop.f32.mrb[97].mxu1 }
 0x76d   : > { %v12456_v39 = vpop.f32.mrb[98].mxu1 }
 0x76e   : > { %v12503_v14 = vpack.c.bf16 %v12456_v39, %v12452_v26  ;;  %v12458_v48 = vpop.f32.mrb[99].mxu1 }
 0x76f   : > { %v12504_v43 = vpack.c.bf16 %v12458_v48, %v12454_v13  ;;  %v17592_v48 = vld [vmem:[%s22883_s5 + $0x18] sm:$0xff]  }
 0x771   : > { %12599 = vmatprep.subr.bf16.mxu1 %v12504_v43 }
 0x772   : > { %12600 = vmatpush1.bf16.msra.mxu1 %v12503_v14  ;;  %v17591_v14 = vld [vmem:[%s22883_s5 + $0x58] sm:$0xff]  }
 0x773   : > { %v12462_v56 = vpop.f32.mrb[100].mxu1 }
 0x774   : > { %v12464_v58 = vpop.f32.mrb[101].mxu1 }
 0x775   : > { %v12466_v45 = vpop.f32.mrb[102].mxu1 }
 0x776   : > { %v12505_v61 = vpack.c.bf16 %v12466_v45, %v12462_v56  ;;  %v12468_v37 = vpop.f32.mrb[103].mxu1 }
 0x777   : > { %v12506_v6 = vpack.c.bf16 %v12468_v37, %v12464_v58 }
 0x779   : > { %12601 = vmatprep.subr.bf16.mxu1 %v12506_v6 }
 0x77a   : > { %12602 = vmatpush1.bf16.msra.mxu1 %v12505_v61 }
 0x77b   : > { %16668 = vmatprep.subr.bf16.mxu1 %v17585_v1 }
 0x77d   : > { %12612 = vmatmul.mubr.bf16.vlgmr.msra.gmra.mrb[104].mxu1 %v17567_v40 }
 0x77e   : > { %16540 = vmatprep.mubr.msk.bf16.mxu1 %vm6047_vm4, %v17570_v8  ;;  %16669 = vmatpush3.bf16.msra.mxu1 %v17586_v19 }
 0x77f   : > { %16670 = vmatprep.subr.bf16.mxu1 %v17587_v62 }
 0x782   : > { %16671 = vmatpush3.bf16.msra.mxu1 %v17588_v47 }
 0x783   : > { %16672 = vmatprep.subr.bf16.mxu1 %v17589_v24 }
 0x785   : > { %12622 = vmatmul.mubr.bf16.gmra.mrb[108].mxu1 %v17572_v10 }
 0x786   : > { %16541 = vmatprep.mubr.msk.bf16.mxu1 %vm6047_vm4, %v17573_v2  ;;  %16673 = vmatpush3.bf16.msra.mxu1 %v17590_v44 }
 0x787   : > { %16674 = vmatprep.subr.bf16.mxu1 %v17591_v14 }
 0x78a   : > { %16675 = vmatpush3.bf16.msra.mxu1 %v17592_v48 }
 0x78d   : > { %12632 = vmatmul.mubr.bf16.gmra.mrb[112].mxu1 %v17575_v46 }
 0x78e   : > { %16542 = vmatprep.mubr.msk.bf16.mxu1 %vm6047_vm4, %v17576_v21 }
 0x795   : > { %12642 = vmatmul.mubr.bf16.gmra.mrb[116].mxu1 %v17578_v33 }
 0x796   : > { %16543 = vmatprep.mubr.msk.bf16.mxu1 %vm6047_vm4, %v17579_v15 }
 0x79d   : > { %12652 = vmatmul.mubr.bf16.gmra.mrb[120].mxu1 %v17581_v5 }
 0x79e   : > { %16544 = vmatprep.mubr.msk.bf16.mxu1 %vm6047_vm4, %v17582_v16 }
 0x7a5   : > { %12662 = vmatmul.mubr.bf16.gmra.mrb[124].mxu1 %v17584_v25 }
 0x850   : > { %v12613_v9 = vpop.f32.mrb[104].mxu1 }
 0x851   : > { %v12615_v53 = vpop.f32.mrb[105].mxu1 }
 0x852   : > { %v16545_v20 = vpack.c.bf16 %v12615_v53, %v12613_v9  ;;  %v12617_v4 = vpop.f32.mrb[106].mxu1 }
 0x853   : > { %v12619_v3 = vpop.f32.mrb[107].mxu1 }
 0x854   : > { %v12704_v36 = vrot.slane %v16545_v20, %v19557_v11  ;;  %v16546_v18 = vpack.c.bf16 %v12619_v3, %v12617_v4 }
 0x856   : > { %v12712_v54 = vcombine.high %v12704_v36, %v12704_v36  ;;  %v12720_v59 = vrot.slane %v12704_v36, %v19557_v11  ;;  %v12711_v31 = vrot.slane %v16546_v18, %v19557_v11 }
 0x858   : > { %v21873_v30 = vrot.slane %v12712_v54, %v19557_v11  ;;  %v21875_v29 = vcombine.high %v12720_v59, %v12720_v59  ;;  %v12713_v38 = vcombine.high %v12711_v31, %v12711_v31  ;;  %v12623_v34 = vpop.f32.mrb[108].mxu1  ;;  %v21881_v60 = vrot.slane %v12711_v31, %v19557_v11  ;;  %v17594_v31 = vld [vmem:[%s22883_s5 + $0x20] sm:$0xff]  }
 0x859   : > { %v12625_v23 = vpop.f32.mrb[109].mxu1 }
 0x85a   : > { %v12996_v50 = vcombine.low %v12720_v59, %v21873_v30  ;;  %v21884_v52 = vrot.slane %v12713_v38, %v19557_v11  ;;  %v12627_v12 = vpop.f32.mrb[110].mxu1  ;;  %v12744_v42 = vcombine.high %v21873_v30, %v21873_v30  ;;  %v16547_v49 = vpack.c.bf16 %v12625_v23, %v12623_v34  ;;  %v17593_v59 = vld [vmem:[%s22883_s5 + $0x60] sm:$0xff]  }
 0x85b   : > { %v12629_v41 = vpop.f32.mrb[111].mxu1  ;;  %v21893_v0 = vrot.slane %v21875_v29, %v19557_v11  ;;  %16676 = vmatprep.subr.bf16.mxu1 %v17593_v59  ;;  %v17595_v59 = vld [vmem:[%s22883_s5 + $0x68] sm:$0xff]  }
 0x85c   : > { %v21889_v17 = vrot.slane %v12996_v50, %v19557_v11  ;;  %v16557_v22 = vcombine.high %v21881_v60, %v21884_v52  ;;  %v16548_v55 = vpack.c.bf16 %v12629_v41, %v12627_v12  ;;  %v13019_v57 = vcombine.low %v12744_v42, %v21881_v60  ;;  %16677 = vmatpush3.bf16.msra.mxu1 %v17594_v31  ;;  %v17596_v31 = vld [vmem:[%s22883_s5 + $0x28] sm:$0xff]  }
 0x85d   : > { %v12754_v51 = vrot.slane %v16547_v49, %v19557_v11  ;;  %v21904_v32 = vrot.slane %v21884_v52, %v19557_v11  ;;  %16678 = vmatprep.subr.bf16.mxu1 %v17595_v59 }
 0x85e   : > { %v12761_v35 = vrot.slane %v16548_v55, %v19557_v11  ;;  %v13371_v63 = vcombine.low %v21889_v17, %v21893_v0  ;;  %v21907_v27 = vrot.slane %v13019_v57, %v19557_v11  ;;  %v21910_v26 = vrot.slane %v16557_v22, %v19557_v11 }
 0x85f   : > { %v12762_v13 = vcombine.high %v12754_v51, %v12754_v51  ;;  %v21913_v39 = vrot.slane %v12754_v51, %v19557_v11 }
 0x860   : > { %v12763_v43 = vcombine.high %v12761_v35, %v12761_v35  ;;  %v12777_v56 = vrot.slane %v12761_v35, %v19557_v11  ;;  %v12633_v58 = vpop.f32.mrb[112].mxu1  ;;  %v13379_v45 = vrot.slane %v13371_v63, %v19557_v11  ;;  %v13394_v8 = vcombine.low %v21907_v27, %v21904_v32  ;;  %16679 = vmatpush3.bf16.msra.mxu1 %v17596_v31 }
 0x861   : > { %v21926_v37 = vrot.slane %v12762_v13, %v19557_v11  ;;  %v12792_v6 = vcombine.high %v21913_v39, %v21913_v39  ;;  %v12635_v40 = vpop.f32.mrb[113].mxu1  ;;  %v21934_v10 = vrot.slane %v21913_v39, %v19557_v11 }
 0x862   : > { %v21937_v2 = vrot.slane %v12763_v43, %v19557_v11  ;;  %v21939_v46 = vcombine.high %v12777_v56, %v12777_v56  ;;  %v16549_v21 = vpack.c.bf16 %v12635_v40, %v12633_v58  ;;  %v12637_v33 = vpop.f32.mrb[114].mxu1  ;;  %v13733_v15 = vshrl.u32 %v13379_v45, 16 }
 0x863   : > { %v12794_v5 = vcombine.high %v21926_v37, %v21926_v37  ;;  %v13065_v16 = vcombine.low %v21926_v37, %v12792_v6  ;;  %v12639_v25 = vpop.f32.mrb[115].mxu1  ;;  %v13735_v1 = vshll.u32 %v13379_v45, 16  ;;  %v13402_v19 = vrot.slane %v13394_v8, %v19557_v11 }
 0x864   : > { %23498 = vst [vmem:[#allocation38_spill] sm:$0xff] %v21937_v2  ;;  %23499 = vst [vmem:[#allocation36_spill] sm:$0xff] %v21939_v46  ;;  %v13088_v62 = vcombine.low %v12777_v56, %v21937_v2  ;;  %v21948_v47 = vrot.slane %v21939_v46, %v19557_v11  ;;  %v12795_v44 = vcombine.high %v21937_v2, %v21937_v2 }
 0x865   : > { %v21955_v9 = vrot.slane %v13065_v16, %v19557_v11  ;;  %v12804_v53 = vrot.slane %v16549_v21, %v19557_v11  ;;  %v16550_v20 = vpack.c.bf16 %v12639_v25, %v12637_v33  ;;  %v13737_v4 = vrot.slane %v13735_v1, 1 }
 0x866   : > { %v21959_v3 = vrot.slane %v13088_v62, %v19557_v11  ;;  %v13747_v36 = vshrl.u32 %v13402_v19, 16  ;;  %v13749_v18 = vshll.u32 %v13402_v19, 16  ;;  %v13417_v54 = vcombine.low %v21910_v26, %v21934_v10 }
 0x867   : > { %v12812_v38 = vcombine.high %v12804_v53, %v12804_v53  ;;  %v21970_v34 = vrot.slane %v12804_v53, %v19557_v11  ;;  %v12811_v23 = vrot.slane %v16550_v20, %v19557_v11  ;;  %v13738_v50 = vor.u32 %v13737_v4, %v13733_v15 }
 0x868   : > { %v12643_v12 = vpop.f32.mrb[116].mxu1  ;;  %v13751_v42 = vrot.slane %v13749_v18, 1  ;;  %v13425_v49 = vrot.slane %v13417_v54, %v19557_v11  ;;  %v21975_v41 = vrot.slane %v12794_v5, %v19557_v11  ;;  %v13463_v22 = vcombine.low %v21959_v3, %v21948_v47 }
 0x869   : > { %23500 = vst [vmem:[#allocation4_spill] sm:$0xff] %v21970_v34  ;;  %v21980_v55 = vrot.slane %v12812_v38, %v19557_v11  ;;  %v13111_v57 = vcombine.low %v12795_v44, %v21970_v34  ;;  %v12813_v51 = vcombine.high %v12811_v23, %v12811_v23  ;;  %v21984_v35 = vrot.slane %v12811_v23, %v19557_v11  ;;  %v12645_v63 = vpop.f32.mrb[117].mxu1  ;;  %v17597_v38 = vld [vmem:[%s22883_s5 + $0x70] sm:$0xff]  }
 0x86a   : > { %13956 = vrot.lane.b32.xlu0 %v13738_v50, %s17665_s9  ;;  %v16551_v13 = vpack.c.bf16 %v12645_v63, %v12643_v12  ;;  %v13752_v14 = vor.u32 %v13751_v42, %v13747_v36  ;;  %v12647_v48 = vpop.f32.mrb[118].mxu1  ;;  %v13761_v43 = vshrl.u32 %v13425_v49, 16  ;;  %v13763_v56 = vshll.u32 %v13425_v49, 16  ;;  %16680 = vmatprep.subr.bf16.mxu1 %v17597_v38 }
 0x86b   : > { %23501 = vst [vmem:[#allocation25_spill] sm:$0xff] %v21984_v35  ;;  %v21988_v58 = vrot.slane %v13111_v57, %v19557_v11  ;;  %v16558_v45 = vcombine.high %v21970_v34, %v21980_v55  ;;  %v21993_v6 = vrot.slane %v12813_v51, %v19557_v11  ;;  %v12843_v40 = vcombine.high %v21984_v35, %v21984_v35  ;;  %v12649_v8 = vpop.f32.mrb[119].mxu1 }
 0x86c   : > { %v12854_v21 = vrot.slane %v16551_v13, %v19557_v11  ;;  %13960 = vrot.lane.b32.xlu1 %v13752_v14, %s17665_s9  ;;  %v16552_v33 = vpack.c.bf16 %v12649_v8, %v12647_v48  ;;  %v13765_v15 = vrot.slane %v13763_v56, 1  ;;  %v13440_v5 = vcombine.low %v21955_v9, %v21975_v41 }
 0x86d   : > { %23502 = vst [vmem:[#allocation19_spill] sm:$0xff] %v21993_v6  ;;  %v22002_v16 = vrot.slane %v16558_v45, %v19557_v11  ;;  %v12845_v25 = vcombine.high %v21993_v6, %v21993_v6  ;;  %v13157_v1 = vcombine.low %v21993_v6, %v12843_v40  ;;  %v13471_v19 = vrot.slane %v13463_v22, %v19557_v11  ;;  %v17598_v40 = vld [vmem:[%s22883_s5 + $0x30] sm:$0xff]  }
 0x86e   : > { %v12862_v62 = vcombine.high %v12854_v21, %v12854_v21  ;;  %v12870_v44 = vrot.slane %v12854_v21, %v19557_v11  ;;  %v12861_v53 = vrot.slane %v16552_v33, %v19557_v11  ;;  %v13766_v20 = vor.u32 %v13765_v15, %v13761_v43  ;;  %16681 = vmatpush3.bf16.msra.mxu1 %v17598_v40 }
 0x86f   : > { %v22011_v4 = vrot.slane %v13157_v1, %v19557_v11  ;;  %v13448_v36 = vrot.slane %v13440_v5, %v19557_v11  ;;  %v13789_v18 = vshrl.u32 %v13471_v19, 16  ;;  %v13791_v54 = vshll.u32 %v13471_v19, 16 }
 0x870   : > { %v22024_v23 = vrot.slane %v12862_v62, %v19557_v11  ;;  %v22026_v50 = vcombine.high %v12870_v44, %v12870_v44  ;;  %v12863_v12 = vcombine.high %v12861_v53, %v12861_v53  ;;  %v22029_v42 = vrot.slane %v12861_v53, %v19557_v11  ;;  %13964 = vrot.lane.b32.xlu0 %v13766_v20, %s17665_s9  ;;  %v12653_v49 = vpop.f32.mrb[120].mxu1 }
 0x871   : > { %v13775_v22 = vshrl.u32 %v13448_v36, 16  ;;  %v13777_v57 = vshll.u32 %v13448_v36, 16  ;;  %v12655_v51 = vpop.f32.mrb[121].mxu1  ;;  %v13793_v63 = vrot.slane %v13791_v54, 1  ;;  %v22034_v13 = vrot.slane %v21980_v55, %v19557_v11 }
 0x872   : > { %23503 = vst [vmem:[#allocation21_spill] sm:$0xff] %v22024_v23  ;;  %23504 = vst [vmem:[#allocation24_spill] sm:$0xff] %v22026_v50  ;;  %v13180_v14 = vcombine.low %v12870_v44, %v22024_v23  ;;  %v22039_v48 = vrot.slane %v22026_v50, %v19557_v11  ;;  %v22044_v56 = vrot.slane %v12863_v12, %v19557_v11  ;;  %v12657_v45 = vpop.f32.mrb[122].mxu1 }
 0x873   : > { %23505 = vst [vmem:[#allocation12_spill] sm:$0xff] %v22029_v42  ;;  %v12894_v8 = vcombine.high %v22024_v23, %v22024_v23  ;;  %v13779_v21 = vrot.slane %v13777_v57, 1  ;;  %v16553_v33 = vpack.c.bf16 %v12655_v51, %v12653_v49  ;;  %v13794_v15 = vor.u32 %v13793_v63, %v13789_v18  ;;  %v12659_v5 = vpop.f32.mrb[123].mxu1  ;;  %v17599_v51 = vld [vmem:[%s22883_s5 + $0x78] sm:$0xff]  }
 0x874   : > { %23506 = vst [vmem:[#allocation17_spill] sm:$0xff] %v22044_v56  ;;  %v22052_v1 = vrot.slane %v13180_v14, %v19557_v11  ;;  %v16559_v19 = vcombine.high %v22029_v42, %v22044_v56  ;;  %v16554_v62 = vpack.c.bf16 %v12659_v5, %v12657_v45  ;;  %v13486_v44 = vcombine.low %v21988_v58, %v22034_v13 }
 0x875   : > { %v13203_v53 = vcombine.low %v12894_v8, %v22029_v42  ;;  %v13780_v20 = vor.u32 %v13779_v21, %v13775_v22  ;;  %v12904_v36 = vrot.slane %v16553_v33, %v19557_v11  ;;  %13972 = vrot.lane.b32.xlu0 %v13794_v15, %s17665_s9  ;;  %v22063_v18 = vrot.slane %v21984_v35, %v19557_v11 }
 0x876   : > { %v22066_v54 = vrot.slane %v16559_v19, %v19557_v11  ;;  %v12911_v59 = vrot.slane %v16554_v62, %v19557_v11  ;;  %v13494_v31 = vrot.slane %v13486_v44, %v19557_v11  ;;  %v22071_v38 = vrot.slane %v12845_v25, %v19557_v11  ;;  %v17600_v25 = vld [vmem:[%s22883_s5 + $0x38] sm:$0xff]   ;;  %16682 = vmatprep.subr.bf16.mxu1 %v17599_v51 }
 0x877   : > { %v22074_v12 = vrot.slane %v13203_v53, %v19557_v11  ;;  %13968 = vrot.lane.b32.xlu1 %v13780_v20, %s17665_s9  ;;  %v12912_v49 = vcombine.high %v12904_v36, %v12904_v36  ;;  %v22078_v22 = vrot.slane %v12904_v36, %v19557_v11  ;;  %v13509_v57 = vcombine.low %v22002_v16, %v22063_v18 }
 0x878   : > { %v12913_v63 = vcombine.high %v12911_v59, %v12911_v59  ;;  %v12927_v14 = vrot.slane %v12911_v59, %v19557_v11  ;;  %v13803_v45 = vshrl.u32 %v13494_v31, 16  ;;  %v13805_v40 = vshll.u32 %v13494_v31, 16  ;;  %v12663_v8 = vpop.f32.mrb[124].mxu1  ;;  %16683 = vmatpush3.bf16.msra.mxu1 %v17600_v25 }
 0x879   : > { %23507 = vst [vmem:[#allocation18_spill] sm:$0xff] %v22078_v22  ;;  %v22090_v21 = vrot.slane %v12912_v49, %v19557_v11  ;;  %v12942_v33 = vcombine.high %v22078_v22, %v22078_v22  ;;  %v13517_v15 = vrot.slane %v13509_v57, %v19557_v11  ;;  %v12665_v5 = vpop.f32.mrb[125].mxu1  ;;  %v13532_v19 = vcombine.low %v22011_v4, %v22071_v38 }
 0x87a   : > { %v22098_v62 = vrot.slane %v12913_v63, %v19557_v11  ;;  %v22100_v44 = vcombine.high %v12927_v14, %v12927_v14  ;;  %v13807_v53 = vrot.slane %v13805_v40, 1  ;;  %v16555_v20 = vpack.c.bf16 %v12665_v5, %v12663_v8  ;;  %v12667_v36 = vpop.f32.mrb[126].mxu1 }
 0x87b   : > { %23508 = vst [vmem:[#allocation47_spill] sm:$0xff] %v22090_v21  ;;  %v12944_v59 = vcombine.high %v22090_v21, %v22090_v21  ;;  %v13249_v31 = vcombine.low %v22090_v21, %v12942_v33  ;;  %v13817_v49 = vshrl.u32 %v13517_v15, 16  ;;  %v13819_v57 = vshll.u32 %v13517_v15, 16  ;;  %v12669_v43 = vpop.f32.mrb[127].mxu1 }
 0x87c   : > { %23509 = vst [vmem:[#allocation52_spill] sm:$0xff] %v22098_v62  ;;  %23510 = vst [vmem:[#allocation59_spill] sm:$0xff] %v22100_v44  ;;  %v13272_v24 = vcombine.low %v12927_v14, %v22098_v62  ;;  %v22108_v51 = vrot.slane %v22100_v44, %v19557_v11  ;;  %v13808_v40 = vor.u32 %v13807_v53, %v13803_v45 }
 0x87d   : > { %v22113_v25 = vrot.slane %v13249_v31, %v19557_v11  ;;  %v13821_v8 = vrot.slane %v13819_v57, 1  ;;  %v12945_v33 = vcombine.high %v22098_v62, %v22098_v62  ;;  %v12954_v15 = vrot.slane %v16555_v20, %v19557_v11 }
 0x87e   : > { %v22119_v5 = vrot.slane %v13272_v24, %v19557_v11  ;;  %13976 = vrot.lane.b32.xlu1 %v13808_v40, %s17665_s9  ;;  %v13540_v14 = vrot.slane %v13532_v19, %v19557_v11  ;;  %v16556_v7 = vpack.c.bf16 %v12669_v43, %v12667_v36  ;;  %v13555_v45 = vcombine.low %v22052_v1, %v22039_v48 }
 0x87f   : > { %v13822_v53 = vor.u32 %v13821_v8, %v13817_v49  ;;  %v12962_v31 = vcombine.high %v12954_v15, %v12954_v15  ;;  %v22126_v57 = vrot.slane %v12954_v15, %v19557_v11  ;;  %v22130_v63 = vrot.slane %v22044_v56, %v19557_v11 }
 0x880   : > { %v13831_v20 = vshrl.u32 %v13540_v14, 16  ;;  %v13833_v24 = vshll.u32 %v13540_v14, 16  ;;  %v12961_v61 = vrot.slane %v16556_v7, %v19557_v11  ;;  %v13563_v40 = vrot.slane %v13555_v45, %v19557_v11 }
 0x881   : > { %23511 = vst [vmem:[#allocation26_spill] sm:$0xff] %v22126_v57  ;;  %13980 = vrot.lane.b32.xlu0 %v13822_v53, %s17665_s9  ;;  %v22136_v43 = vrot.slane %v12962_v31, %v19557_v11  ;;  %v13295_v19 = vcombine.low %v12945_v33, %v22126_v57  ;;  %v13578_v36 = vcombine.low %v22074_v12, %v22130_v63 }
 0x882   : > { %v22143_v49 = vrot.slane %v22078_v22, %v19557_v11  ;;  %v13835_v8 = vrot.slane %v13833_v24, 1  ;;  %v12963_v15 = vcombine.high %v12961_v61, %v12961_v61  ;;  %v22146_v7 = vrot.slane %v12961_v61, %v19557_v11 }
 0x883   : > { %23512 = vst [vmem:[#allocation28_spill] sm:$0xff] %v22136_v43  ;;  %v13845_v14 = vshrl.u32 %v13563_v40, 16  ;;  %v22149_v45 = vrot.slane %v13295_v19, %v19557_v11  ;;  %v16560_v53 = vcombine.high %v22126_v57, %v22136_v43  ;;  %v13847_v33 = vshll.u32 %v13563_v40, 16  ;;  %v17601_v40 = vld [vmem:[%s22883_s5 + $0xc0] sm:$0xff]  }
 0x884   : > { %23513 = vst [vmem:[#allocation35_spill] sm:$0xff] %v22146_v7  ;;  %v13586_v31 = vrot.slane %v13578_v36, %v19557_v11  ;;  %v13836_v44 = vor.u32 %v13835_v8, %v13831_v20  ;;  %v22155_v62 = vrot.slane %v12963_v15, %v19557_v11  ;;  %v12993_v24 = vcombine.high %v22146_v7, %v22146_v7 }
 0x885   : > { %v13601_v61 = vcombine.low %v22066_v54, %v22143_v49  ;;  %v22162_v21 = vrot.slane %v16560_v53, %v19557_v11  ;;  %v13849_v19 = vrot.slane %v13847_v33, 1  ;;  %v22173_v15 = vrot.slane %v12944_v59, %v19557_v11  ;;  %16708 = vmatprep.subr.bf16.mxu1 %v17601_v40 }
 0x886   : > { %23514 = vst [vmem:[#allocation31_spill] sm:$0xff] %v22155_v62  ;;  %v13859_v22 = vshrl.u32 %v13586_v31, 16  ;;  %v13861_v50 = vshll.u32 %v13586_v31, 16  ;;  %13984 = vrot.lane.b32.xlu1 %v13836_v44, %s17665_s9  ;;  %v12995_v20 = vcombine.high %v22155_v62, %v22155_v62  ;;  %v13341_v36 = vcombine.low %v22155_v62, %v12993_v24 }
 0x887   : > { %v13609_v8 = vrot.slane %v13601_v61, %v19557_v11  ;;  %v13850_v53 = vor.u32 %v13849_v19, %v13845_v14  ;;  %v13647_v31 = vcombine.low %v22119_v5, %v22108_v51  ;;  %v22179_v57 = vrot.slane %v22136_v43, %v19557_v11 }
 0x888   : > { %v13863_v33 = vrot.slane %v13861_v50, 1  ;;  %v22182_v44 = vrot.slane %v13341_v36, %v19557_v11  ;;  %v13624_v24 = vcombine.low %v22113_v25, %v22173_v15  ;;  %v23515_v59 = vcombine.high %v21889_v17, %v21893_v0 }
 0x889   : > { %v13875_v23 = vshll.u32 %v13609_v8, 16  ;;  %13988 = vrot.lane.b32.xlu0 %v13850_v53, %s17665_s9  ;;  %v13655_v61 = vrot.slane %v13647_v31, %v19557_v11  ;;  %v13670_v19 = vcombine.low %v22149_v45, %v22179_v57  ;;  %v22196_v40 = vrot.slane %v22146_v7, %v19557_v11 }
 0x88a   : > { %v13386_v50 = vrot.slane %v23515_v59, %v19557_v11  ;;  %v13864_v14 = vor.u32 %v13863_v33, %v13859_v22  ;;  %v13873_v36 = vshrl.u32 %v13609_v8, 16  ;;  %v13632_v43 = vrot.slane %v13624_v24, %v19557_v11 }
 0x88b   : > { %v13877_v62 = vrot.slane %v13875_v23, 1  ;;  %v22200_v42 = vrot.slane %v12995_v20, %v19557_v11  ;;  %v13903_v0 = vshll.u32 %v13655_v61, 16  ;;  %v13678_v22 = vrot.slane %v13670_v19, %v19557_v11 }
 0x88c   : > { %13992 = vrot.lane.b32.xlu1 %v13864_v14, %s17665_s9  ;;  %v13693_v53 = vcombine.low %v22162_v21, %v22196_v40  ;;  %v13889_v31 = vshll.u32 %v13632_v43, 16  ;;  %v13901_v59 = vshrl.u32 %v13655_v61, 16  ;;  %v13887_v23 = vshrl.u32 %v13632_v43, 16 }
 0x88d   : > { %v13878_v33 = vor.u32 %v13877_v62, %v13873_v36  ;;  %v13716_v8 = vcombine.low %v22182_v44, %v22200_v42  ;;  %v13905_v7 = vrot.slane %v13903_v0, 1  ;;  %v13917_v24 = vshll.u32 %v13678_v22, 16 }
 0x88e   : > { %v13701_v20 = vrot.slane %v13693_v53, %v19557_v11  ;;  %v13891_v14 = vrot.slane %v13889_v31, 1  ;;  %v13742_v19 = vshll.u32 %v13386_v50, 16  ;;  %v13395_v35 = vcombine.high %v21907_v27, %v21904_v32 }
 0x88f   : > { %13996 = vrot.lane.b32.xlu0 %v13878_v33, %s17665_s9  ;;  %v13724_v56 = vrot.slane %v13716_v8, %v19557_v11  ;;  %v13906_v62 = vor.u32 %v13905_v7, %v13901_v59  ;;  %v13919_v36 = vrot.slane %v13917_v24, 1  ;;  %v13915_v34 = vshrl.u32 %v13678_v22, 16 }
 0x890   : > { %v13931_v61 = vshll.u32 %v13701_v20, 16  ;;  %v13892_v6 = vor.u32 %v13891_v14, %v13887_v23  ;;  %v13929_v46 = vshrl.u32 %v13701_v20, 16  ;;  %v13744_v2 = vrot.slane %v13742_v19, 1 }
 0x891   : > { %v13945_v43 = vshll.u32 %v13724_v56, 16  ;;  %v13409_v53 = vrot.slane %v13395_v35, %v19557_v11  ;;  %v13418_v33 = vcombine.high %v21910_v26, %v21934_v10  ;;  %v13920_v31 = vor.u32 %v13919_v36, %v13915_v34 }
 0x892   : > { %v13933_v0 = vrot.slane %v13931_v61, 1  ;;  %14000 = vrot.lane.b32.xlu1 %v13892_v6, %s17665_s9  ;;  %v13441_v7 = vcombine.high %v21955_v9, %v21975_v41  ;;  %v13464_v22 = vcombine.high %v21959_v3, %v21948_v47  ;;  %v13740_v8 = vshrl.u32 %v13386_v50, 16 }
 0x893   : > { %14004 = vrot.lane.b32.xlu0 %v13906_v62, %s17665_s9  ;;  %v13947_v32 = vrot.slane %v13945_v43, 1  ;;  %v13756_v23 = vshll.u32 %v13409_v53, 16  ;;  %v13432_v35 = vrot.slane %v13418_v33, %v19557_v11  ;;  %v13943_v24 = vshrl.u32 %v13724_v56, 16 }
 0x894   : > { %v13934_v59 = vor.u32 %v13933_v0, %v13929_v46  ;;  %v13455_v10 = vrot.slane %v13441_v7, %v19557_v11  ;;  %v13478_v6 = vrot.slane %v13464_v22, %v19557_v11  ;;  %v13487_v34 = vcombine.high %v21988_v58, %v22034_v13 }
 0x895   : > { %v13770_v20 = vshll.u32 %v13432_v35, 16  ;;  %v13510_v41 = vcombine.high %v22002_v16, %v22063_v18  ;;  %v13948_v46 = vor.u32 %v13947_v32, %v13943_v24  ;;  %v13745_v47 = vor.u32 %v13744_v2, %v13740_v8 }
 0x896   : > { %14008 = vrot.lane.b32.xlu1 %v13920_v31, %s17665_s9  ;;  %v13758_v50 = vrot.slane %v13756_v23, 1  ;;  %v13784_v14 = vshll.u32 %v13455_v10, 16  ;;  %v13798_v56 = vshll.u32 %v13478_v6, 16  ;;  %v13501_v19 = vrot.slane %v13487_v34, %v19557_v11 }
 0x897   : > { %14012 = vrot.lane.b32.xlu0 %v13934_v59, %s17665_s9  ;;  %v13772_v62 = vrot.slane %v13770_v20, 1  ;;  %v13524_v36 = vrot.slane %v13510_v41, %v19557_v11  ;;  %v13533_v13 = vcombine.high %v22011_v4, %v22071_v38  ;;  %v13556_v18 = vcombine.high %v22052_v1, %v22039_v48 }
 0x898   : > { %v13754_v61 = vshrl.u32 %v13409_v53, 16  ;;  %v13768_v2 = vshrl.u32 %v13432_v35, 16  ;;  %v13812_v43 = vshll.u32 %v13501_v19, 16  ;;  %v13579_v32 = vcombine.high %v22074_v12, %v22130_v63 }
 0x899   : > { %v13547_v0 = vrot.slane %v13533_v13, %v19557_v11  ;;  %v13570_v31 = vrot.slane %v13556_v18, %v19557_v11  ;;  %v13602_v38 = vcombine.high %v22066_v54, %v22143_v49  ;;  %v13786_v48 = vrot.slane %v13784_v14, 1 }
 0x89a   : > { %14016 = vrot.lane.b32.xlu1 %v13948_v46, %s17665_s9  ;;  %v13759_v33 = vor.u32 %v13758_v50, %v13754_v61  ;;  %v13773_v7 = vor.u32 %v13772_v62, %v13768_v2  ;;  %v13800_v53 = vrot.slane %v13798_v56, 1  ;;  %v13826_v22 = vshll.u32 %v13524_v36, 16 }
 0x89b   : > { %13958 = vrot.lane.b32.xlu0 %v13745_v47, %s17665_s9  ;;  %v13782_v59 = vshrl.u32 %v13455_v10, 16  ;;  %v13796_v8 = vshrl.u32 %v13478_v6, 16  ;;  %v13810_v23 = vshrl.u32 %v13501_v19, 16  ;;  %v13814_v35 = vrot.slane %v13812_v43, 1 }
 0x89c   : > { %v13840_v24 = vshll.u32 %v13547_v0, 16  ;;  %v13854_v34 = vshll.u32 %v13570_v31, 16  ;;  %v13593_v20 = vrot.slane %v13579_v32, %v19557_v11  ;;  %v13616_v63 = vrot.slane %v13602_v38, %v19557_v11 }
 0x89d   : > { %v13625_v49 = vcombine.high %v22113_v25, %v22173_v15  ;;  %v13787_v41 = vor.u32 %v13786_v48, %v13782_v59  ;;  %v13801_v46 = vor.u32 %v13800_v53, %v13796_v8  ;;  %v13828_v47 = vrot.slane %v13826_v22, 1 }
 0x89e   : > { %13962 = vrot.lane.b32.xlu1 %v13759_v33, %s17665_s9  ;;  %v13648_v10 = vcombine.high %v22119_v5, %v22108_v51  ;;  %v13815_v6 = vor.u32 %v13814_v35, %v13810_v23  ;;  %v13824_v50 = vshrl.u32 %v13524_v36, 16  ;;  %v13838_v14 = vshrl.u32 %v13547_v0, 16 }
 0x89f   : > { %13966 = vrot.lane.b32.xlu0 %v13773_v7, %s17665_s9  ;;  %v13842_v56 = vrot.slane %v13840_v24, 1  ;;  %v13856_v19 = vrot.slane %v13854_v34, 1  ;;  %v13868_v62 = vshll.u32 %v13593_v20, 16  ;;  %v13882_v13 = vshll.u32 %v13616_v63, 16 }
 0x8a0   : > { %v13639_v18 = vrot.slane %v13625_v49, %v19557_v11  ;;  %v13829_v15 = vor.u32 %v13828_v47, %v13824_v50  ;;  %v13662_v61 = vrot.slane %v13648_v10, %v19557_v11  ;;  %v13671_v2 = vcombine.high %v22149_v45, %v22179_v57 }
 0x8a1   : > { %v13694_v51 = vcombine.high %v22162_v21, %v22196_v40  ;;  %v13852_v43 = vshrl.u32 %v13570_v31, 16  ;;  %v13843_v36 = vor.u32 %v13842_v56, %v13838_v14  ;;  %v13870_v33 = vrot.slane %v13868_v62, 1 }
 0x8a2   : > { %13970 = vrot.lane.b32.xlu1 %v13787_v41, %s17665_s9  ;;  %v13884_v32 = vrot.slane %v13882_v13, 1  ;;  %v13896_v38 = vshll.u32 %v13639_v18, 16  ;;  %v13910_v7 = vshll.u32 %v13662_v61, 16  ;;  %v13685_v48 = vrot.slane %v13671_v2, %v19557_v11  ;;  %v17621_v13 = vld [vmem:[%s22884_s6 + $0xc0] sm:$0xff]   ;;  %v17625_v2 = vld [vmem:[%s22884_s6 + $0xd0] sm:$0xff]  }
 0x8a3   : > { %13974 = vrot.lane.b32.xlu0 %v13801_v46, %s17665_s9  ;;  %v13857_v0 = vor.u32 %v13856_v19, %v13852_v43  ;;  %v13708_v53 = vrot.slane %v13694_v51, %v19557_v11  ;;  %v13717_v57 = vcombine.high %v22182_v44, %v22200_v42  ;;  %v13866_v22 = vshrl.u32 %v13593_v20, 16  ;;  %16778 = vmatprep.subr.bf16.mxu0 %v17621_v13  ;;  %v17626_v51 = vld [vmem:[%s22884_s6 + $0x90] sm:$0xff]   ;;  %v17627_v43 = vld [vmem:[%s22884_s6 + $0xd8] sm:$0xff]  }
 0x8a4   : > { %v13880_v40 = vshrl.u32 %v13616_v63, 16  ;;  %v13898_v8 = vrot.slane %v13896_v38, 1  ;;  %v13912_v23 = vrot.slane %v13910_v7, 1  ;;  %v13924_v35 = vshll.u32 %v13685_v48, 16 }
 0x8a5   : > { %v13871_v31 = vor.u32 %v13870_v33, %v13866_v22  ;;  %v13938_v24 = vshll.u32 %v13708_v53, 16  ;;  %v13731_v34 = vrot.slane %v13717_v57, %v19557_v11  ;;  %v13894_v49 = vshrl.u32 %v13639_v18, 16  ;;  %v17622_v18 = vld [vmem:[%s22884_s6 + $0x80] sm:$0xff]  }
 0x8a6   : > { %13978 = vrot.lane.b32.xlu1 %v13815_v6, %s17665_s9  ;;  %v13885_v59 = vor.u32 %v13884_v32, %v13880_v40  ;;  %v13908_v42 = vshrl.u32 %v13662_v61, 16  ;;  %v13926_v41 = vrot.slane %v13924_v35, 1  ;;  %v13922_v10 = vshrl.u32 %v13685_v48, 16  ;;  %16779 = vmatpush3.bf16.msra.mxu0 %v17622_v18  ;;  %v17624_v61 = vld [vmem:[%s22884_s6 + $0x88] sm:$0xff]   ;;  %v17630_v33 = vld [vmem:[%s22884_s6 + $0xa0] sm:$0xff]  }
 0x8a7   : > { %13982 = vrot.lane.b32.xlu0 %v13829_v15, %s17665_s9  ;;  %v13899_v20 = vor.u32 %v13898_v8, %v13894_v49  ;;  %v13940_v46 = vrot.slane %v13938_v24, 1  ;;  %v13952_v47 = vshll.u32 %v13731_v34, 16  ;;  %v13936_v6 = vshrl.u32 %v13708_v53, 16  ;;  %v17623_v15 = vld [vmem:[%s22884_s6 + $0xc8] sm:$0xff]  }
 0x8a8   : > { %v13913_v63 = vor.u32 %v13912_v23, %v13908_v42  ;;  %v13927_v50 = vor.u32 %v13926_v41, %v13922_v10  ;;  %v13950_v19 = vshrl.u32 %v13731_v34, 16  ;;  %16780 = vmatprep.subr.bf16.mxu0 %v17623_v15  ;;  %v13027_v32 = vcombine.high %v21907_v27, %v21907_v27 }
 0x8a9   : > { %v13941_v14 = vor.u32 %v13940_v46, %v13936_v6  ;;  %v13954_v56 = vrot.slane %v13952_v47, 1  ;;  %v13004_v7 = vcombine.high %v21889_v17, %v21889_v17  ;;  %v13050_v57 = vcombine.high %v21910_v26, %v21910_v26 }
 0x8aa   : > { %13986 = vrot.lane.b32.xlu1 %v13843_v36, %s17665_s9  ;;  %16781 = vmatpush3.bf16.msra.mxu0 %v17624_v61  ;;  %v17628_v36 = vld [vmem:[%s22884_s6 + $0x98] sm:$0xff]   ;;  %v13041_v53 = vrot.slane %v13027_v32, %v19557_v11  ;;  %v13073_v35 = vcombine.high %v21955_v9, %v21955_v9  ;;  %v13011_v24 = vrot.slane %v21889_v17, %v19557_v11 }
 0x8ab   : > { %13990 = vrot.lane.b32.xlu0 %v13857_v0, %s17665_s9  ;;  %v13955_v62 = vor.u32 %v13954_v56, %v13950_v19  ;;  %16782 = vmatprep.subr.bf16.mxu0 %v17625_v2  ;;  %v17629_v0 = vld [vmem:[%s22884_s6 + $0xe0] sm:$0xff]   ;;  %v13018_v22 = vrot.slane %v13004_v7, %v19557_v11  ;;  %v13064_v23 = vrot.slane %v13050_v57, %v19557_v11 }
 0x8ac   : > { %v13080_v46 = vrot.slane %v21955_v9, %v19557_v11  ;;  %v13096_v19 = vcombine.high %v21959_v3, %v21959_v3  ;;  %v13142_v18 = vcombine.high %v22002_v16, %v22002_v16 }
 0x8ae   : > { %13994 = vrot.lane.b32.xlu1 %v13871_v31, %s17665_s9  ;;  %16783 = vmatpush3.bf16.msra.mxu0 %v17626_v51  ;;  %v13034_v31 = vrot.slane %v21907_v27, %v19557_v11  ;;  %v13057_v27 = vrot.slane %v21910_v26, %v19557_v11  ;;  %v13110_v61 = vrot.slane %v13096_v19, %v19557_v11 }
 0x8af   : > { %13998 = vrot.lane.b32.xlu0 %v13885_v59, %s17665_s9  ;;  %16784 = vmatprep.subr.bf16.mxu0 %v17627_v43  ;;  %v13156_v32 = vrot.slane %v13142_v18, %v19557_v11 }
 0x8b2   : > { %14002 = vrot.lane.b32.xlu1 %v13899_v20, %s17665_s9  ;;  %16785 = vmatpush3.bf16.msra.mxu0 %v17628_v36  ;;  %v13087_v20 = vrot.slane %v13073_v35, %v19557_v11  ;;  %v13126_v36 = vrot.slane %v21988_v58, %v19557_v11  ;;  %v13149_v35 = vrot.slane %v22002_v16, %v19557_v11 }
 0x8b3   : > { %14006 = vrot.lane.b32.xlu0 %v13913_v63, %s17665_s9  ;;  %16786 = vmatprep.subr.bf16.mxu0 %v17629_v0  ;;  %v13165_v0 = vcombine.high %v22011_v4, %v22011_v4  ;;  %v13172_v16 = vrot.slane %v22011_v4, %v19557_v11  ;;  %v13195_v4 = vrot.slane %v22052_v1, %v19557_v11 }
 0x8b6   : > { %14010 = vrot.lane.b32.xlu1 %v13927_v50, %s17665_s9  ;;  %16787 = vmatpush3.bf16.msra.mxu0 %v17630_v33  ;;  %v13119_v50 = vcombine.high %v21988_v58, %v21988_v58 }
 0x8b7   : > { %14014 = vrot.lane.b32.xlu0 %v13941_v14, %s17665_s9 }
 0x8b8   : > { %v13133_v13 = vrot.slane %v13119_v50, %v19557_v11 }
 0x8ba   : > { %14018 = vrot.lane.b32.xlu1 %v13955_v62, %s17665_s9 }
 0x8dc   : > { %v22309_v38 = vpop.permute.xlu0 %13956 }
 0x8dd   : > { %v14406_v8 = vsel %vm6047_vm4, %v13018_v22, %v22309_v38  ;;  %v17602_v22 = vld [vmem:[%s22883_s5 + $0x80] sm:$0xff]  }
 0x8de   : > { %v22313_v48 = vpop.permute.xlu1 %13960  ;;  %v14468_v42 = vcombine.low %v13011_v24, %v14406_v8  ;;  %v13188_v24 = vcombine.high %v22052_v1, %v22052_v1  ;;  %v17607_v1 = vld [vmem:[%s22883_s5 + $0xd8] sm:$0xff]  }
 0x8df   : > { %v14409_v40 = vsel %vm6047_vm4, %v13041_v53, %v22313_v48 }
 0x8e0   : > { %v14492_v34 = vcombine.low %v13034_v31, %v14409_v40  ;;  %v14476_v10 = vrot.slane %v14468_v42, %v23402_v28  ;;  %v13103_v40 = vrot.slane %v21959_v3, %v19557_v11  ;;  %v17603_v31 = vld [vmem:[%s22883_s5 + $0xc8] sm:$0xff]   ;;  %v13211_v3 = vcombine.high %v22074_v12, %v22074_v12 }
 0x8e2   : > { %v22323_v59 = vpop.permute.xlu0 %13964  ;;  %v14500_v63 = vrot.slane %v14492_v34, %v23402_v28  ;;  %v13179_v34 = vrot.slane %v13165_v0, %v19557_v11  ;;  %v13225_v50 = vrot.slane %v13211_v3, %v19557_v11 }
 0x8e3   : > { %v14412_v49 = vsel %vm6047_vm4, %v13064_v23, %v22323_v59 }
 0x8e4   : > { %v14516_v41 = vcombine.low %v13057_v27, %v14412_v49  ;;  %v16565_v26 = vcombine.low %v14476_v10, %v14500_v63  ;;  %v17604_v49 = vld [vmem:[%s22883_s5 + $0x88] sm:$0xff]   ;;  %v17605_v63 = vld [vmem:[%s22883_s5 + $0xd0] sm:$0xff]   ;;  %v13202_v10 = vrot.slane %v13188_v24, %v19557_v11 }
 0x8e6   : > { %v14524_v14 = vrot.slane %v14516_v41, %v23402_v28  ;;  %v14934_v51 = vrot.slane %v16565_v26, %v23402_v28  ;;  %v13234_v26 = vcombine.high %v22066_v54, %v22066_v54 }
 0x8e7   : > { %v22351_v62 = vpop.permute.xlu0 %13972 }
 0x8e8   : > { %v14418_v33 = vsel %vm6047_vm4, %v13110_v61, %v22351_v62  ;;  %v13218_v61 = vrot.slane %v22074_v12, %v19557_v11  ;;  %v13248_v0 = vrot.slane %v13234_v26, %v19557_v11  ;;  %v17608_v12 = vld [vmem:[%s22883_s5 + $0x98] sm:$0xff]  }
 0x8e9   : > { %v22340_v47 = vpop.permute.xlu1 %13968  ;;  %v14564_v23 = vcombine.low %v13103_v40, %v14418_v33  ;;  %v13257_v33 = vcombine.high %v22113_v25, %v22113_v25  ;;  %v17609_v40 = vld [vmem:[%s22883_s5 + $0xe0] sm:$0xff]  }
 0x8ea   : > { %v14415_v17 = vsel %vm6047_vm4, %v13087_v20, %v22340_v47 }
 0x8eb   : > { %v14540_v6 = vcombine.low %v13080_v46, %v14415_v17  ;;  %v14572_v46 = vrot.slane %v14564_v23, %v23402_v28  ;;  %v13241_v23 = vrot.slane %v22066_v54, %v19557_v11  ;;  %v13264_v54 = vrot.slane %v22113_v25, %v19557_v11 }
 0x8ec   : > { %v13287_v25 = vrot.slane %v22119_v5, %v19557_v11 }
 0x8ed   : > { %v14548_v56 = vrot.slane %v14540_v6, %v23402_v28 }
 0x8ef   : > { %v16567_v9 = vcombine.low %v14524_v14, %v14548_v56  ;;  %v17606_v14 = vld [vmem:[%s22883_s5 + $0x90] sm:$0xff]  }
 0x8f0   : > { %v22356_v15 = vpop.permute.xlu1 %13976 }
 0x8f1   : > { %v14421_v2 = vsel %vm6047_vm4, %v13133_v13, %v22356_v15  ;;  %v14948_v43 = vrot.slane %v16567_v9, %v23402_v28 }
 0x8f2   : > { %v14588_v58 = vcombine.low %v13126_v36, %v14421_v2 }
 0x8f3   : > { %v22370_v7 = vpop.permute.xlu0 %13980  ;;  %v14956_v53 = vcombine.low %v14934_v51, %v14948_v43  ;;  %v14957_v57 = vcombine.high %v14934_v51, %v14948_v43 }
 0x8f4   : > { %v14424_v8 = vsel %vm6047_vm4, %v13156_v32, %v22370_v7  ;;  %v14596_v42 = vrot.slane %v14588_v58, %v23402_v28  ;;  %v13280_v32 = vcombine.high %v22119_v5, %v22119_v5  ;;  %v12745_v5 = vcombine.high %v21884_v52, %v21884_v52 }
 0x8f5   : > { %15412 = vmatprep.mubr.bf16.mxu1 %v14957_v57  ;;  %v14612_v27 = vcombine.low %v13149_v35, %v14424_v8 }
 0x8f6   : > { %15413 = vmatmul.mubr.bf16.vlgmr.msra.gmra.mrb[128].mxu1 %v14956_v53  ;;  %v16569_v56 = vcombine.low %v14572_v46, %v14596_v42  ;;  %v13294_v42 = vrot.slane %v13280_v32, %v19557_v11 }
 0x8f7   : > { %16709 = vmatpush3.bf16.msra.mxu1 %v17602_v22  ;;  %v14620_v19 = vrot.slane %v14612_v27, %v23402_v28  ;;  %v13326_v27 = vcombine.high %v22162_v21, %v22162_v21 }
 0x8f8   : > { %v22395_v20 = vpop.permute.xlu1 %13984  ;;  %16710 = vmatprep.subr.bf16.mxu1 %v17603_v31  ;;  %v14987_v57 = vrot.slane %v16569_v56, %v23402_v28 }
 0x8f9   : > { %v14427_v41 = vsel %vm6047_vm4, %v13179_v34, %v22395_v20  ;;  %v13303_v34 = vcombine.high %v22149_v45, %v22149_v45  ;;  %v13340_v56 = vrot.slane %v13326_v27, %v19557_v11 }
 0x8fa   : > { %v14636_v17 = vcombine.low %v13172_v16, %v14427_v41  ;;  %v17610_v16 = vld [vmem:[%s22883_s5 + $0xa0] sm:$0xff]  }
 0x8fb   : > { %v22404_v6 = vpop.permute.xlu0 %13988  ;;  %16711 = vmatpush3.bf16.msra.mxu1 %v17604_v49  ;;  %v13271_v49 = vrot.slane %v13257_v33, %v19557_v11  ;;  %v13317_v26 = vrot.slane %v13303_v34, %v19557_v11 }
 0x8fc   : > { %v14644_v9 = vrot.slane %v14636_v17, %v23402_v28  ;;  %v14430_v13 = vsel %vm6047_vm4, %v13202_v10, %v22404_v6  ;;  %16712 = vmatprep.subr.bf16.mxu1 %v17605_v63  ;;  %v17611_v17 = vld [vmem:[%s22883_s5 + $0xe8] sm:$0xff]  }
 0x8fd   : > { %v14660_v18 = vcombine.low %v13195_v4, %v14430_v13  ;;  %v14059_v13 = vcombine.low %v21881_v60, %v21884_v52  ;;  %v17613_v60 = vld [vmem:[%s22883_s5 + $0xf0] sm:$0xff]  }
 0x8fe   : > { %v22423_v2 = vpop.permute.xlu1 %13992  ;;  %v16571_v51 = vcombine.low %v14620_v19, %v14644_v9  ;;  %v23516_v19 = vcombine.low %v21873_v30, %v21875_v29  ;;  %v13310_v30 = vrot.slane %v22149_v45, %v19557_v11  ;;  %v16561_v45 = vcombine.high %v21913_v39, %v21926_v37 }
 0x8ff   : > { %v14433_v43 = vsel %vm6047_vm4, %v13225_v50, %v22423_v2  ;;  %16713 = vmatpush3.bf16.msra.mxu1 %v17606_v14  ;;  %v14668_v58 = vrot.slane %v14660_v18, %v23402_v28  ;;  %v13349_v14 = vcombine.high %v22182_v44, %v22182_v44 }
 0x900   : > { %v14684_v36 = vcombine.low %v13218_v61, %v14433_v43  ;;  %v15001_v22 = vrot.slane %v16571_v51, %v23402_v28  ;;  %16714 = vmatprep.subr.bf16.mxu1 %v17607_v1  ;;  %v22480_v9 = vrot.slane %v23516_v19, %v19557_v11  ;;  %v17612_v1 = vld [vmem:[%s22883_s5 + $0xa8] sm:$0xff]   ;;  %v17616_v19 = vld [vmem:[%s22883_s5 + $0xb8] sm:$0xff]  }
 0x901   : > { %v22435_v53 = vpop.permute.xlu0 %13996 }
 0x902   : > { %v14692_v31 = vrot.slane %v14684_v36, %v23402_v28  ;;  %v14436_v8 = vsel %vm6047_vm4, %v13248_v0, %v22435_v53  ;;  %v15010_v35 = vcombine.high %v14987_v57, %v15001_v22  ;;  %v15009_v24 = vcombine.low %v14987_v57, %v15001_v22 }
 0x903   : > { %16715 = vmatpush3.bf16.msra.mxu1 %v17608_v12  ;;  %v14708_v63 = vcombine.low %v13241_v23, %v14436_v8  ;;  %v14082_v0 = vcombine.low %v12745_v5, %v21913_v39  ;;  %v13333_v12 = vrot.slane %v22162_v21, %v19557_v11  ;;  %v13356_v57 = vrot.slane %v22182_v44, %v19557_v11  ;;  %v17614_v39 = vld [vmem:[%s22883_s5 + $0xb0] sm:$0xff]  }
 0x904   : > { %v16573_v3 = vcombine.low %v14668_v58, %v14692_v31  ;;  %15420 = vmatprep.mubr.bf16.mxu1 %v15010_v35  ;;  %v22459_v41 = vpop.permute.xlu1 %14000  ;;  %16716 = vmatprep.subr.bf16.mxu1 %v17609_v40  ;;  %v13363_v22 = vrot.slane %v13349_v14, %v19557_v11  ;;  %v14044_v58 = vcombine.high %v22480_v9, %v22480_v9  ;;  %v23520_v14 = vld [vmem:[#allocation4_spill] sm:$0xff] }
 0x905   : > { %v22461_v46 = vpop.permute.xlu0 %14004  ;;  %15421 = vmatmul.mubr.bf16.gmra.mrb[132].mxu1 %v15009_v24  ;;  %v14439_v10 = vsel %vm6047_vm4, %v13271_v49, %v22459_v41  ;;  %v14716_v18 = vrot.slane %v14708_v63, %v23402_v28  ;;  %v22516_v31 = vrot.slane %v14059_v13, %v19557_v11  ;;  %v17615_v24 = vld [vmem:[%s22883_s5 + $0xf8] sm:$0xff]   ;;  %v22534_v49 = vrot.slane %v14082_v0, %v19557_v11 }
 0x906   : > { %v14442_v4 = vsel %vm6047_vm4, %v13294_v42, %v22461_v46  ;;  %v14732_v50 = vcombine.low %v13264_v54, %v14439_v10  ;;  %v15040_v40 = vrot.slane %v16573_v3, %v23402_v28  ;;  %v14051_v3 = vrot.slane %v22480_v9, %v19557_v11 }
 0x907   : > { %16717 = vmatpush3.bf16.msra.mxu1 %v17610_v16  ;;  %v14756_v51 = vcombine.low %v13287_v25, %v14442_v4  ;;  %v22537_v42 = vrot.slane %v16561_v45, %v19557_v11  ;;  %v12844_v54 = vcombine.high %v21980_v55, %v21980_v55  ;;  %v23517_v4 = vld [vmem:[#allocation38_spill] sm:$0xff] }
 0x908   : > { %v14740_v61 = vrot.slane %v14732_v50, %v23402_v28  ;;  %v22493_v29 = vpop.permute.xlu1 %14008  ;;  %16718 = vmatprep.subr.bf16.mxu1 %v17611_v17  ;;  %v23518_v50 = vld [vmem:[#allocation36_spill] sm:$0xff] }
 0x909   : > { %v22495_v43 = vpop.permute.xlu0 %14012  ;;  %v14445_v52 = vsel %vm6047_vm4, %v13317_v26, %v22493_v29  ;;  %v14764_v37 = vrot.slane %v14756_v51, %v23402_v28  ;;  %v23519_v25 = vcombine.low %v23517_v4, %v23518_v50 }
 0x90a   : > { %v14448_v36 = vsel %vm6047_vm4, %v13340_v56, %v22495_v43  ;;  %v16575_v33 = vcombine.low %v14716_v18, %v14740_v61  ;;  %v14780_v32 = vcombine.low %v13310_v30, %v14445_v52  ;;  %v14151_v56 = vcombine.low %v23520_v14, %v21980_v55  ;;  %v22561_v55 = vld [vmem:[%s22883_s5 + $0x100] sm:$0xff]   ;;  %v23521_v30 = vld [vmem:[#allocation19_spill] sm:$0xff] }
 0x90b   : > { %16719 = vmatpush3.bf16.msra.mxu1 %v17612_v1  ;;  %v14804_v44 = vcombine.low %v13333_v12, %v14448_v36  ;;  %v22547_v26 = vrot.slane %v23519_v25, %v19557_v11  ;;  %v14097_v61 = vrot.slane %v22534_v49, %v19557_v11 }
 0x90c   : > { %v14788_v21 = vrot.slane %v14780_v32, %v23402_v28  ;;  %v22523_v8 = vpop.permute.xlu1 %14016  ;;  %v15054_v23 = vrot.slane %v16575_v33, %v23402_v28  ;;  %16720 = vmatprep.subr.bf16.mxu1 %v17613_v60  ;;  %v23522_v60 = vld [vmem:[#allocation25_spill] sm:$0xff]  ;;  %v22573_v32 = vrot.slane %v14044_v58, %v19557_v11  ;;  %v22578_v12 = vrot.slane %v14151_v56, %v19557_v11 }
 0x90d   : > { %v13959_v35 = vpop.permute.xlu0 %13958  ;;  %v14451_v34 = vsel %vm6047_vm4, %v13363_v22, %v22523_v8  ;;  %v14812_v9 = vrot.slane %v14804_v44, %v23402_v28  ;;  %v16562_v52 = vcombine.high %v23522_v60, %v23521_v30  ;;  %v14174_v33 = vcombine.low %v12844_v54, %v23522_v60  ;;  %v23524_v54 = vld [vmem:[#allocation12_spill] sm:$0xff] }
 0x90e   : > { %v16577_v27 = vcombine.low %v14764_v37, %v14788_v21  ;;  %v14828_v16 = vcombine.low %v13356_v57, %v14451_v34  ;;  %v15063_v63 = vcombine.high %v15040_v40, %v15054_v23  ;;  %v14020_v17 = vsel %vm6047_vm4, %v22309_v38, %v13959_v35 }
 0x90f   : > { %v15062_v10 = vcombine.low %v15040_v40, %v15054_v23  ;;  %16721 = vmatpush3.bf16.msra.mxu1 %v17614_v39  ;;  %v14074_v38 = vrot.slane %v22516_v31, %v19557_v11  ;;  %v14469_v0 = vcombine.low %v14020_v17, %v14051_v3  ;;  %v14067_v58 = vcombine.high %v22516_v31, %v22516_v31 }
 0x910   : > { %v14836_v13 = vrot.slane %v14828_v16, %v23402_v28  ;;  %15428 = vmatprep.mubr.bf16.mxu1 %v15063_v63  ;;  %v13963_v5 = vpop.permute.xlu1 %13962  ;;  %16722 = vmatprep.subr.bf16.mxu1 %v17615_v24  ;;  %v15093_v39 = vrot.slane %v16577_v27, %v23402_v28  ;;  %v14143_v44 = vrot.slane %v22547_v26, %v19557_v11  ;;  %v23523_v63 = vld [vmem:[#allocation17_spill] sm:$0xff] }
 0x911   : > { %v13967_v1 = vpop.permute.xlu0 %13966  ;;  %15429 = vmatmul.mubr.bf16.gmra.mrb[136].mxu1 %v15062_v10  ;;  %v14021_v18 = vsel %vm6047_vm4, %v22313_v48, %v13963_v5  ;;  %v14120_v48 = vrot.slane %v22537_v42, %v19557_v11  ;;  %v22591_v23 = vrot.slane %v16562_v52, %v19557_v11  ;;  %v14483_v35 = vrot.slane %v14469_v0, %v23402_v28 }
 0x912   : > { %v14022_v51 = vsel %vm6047_vm4, %v22323_v59, %v13967_v1  ;;  %v16579_v36 = vcombine.low %v14812_v9, %v14836_v13  ;;  %v14493_v45 = vcombine.low %v14021_v18, %v14074_v38  ;;  %v22595_v3 = vrot.slane %v14174_v33, %v19557_v11  ;;  %v23525_v9 = vld [vmem:[#allocation21_spill] sm:$0xff]  ;;  %v23526_v13 = vld [vmem:[#allocation24_spill] sm:$0xff]  ;;  %v23528_v1 = vld [vmem:[#allocation18_spill] sm:$0xff] }
 0x913   : > { %16723 = vmatpush3.bf16.msra.mxu1 %v17616_v19  ;;  %v14517_v57 = vcombine.low %v14022_v51, %v14097_v61  ;;  %v12895_v17 = vcombine.high %v23523_v63, %v23523_v63  ;;  %v14166_v25 = vrot.slane %v22578_v12, %v19557_v11  ;;  %v23527_v38 = vcombine.low %v23525_v9, %v23526_v13  ;;  %v23533_v9 = vld [vmem:[#allocation59_spill] sm:$0xff] }
 0x914   : > { %v14507_v59 = vrot.slane %v14493_v45, %v23402_v28  ;;  %v13971_v22 = vpop.permute.xlu1 %13970  ;;  %v15107_v37 = vrot.slane %v16579_v36, %v23402_v28  ;;  %16800 = vmatprep.subr.bf16.mxu1 %v22561_v55  ;;  %v14189_v60 = vrot.slane %v22595_v3, %v19557_v11  ;;  %v23529_v36 = vld [vmem:[#allocation47_spill] sm:$0xff] }
 0x915   : > { %v13975_v40 = vpop.permute.xlu0 %13974  ;;  %v14023_v21 = vsel %vm6047_vm4, %v22340_v47, %v13971_v22  ;;  %v14243_v47 = vcombine.low %v23524_v54, %v23523_v63  ;;  %v14531_v4 = vrot.slane %v14517_v57, %v23402_v28  ;;  %v22615_v5 = vrot.slane %v23527_v38, %v19557_v11 }
 0x916   : > { %v14541_v24 = vcombine.low %v14023_v21, %v14120_v48  ;;  %v15116_v34 = vcombine.high %v15093_v39, %v15107_v37  ;;  %v14024_v27 = vsel %vm6047_vm4, %v22351_v62, %v13975_v40  ;;  %v15115_v16 = vcombine.low %v15093_v39, %v15107_v37 }
 0x917   : > { %v16566_v10 = vcombine.low %v14483_v35, %v14507_v59  ;;  %v14266_v18 = vcombine.low %v12895_v17, %v23528_v1  ;;  %v14565_v51 = vcombine.low %v14024_v27, %v14143_v44  ;;  %v22625_v52 = vrot.slane %v14243_v47, %v19557_v11 }
 0x918   : > { %v14555_v50 = vrot.slane %v14541_v24, %v23402_v28  ;;  %15436 = vmatprep.mubr.bf16.mxu1 %v15116_v34  ;;  %v13979_v14 = vpop.permute.xlu1 %13978  ;;  %v16563_v0 = vcombine.high %v23528_v1, %v23529_v36  ;;  %v14235_v39 = vrot.slane %v22615_v5, %v19557_v11  ;;  %v23530_v24 = vld [vmem:[#allocation28_spill] sm:$0xff] }
 0x919   : > { %v13983_v56 = vpop.permute.xlu0 %13982  ;;  %v14025_v62 = vsel %vm6047_vm4, %v22356_v15, %v13979_v14  ;;  %15437 = vmatmul.mubr.bf16.gmra.mrb[140].mxu1 %v15115_v16  ;;  %v14113_v15 = vcombine.high %v22537_v42, %v22537_v42  ;;  %v14941_v57 = vrot.slane %v16566_v10, %v23402_v28  ;;  %v14136_v42 = vcombine.high %v22547_v26, %v22547_v26 }
 0x91a   : > { %v14026_v19 = vsel %vm6047_vm4, %v22370_v7, %v13983_v56  ;;  %v16568_v61 = vcombine.low %v14531_v4, %v14555_v50  ;;  %v14589_v30 = vcombine.low %v14025_v62, %v14166_v25  ;;  %v14212_v7 = vrot.slane %v22591_v23, %v19557_v11 }
 0x91b   : > { %v14613_v33 = vcombine.low %v14026_v19, %v14189_v60  ;;  %v22639_v37 = vrot.slane %v14266_v18, %v19557_v11  ;;  %v14579_v21 = vrot.slane %v14565_v51, %v23402_v28  ;;  %v12994_v34 = vcombine.high %v23530_v24, %v23530_v24  ;;  %v23532_v19 = vld [vmem:[#allocation52_spill] sm:$0xff]  ;;  %v23535_v51 = vld [vmem:[#allocation35_spill] sm:$0xff] }
 0x91c   : > { %v14603_v45 = vrot.slane %v14589_v30, %v23402_v28  ;;  %v13987_v48 = vpop.permute.xlu1 %13986  ;;  %v14955_v22 = vrot.slane %v16568_v61, %v23402_v28  ;;  %v22647_v63 = vrot.slane %v16563_v0, %v19557_v11  ;;  %v14258_v4 = vrot.slane %v22625_v52, %v19557_v11 }
 0x91d   : > { %v13991_v59 = vpop.permute.xlu0 %13990  ;;  %v14027_v40 = vsel %vm6047_vm4, %v22395_v20, %v13987_v48  ;;  %v23531_v20 = vld [vmem:[#allocation26_spill] sm:$0xff]  ;;  %v14627_v17 = vrot.slane %v14613_v33, %v23402_v28  ;;  %v14281_v56 = vrot.slane %v22639_v37, %v19557_v11  ;;  %v23534_v13 = vcombine.low %v23532_v19, %v23533_v9 }
 0x91e   : > { %v14637_v44 = vcombine.low %v14027_v40, %v14212_v7  ;;  %v14958_v35 = vcombine.low %v14941_v57, %v14955_v22  ;;  %v14028_v27 = vsel %vm6047_vm4, %v22404_v6, %v13991_v59  ;;  %v14959_v16 = vcombine.high %v14941_v57, %v14955_v22  ;;  %v17618_v6 = vld [vmem:[%s22883_s5 + $0x108] sm:$0xff]  }
 0x91f   : > { %v14335_v54 = vcombine.low %v23531_v20, %v23530_v24  ;;  %v16570_v47 = vcombine.low %v14579_v21, %v14603_v45  ;;  %v22668_v38 = vrot.slane %v23534_v13, %v19557_v11  ;;  %v14661_v18 = vcombine.low %v14028_v27, %v14235_v39  ;;  %v23536_v7 = vld [vmem:[#allocation31_spill] sm:$0xff] }
 0x920   : > { %v14651_v10 = vrot.slane %v14637_v44, %v23402_v28  ;;  %v13995_v50 = vpop.permute.xlu1 %13994  ;;  %15477 = vmatprep.mubr.bf16.mxu1 %v14959_v16  ;;  %v14358_v30 = vcombine.low %v12994_v34, %v23535_v51  ;;  %v16564_v36 = vcombine.high %v23535_v51, %v23536_v7  ;;  %v14090_v59 = vcombine.high %v22534_v49, %v22534_v49 }
 0x921   : > { %v13999_v25 = vpop.permute.xlu0 %13998  ;;  %v14029_v14 = vsel %vm6047_vm4, %v22423_v2, %v13995_v50  ;;  %15478 = vmatmul.mubr.bf16.vlgmr.msra.gmra.mrb[144].mxu1 %v14958_v35  ;;  %v22675_v2 = vrot.slane %v14067_v58, %v19557_v11  ;;  %v22681_v60 = vrot.slane %v14335_v54, %v19557_v11  ;;  %v14994_v31 = vrot.slane %v16570_v47, %v23402_v28 }
 0x922   : > { %v14030_v62 = vsel %vm6047_vm4, %v22435_v53, %v13999_v25  ;;  %v16572_v1 = vcombine.low %v14627_v17, %v14651_v10  ;;  %v14685_v61 = vcombine.low %v14029_v14, %v14258_v4  ;;  %v14304_v53 = vrot.slane %v22647_v63, %v19557_v11  ;;  %16801 = vmatpush3.bf16.msra.mxu1 %v22561_v55  ;;  %v17619_v55 = vld [vmem:[%s22883_s5 + $0x110] sm:$0xff]  }
 0x923   : > { %v14709_v45 = vcombine.low %v14030_v62, %v14281_v56  ;;  %16802 = vmatprep.subr.bf16.mxu1 %v17618_v6  ;;  %v14127_v57 = vrot.slane %v14113_v15, %v19557_v11  ;;  %v14327_v40 = vrot.slane %v22668_v38, %v19557_v11  ;;  %v14675_v39 = vrot.slane %v14661_v18, %v23402_v28 }
 0x924   : > { %v14699_v0 = vrot.slane %v14685_v61, %v23402_v28  ;;  %v14003_v33 = vpop.permute.xlu1 %14002  ;;  %v15008_v58 = vrot.slane %v16572_v1, %v23402_v28  ;;  %v22700_v35 = vrot.slane %v14358_v30, %v19557_v11  ;;  %v14350_v49 = vrot.slane %v22681_v60, %v19557_v11 }
 0x925   : > { %v14007_v48 = vpop.permute.xlu0 %14006  ;;  %v14031_v22 = vsel %vm6047_vm4, %v22459_v41, %v14003_v33  ;;  %v22707_v34 = vrot.slane %v16564_v36, %v19557_v11  ;;  %v14723_v27 = vrot.slane %v14709_v45, %v23402_v28  ;;  %v14515_v47 = vrot.slane %v22675_v2, %v23402_v28 }
 0x926   : > { %v14733_v21 = vcombine.low %v14031_v22, %v14304_v53  ;;  %v15012_v44 = vcombine.high %v14994_v31, %v15008_v58  ;;  %v14032_v24 = vsel %vm6047_vm4, %v22461_v46, %v14007_v48  ;;  %v15011_v15 = vcombine.low %v14994_v31, %v15008_v58  ;;  %16803 = vmatpush3.bf16.msra.mxu1 %v17618_v6  ;;  %v17620_v46 = vld [vmem:[%s22883_s5 + $0x118] sm:$0xff]  }
 0x927   : > { %v16574_v41 = vcombine.low %v14675_v39, %v14699_v0  ;;  %16804 = vmatprep.subr.bf16.mxu1 %v17619_v55  ;;  %v14205_v17 = vcombine.high %v22591_v23, %v22591_v23  ;;  %v14757_v25 = vcombine.low %v14032_v24, %v14327_v40  ;;  %v14373_v14 = vrot.slane %v22700_v35, %v19557_v11 }
 0x928   : > { %v14747_v16 = vrot.slane %v14733_v21, %v23402_v28  ;;  %15485 = vmatprep.mubr.bf16.mxu1 %v15012_v44  ;;  %v14011_v20 = vpop.permute.xlu1 %14010  ;;  %v14104_v56 = vrot.slane %v14090_v59, %v19557_v11  ;;  %v14563_v62 = vrot.slane %v14127_v57, %v23402_v28  ;;  %v14182_v23 = vcombine.high %v22595_v3, %v22595_v3 }
 0x929   : > { %v14015_v54 = vpop.permute.xlu0 %14014  ;;  %v14033_v10 = vsel %vm6047_vm4, %v22493_v29, %v14011_v20  ;;  %15486 = vmatmul.mubr.bf16.gmra.mrb[148].mxu1 %v15011_v15  ;;  %v14396_v29 = vrot.slane %v22707_v34, %v19557_v11  ;;  %v15047_v13 = vrot.slane %v16574_v41, %v23402_v28  ;;  %v14159_v18 = vcombine.high %v22578_v12, %v22578_v12 }
 0x92a   : > { %v14034_v4 = vsel %vm6047_vm4, %v22495_v43, %v14015_v54  ;;  %v16576_v50 = vcombine.low %v14723_v27, %v14747_v16  ;;  %v14781_v6 = vcombine.low %v14033_v10, %v14350_v49  ;;  %16805 = vmatpush3.bf16.msra.mxu1 %v17619_v55  ;;  %v14219_v61 = vrot.slane %v14205_v17, %v19557_v11 }
 0x92b   : > { %v14805_v19 = vcombine.low %v14034_v4, %v14373_v14  ;;  %16806 = vmatprep.subr.bf16.mxu1 %v17620_v46  ;;  %v14297_v3 = vcombine.high %v22647_v63, %v22647_v63  ;;  %v14771_v30 = vrot.slane %v14757_v25, %v23402_v28  ;;  %v14539_v36 = vrot.slane %v14104_v56, %v23402_v28 }
 0x92c   : > { %v14795_v43 = vrot.slane %v14781_v6, %v23402_v28  ;;  %v14019_v9 = vpop.permute.xlu1 %14018  ;;  %v15061_v1 = vrot.slane %v16576_v50, %v23402_v28  ;;  %v14196_v0 = vrot.slane %v14182_v23, %v19557_v11  ;;  %v14251_v12 = vcombine.high %v22625_v52, %v22625_v52 }
 0x92d   : > { %v14035_v51 = vsel %vm6047_vm4, %v22523_v8, %v14019_v9  ;;  %v14274_v45 = vcombine.high %v22639_v37, %v22639_v37  ;;  %v14819_v33 = vrot.slane %v14805_v19, %v23402_v28  ;;  %v14491_v48 = vrot.slane %v22573_v32, %v23402_v28 }
 0x92e   : > { %v14829_v2 = vcombine.low %v14035_v51, %v14396_v29  ;;  %v15065_v53 = vcombine.high %v15047_v13, %v15061_v1  ;;  %v15064_v7 = vcombine.low %v15047_v13, %v15061_v1  ;;  %16807 = vmatpush3.bf16.msra.mxu1 %v17620_v46  ;;  %v16578_v63 = vcombine.low %v14771_v30, %v14795_v43 }
 0x92f   : > { %v14228_v31 = vcombine.high %v22615_v5, %v22615_v5  ;;  %v14311_v58 = vrot.slane %v14297_v3, %v19557_v11  ;;  %v14961_v55 = vcombine.low %v14539_v36, %v14563_v62  ;;  %v14150_v52 = vrot.slane %v14136_v42, %v19557_v11  ;;  %v17634_v36 = vld [vmem:[%s22884_s6 + $0xb0] sm:$0xff]  }
 0x930   : > { %v14843_v8 = vrot.slane %v14829_v2, %v23402_v28  ;;  %15493 = vmatprep.mubr.bf16.mxu1 %v15065_v53  ;;  %v14173_v37 = vrot.slane %v14159_v18, %v19557_v11  ;;  %v14659_v59 = vrot.slane %v14219_v61, %v23402_v28  ;;  %v14635_v22 = vrot.slane %v14196_v0, %v23402_v28  ;;  %v17631_v2 = vld [vmem:[%s22884_s6 + $0xe8] sm:$0xff]   ;;  %v17635_v0 = vld [vmem:[%s22884_s6 + $0x40] sm:$0xff]  }
 0x931   : > { %15494 = vmatmul.mubr.bf16.gmra.mrb[152].mxu1 %v15064_v7  ;;  %v14265_v32 = vrot.slane %v14251_v12, %v19557_v11  ;;  %v14288_v5 = vrot.slane %v14274_v45, %v19557_v11  ;;  %v14960_v40 = vcombine.low %v14491_v48, %v14515_v47  ;;  %v14366_v39 = vcombine.high %v22700_v35, %v22700_v35  ;;  %v17632_v53 = vld [vmem:[%s22884_s6 + $0xa8] sm:$0xff]   ;;  %v17633_v7 = vld [vmem:[%s22884_s6 + $0xf0] sm:$0xff]   ;;  %v17636_v12 = vld [vmem:[%s22884_s6] sm:$0xff]  }
 0x932   : > { %v16580_v57 = vcombine.low %v14819_v33, %v14843_v8  ;;  %v14389_v26 = vcombine.high %v22707_v34, %v22707_v34  ;;  %v15100_v42 = vrot.slane %v16578_v63, %v23402_v28  ;;  %v14242_v44 = vrot.slane %v14228_v31, %v19557_v11  ;;  %16788 = vmatprep.subr.bf16.mxu0 %v17631_v2  ;;  %v17637_v45 = vld [vmem:[%s22884_s6 + $0x48] sm:$0xff]   ;;  %v17639_v33 = vld [vmem:[%s22884_s6 + $0x50] sm:$0xff]   ;;  %v17641_v48 = vld [vmem:[%s22884_s6 + $0xf8] sm:$0xff]  }
 0x933   : > { %v14755_v24 = vrot.slane %v14311_v58, %v23402_v28  ;;  %v14975_v49 = vrot.slane %v14961_v55, %v23402_v28  ;;  %v14611_v15 = vrot.slane %v14173_v37, %v23402_v28  ;;  %v14343_v41 = vcombine.high %v22681_v60, %v22681_v60  ;;  %16789 = vmatpush3.bf16.msra.mxu0 %v17632_v53  ;;  %v17638_v63 = vld [vmem:[%s22884_s6 + $0x8] sm:$0xff]   ;;  %v17640_v8 = vld [vmem:[%s22884_s6 + $0x10] sm:$0xff]   ;;  %v17642_v31 = vld [vmem:[%s22884_s6 + $0xb8] sm:$0xff]  }
 0x934   : > { %v15114_v21 = vrot.slane %v16580_v57, %v23402_v28  ;;  %v14587_v16 = vrot.slane %v14150_v52, %v23402_v28  ;;  %v14707_v34 = vrot.slane %v14265_v32, %v23402_v28  ;;  %v14731_v20 = vrot.slane %v14288_v5, %v23402_v28  ;;  %16790 = vmatprep.subr.bf16.mxu0 %v17633_v7  ;;  %v17643_v58 = vld [vmem:[%s22884_s6 + $0x58] sm:$0xff]   ;;  %v17645_v52 = vld [vmem:[%s22884_s6 + $0x60] sm:$0xff]   ;;  %v17648_v57 = vld [vmem:[%s22884_s6 + $0x28] sm:$0xff]  }
 0x935   : > { %v14968_v54 = vrot.slane %v14960_v40, %v23402_v28  ;;  %v15014_v46 = vcombine.low %v14635_v22, %v14659_v59  ;;  %v14320_v47 = vcombine.high %v22668_v38, %v22668_v38  ;;  %v14380_v17 = vrot.slane %v14366_v39, %v19557_v11  ;;  %16756 = vmatprep.subr.bf16.mxu1 %v17635_v0  ;;  %v17644_v55 = vld [vmem:[%s22884_s6 + $0x18] sm:$0xff]   ;;  %v17646_v37 = vld [vmem:[%s22884_s6 + $0x20] sm:$0xff]   ;;  %v17647_v59 = vld [vmem:[%s22884_s6 + $0x68] sm:$0xff]  }
 0x936   : > { %v15118_v27 = vcombine.high %v15100_v42, %v15114_v21  ;;  %v15117_v35 = vcombine.low %v15100_v42, %v15114_v21  ;;  %v14403_v10 = vrot.slane %v14389_v26, %v19557_v11  ;;  %v14683_v60 = vrot.slane %v14242_v44, %v23402_v28  ;;  %v17649_v22 = vld [vmem:[%s22884_s6 + $0x70] sm:$0xff]   ;;  %v17651_v5 = vld [vmem:[%s22884_s6 + $0x78] sm:$0xff]  }
 0x937   : > { %v14976_v4 = vcombine.low %v14968_v54, %v14975_v49  ;;  %v15067_v50 = vcombine.low %v14731_v20, %v14755_v24  ;;  %v15013_v25 = vcombine.low %v14587_v16, %v14611_v15  ;;  %v14357_v6 = vrot.slane %v14343_v41, %v19557_v11  ;;  %16791 = vmatpush3.bf16.msra.mxu0 %v17634_v36  ;;  %v17650_v32 = vld [vmem:[%s22884_s6 + $0x30] sm:$0xff]   ;;  %v17652_v40 = vld [vmem:[%s22884_s6 + $0x38] sm:$0xff]  }
 0x938   : > { %15501 = vmatprep.mubr.bf16.mxu1 %v15118_v27  ;;  %v15066_v14 = vcombine.low %v14683_v60, %v14707_v34  ;;  %v15028_v56 = vrot.slane %v15014_v46, %v23402_v28  ;;  %v14334_v38 = vrot.slane %v14320_v47, %v19557_v11  ;;  %v14827_v62 = vrot.slane %v14380_v17, %v23402_v28 }
 0x939   : > { %15502 = vmatmul.mubr.bf16.gmra.mrb[156].mxu1 %v15117_v35  ;;  %v14851_v23 = vrot.slane %v14403_v10, %v23402_v28  ;;  %v15081_v29 = vrot.slane %v15067_v50, %v23402_v28  ;;  %v15021_v43 = vrot.slane %v15013_v25, %v23402_v28  ;;  %v14803_v19 = vrot.slane %v14357_v6, %v23402_v28 }
 0x93a   : > { %16808 = vmatprep.mubr.msk.bf16.mxu1 %vm6047_vm4, %v14976_v4  ;;  %v15074_v9 = vrot.slane %v15066_v14, %v23402_v28  ;;  %v14779_v13 = vrot.slane %v14334_v38, %v23402_v28  ;;  %16792 = vmatprep.subr.bf16.mxu0 %v17641_v48 }
 0x93b   : > { %v15029_v1 = vcombine.low %v15021_v43, %v15028_v56  ;;  %v15120_v18 = vcombine.low %v14827_v62, %v14851_v23  ;;  %16793 = vmatpush3.bf16.msra.mxu0 %v17642_v31 }
 0x93c   : > { %v15082_v61 = vcombine.low %v15074_v9, %v15081_v29  ;;  %v15119_v11 = vcombine.low %v14779_v13, %v14803_v19 }
 0x93d   : > { %v15134_v3 = vrot.slane %v15120_v18, %v23402_v28 }
 0x93e   : > { %v15127_v51 = vrot.slane %v15119_v11, %v23402_v28 }
 0x940   : > { %v15135_v30 = vcombine.low %v15127_v51, %v15134_v3 }
 0x941   : > { %16809 = vmatmul.mubr.msk.bf16.vlgmr.msra.gmra.mrb[160].mxu1 %vm6047_vm4, %v15029_v1 }
 0x942   : > { %16812 = vmatprep.mubr.msk.bf16.mxu1 %vm6047_vm4, %v15082_v61  ;;  %16757 = vmatpush3.bf16.msra.mxu1 %v17636_v12 }
 0x943   : > { %16758 = vmatprep.subr.bf16.mxu1 %v17637_v45 }
 0x946   : > { %16759 = vmatpush3.bf16.msra.mxu1 %v17638_v63 }
 0x947   : > { %16760 = vmatprep.subr.bf16.mxu1 %v17639_v33 }
 0x949   : > { %16813 = vmatmul.mubr.msk.bf16.gmra.mrb[164].mxu1 %vm6047_vm4, %v15135_v30 }
 0x94a   : > { %16761 = vmatpush3.bf16.msra.mxu1 %v17640_v8 }
 0x94b   : > { %16762 = vmatprep.subr.bf16.mxu1 %v17643_v58 }
 0x94e   : > { %16763 = vmatpush3.bf16.msra.mxu1 %v17644_v55 }
 0x94f   : > { %16764 = vmatprep.subr.bf16.mxu1 %v17645_v52 }
 0x952   : > { %16765 = vmatpush3.bf16.msra.mxu1 %v17646_v37 }
 0x953   : > { %16766 = vmatprep.subr.bf16.mxu1 %v17647_v59 }
 0x956   : > { %16767 = vmatpush3.bf16.msra.mxu1 %v17648_v57 }
 0x957   : > { %16768 = vmatprep.subr.bf16.mxu1 %v17649_v22 }
 0x95a   : > { %16769 = vmatpush3.bf16.msra.mxu1 %v17650_v32 }
 0x95b   : > { %16770 = vmatprep.subr.bf16.mxu1 %v17651_v5 }
 0x95e   : > { %16771 = vmatpush3.bf16.msra.mxu1 %v17652_v40 }
 0x9c9   : > { %v16684_v39 = vpop.f32.mrb[128].mxu1 }
 0x9ca   : > { %v16685_v26 = vpop.f32.mrb[129].mxu1 }
 0x9cb   : > { %v16686_v42 = vadd.f32 %v16685_v26, %v16684_v39  ;;  %v16687_v21 = vpop.f32.mrb[130].mxu1 }
 0x9cc   : > { %v16688_v44 = vpop.f32.mrb[131].mxu1 }
 0x9cd   : > { %v16689_v24 = vadd.f32 %v16688_v44, %v16687_v21 }
 0x9d8   : > { %v16690_v49 = vpop.f32.mrb[132].mxu1 }
 0x9d9   : > { %v16691_v15 = vpop.f32.mrb[133].mxu1 }
 0x9da   : > { %v16692_v41 = vadd.f32 %v16691_v15, %v16690_v49  ;;  %v16693_v27 = vpop.f32.mrb[134].mxu1 }
 0x9db   : > { %v16694_v35 = vpop.f32.mrb[135].mxu1 }
 0x9dc   : > { %v16695_v16 = vadd.f32 %v16694_v35, %v16693_v27 }
 0x9e4   : > { %v16696_v34 = vpop.f32.mrb[136].mxu1 }
 0x9e5   : > { %v16697_v20 = vpop.f32.mrb[137].mxu1 }
 0x9e6   : > { %v16698_v54 = vadd.f32 %v16697_v20, %v16696_v34  ;;  %v16699_v46 = vpop.f32.mrb[138].mxu1 }
 0x9e7   : > { %v16700_v47 = vpop.f32.mrb[139].mxu1 }
 0x9e8   : > { %v16701_v17 = vadd.f32 %v16700_v47, %v16699_v46 }
 0x9ec   : > { %v16702_v10 = vpop.f32.mrb[140].mxu1 }
 0x9ed   : > { %v16703_v60 = vpop.f32.mrb[141].mxu1 }
 0x9ee   : > { %v16704_v4 = vadd.f32 %v16703_v60, %v16702_v10  ;;  %v16705_v50 = vpop.f32.mrb[142].mxu1 }
 0x9ef   : > { %v16706_v25 = vpop.f32.mrb[143].mxu1 }
 0x9f0   : > { %v16707_v6 = vadd.f32 %v16706_v25, %v16705_v50 }
 0x9f4   : > { %v16724_v14 = vpop.f32.mrb[144].mxu1 }
 0x9f5   : > { %v16725_v56 = vpop.f32.mrb[145].mxu1 }
 0x9f6   : > { %v16726_v38 = vadd.f32 %v16725_v56, %v16724_v14  ;;  %v16727_v62 = vpop.f32.mrb[146].mxu1 }
 0x9f7   : > { %v16728_v23 = vpop.f32.mrb[147].mxu1 }
 0x9f8   : > { %v16729_v29 = vadd.f32 %v16728_v23, %v16727_v62  ;;  %v15480_v43 = vadd.f32 %v16726_v38, %v16686_v42 }
 0x9fa   : > { %v15483_v19 = vadd.f32 %v16729_v29, %v16689_v24 }
 0x9fc   : > { %v16730_v9 = vpop.f32.mrb[148].mxu1 }
 0x9fd   : > { %v16731_v13 = vpop.f32.mrb[149].mxu1 }
 0x9fe   : > { %v16732_v1 = vadd.f32 %v16731_v13, %v16730_v9  ;;  %v16733_v18 = vpop.f32.mrb[150].mxu1 }
 0x9ff   : > { %v16734_v61 = vpop.f32.mrb[151].mxu1 }
 0xa00   : > { %v16735_v11 = vadd.f32 %v16734_v61, %v16733_v18  ;;  %v15488_v3 = vadd.f32 %v16732_v1, %v16692_v41 }
 0xa02   : > { %v15491_v51 = vadd.f32 %v16735_v11, %v16695_v16 }
 0xa04   : > { %v16736_v30 = vpop.f32.mrb[152].mxu1 }
 0xa05   : > { %v16737_v2 = vpop.f32.mrb[153].mxu1 }
 0xa06   : > { %v16738_v53 = vadd.f32 %v16737_v2, %v16736_v30  ;;  %v16739_v7 = vpop.f32.mrb[154].mxu1 }
 0xa07   : > { %v16740_v36 = vpop.f32.mrb[155].mxu1 }
 0xa08   : > { %v16741_v0 = vadd.f32 %v16740_v36, %v16739_v7  ;;  %v15496_v12 = vadd.f32 %v16738_v53, %v16698_v54 }
 0xa0a   : > { %v15499_v45 = vadd.f32 %v16741_v0, %v16701_v17 }
 0xa0c   : > { %v16742_v63 = vpop.f32.mrb[156].mxu1 }
 0xa0d   : > { %v16743_v33 = vpop.f32.mrb[157].mxu1 }
 0xa0e   : > { %v16744_v8 = vadd.f32 %v16743_v33, %v16742_v63  ;;  %v16745_v48 = vpop.f32.mrb[158].mxu1 }
 0xa0f   : > { %v16746_v31 = vpop.f32.mrb[159].mxu1 }
 0xa10   : > { %v16747_v58 = vadd.f32 %v16746_v31, %v16745_v48  ;;  %v15504_v55 = vadd.f32 %v16744_v8, %v16704_v4 }
 0xa12   : > { %v15507_v52 = vadd.f32 %v16747_v58, %v16707_v6 }
 0xa14   : > { %v16810_v37 = vpop.f32.mrb[160].mxu1 }
 0xa15   : > { %v15553_v59 = vadd.f32 %v16810_v37, %v15488_v3  ;;  %v15544_v57 = vpop.f32.mrb[161].mxu1 }
 0xa16   : > { %v15545_v22 = vadd.f32 %v15544_v57, %v15480_v43  ;;  %v16811_v32 = vpop.f32.mrb[162].mxu1 }
 0xa17   : > { %v15556_v5 = vadd.f32 %v16811_v32, %v15491_v51  ;;  %v15547_v40 = vpop.f32.mrb[163].mxu1 }
 0xa18   : > { %v15548_v39 = vadd.f32 %v15547_v40, %v15483_v19 }
 0xa19   : > { %v15576_v26 = vpack.c.bf16 %v15556_v5, %v15553_v59 }
 0xa1a   : > { %v15575_v42 = vpack.c.bf16 %v15548_v39, %v15545_v22 }
 0xa1b   : > { %v15588_v21 = vunpack.i.h.s16 %v15576_v26 }
 0xa1c   : > { %v15581_v44 = vunpack.i.h.s16 %v15575_v42  ;;  %v16814_v24 = vpop.f32.mrb[164].mxu1 }
 0xa1d   : > { %v16623_v49 = vpack.c.b16 %v15588_v21, %v15576_v26  ;;  %v15569_v15 = vadd.f32 %v16814_v24, %v15504_v55  ;;  %v15560_v41 = vpop.f32.mrb[165].mxu1 }
 0xa1e   : > { %v16621_v27 = vpack.c.b16 %v15581_v44, %v15575_v42  ;;  %v15561_v35 = vadd.f32 %v15560_v41, %v15496_v12  ;;  %v16815_v16 = vpop.f32.mrb[166].mxu1 }
 0xa1f   : > { %v15591_v34 = vunpack.i.h.s16 %v16623_v49  ;;  %v15572_v20 = vadd.f32 %v16815_v16, %v15507_v52  ;;  %v15563_v54 = vpop.f32.mrb[167].mxu1 }
 0xa20   : > { %v15584_v46 = vunpack.i.h.s16 %v16621_v27  ;;  %v16629_v47 = vpack.c.b16 %v16623_v49, %v16621_v27  ;;  %v15564_v17 = vadd.f32 %v15563_v54, %v15499_v45 }
 0xa21   : > { %v15578_v10 = vpack.c.bf16 %v15572_v20, %v15569_v15 }
 0xa22   : > { %v15577_v60 = vpack.c.bf16 %v15564_v17, %v15561_v35  ;;  %v16630_v4 = vpack.c.b16 %v15591_v34, %v15584_v46  ;;  %v15681_v23 = vrot.slane %v16629_v47, %v23402_v28 }
 0xa23   : > { %v15602_v50 = vunpack.i.h.s16 %v15578_v10 }
 0xa24   : > { %v15595_v25 = vunpack.i.h.s16 %v15577_v60  ;;  %v15688_v13 = vrot.slane %v16630_v4, %v23402_v28 }
 0xa25   : > { %v16627_v6 = vpack.c.b16 %v15602_v50, %v15578_v10 }
 0xa26   : > { %v16625_v14 = vpack.c.b16 %v15595_v25, %v15577_v60 }
 0xa27   : > { %v15605_v56 = vunpack.i.h.s16 %v16627_v6 }
 0xa28   : > { %v15598_v38 = vunpack.i.h.s16 %v16625_v14  ;;  %v16631_v62 = vpack.c.b16 %v16627_v6, %v16625_v14 }
 0xa2a   : > { %v15695_v29 = vrot.slane %v16631_v62, %v23402_v28  ;;  %v16632_v43 = vpack.c.b16 %v15605_v56, %v15598_v38 }
 0xa2c   : > { %v15703_v19 = vcombine.low %v15681_v23, %v15695_v29  ;;  %v15704_v9 = vcombine.high %v15681_v23, %v15695_v29  ;;  %v15702_v1 = vrot.slane %v16632_v43, %v23402_v28 }
 0xa2e   : > { %15935 = vmatprep.mubr.bf16.mxu1 %v15704_v9  ;;  %v15705_v18 = vcombine.low %v15688_v13, %v15702_v1  ;;  %v15706_v61 = vcombine.high %v15688_v13, %v15702_v1 }
 0xa2f   : > { %15936 = vmatmul.mubr.bf16.vlgmr.msra.gmra.mrb[168].mxu1 %v15703_v19 }
 0xa30   : > { %15976 = vmatprep.mubr.bf16.mxu0 %v15706_v61 }
 0xa31   : > { %15977 = vmatmul.mubr.bf16.vlgmr.msra.gmra.mrb[112].mxu0 %v15705_v18 }
 0xb02   : > { %v16772_v11 = vpop.f32.mrb[168].mxu1 }
 0xb03   : > { %v16773_v3 = vpop.f32.mrb[169].mxu1 }
 0xb04   : > { %v16774_v51 = vadd.f32 %v16773_v3, %v16772_v11  ;;  %v16775_v30 = vpop.f32.mrb[170].mxu1  ;;  %v16794_v2 = vpop.f32.mrb[112].mxu0 }
 0xb05   : > { %v16776_v53 = vpop.f32.mrb[171].mxu1  ;;  %v16795_v7 = vpop.f32.mrb[113].mxu0 }
 0xb06   : > { %v16777_v36 = vadd.f32 %v16776_v53, %v16775_v30  ;;  %v16796_v28 = vadd.f32 %v16795_v7, %v16794_v2  ;;  %v16797_v0 = vpop.f32.mrb[114].mxu0 }
 0xb07   : > { %v16798_v12 = vpop.f32.mrb[115].mxu0 }
 0xb08   : > { %v15979_v45 = vadd.f32 %v16796_v28, %v16774_v51  ;;  %v16799_v63 = vadd.f32 %v16798_v12, %v16797_v0 }
 0xb0a   : > { %15985 = vst [vmem:[%s283_s19] sm:$0xff] %v15979_v45  ;;  %v15982_v33 = vadd.f32 %v16799_v63, %v16777_v36 }
 0xb0c   : > { %15986 = vst [vmem:[%s283_s19 + $0x8] sm:$0xff] %v15982_v33 }
 0xb0d PF: > { %s17_s24 = sadd.s32 1, %s17659_s24  }
 0xb0e   : > { %p14_p5 = scmp.ge.s32.totalorder %s17_s24, 4  }
 0xb10   :  { %16 = sbr.rel (!%p14_p5) target bundleno = 1 (0x1), region = 78 }

</bundles_post_ra>
